<compile_context>
chip_gen: v6e
topology: v6e:2x2x1
jax: 0.10.0
libtpu: 0.0.40
codegen_flags: <defaults>
</compile_context>

<pallas_src>
import jax
import jax.numpy as jnp
from jax.experimental import pallas as pl
from jax.experimental.pallas import tpu as pltpu


# -----------------------------------------------------------------------------
# Single fused kernel: conv stack + BiLSTM(2 layers) + head
# -----------------------------------------------------------------------------
def fused_audio_emotion_kernel(
    # --- inputs ---------------------------------------------------------------
    xtp_ref,                     # (L+4, B)    padded input, time on sublanes
    w1_ref, s1_ref, sh1_ref,     # (K,1,C1), (1,C1), (1,C1)    conv1 + folded bn1
    w2f_ref, s2_ref, sh2_ref,    # (K*C1,C2), (1,C2), (1,C2)   conv2 (im2col) + bn2
    wih1_ref, b1_ref,            # (C2,8H), (1,8H)   layer-1 input proj (fwd|bwd)
    whh1f_ref, whh1b_ref,        # (H,4H) each       layer-1 recurrent weights
    wih2f_ref, b2f_ref,          # (2H,4H), (1,4H)   layer-2 fwd input proj
    wih2b_ref, b2b_ref,          # (2H,4H), (1,4H)   layer-2 bwd input proj
    whh2f_ref,                   # (H,4H)            layer-2 fwd recurrent
    fc1w_ref, fc1b_ref,          # (2H,64), (1,64)
    fc2w_ref, fc2b_ref,          # (64,C), (1,C)
    # --- output ---------------------------------------------------------------
    o_ref,                       # (B, C)
    # --- scratch ---------------------------------------------------------------
    gx1_ref,                     # (T, B, 8H)  hoisted layer-1 gates (t leading)
    fseq_ref,                    # (T, B, H)   layer-1 forward hidden states
    bseq_ref,                    # (T, B, H)   layer-1 backward hiddens, time order
):
    f32 = jnp.float32
    Lp, B = xtp_ref.shape
    K, _, C1 = w1_ref.shape
    C2 = w2f_ref.shape[1]
    H = whh1f_ref.shape[0]
    L = Lp - (K - 1)
    L2 = L // 2
    T = L2 // 2

    # ---------------- conv1 + bn1 + relu (batch-vectorized) --------------------
    # out[l, b, c] = sum_k x_pad[l+k, b] * w1[k, 0, c]
    acc1 = jnp.zeros((L, B, C1), f32)
    for k in range(K):
        acc1 = acc1 + xtp_ref[k:k + L, :][:, :, None] * w1_ref[k]
    h1 = jnp.maximum(acc1 * s1_ref[...] + sh1_ref[...], 0.0)        # (L, B, C1)

    # MaxPool1d(2) over time
    h1p = h1.reshape(L2, 2, B, C1)
    p1 = jnp.maximum(h1p[:, 0], h1p[:, 1])                          # (L2, B, C1)

    # ---------------- conv2 via im2col: ONE matmul over the whole batch --------
    zpad = jnp.zeros((2, B, C1), f32)
    p1pad = jnp.concatenate([zpad, p1, zpad], axis=0)               # (L2+4, B, C1)
    slab = jnp.concatenate([p1pad[k:k + L2] for k in range(K)],
                           axis=-1)                                 # (L2, B, K*C1)
    acc2 = jnp.dot(slab.reshape(L2 * B, K * C1), w2f_ref[...],
                   preferred_element_type=f32)                      # (L2*B, C2)
    h2 = jnp.maximum(acc2 * s2_ref[...] + sh2_ref[...], 0.0)

    # MaxPool1d(2) over time (rows ordered (l2, b))
    h2p = h2.reshape(T, 2, B, C2)
    p2 = jnp.maximum(h2p[:, 0], h2p[:, 1])                          # (T, B, C2)

    # ---------------- layer-1 input projection: both directions, ONE matmul ----
    gx1 = jnp.dot(p2.reshape(T * B, C2), wih1_ref[...],
                  preferred_element_type=f32) + b1_ref[...]         # (T*B, 8H)
    gx1_ref[...] = gx1.reshape(T, B, 8 * H)

    def gates(pre):              # pre: (rows, 4H), gate order i, f, g, o
        i = jax.nn.sigmoid(pre[:, 0 * H:1 * H])
        f = jax.nn.sigmoid(pre[:, 1 * H:2 * H])
        g = jnp.tanh(pre[:, 2 * H:3 * H])
        o = jax.nn.sigmoid(pre[:, 3 * H:4 * H])
        return i, f, g, o

    # ---------------- LSTM layer 1: fwd + bwd chains fused on sublanes ---------
    h_fb = jnp.zeros((2 * B, H), f32)      # rows 0:B = fwd, B:2B = bwd
    c_fb = jnp.zeros((2 * B, H), f32)
    for t in range(T):                     # fully unrolled (T is static & tiny)
        gx_f = gx1_ref[t][:, 0:4 * H]                               # (B, 4H)
        gx_b = gx1_ref[T - 1 - t][:, 4 * H:8 * H]                   # (B, 4H)
        pre_f = gx_f + jnp.dot(h_fb[0:B], whh1f_ref[...],
                               preferred_element_type=f32)
        pre_b = gx_b + jnp.dot(h_fb[B:2 * B], whh1b_ref[...],
                               preferred_element_type=f32)
        pre = jnp.concatenate([pre_f, pre_b], axis=0)               # (2B, 4H)
        i, f, g, o = gates(pre)            # one activation pass for both dirs
        c_fb = f * c_fb + i * g
        h_fb = o * jnp.tanh(c_fb)
        fseq_ref[t] = h_fb[0:B]            # forward hidden at time t
        bseq_ref[T - 1 - t] = h_fb[B:2 * B]  # backward hidden at time T-1-t

    # ---------------- LSTM layer 2 ----------------------------------------------
    # Input projection batched over time: 2 matmuls total instead of 2T.
    fwd_all = fseq_ref[...].reshape(T * B, H)
    bwd_all = bseq_ref[...].reshape(T * B, H)                       # time order
    gx2 = (jnp.dot(fwd_all, wih2f_ref[0:H, :], preferred_element_type=f32)
           + jnp.dot(bwd_all, wih2f_ref[H:2 * H, :], preferred_element_type=f32)
           + b2f_ref[...])                                          # (T*B, 4H)

    # forward direction: full recurrence, keep only the final hidden state
    h2f = jnp.zeros((B, H), f32)
    c2f = jnp.zeros((B, H), f32)
    for t in range(T):
        pre = gx2[t * B:(t + 1) * B, :] + jnp.dot(h2f, whh2f_ref[...],
                                                  preferred_element_type=f32)
        i, f, g, o = gates(pre)
        c2f = f * c2f + i * g
        h2f = o * jnp.tanh(c2f)

    # backward direction: exactly ONE step at time T-1 from (h0, c0) = 0
    # (weight_hh_l1_reverse is mathematically unused: h0 @ W_hh == 0)
    g2b = (jnp.dot(fseq_ref[T - 1], wih2b_ref[0:H, :], preferred_element_type=f32)
           + jnp.dot(bseq_ref[T - 1], wih2b_ref[H:2 * H, :],
                     preferred_element_type=f32)
           + b2b_ref[...])
    i2 = jax.nn.sigmoid(g2b[:, 0:H])
    g2 = jnp.tanh(g2b[:, 2 * H:3 * H])
    o2 = jax.nn.sigmoid(g2b[:, 3 * H:4 * H])
    h2b = o2 * jnp.tanh(i2 * g2)           # c = f*c0 + i*g with c0 = 0

    # ---------------- head: fc1 + ReLU (+ eval-mode Dropout) + fc2 --------------
    z = (jnp.dot(h2f, fc1w_ref[0:H, :], preferred_element_type=f32)
         + jnp.dot(h2b, fc1w_ref[H:2 * H, :], preferred_element_type=f32)
         + fc1b_ref[...])
    z = jnp.maximum(z, 0.0)
    o_ref[...] = (jnp.dot(z, fc2w_ref[...], preferred_element_type=f32)
                  + fc2b_ref[...])


# -----------------------------------------------------------------------------
# Wrapper: one pallas_call for the whole forward pass
# -----------------------------------------------------------------------------
def forward(x, params):
    """Eval-mode forward of AudioEmotionModel.  x: (B, L, 1) float32."""
    B, L, _ = x.shape
    # MaxPool1d(2) twice: PyTorch silently floors odd lengths; we require L % 4 == 0.
    assert L % 4 == 0, "sequence length must be divisible by 4"
    T = L // 4
    K, _, C1 = params["w1"].shape
    C2 = params["w2"].shape[2]
    H = params["whh1f"].shape[0]
    num_classes = params["fc2_w"].shape[1]

    # Tiny host-side prep: squeeze channel dim, put time on sublanes, add
    # conv1's padding of 2, and flatten conv2 weights for the im2col matmul.
    xtp = jnp.pad(jnp.transpose(x[:, :, 0]), ((2, 2), (0, 0)))      # (L+4, B)
    w2flat = params["w2"].reshape(K * C1, C2)                       # (K*C1, C2)

    args = (xtp,
            params["w1"], params["scale1"], params["shift1"],
            w2flat, params["scale2"], params["shift2"],
            params["wih1"], params["b1"],
            params["whh1f"], params["whh1b"],
            params["wih2f"], params["b2f"],
            params["wih2b"], params["b2b"],
            params["whh2f"],
            params["fc1_w"], params["fc1_b"],
            params["fc2_w"], params["fc2_b"])

    def _full(arr):
        n = arr.ndim
        return pl.BlockSpec(arr.shape, lambda i, _n=n: (0,) * _n)

    return pl.pallas_call(
        fused_audio_emotion_kernel,
        out_shape=jax.ShapeDtypeStruct((B, num_classes), jnp.float32),
        grid=(1,),
        in_specs=[_full(a) for a in args],
        out_specs=pl.BlockSpec((B, num_classes), lambda i: (0, 0)),
        scratch_shapes=[
            pltpu.VMEM((T, B, 8 * H), jnp.float32),     # hoisted layer-1 gates
            pltpu.VMEM((T, B, H), jnp.float32),         # layer-1 fwd hiddens
            pltpu.VMEM((T, B, H), jnp.float32),         # layer-1 bwd hiddens
        ],
        compiler_params=pltpu.CompilerParams(
            dimension_semantics=("arbitrary",)),
    )(*args)


# -----------------------------------------------------------------------------
# Deterministic synthetic parameters (shapes derived from the nn.Module).
# A real PyTorch conversion would transpose conv weights (cout,cin,5)->(5,cin,cout),
# LSTM/Linear weights (out,in)->(in,out), fold BN running stats into scale/shift,
# sum b_ih+b_hh, and concatenate layer-1's fwd/bwd input projections along cols.
# -----------------------------------------------------------------------------
def init_params(key, num_classes, H=128):
    cnt = [0]

    def nrm(shape, s=0.05):
        cnt[0] += 1
        k = jax.random.fold_in(key, cnt[0])
        return s * jax.random.normal(k, shape, jnp.float32)

    eps = 1e-5
    C1, C2 = 64, 128

    def conv_bn(cin, cout):
        w = nrm((5, cin, cout), 0.2)
        bias = nrm((cout,), 0.1)
        gamma = 1.0 + nrm((cout,), 0.1)
        beta = nrm((cout,), 0.1)
        mean = nrm((cout,), 0.1)
        var = 1.0 + jnp.abs(nrm((cout,), 0.1))
        s = gamma / jnp.sqrt(var + eps)
        scale = s.reshape(1, cout)
        shift = (beta + (bias - mean) * s).reshape(1, cout)
        return w, scale, shift

    w1, scale1, shift1 = conv_bn(1, C1)
    w2, scale2, shift2 = conv_bn(C1, C2)

    # LSTM layer 1 (bidirectional), input D = 128.
    wih1 = nrm((C2, 8 * H))          # [W_ih_l0^T | W_ih_l0_rev^T], gates i,f,g,o
    b1 = nrm((1, 8 * H))             # [b_ih+b_hh (fwd) | b_ih+b_hh (bwd)]
    whh1f = nrm((H, 4 * H))
    whh1b = nrm((H, 4 * H))

    # LSTM layer 2 (bidirectional), input D = 2H = 256.
    wih2f = nrm((2 * H, 4 * H))
    b2f = nrm((1, 4 * H))
    wih2b = nrm((2 * H, 4 * H))
    b2b = nrm((1, 4 * H))
    whh2f = nrm((H, 4 * H))
    # weight_hh_l1_reverse is mathematically unused (single step from zeros).

    return dict(w1=w1, scale1=scale1, shift1=shift1,
                w2=w2, scale2=scale2, shift2=shift2,
                wih1=wih1, b1=b1, whh1f=whh1f, whh1b=whh1b,
                wih2f=wih2f, b2f=b2f, wih2b=wih2b, b2b=b2b, whh2f=whh2f,
                fc1_w=nrm((2 * H, 64)), fc1_b=nrm((1, 64)),
                fc2_w=nrm((64, num_classes)), fc2_b=nrm((1, num_classes)))


if __name__ == "__main__":
    B, L, num_classes = 2, 16, 8     # input_dim = 16 (seq length), 8 emotion classes
    key = jax.random.PRNGKey(0)
    k_x, k_p = jax.random.split(key)
    x = jax.random.normal(k_x, (B, L, 1), jnp.float32)
    params = init_params(k_p, num_classes)

    logits = jax.jit(forward)(x, params)
    jax.block_until_ready(logits)
    assert logits.shape == (B, num_classes)
    print("KERNEL_OK")
</pallas_src>

<mosaic_0001>
module attributes {stable_mosaic.version = 11 : i64} {
  func.func @fused_audio_emotion_kernel(%arg0: i32, %arg1: memref<20x2xf32, #tpu.memory_space<vmem>>, %arg2: memref<5x1x64xf32, #tpu.memory_space<vmem>>, %arg3: memref<1x64xf32, #tpu.memory_space<vmem>>, %arg4: memref<1x64xf32, #tpu.memory_space<vmem>>, %arg5: memref<320x128xf32, #tpu.memory_space<vmem>>, %arg6: memref<1x128xf32, #tpu.memory_space<vmem>>, %arg7: memref<1x128xf32, #tpu.memory_space<vmem>>, %arg8: memref<128x1024xf32, #tpu.memory_space<vmem>>, %arg9: memref<1x1024xf32, #tpu.memory_space<vmem>>, %arg10: memref<128x512xf32, #tpu.memory_space<vmem>>, %arg11: memref<128x512xf32, #tpu.memory_space<vmem>>, %arg12: memref<256x512xf32, #tpu.memory_space<vmem>>, %arg13: memref<1x512xf32, #tpu.memory_space<vmem>>, %arg14: memref<256x512xf32, #tpu.memory_space<vmem>>, %arg15: memref<1x512xf32, #tpu.memory_space<vmem>>, %arg16: memref<128x512xf32, #tpu.memory_space<vmem>>, %arg17: memref<256x64xf32, #tpu.memory_space<vmem>>, %arg18: memref<1x64xf32, #tpu.memory_space<vmem>>, %arg19: memref<64x8xf32, #tpu.memory_space<vmem>>, %arg20: memref<1x8xf32, #tpu.memory_space<vmem>>, %arg21: memref<2x8xf32, #tpu.memory_space<vmem>>, %arg22: memref<4x2x1024xf32, #tpu.memory_space<vmem>>, %arg23: memref<4x2x128xf32, #tpu.memory_space<vmem>>, %arg24: memref<4x2x128xf32, #tpu.memory_space<vmem>>) attributes {dimension_semantics = [#tpu.dimension_semantics<arbitrary>], iteration_bounds = array<i64: 1>, scalar_prefetch = 0 : i64, scratch_operands = 3 : i64, tpu.core_type = #tpu.core_type<tc>, window_params = [{pipeline_mode = #tpu.pipeline_mode<synchronous>, transform_indices = @transform_0, window_bounds = array<i64: 20, 2>}, {pipeline_mode = #tpu.pipeline_mode<synchronous>, transform_indices = @transform_1, window_bounds = array<i64: 5, 1, 64>}, {pipeline_mode = #tpu.pipeline_mode<synchronous>, transform_indices = @transform_2, window_bounds = array<i64: 1, 64>}, {pipeline_mode = #tpu.pipeline_mode<synchronous>, transform_indices = @transform_3, window_bounds = array<i64: 1, 64>}, {pipeline_mode = #tpu.pipeline_mode<synchronous>, transform_indices = @transform_4, window_bounds = array<i64: 320, 128>}, {pipeline_mode = #tpu.pipeline_mode<synchronous>, transform_indices = @transform_5, window_bounds = array<i64: 1, 128>}, {pipeline_mode = #tpu.pipeline_mode<synchronous>, transform_indices = @transform_6, window_bounds = array<i64: 1, 128>}, {pipeline_mode = #tpu.pipeline_mode<synchronous>, transform_indices = @transform_7, window_bounds = array<i64: 128, 1024>}, {pipeline_mode = #tpu.pipeline_mode<synchronous>, transform_indices = @transform_8, window_bounds = array<i64: 1, 1024>}, {pipeline_mode = #tpu.pipeline_mode<synchronous>, transform_indices = @transform_9, window_bounds = array<i64: 128, 512>}, {pipeline_mode = #tpu.pipeline_mode<synchronous>, transform_indices = @transform_10, window_bounds = array<i64: 128, 512>}, {pipeline_mode = #tpu.pipeline_mode<synchronous>, transform_indices = @transform_11, window_bounds = array<i64: 256, 512>}, {pipeline_mode = #tpu.pipeline_mode<synchronous>, transform_indices = @transform_12, window_bounds = array<i64: 1, 512>}, {pipeline_mode = #tpu.pipeline_mode<synchronous>, transform_indices = @transform_13, window_bounds = array<i64: 256, 512>}, {pipeline_mode = #tpu.pipeline_mode<synchronous>, transform_indices = @transform_14, window_bounds = array<i64: 1, 512>}, {pipeline_mode = #tpu.pipeline_mode<synchronous>, transform_indices = @transform_15, window_bounds = array<i64: 128, 512>}, {pipeline_mode = #tpu.pipeline_mode<synchronous>, transform_indices = @transform_16, window_bounds = array<i64: 256, 64>}, {pipeline_mode = #tpu.pipeline_mode<synchronous>, transform_indices = @transform_17, window_bounds = array<i64: 1, 64>}, {pipeline_mode = #tpu.pipeline_mode<synchronous>, transform_indices = @transform_18, window_bounds = array<i64: 64, 8>}, {pipeline_mode = #tpu.pipeline_mode<synchronous>, transform_indices = @transform_19, window_bounds = array<i64: 1, 8>}, {pipeline_mode = #tpu.pipeline_mode<synchronous>, transform_indices = @transform_20, window_bounds = array<i64: 2, 8>}]} {
    %cst = arith.constant 0.000000e+00 : f32
    %0 = vector.broadcast %cst : f32 to vector<16x2x64xf32>
    %c0 = arith.constant 0 : index
    %c0_0 = arith.constant 0 : index
    %1 = vector.load %arg1[%c0, %c0_0] : memref<20x2xf32, #tpu.memory_space<vmem>>, vector<16x2xf32>
    %2 = vector.shape_cast %1 : vector<16x2xf32> to vector<16x2x1xf32>
    %c0_1 = arith.constant 0 : index
    %c0_2 = arith.constant 0 : index
    %c0_3 = arith.constant 0 : index
    %3 = vector.load %arg2[%c0_1, %c0_2, %c0_3] : memref<5x1x64xf32, #tpu.memory_space<vmem>>, vector<1x1x64xf32>
    %4 = vector.shape_cast %3 : vector<1x1x64xf32> to vector<1x64xf32>
    %5 = vector.shape_cast %4 : vector<1x64xf32> to vector<1x1x64xf32>
    %6 = vector.broadcast %2 : vector<16x2x1xf32> to vector<16x2x64xf32>
    %7 = vector.broadcast %5 : vector<1x1x64xf32> to vector<16x2x64xf32>
    %8 = arith.mulf %6, %7 : vector<16x2x64xf32>
    %9 = arith.addf %0, %8 : vector<16x2x64xf32>
    %c1 = arith.constant 1 : index
    %c0_4 = arith.constant 0 : index
    %10 = vector.load %arg1[%c1, %c0_4] : memref<20x2xf32, #tpu.memory_space<vmem>>, vector<16x2xf32>
    %11 = vector.shape_cast %10 : vector<16x2xf32> to vector<16x2x1xf32>
    %c1_5 = arith.constant 1 : index
    %c0_6 = arith.constant 0 : index
    %c0_7 = arith.constant 0 : index
    %12 = vector.load %arg2[%c1_5, %c0_6, %c0_7] : memref<5x1x64xf32, #tpu.memory_space<vmem>>, vector<1x1x64xf32>
    %13 = vector.shape_cast %12 : vector<1x1x64xf32> to vector<1x64xf32>
    %14 = vector.shape_cast %13 : vector<1x64xf32> to vector<1x1x64xf32>
    %15 = vector.broadcast %11 : vector<16x2x1xf32> to vector<16x2x64xf32>
    %16 = vector.broadcast %14 : vector<1x1x64xf32> to vector<16x2x64xf32>
    %17 = arith.mulf %15, %16 : vector<16x2x64xf32>
    %18 = arith.addf %9, %17 : vector<16x2x64xf32>
    %c2 = arith.constant 2 : index
    %c0_8 = arith.constant 0 : index
    %19 = vector.load %arg1[%c2, %c0_8] : memref<20x2xf32, #tpu.memory_space<vmem>>, vector<16x2xf32>
    %20 = vector.shape_cast %19 : vector<16x2xf32> to vector<16x2x1xf32>
    %c2_9 = arith.constant 2 : index
    %c0_10 = arith.constant 0 : index
    %c0_11 = arith.constant 0 : index
    %21 = vector.load %arg2[%c2_9, %c0_10, %c0_11] : memref<5x1x64xf32, #tpu.memory_space<vmem>>, vector<1x1x64xf32>
    %22 = vector.shape_cast %21 : vector<1x1x64xf32> to vector<1x64xf32>
    %23 = vector.shape_cast %22 : vector<1x64xf32> to vector<1x1x64xf32>
    %24 = vector.broadcast %20 : vector<16x2x1xf32> to vector<16x2x64xf32>
    %25 = vector.broadcast %23 : vector<1x1x64xf32> to vector<16x2x64xf32>
    %26 = arith.mulf %24, %25 : vector<16x2x64xf32>
    %27 = arith.addf %18, %26 : vector<16x2x64xf32>
    %c3 = arith.constant 3 : index
    %c0_12 = arith.constant 0 : index
    %28 = vector.load %arg1[%c3, %c0_12] : memref<20x2xf32, #tpu.memory_space<vmem>>, vector<16x2xf32>
    %29 = vector.shape_cast %28 : vector<16x2xf32> to vector<16x2x1xf32>
    %c3_13 = arith.constant 3 : index
    %c0_14 = arith.constant 0 : index
    %c0_15 = arith.constant 0 : index
    %30 = vector.load %arg2[%c3_13, %c0_14, %c0_15] : memref<5x1x64xf32, #tpu.memory_space<vmem>>, vector<1x1x64xf32>
    %31 = vector.shape_cast %30 : vector<1x1x64xf32> to vector<1x64xf32>
    %32 = vector.shape_cast %31 : vector<1x64xf32> to vector<1x1x64xf32>
    %33 = vector.broadcast %29 : vector<16x2x1xf32> to vector<16x2x64xf32>
    %34 = vector.broadcast %32 : vector<1x1x64xf32> to vector<16x2x64xf32>
    %35 = arith.mulf %33, %34 : vector<16x2x64xf32>
    %36 = arith.addf %27, %35 : vector<16x2x64xf32>
    %c4 = arith.constant 4 : index
    %c0_16 = arith.constant 0 : index
    %37 = vector.load %arg1[%c4, %c0_16] : memref<20x2xf32, #tpu.memory_space<vmem>>, vector<16x2xf32>
    %38 = vector.shape_cast %37 : vector<16x2xf32> to vector<16x2x1xf32>
    %c4_17 = arith.constant 4 : index
    %c0_18 = arith.constant 0 : index
    %c0_19 = arith.constant 0 : index
    %39 = vector.load %arg2[%c4_17, %c0_18, %c0_19] : memref<5x1x64xf32, #tpu.memory_space<vmem>>, vector<1x1x64xf32>
    %40 = vector.shape_cast %39 : vector<1x1x64xf32> to vector<1x64xf32>
    %41 = vector.shape_cast %40 : vector<1x64xf32> to vector<1x1x64xf32>
    %42 = vector.broadcast %38 : vector<16x2x1xf32> to vector<16x2x64xf32>
    %43 = vector.broadcast %41 : vector<1x1x64xf32> to vector<16x2x64xf32>
    %44 = arith.mulf %42, %43 : vector<16x2x64xf32>
    %45 = arith.addf %36, %44 : vector<16x2x64xf32>
    %c0_20 = arith.constant 0 : index
    %c0_21 = arith.constant 0 : index
    %46 = vector.load %arg3[%c0_20, %c0_21] : memref<1x64xf32, #tpu.memory_space<vmem>>, vector<1x64xf32>
    %47 = vector.shape_cast %46 : vector<1x64xf32> to vector<1x1x64xf32>
    %48 = vector.broadcast %47 : vector<1x1x64xf32> to vector<16x2x64xf32>
    %49 = arith.mulf %45, %48 : vector<16x2x64xf32>
    %c0_22 = arith.constant 0 : index
    %c0_23 = arith.constant 0 : index
    %50 = vector.load %arg4[%c0_22, %c0_23] : memref<1x64xf32, #tpu.memory_space<vmem>>, vector<1x64xf32>
    %51 = vector.shape_cast %50 : vector<1x64xf32> to vector<1x1x64xf32>
    %52 = vector.broadcast %51 : vector<1x1x64xf32> to vector<16x2x64xf32>
    %53 = arith.addf %49, %52 : vector<16x2x64xf32>
    %cst_24 = arith.constant 0.000000e+00 : f32
    %54 = vector.broadcast %cst_24 : f32 to vector<16x2x64xf32>
    %55 = arith.maximumf %53, %54 : vector<16x2x64xf32>
    %56 = vector.shape_cast %55 : vector<16x2x64xf32> to vector<8x2x2x64xf32>
    %57 = vector.extract_strided_slice %56 {offsets = [0, 0, 0, 0], sizes = [8, 1, 2, 64], strides = [1, 1, 1, 1]} : vector<8x2x2x64xf32> to vector<8x1x2x64xf32>
    %58 = vector.shape_cast %57 : vector<8x1x2x64xf32> to vector<8x2x64xf32>
    %59 = vector.extract_strided_slice %56 {offsets = [0, 1, 0, 0], sizes = [8, 1, 2, 64], strides = [1, 1, 1, 1]} : vector<8x2x2x64xf32> to vector<8x1x2x64xf32>
    %60 = vector.shape_cast %59 : vector<8x1x2x64xf32> to vector<8x2x64xf32>
    %61 = arith.maximumf %58, %60 : vector<8x2x64xf32>
    %cst_25 = arith.constant 0.000000e+00 : f32
    %62 = vector.broadcast %cst_25 : f32 to vector<2x2x64xf32>
    %63 = tpu.concatenate %62, %61, %62 in 0 : vector<2x2x64xf32>, vector<8x2x64xf32>, vector<2x2x64xf32> -> vector<12x2x64xf32>
    %64 = vector.extract_strided_slice %63 {offsets = [0, 0, 0], sizes = [8, 2, 64], strides = [1, 1, 1]} : vector<12x2x64xf32> to vector<8x2x64xf32>
    %65 = vector.extract_strided_slice %63 {offsets = [1, 0, 0], sizes = [8, 2, 64], strides = [1, 1, 1]} : vector<12x2x64xf32> to vector<8x2x64xf32>
    %66 = vector.extract_strided_slice %63 {offsets = [2, 0, 0], sizes = [8, 2, 64], strides = [1, 1, 1]} : vector<12x2x64xf32> to vector<8x2x64xf32>
    %67 = vector.extract_strided_slice %63 {offsets = [3, 0, 0], sizes = [8, 2, 64], strides = [1, 1, 1]} : vector<12x2x64xf32> to vector<8x2x64xf32>
    %68 = vector.extract_strided_slice %63 {offsets = [4, 0, 0], sizes = [8, 2, 64], strides = [1, 1, 1]} : vector<12x2x64xf32> to vector<8x2x64xf32>
    %69 = tpu.concatenate %64, %65, %66, %67, %68 in 2 : vector<8x2x64xf32>, vector<8x2x64xf32>, vector<8x2x64xf32>, vector<8x2x64xf32>, vector<8x2x64xf32> -> vector<8x2x320xf32>
    %70 = vector.shape_cast %69 : vector<8x2x320xf32> to vector<16x320xf32>
    %c0_26 = arith.constant 0 : index
    %c0_27 = arith.constant 0 : index
    %71 = vector.load %arg5[%c0_26, %c0_27] : memref<320x128xf32, #tpu.memory_space<vmem>>, vector<320x128xf32>
    %cst_28 = arith.constant dense<0.000000e+00> : vector<16x128xf32>
    %72 = tpu.matmul %70, %71, %cst_28 {dimension_numbers = #tpu.dot_dimension_numbers<[1], [0], [0], [1], [0, 0, 1, 1], [], []>} : vector<16x320xf32>, vector<320x128xf32>, vector<16x128xf32> -> vector<16x128xf32>
    %c0_29 = arith.constant 0 : index
    %c0_30 = arith.constant 0 : index
    %73 = vector.load %arg6[%c0_29, %c0_30] : memref<1x128xf32, #tpu.memory_space<vmem>>, vector<1x128xf32>
    %74 = vector.broadcast %73 : vector<1x128xf32> to vector<16x128xf32>
    %75 = arith.mulf %72, %74 : vector<16x128xf32>
    %c0_31 = arith.constant 0 : index
    %c0_32 = arith.constant 0 : index
    %76 = vector.load %arg7[%c0_31, %c0_32] : memref<1x128xf32, #tpu.memory_space<vmem>>, vector<1x128xf32>
    %77 = vector.broadcast %76 : vector<1x128xf32> to vector<16x128xf32>
    %78 = arith.addf %75, %77 : vector<16x128xf32>
    %cst_33 = arith.constant 0.000000e+00 : f32
    %79 = vector.broadcast %cst_33 : f32 to vector<16x128xf32>
    %80 = arith.maximumf %78, %79 : vector<16x128xf32>
    %81 = vector.shape_cast %80 : vector<16x128xf32> to vector<4x2x2x128xf32>
    %82 = vector.extract_strided_slice %81 {offsets = [0, 0, 0, 0], sizes = [4, 1, 2, 128], strides = [1, 1, 1, 1]} : vector<4x2x2x128xf32> to vector<4x1x2x128xf32>
    %83 = vector.shape_cast %82 : vector<4x1x2x128xf32> to vector<4x2x128xf32>
    %84 = vector.extract_strided_slice %81 {offsets = [0, 1, 0, 0], sizes = [4, 1, 2, 128], strides = [1, 1, 1, 1]} : vector<4x2x2x128xf32> to vector<4x1x2x128xf32>
    %85 = vector.shape_cast %84 : vector<4x1x2x128xf32> to vector<4x2x128xf32>
    %86 = arith.maximumf %83, %85 : vector<4x2x128xf32>
    %87 = vector.shape_cast %86 : vector<4x2x128xf32> to vector<8x128xf32>
    %c0_34 = arith.constant 0 : index
    %c0_35 = arith.constant 0 : index
    %88 = vector.load %arg8[%c0_34, %c0_35] : memref<128x1024xf32, #tpu.memory_space<vmem>>, vector<128x1024xf32>
    %cst_36 = arith.constant dense<0.000000e+00> : vector<8x1024xf32>
    %89 = tpu.matmul %87, %88, %cst_36 {dimension_numbers = #tpu.dot_dimension_numbers<[1], [0], [0], [1], [0, 0, 1, 1], [], []>} : vector<8x128xf32>, vector<128x1024xf32>, vector<8x1024xf32> -> vector<8x1024xf32>
    %c0_37 = arith.constant 0 : index
    %c0_38 = arith.constant 0 : index
    %90 = vector.load %arg9[%c0_37, %c0_38] : memref<1x1024xf32, #tpu.memory_space<vmem>>, vector<1x1024xf32>
    %91 = vector.broadcast %90 : vector<1x1024xf32> to vector<8x1024xf32>
    %92 = arith.addf %89, %91 : vector<8x1024xf32>
    %93 = vector.shape_cast %92 : vector<8x1024xf32> to vector<4x2x1024xf32>
    %c0_39 = arith.constant 0 : index
    %c0_40 = arith.constant 0 : index
    %c0_41 = arith.constant 0 : index
    %94 = vector.load %arg22[%c0_39, %c0_40, %c0_41] : memref<4x2x1024xf32, #tpu.memory_space<vmem>>, vector<4x2x1024xf32>
    tpu.vector_store %arg22[%c0_39, %c0_40, %c0_41], %93 {strides = array<i32>} : memref<4x2x1024xf32, #tpu.memory_space<vmem>>, vector<4x2x1024xf32>,
    %cst_42 = arith.constant 0.000000e+00 : f32
    %95 = vector.broadcast %cst_42 : f32 to vector<4x128xf32>
    %cst_43 = arith.constant 0.000000e+00 : f32
    %96 = vector.broadcast %cst_43 : f32 to vector<4x128xf32>
    %c0_44 = arith.constant 0 : index
    %c0_45 = arith.constant 0 : index
    %c0_46 = arith.constant 0 : index
    %97 = vector.load %arg22[%c0_44, %c0_45, %c0_46] : memref<4x2x1024xf32, #tpu.memory_space<vmem>>, vector<1x2x1024xf32>
    %98 = vector.shape_cast %97 : vector<1x2x1024xf32> to vector<2x1024xf32>
    %99 = vector.extract_strided_slice %98 {offsets = [0, 0], sizes = [2, 512], strides = [1, 1]} : vector<2x1024xf32> to vector<2x512xf32>
    %c3_47 = arith.constant 3 : index
    %c0_48 = arith.constant 0 : index
    %c0_49 = arith.constant 0 : index
    %100 = vector.load %arg22[%c3_47, %c0_48, %c0_49] : memref<4x2x1024xf32, #tpu.memory_space<vmem>>, vector<1x2x1024xf32>
    %101 = vector.shape_cast %100 : vector<1x2x1024xf32> to vector<2x1024xf32>
    %102 = vector.extract_strided_slice %101 {offsets = [0, 512], sizes = [2, 512], strides = [1, 1]} : vector<2x1024xf32> to vector<2x512xf32>
    %103 = vector.extract_strided_slice %95 {offsets = [0, 0], sizes = [2, 128], strides = [1, 1]} : vector<4x128xf32> to vector<2x128xf32>
    %c0_50 = arith.constant 0 : index
    %c0_51 = arith.constant 0 : index
    %104 = vector.load %arg10[%c0_50, %c0_51] : memref<128x512xf32, #tpu.memory_space<vmem>>, vector<128x512xf32>
    %cst_52 = arith.constant dense<0.000000e+00> : vector<2x512xf32>
    %105 = tpu.matmul %103, %104, %cst_52 {dimension_numbers = #tpu.dot_dimension_numbers<[1], [0], [0], [1], [0, 0, 1, 1], [], []>} : vector<2x128xf32>, vector<128x512xf32>, vector<2x512xf32> -> vector<2x512xf32>
    %106 = arith.addf %99, %105 : vector<2x512xf32>
    %107 = vector.extract_strided_slice %95 {offsets = [2, 0], sizes = [2, 128], strides = [1, 1]} : vector<4x128xf32> to vector<2x128xf32>
    %c0_53 = arith.constant 0 : index
    %c0_54 = arith.constant 0 : index
    %108 = vector.load %arg11[%c0_53, %c0_54] : memref<128x512xf32, #tpu.memory_space<vmem>>, vector<128x512xf32>
    %cst_55 = arith.constant dense<0.000000e+00> : vector<2x512xf32>
    %109 = tpu.matmul %107, %108, %cst_55 {dimension_numbers = #tpu.dot_dimension_numbers<[1], [0], [0], [1], [0, 0, 1, 1], [], []>} : vector<2x128xf32>, vector<128x512xf32>, vector<2x512xf32> -> vector<2x512xf32>
    %110 = arith.addf %102, %109 : vector<2x512xf32>
    %111 = tpu.concatenate %106, %110 in 0 : vector<2x512xf32>, vector<2x512xf32> -> vector<4x512xf32>
    %112 = vector.extract_strided_slice %111 {offsets = [0, 0], sizes = [4, 128], strides = [1, 1]} : vector<4x512xf32> to vector<4x128xf32>
    %113 = arith.negf %112 : vector<4x128xf32>
    %114 = math.exp %113 : vector<4x128xf32>
    %cst_56 = arith.constant 1.000000e+00 : f32
    %115 = vector.broadcast %cst_56 : f32 to vector<4x128xf32>
    %116 = arith.addf %115, %114 : vector<4x128xf32>
    %117 = arith.divf %115, %116 : vector<4x128xf32>
    %118 = vector.extract_strided_slice %111 {offsets = [0, 128], sizes = [4, 128], strides = [1, 1]} : vector<4x512xf32> to vector<4x128xf32>
    %119 = arith.negf %118 : vector<4x128xf32>
    %120 = math.exp %119 : vector<4x128xf32>
    %cst_57 = arith.constant 1.000000e+00 : f32
    %121 = vector.broadcast %cst_57 : f32 to vector<4x128xf32>
    %122 = arith.addf %121, %120 : vector<4x128xf32>
    %123 = arith.divf %121, %122 : vector<4x128xf32>
    %124 = vector.extract_strided_slice %111 {offsets = [0, 256], sizes = [4, 128], strides = [1, 1]} : vector<4x512xf32> to vector<4x128xf32>
    %125 = math.tanh %124 : vector<4x128xf32>
    %126 = vector.extract_strided_slice %111 {offsets = [0, 384], sizes = [4, 128], strides = [1, 1]} : vector<4x512xf32> to vector<4x128xf32>
    %127 = arith.negf %126 : vector<4x128xf32>
    %128 = math.exp %127 : vector<4x128xf32>
    %cst_58 = arith.constant 1.000000e+00 : f32
    %129 = vector.broadcast %cst_58 : f32 to vector<4x128xf32>
    %130 = arith.addf %129, %128 : vector<4x128xf32>
    %131 = arith.divf %129, %130 : vector<4x128xf32>
    %132 = arith.mulf %123, %96 : vector<4x128xf32>
    %133 = arith.mulf %117, %125 : vector<4x128xf32>
    %134 = arith.addf %132, %133 : vector<4x128xf32>
    %135 = math.tanh %134 : vector<4x128xf32>
    %136 = arith.mulf %131, %135 : vector<4x128xf32>
    %137 = vector.extract_strided_slice %136 {offsets = [0, 0], sizes = [2, 128], strides = [1, 1]} : vector<4x128xf32> to vector<2x128xf32>
    %c0_59 = arith.constant 0 : index
    %c0_60 = arith.constant 0 : index
    %c0_61 = arith.constant 0 : index
    %138 = vector.load %arg23[%c0_59, %c0_60, %c0_61] : memref<4x2x128xf32, #tpu.memory_space<vmem>>, vector<1x2x128xf32>
    %139 = vector.shape_cast %138 : vector<1x2x128xf32> to vector<2x128xf32>
    %140 = vector.shape_cast %137 : vector<2x128xf32> to vector<1x2x128xf32>
    tpu.vector_store %arg23[%c0_59, %c0_60, %c0_61], %140 {strides = array<i32>} : memref<4x2x128xf32, #tpu.memory_space<vmem>>, vector<1x2x128xf32>,
    %141 = vector.extract_strided_slice %136 {offsets = [2, 0], sizes = [2, 128], strides = [1, 1]} : vector<4x128xf32> to vector<2x128xf32>
    %c3_62 = arith.constant 3 : index
    %c0_63 = arith.constant 0 : index
    %c0_64 = arith.constant 0 : index
    %142 = vector.load %arg24[%c3_62, %c0_63, %c0_64] : memref<4x2x128xf32, #tpu.memory_space<vmem>>, vector<1x2x128xf32>
    %143 = vector.shape_cast %142 : vector<1x2x128xf32> to vector<2x128xf32>
    %144 = vector.shape_cast %141 : vector<2x128xf32> to vector<1x2x128xf32>
    tpu.vector_store %arg24[%c3_62, %c0_63, %c0_64], %144 {strides = array<i32>} : memref<4x2x128xf32, #tpu.memory_space<vmem>>, vector<1x2x128xf32>,
    %c1_65 = arith.constant 1 : index
    %c0_66 = arith.constant 0 : index
    %c0_67 = arith.constant 0 : index
    %145 = vector.load %arg22[%c1_65, %c0_66, %c0_67] : memref<4x2x1024xf32, #tpu.memory_space<vmem>>, vector<1x2x1024xf32>
    %146 = vector.shape_cast %145 : vector<1x2x1024xf32> to vector<2x1024xf32>
    %147 = vector.extract_strided_slice %146 {offsets = [0, 0], sizes = [2, 512], strides = [1, 1]} : vector<2x1024xf32> to vector<2x512xf32>
    %c2_68 = arith.constant 2 : index
    %c0_69 = arith.constant 0 : index
    %c0_70 = arith.constant 0 : index
    %148 = vector.load %arg22[%c2_68, %c0_69, %c0_70] : memref<4x2x1024xf32, #tpu.memory_space<vmem>>, vector<1x2x1024xf32>
    %149 = vector.shape_cast %148 : vector<1x2x1024xf32> to vector<2x1024xf32>
    %150 = vector.extract_strided_slice %149 {offsets = [0, 512], sizes = [2, 512], strides = [1, 1]} : vector<2x1024xf32> to vector<2x512xf32>
    %151 = vector.extract_strided_slice %136 {offsets = [0, 0], sizes = [2, 128], strides = [1, 1]} : vector<4x128xf32> to vector<2x128xf32>
    %c0_71 = arith.constant 0 : index
    %c0_72 = arith.constant 0 : index
    %152 = vector.load %arg10[%c0_71, %c0_72] : memref<128x512xf32, #tpu.memory_space<vmem>>, vector<128x512xf32>
    %cst_73 = arith.constant dense<0.000000e+00> : vector<2x512xf32>
    %153 = tpu.matmul %151, %152, %cst_73 {dimension_numbers = #tpu.dot_dimension_numbers<[1], [0], [0], [1], [0, 0, 1, 1], [], []>} : vector<2x128xf32>, vector<128x512xf32>, vector<2x512xf32> -> vector<2x512xf32>
    %154 = arith.addf %147, %153 : vector<2x512xf32>
    %155 = vector.extract_strided_slice %136 {offsets = [2, 0], sizes = [2, 128], strides = [1, 1]} : vector<4x128xf32> to vector<2x128xf32>
    %c0_74 = arith.constant 0 : index
    %c0_75 = arith.constant 0 : index
    %156 = vector.load %arg11[%c0_74, %c0_75] : memref<128x512xf32, #tpu.memory_space<vmem>>, vector<128x512xf32>
    %cst_76 = arith.constant dense<0.000000e+00> : vector<2x512xf32>
    %157 = tpu.matmul %155, %156, %cst_76 {dimension_numbers = #tpu.dot_dimension_numbers<[1], [0], [0], [1], [0, 0, 1, 1], [], []>} : vector<2x128xf32>, vector<128x512xf32>, vector<2x512xf32> -> vector<2x512xf32>
    %158 = arith.addf %150, %157 : vector<2x512xf32>
    %159 = tpu.concatenate %154, %158 in 0 : vector<2x512xf32>, vector<2x512xf32> -> vector<4x512xf32>
    %160 = vector.extract_strided_slice %159 {offsets = [0, 0], sizes = [4, 128], strides = [1, 1]} : vector<4x512xf32> to vector<4x128xf32>
    %161 = arith.negf %160 : vector<4x128xf32>
    %162 = math.exp %161 : vector<4x128xf32>
    %cst_77 = arith.constant 1.000000e+00 : f32
    %163 = vector.broadcast %cst_77 : f32 to vector<4x128xf32>
    %164 = arith.addf %163, %162 : vector<4x128xf32>
    %165 = arith.divf %163, %164 : vector<4x128xf32>
    %166 = vector.extract_strided_slice %159 {offsets = [0, 128], sizes = [4, 128], strides = [1, 1]} : vector<4x512xf32> to vector<4x128xf32>
    %167 = arith.negf %166 : vector<4x128xf32>
    %168 = math.exp %167 : vector<4x128xf32>
    %cst_78 = arith.constant 1.000000e+00 : f32
    %169 = vector.broadcast %cst_78 : f32 to vector<4x128xf32>
    %170 = arith.addf %169, %168 : vector<4x128xf32>
    %171 = arith.divf %169, %170 : vector<4x128xf32>
    %172 = vector.extract_strided_slice %159 {offsets = [0, 256], sizes = [4, 128], strides = [1, 1]} : vector<4x512xf32> to vector<4x128xf32>
    %173 = math.tanh %172 : vector<4x128xf32>
    %174 = vector.extract_strided_slice %159 {offsets = [0, 384], sizes = [4, 128], strides = [1, 1]} : vector<4x512xf32> to vector<4x128xf32>
    %175 = arith.negf %174 : vector<4x128xf32>
    %176 = math.exp %175 : vector<4x128xf32>
    %cst_79 = arith.constant 1.000000e+00 : f32
    %177 = vector.broadcast %cst_79 : f32 to vector<4x128xf32>
    %178 = arith.addf %177, %176 : vector<4x128xf32>
    %179 = arith.divf %177, %178 : vector<4x128xf32>
    %180 = arith.mulf %171, %134 : vector<4x128xf32>
    %181 = arith.mulf %165, %173 : vector<4x128xf32>
    %182 = arith.addf %180, %181 : vector<4x128xf32>
    %183 = math.tanh %182 : vector<4x128xf32>
    %184 = arith.mulf %179, %183 : vector<4x128xf32>
    %185 = vector.extract_strided_slice %184 {offsets = [0, 0], sizes = [2, 128], strides = [1, 1]} : vector<4x128xf32> to vector<2x128xf32>
    %c1_80 = arith.constant 1 : index
    %c0_81 = arith.constant 0 : index
    %c0_82 = arith.constant 0 : index
    %186 = vector.load %arg23[%c1_80, %c0_81, %c0_82] : memref<4x2x128xf32, #tpu.memory_space<vmem>>, vector<1x2x128xf32>
    %187 = vector.shape_cast %186 : vector<1x2x128xf32> to vector<2x128xf32>
    %188 = vector.shape_cast %185 : vector<2x128xf32> to vector<1x2x128xf32>
    tpu.vector_store %arg23[%c1_80, %c0_81, %c0_82], %188 {strides = array<i32>} : memref<4x2x128xf32, #tpu.memory_space<vmem>>, vector<1x2x128xf32>,
    %189 = vector.extract_strided_slice %184 {offsets = [2, 0], sizes = [2, 128], strides = [1, 1]} : vector<4x128xf32> to vector<2x128xf32>
    %c2_83 = arith.constant 2 : index
    %c0_84 = arith.constant 0 : index
    %c0_85 = arith.constant 0 : index
    %190 = vector.load %arg24[%c2_83, %c0_84, %c0_85] : memref<4x2x128xf32, #tpu.memory_space<vmem>>, vector<1x2x128xf32>
    %191 = vector.shape_cast %190 : vector<1x2x128xf32> to vector<2x128xf32>
    %192 = vector.shape_cast %189 : vector<2x128xf32> to vector<1x2x128xf32>
    tpu.vector_store %arg24[%c2_83, %c0_84, %c0_85], %192 {strides = array<i32>} : memref<4x2x128xf32, #tpu.memory_space<vmem>>, vector<1x2x128xf32>,
    %c2_86 = arith.constant 2 : index
    %c0_87 = arith.constant 0 : index
    %c0_88 = arith.constant 0 : index
    %193 = vector.load %arg22[%c2_86, %c0_87, %c0_88] : memref<4x2x1024xf32, #tpu.memory_space<vmem>>, vector<1x2x1024xf32>
    %194 = vector.shape_cast %193 : vector<1x2x1024xf32> to vector<2x1024xf32>
    %195 = vector.extract_strided_slice %194 {offsets = [0, 0], sizes = [2, 512], strides = [1, 1]} : vector<2x1024xf32> to vector<2x512xf32>
    %c1_89 = arith.constant 1 : index
    %c0_90 = arith.constant 0 : index
    %c0_91 = arith.constant 0 : index
    %196 = vector.load %arg22[%c1_89, %c0_90, %c0_91] : memref<4x2x1024xf32, #tpu.memory_space<vmem>>, vector<1x2x1024xf32>
    %197 = vector.shape_cast %196 : vector<1x2x1024xf32> to vector<2x1024xf32>
    %198 = vector.extract_strided_slice %197 {offsets = [0, 512], sizes = [2, 512], strides = [1, 1]} : vector<2x1024xf32> to vector<2x512xf32>
    %199 = vector.extract_strided_slice %184 {offsets = [0, 0], sizes = [2, 128], strides = [1, 1]} : vector<4x128xf32> to vector<2x128xf32>
    %c0_92 = arith.constant 0 : index
    %c0_93 = arith.constant 0 : index
    %200 = vector.load %arg10[%c0_92, %c0_93] : memref<128x512xf32, #tpu.memory_space<vmem>>, vector<128x512xf32>
    %cst_94 = arith.constant dense<0.000000e+00> : vector<2x512xf32>
    %201 = tpu.matmul %199, %200, %cst_94 {dimension_numbers = #tpu.dot_dimension_numbers<[1], [0], [0], [1], [0, 0, 1, 1], [], []>} : vector<2x128xf32>, vector<128x512xf32>, vector<2x512xf32> -> vector<2x512xf32>
    %202 = arith.addf %195, %201 : vector<2x512xf32>
    %203 = vector.extract_strided_slice %184 {offsets = [2, 0], sizes = [2, 128], strides = [1, 1]} : vector<4x128xf32> to vector<2x128xf32>
    %c0_95 = arith.constant 0 : index
    %c0_96 = arith.constant 0 : index
    %204 = vector.load %arg11[%c0_95, %c0_96] : memref<128x512xf32, #tpu.memory_space<vmem>>, vector<128x512xf32>
    %cst_97 = arith.constant dense<0.000000e+00> : vector<2x512xf32>
    %205 = tpu.matmul %203, %204, %cst_97 {dimension_numbers = #tpu.dot_dimension_numbers<[1], [0], [0], [1], [0, 0, 1, 1], [], []>} : vector<2x128xf32>, vector<128x512xf32>, vector<2x512xf32> -> vector<2x512xf32>
    %206 = arith.addf %198, %205 : vector<2x512xf32>
    %207 = tpu.concatenate %202, %206 in 0 : vector<2x512xf32>, vector<2x512xf32> -> vector<4x512xf32>
    %208 = vector.extract_strided_slice %207 {offsets = [0, 0], sizes = [4, 128], strides = [1, 1]} : vector<4x512xf32> to vector<4x128xf32>
    %209 = arith.negf %208 : vector<4x128xf32>
    %210 = math.exp %209 : vector<4x128xf32>
    %cst_98 = arith.constant 1.000000e+00 : f32
    %211 = vector.broadcast %cst_98 : f32 to vector<4x128xf32>
    %212 = arith.addf %211, %210 : vector<4x128xf32>
    %213 = arith.divf %211, %212 : vector<4x128xf32>
    %214 = vector.extract_strided_slice %207 {offsets = [0, 128], sizes = [4, 128], strides = [1, 1]} : vector<4x512xf32> to vector<4x128xf32>
    %215 = arith.negf %214 : vector<4x128xf32>
    %216 = math.exp %215 : vector<4x128xf32>
    %cst_99 = arith.constant 1.000000e+00 : f32
    %217 = vector.broadcast %cst_99 : f32 to vector<4x128xf32>
    %218 = arith.addf %217, %216 : vector<4x128xf32>
    %219 = arith.divf %217, %218 : vector<4x128xf32>
    %220 = vector.extract_strided_slice %207 {offsets = [0, 256], sizes = [4, 128], strides = [1, 1]} : vector<4x512xf32> to vector<4x128xf32>
    %221 = math.tanh %220 : vector<4x128xf32>
    %222 = vector.extract_strided_slice %207 {offsets = [0, 384], sizes = [4, 128], strides = [1, 1]} : vector<4x512xf32> to vector<4x128xf32>
    %223 = arith.negf %222 : vector<4x128xf32>
    %224 = math.exp %223 : vector<4x128xf32>
    %cst_100 = arith.constant 1.000000e+00 : f32
    %225 = vector.broadcast %cst_100 : f32 to vector<4x128xf32>
    %226 = arith.addf %225, %224 : vector<4x128xf32>
    %227 = arith.divf %225, %226 : vector<4x128xf32>
    %228 = arith.mulf %219, %182 : vector<4x128xf32>
    %229 = arith.mulf %213, %221 : vector<4x128xf32>
    %230 = arith.addf %228, %229 : vector<4x128xf32>
    %231 = math.tanh %230 : vector<4x128xf32>
    %232 = arith.mulf %227, %231 : vector<4x128xf32>
    %233 = vector.extract_strided_slice %232 {offsets = [0, 0], sizes = [2, 128], strides = [1, 1]} : vector<4x128xf32> to vector<2x128xf32>
    %c2_101 = arith.constant 2 : index
    %c0_102 = arith.constant 0 : index
    %c0_103 = arith.constant 0 : index
    %234 = vector.load %arg23[%c2_101, %c0_102, %c0_103] : memref<4x2x128xf32, #tpu.memory_space<vmem>>, vector<1x2x128xf32>
    %235 = vector.shape_cast %234 : vector<1x2x128xf32> to vector<2x128xf32>
    %236 = vector.shape_cast %233 : vector<2x128xf32> to vector<1x2x128xf32>
    tpu.vector_store %arg23[%c2_101, %c0_102, %c0_103], %236 {strides = array<i32>} : memref<4x2x128xf32, #tpu.memory_space<vmem>>, vector<1x2x128xf32>,
    %237 = vector.extract_strided_slice %232 {offsets = [2, 0], sizes = [2, 128], strides = [1, 1]} : vector<4x128xf32> to vector<2x128xf32>
    %c1_104 = arith.constant 1 : index
    %c0_105 = arith.constant 0 : index
    %c0_106 = arith.constant 0 : index
    %238 = vector.load %arg24[%c1_104, %c0_105, %c0_106] : memref<4x2x128xf32, #tpu.memory_space<vmem>>, vector<1x2x128xf32>
    %239 = vector.shape_cast %238 : vector<1x2x128xf32> to vector<2x128xf32>
    %240 = vector.shape_cast %237 : vector<2x128xf32> to vector<1x2x128xf32>
    tpu.vector_store %arg24[%c1_104, %c0_105, %c0_106], %240 {strides = array<i32>} : memref<4x2x128xf32, #tpu.memory_space<vmem>>, vector<1x2x128xf32>,
    %c3_107 = arith.constant 3 : index
    %c0_108 = arith.constant 0 : index
    %c0_109 = arith.constant 0 : index
    %241 = vector.load %arg22[%c3_107, %c0_108, %c0_109] : memref<4x2x1024xf32, #tpu.memory_space<vmem>>, vector<1x2x1024xf32>
    %242 = vector.shape_cast %241 : vector<1x2x1024xf32> to vector<2x1024xf32>
    %243 = vector.extract_strided_slice %242 {offsets = [0, 0], sizes = [2, 512], strides = [1, 1]} : vector<2x1024xf32> to vector<2x512xf32>
    %c0_110 = arith.constant 0 : index
    %c0_111 = arith.constant 0 : index
    %c0_112 = arith.constant 0 : index
    %244 = vector.load %arg22[%c0_110, %c0_111, %c0_112] : memref<4x2x1024xf32, #tpu.memory_space<vmem>>, vector<1x2x1024xf32>
    %245 = vector.shape_cast %244 : vector<1x2x1024xf32> to vector<2x1024xf32>
    %246 = vector.extract_strided_slice %245 {offsets = [0, 512], sizes = [2, 512], strides = [1, 1]} : vector<2x1024xf32> to vector<2x512xf32>
    %247 = vector.extract_strided_slice %232 {offsets = [0, 0], sizes = [2, 128], strides = [1, 1]} : vector<4x128xf32> to vector<2x128xf32>
    %c0_113 = arith.constant 0 : index
    %c0_114 = arith.constant 0 : index
    %248 = vector.load %arg10[%c0_113, %c0_114] : memref<128x512xf32, #tpu.memory_space<vmem>>, vector<128x512xf32>
    %cst_115 = arith.constant dense<0.000000e+00> : vector<2x512xf32>
    %249 = tpu.matmul %247, %248, %cst_115 {dimension_numbers = #tpu.dot_dimension_numbers<[1], [0], [0], [1], [0, 0, 1, 1], [], []>} : vector<2x128xf32>, vector<128x512xf32>, vector<2x512xf32> -> vector<2x512xf32>
    %250 = arith.addf %243, %249 : vector<2x512xf32>
    %251 = vector.extract_strided_slice %232 {offsets = [2, 0], sizes = [2, 128], strides = [1, 1]} : vector<4x128xf32> to vector<2x128xf32>
    %c0_116 = arith.constant 0 : index
    %c0_117 = arith.constant 0 : index
    %252 = vector.load %arg11[%c0_116, %c0_117] : memref<128x512xf32, #tpu.memory_space<vmem>>, vector<128x512xf32>
    %cst_118 = arith.constant dense<0.000000e+00> : vector<2x512xf32>
    %253 = tpu.matmul %251, %252, %cst_118 {dimension_numbers = #tpu.dot_dimension_numbers<[1], [0], [0], [1], [0, 0, 1, 1], [], []>} : vector<2x128xf32>, vector<128x512xf32>, vector<2x512xf32> -> vector<2x512xf32>
    %254 = arith.addf %246, %253 : vector<2x512xf32>
    %255 = tpu.concatenate %250, %254 in 0 : vector<2x512xf32>, vector<2x512xf32> -> vector<4x512xf32>
    %256 = vector.extract_strided_slice %255 {offsets = [0, 0], sizes = [4, 128], strides = [1, 1]} : vector<4x512xf32> to vector<4x128xf32>
    %257 = arith.negf %256 : vector<4x128xf32>
    %258 = math.exp %257 : vector<4x128xf32>
    %cst_119 = arith.constant 1.000000e+00 : f32
    %259 = vector.broadcast %cst_119 : f32 to vector<4x128xf32>
    %260 = arith.addf %259, %258 : vector<4x128xf32>
    %261 = arith.divf %259, %260 : vector<4x128xf32>
    %262 = vector.extract_strided_slice %255 {offsets = [0, 128], sizes = [4, 128], strides = [1, 1]} : vector<4x512xf32> to vector<4x128xf32>
    %263 = arith.negf %262 : vector<4x128xf32>
    %264 = math.exp %263 : vector<4x128xf32>
    %cst_120 = arith.constant 1.000000e+00 : f32
    %265 = vector.broadcast %cst_120 : f32 to vector<4x128xf32>
    %266 = arith.addf %265, %264 : vector<4x128xf32>
    %267 = arith.divf %265, %266 : vector<4x128xf32>
    %268 = vector.extract_strided_slice %255 {offsets = [0, 256], sizes = [4, 128], strides = [1, 1]} : vector<4x512xf32> to vector<4x128xf32>
    %269 = math.tanh %268 : vector<4x128xf32>
    %270 = vector.extract_strided_slice %255 {offsets = [0, 384], sizes = [4, 128], strides = [1, 1]} : vector<4x512xf32> to vector<4x128xf32>
    %271 = arith.negf %270 : vector<4x128xf32>
    %272 = math.exp %271 : vector<4x128xf32>
    %cst_121 = arith.constant 1.000000e+00 : f32
    %273 = vector.broadcast %cst_121 : f32 to vector<4x128xf32>
    %274 = arith.addf %273, %272 : vector<4x128xf32>
    %275 = arith.divf %273, %274 : vector<4x128xf32>
    %276 = arith.mulf %267, %230 : vector<4x128xf32>
    %277 = arith.mulf %261, %269 : vector<4x128xf32>
    %278 = arith.addf %276, %277 : vector<4x128xf32>
    %279 = math.tanh %278 : vector<4x128xf32>
    %280 = arith.mulf %275, %279 : vector<4x128xf32>
    %281 = vector.extract_strided_slice %280 {offsets = [0, 0], sizes = [2, 128], strides = [1, 1]} : vector<4x128xf32> to vector<2x128xf32>
    %c3_122 = arith.constant 3 : index
    %c0_123 = arith.constant 0 : index
    %c0_124 = arith.constant 0 : index
    %282 = vector.load %arg23[%c3_122, %c0_123, %c0_124] : memref<4x2x128xf32, #tpu.memory_space<vmem>>, vector<1x2x128xf32>
    %283 = vector.shape_cast %282 : vector<1x2x128xf32> to vector<2x128xf32>
    %284 = vector.shape_cast %281 : vector<2x128xf32> to vector<1x2x128xf32>
    tpu.vector_store %arg23[%c3_122, %c0_123, %c0_124], %284 {strides = array<i32>} : memref<4x2x128xf32, #tpu.memory_space<vmem>>, vector<1x2x128xf32>,
    %285 = vector.extract_strided_slice %280 {offsets = [2, 0], sizes = [2, 128], strides = [1, 1]} : vector<4x128xf32> to vector<2x128xf32>
    %c0_125 = arith.constant 0 : index
    %c0_126 = arith.constant 0 : index
    %c0_127 = arith.constant 0 : index
    %286 = vector.load %arg24[%c0_125, %c0_126, %c0_127] : memref<4x2x128xf32, #tpu.memory_space<vmem>>, vector<1x2x128xf32>
    %287 = vector.shape_cast %286 : vector<1x2x128xf32> to vector<2x128xf32>
    %288 = vector.shape_cast %285 : vector<2x128xf32> to vector<1x2x128xf32>
    tpu.vector_store %arg24[%c0_125, %c0_126, %c0_127], %288 {strides = array<i32>} : memref<4x2x128xf32, #tpu.memory_space<vmem>>, vector<1x2x128xf32>,
    %c0_128 = arith.constant 0 : index
    %c0_129 = arith.constant 0 : index
    %c0_130 = arith.constant 0 : index
    %289 = vector.load %arg23[%c0_128, %c0_129, %c0_130] : memref<4x2x128xf32, #tpu.memory_space<vmem>>, vector<4x2x128xf32>
    %290 = vector.shape_cast %289 : vector<4x2x128xf32> to vector<8x128xf32>
    %c0_131 = arith.constant 0 : index
    %c0_132 = arith.constant 0 : index
    %c0_133 = arith.constant 0 : index
    %291 = vector.load %arg24[%c0_131, %c0_132, %c0_133] : memref<4x2x128xf32, #tpu.memory_space<vmem>>, vector<4x2x128xf32>
    %292 = vector.shape_cast %291 : vector<4x2x128xf32> to vector<8x128xf32>
    %c0_134 = arith.constant 0 : index
    %c0_135 = arith.constant 0 : index
    %293 = vector.load %arg12[%c0_134, %c0_135] : memref<256x512xf32, #tpu.memory_space<vmem>>, vector<128x512xf32>
    %cst_136 = arith.constant dense<0.000000e+00> : vector<8x512xf32>
    %294 = tpu.matmul %290, %293, %cst_136 {dimension_numbers = #tpu.dot_dimension_numbers<[1], [0], [0], [1], [0, 0, 1, 1], [], []>} : vector<8x128xf32>, vector<128x512xf32>, vector<8x512xf32> -> vector<8x512xf32>
    %c128 = arith.constant 128 : index
    %c0_137 = arith.constant 0 : index
    %295 = vector.load %arg12[%c128, %c0_137] : memref<256x512xf32, #tpu.memory_space<vmem>>, vector<128x512xf32>
    %cst_138 = arith.constant dense<0.000000e+00> : vector<8x512xf32>
    %296 = tpu.matmul %292, %295, %cst_138 {dimension_numbers = #tpu.dot_dimension_numbers<[1], [0], [0], [1], [0, 0, 1, 1], [], []>} : vector<8x128xf32>, vector<128x512xf32>, vector<8x512xf32> -> vector<8x512xf32>
    %297 = arith.addf %294, %296 : vector<8x512xf32>
    %c0_139 = arith.constant 0 : index
    %c0_140 = arith.constant 0 : index
    %298 = vector.load %arg13[%c0_139, %c0_140] : memref<1x512xf32, #tpu.memory_space<vmem>>, vector<1x512xf32>
    %299 = vector.broadcast %298 : vector<1x512xf32> to vector<8x512xf32>
    %300 = arith.addf %297, %299 : vector<8x512xf32>
    %cst_141 = arith.constant 0.000000e+00 : f32
    %301 = vector.broadcast %cst_141 : f32 to vector<2x128xf32>
    %cst_142 = arith.constant 0.000000e+00 : f32
    %302 = vector.broadcast %cst_142 : f32 to vector<2x128xf32>
    %303 = vector.extract_strided_slice %300 {offsets = [0, 0], sizes = [2, 512], strides = [1, 1]} : vector<8x512xf32> to vector<2x512xf32>
    %c0_143 = arith.constant 0 : index
    %c0_144 = arith.constant 0 : index
    %304 = vector.load %arg16[%c0_143, %c0_144] : memref<128x512xf32, #tpu.memory_space<vmem>>, vector<128x512xf32>
    %cst_145 = arith.constant dense<0.000000e+00> : vector<2x512xf32>
    %305 = tpu.matmul %301, %304, %cst_145 {dimension_numbers = #tpu.dot_dimension_numbers<[1], [0], [0], [1], [0, 0, 1, 1], [], []>} : vector<2x128xf32>, vector<128x512xf32>, vector<2x512xf32> -> vector<2x512xf32>
    %306 = arith.addf %303, %305 : vector<2x512xf32>
    %307 = vector.extract_strided_slice %306 {offsets = [0, 0], sizes = [2, 128], strides = [1, 1]} : vector<2x512xf32> to vector<2x128xf32>
    %308 = arith.negf %307 : vector<2x128xf32>
    %309 = math.exp %308 : vector<2x128xf32>
    %cst_146 = arith.constant 1.000000e+00 : f32
    %310 = vector.broadcast %cst_146 : f32 to vector<2x128xf32>
    %311 = arith.addf %310, %309 : vector<2x128xf32>
    %312 = arith.divf %310, %311 : vector<2x128xf32>
    %313 = vector.extract_strided_slice %306 {offsets = [0, 128], sizes = [2, 128], strides = [1, 1]} : vector<2x512xf32> to vector<2x128xf32>
    %314 = arith.negf %313 : vector<2x128xf32>
    %315 = math.exp %314 : vector<2x128xf32>
    %cst_147 = arith.constant 1.000000e+00 : f32
    %316 = vector.broadcast %cst_147 : f32 to vector<2x128xf32>
    %317 = arith.addf %316, %315 : vector<2x128xf32>
    %318 = arith.divf %316, %317 : vector<2x128xf32>
    %319 = vector.extract_strided_slice %306 {offsets = [0, 256], sizes = [2, 128], strides = [1, 1]} : vector<2x512xf32> to vector<2x128xf32>
    %320 = math.tanh %319 : vector<2x128xf32>
    %321 = vector.extract_strided_slice %306 {offsets = [0, 384], sizes = [2, 128], strides = [1, 1]} : vector<2x512xf32> to vector<2x128xf32>
    %322 = arith.negf %321 : vector<2x128xf32>
    %323 = math.exp %322 : vector<2x128xf32>
    %cst_148 = arith.constant 1.000000e+00 : f32
    %324 = vector.broadcast %cst_148 : f32 to vector<2x128xf32>
    %325 = arith.addf %324, %323 : vector<2x128xf32>
    %326 = arith.divf %324, %325 : vector<2x128xf32>
    %327 = arith.mulf %318, %302 : vector<2x128xf32>
    %328 = arith.mulf %312, %320 : vector<2x128xf32>
    %329 = arith.addf %327, %328 : vector<2x128xf32>
    %330 = math.tanh %329 : vector<2x128xf32>
    %331 = arith.mulf %326, %330 : vector<2x128xf32>
    %332 = vector.extract_strided_slice %300 {offsets = [2, 0], sizes = [2, 512], strides = [1, 1]} : vector<8x512xf32> to vector<2x512xf32>
    %c0_149 = arith.constant 0 : index
    %c0_150 = arith.constant 0 : index
    %333 = vector.load %arg16[%c0_149, %c0_150] : memref<128x512xf32, #tpu.memory_space<vmem>>, vector<128x512xf32>
    %cst_151 = arith.constant dense<0.000000e+00> : vector<2x512xf32>
    %334 = tpu.matmul %331, %333, %cst_151 {dimension_numbers = #tpu.dot_dimension_numbers<[1], [0], [0], [1], [0, 0, 1, 1], [], []>} : vector<2x128xf32>, vector<128x512xf32>, vector<2x512xf32> -> vector<2x512xf32>
    %335 = arith.addf %332, %334 : vector<2x512xf32>
    %336 = vector.extract_strided_slice %335 {offsets = [0, 0], sizes = [2, 128], strides = [1, 1]} : vector<2x512xf32> to vector<2x128xf32>
    %337 = arith.negf %336 : vector<2x128xf32>
    %338 = math.exp %337 : vector<2x128xf32>
    %cst_152 = arith.constant 1.000000e+00 : f32
    %339 = vector.broadcast %cst_152 : f32 to vector<2x128xf32>
    %340 = arith.addf %339, %338 : vector<2x128xf32>
    %341 = arith.divf %339, %340 : vector<2x128xf32>
    %342 = vector.extract_strided_slice %335 {offsets = [0, 128], sizes = [2, 128], strides = [1, 1]} : vector<2x512xf32> to vector<2x128xf32>
    %343 = arith.negf %342 : vector<2x128xf32>
    %344 = math.exp %343 : vector<2x128xf32>
    %cst_153 = arith.constant 1.000000e+00 : f32
    %345 = vector.broadcast %cst_153 : f32 to vector<2x128xf32>
    %346 = arith.addf %345, %344 : vector<2x128xf32>
    %347 = arith.divf %345, %346 : vector<2x128xf32>
    %348 = vector.extract_strided_slice %335 {offsets = [0, 256], sizes = [2, 128], strides = [1, 1]} : vector<2x512xf32> to vector<2x128xf32>
    %349 = math.tanh %348 : vector<2x128xf32>
    %350 = vector.extract_strided_slice %335 {offsets = [0, 384], sizes = [2, 128], strides = [1, 1]} : vector<2x512xf32> to vector<2x128xf32>
    %351 = arith.negf %350 : vector<2x128xf32>
    %352 = math.exp %351 : vector<2x128xf32>
    %cst_154 = arith.constant 1.000000e+00 : f32
    %353 = vector.broadcast %cst_154 : f32 to vector<2x128xf32>
    %354 = arith.addf %353, %352 : vector<2x128xf32>
    %355 = arith.divf %353, %354 : vector<2x128xf32>
    %356 = arith.mulf %347, %329 : vector<2x128xf32>
    %357 = arith.mulf %341, %349 : vector<2x128xf32>
    %358 = arith.addf %356, %357 : vector<2x128xf32>
    %359 = math.tanh %358 : vector<2x128xf32>
    %360 = arith.mulf %355, %359 : vector<2x128xf32>
    %361 = vector.extract_strided_slice %300 {offsets = [4, 0], sizes = [2, 512], strides = [1, 1]} : vector<8x512xf32> to vector<2x512xf32>
    %c0_155 = arith.constant 0 : index
    %c0_156 = arith.constant 0 : index
    %362 = vector.load %arg16[%c0_155, %c0_156] : memref<128x512xf32, #tpu.memory_space<vmem>>, vector<128x512xf32>
    %cst_157 = arith.constant dense<0.000000e+00> : vector<2x512xf32>
    %363 = tpu.matmul %360, %362, %cst_157 {dimension_numbers = #tpu.dot_dimension_numbers<[1], [0], [0], [1], [0, 0, 1, 1], [], []>} : vector<2x128xf32>, vector<128x512xf32>, vector<2x512xf32> -> vector<2x512xf32>
    %364 = arith.addf %361, %363 : vector<2x512xf32>
    %365 = vector.extract_strided_slice %364 {offsets = [0, 0], sizes = [2, 128], strides = [1, 1]} : vector<2x512xf32> to vector<2x128xf32>
    %366 = arith.negf %365 : vector<2x128xf32>
    %367 = math.exp %366 : vector<2x128xf32>
    %cst_158 = arith.constant 1.000000e+00 : f32
    %368 = vector.broadcast %cst_158 : f32 to vector<2x128xf32>
    %369 = arith.addf %368, %367 : vector<2x128xf32>
    %370 = arith.divf %368, %369 : vector<2x128xf32>
    %371 = vector.extract_strided_slice %364 {offsets = [0, 128], sizes = [2, 128], strides = [1, 1]} : vector<2x512xf32> to vector<2x128xf32>
    %372 = arith.negf %371 : vector<2x128xf32>
    %373 = math.exp %372 : vector<2x128xf32>
    %cst_159 = arith.constant 1.000000e+00 : f32
    %374 = vector.broadcast %cst_159 : f32 to vector<2x128xf32>
    %375 = arith.addf %374, %373 : vector<2x128xf32>
    %376 = arith.divf %374, %375 : vector<2x128xf32>
    %377 = vector.extract_strided_slice %364 {offsets = [0, 256], sizes = [2, 128], strides = [1, 1]} : vector<2x512xf32> to vector<2x128xf32>
    %378 = math.tanh %377 : vector<2x128xf32>
    %379 = vector.extract_strided_slice %364 {offsets = [0, 384], sizes = [2, 128], strides = [1, 1]} : vector<2x512xf32> to vector<2x128xf32>
    %380 = arith.negf %379 : vector<2x128xf32>
    %381 = math.exp %380 : vector<2x128xf32>
    %cst_160 = arith.constant 1.000000e+00 : f32
    %382 = vector.broadcast %cst_160 : f32 to vector<2x128xf32>
    %383 = arith.addf %382, %381 : vector<2x128xf32>
    %384 = arith.divf %382, %383 : vector<2x128xf32>
    %385 = arith.mulf %376, %358 : vector<2x128xf32>
    %386 = arith.mulf %370, %378 : vector<2x128xf32>
    %387 = arith.addf %385, %386 : vector<2x128xf32>
    %388 = math.tanh %387 : vector<2x128xf32>
    %389 = arith.mulf %384, %388 : vector<2x128xf32>
    %390 = vector.extract_strided_slice %300 {offsets = [6, 0], sizes = [2, 512], strides = [1, 1]} : vector<8x512xf32> to vector<2x512xf32>
    %c0_161 = arith.constant 0 : index
    %c0_162 = arith.constant 0 : index
    %391 = vector.load %arg16[%c0_161, %c0_162] : memref<128x512xf32, #tpu.memory_space<vmem>>, vector<128x512xf32>
    %cst_163 = arith.constant dense<0.000000e+00> : vector<2x512xf32>
    %392 = tpu.matmul %389, %391, %cst_163 {dimension_numbers = #tpu.dot_dimension_numbers<[1], [0], [0], [1], [0, 0, 1, 1], [], []>} : vector<2x128xf32>, vector<128x512xf32>, vector<2x512xf32> -> vector<2x512xf32>
    %393 = arith.addf %390, %392 : vector<2x512xf32>
    %394 = vector.extract_strided_slice %393 {offsets = [0, 0], sizes = [2, 128], strides = [1, 1]} : vector<2x512xf32> to vector<2x128xf32>
    %395 = arith.negf %394 : vector<2x128xf32>
    %396 = math.exp %395 : vector<2x128xf32>
    %cst_164 = arith.constant 1.000000e+00 : f32
    %397 = vector.broadcast %cst_164 : f32 to vector<2x128xf32>
    %398 = arith.addf %397, %396 : vector<2x128xf32>
    %399 = arith.divf %397, %398 : vector<2x128xf32>
    %400 = vector.extract_strided_slice %393 {offsets = [0, 128], sizes = [2, 128], strides = [1, 1]} : vector<2x512xf32> to vector<2x128xf32>
    %401 = arith.negf %400 : vector<2x128xf32>
    %402 = math.exp %401 : vector<2x128xf32>
    %cst_165 = arith.constant 1.000000e+00 : f32
    %403 = vector.broadcast %cst_165 : f32 to vector<2x128xf32>
    %404 = arith.addf %403, %402 : vector<2x128xf32>
    %405 = arith.divf %403, %404 : vector<2x128xf32>
    %406 = vector.extract_strided_slice %393 {offsets = [0, 256], sizes = [2, 128], strides = [1, 1]} : vector<2x512xf32> to vector<2x128xf32>
    %407 = math.tanh %406 : vector<2x128xf32>
    %408 = vector.extract_strided_slice %393 {offsets = [0, 384], sizes = [2, 128], strides = [1, 1]} : vector<2x512xf32> to vector<2x128xf32>
    %409 = arith.negf %408 : vector<2x128xf32>
    %410 = math.exp %409 : vector<2x128xf32>
    %cst_166 = arith.constant 1.000000e+00 : f32
    %411 = vector.broadcast %cst_166 : f32 to vector<2x128xf32>
    %412 = arith.addf %411, %410 : vector<2x128xf32>
    %413 = arith.divf %411, %412 : vector<2x128xf32>
    %414 = arith.mulf %405, %387 : vector<2x128xf32>
    %415 = arith.mulf %399, %407 : vector<2x128xf32>
    %416 = arith.addf %414, %415 : vector<2x128xf32>
    %417 = math.tanh %416 : vector<2x128xf32>
    %418 = arith.mulf %413, %417 : vector<2x128xf32>
    %c3_167 = arith.constant 3 : index
    %c0_168 = arith.constant 0 : index
    %c0_169 = arith.constant 0 : index
    %419 = vector.load %arg23[%c3_167, %c0_168, %c0_169] : memref<4x2x128xf32, #tpu.memory_space<vmem>>, vector<1x2x128xf32>
    %420 = vector.shape_cast %419 : vector<1x2x128xf32> to vector<2x128xf32>
    %c0_170 = arith.constant 0 : index
    %c0_171 = arith.constant 0 : index
    %421 = vector.load %arg14[%c0_170, %c0_171] : memref<256x512xf32, #tpu.memory_space<vmem>>, vector<128x512xf32>
    %cst_172 = arith.constant dense<0.000000e+00> : vector<2x512xf32>
    %422 = tpu.matmul %420, %421, %cst_172 {dimension_numbers = #tpu.dot_dimension_numbers<[1], [0], [0], [1], [0, 0, 1, 1], [], []>} : vector<2x128xf32>, vector<128x512xf32>, vector<2x512xf32> -> vector<2x512xf32>
    %c3_173 = arith.constant 3 : index
    %c0_174 = arith.constant 0 : index
    %c0_175 = arith.constant 0 : index
    %423 = vector.load %arg24[%c3_173, %c0_174, %c0_175] : memref<4x2x128xf32, #tpu.memory_space<vmem>>, vector<1x2x128xf32>
    %424 = vector.shape_cast %423 : vector<1x2x128xf32> to vector<2x128xf32>
    %c128_176 = arith.constant 128 : index
    %c0_177 = arith.constant 0 : index
    %425 = vector.load %arg14[%c128_176, %c0_177] : memref<256x512xf32, #tpu.memory_space<vmem>>, vector<128x512xf32>
    %cst_178 = arith.constant dense<0.000000e+00> : vector<2x512xf32>
    %426 = tpu.matmul %424, %425, %cst_178 {dimension_numbers = #tpu.dot_dimension_numbers<[1], [0], [0], [1], [0, 0, 1, 1], [], []>} : vector<2x128xf32>, vector<128x512xf32>, vector<2x512xf32> -> vector<2x512xf32>
    %427 = arith.addf %422, %426 : vector<2x512xf32>
    %c0_179 = arith.constant 0 : index
    %c0_180 = arith.constant 0 : index
    %428 = vector.load %arg15[%c0_179, %c0_180] : memref<1x512xf32, #tpu.memory_space<vmem>>, vector<1x512xf32>
    %429 = vector.broadcast %428 : vector<1x512xf32> to vector<2x512xf32>
    %430 = arith.addf %427, %429 : vector<2x512xf32>
    %431 = vector.extract_strided_slice %430 {offsets = [0, 0], sizes = [2, 128], strides = [1, 1]} : vector<2x512xf32> to vector<2x128xf32>
    %432 = arith.negf %431 : vector<2x128xf32>
    %433 = math.exp %432 : vector<2x128xf32>
    %cst_181 = arith.constant 1.000000e+00 : f32
    %434 = vector.broadcast %cst_181 : f32 to vector<2x128xf32>
    %435 = arith.addf %434, %433 : vector<2x128xf32>
    %436 = arith.divf %434, %435 : vector<2x128xf32>
    %437 = vector.extract_strided_slice %430 {offsets = [0, 256], sizes = [2, 128], strides = [1, 1]} : vector<2x512xf32> to vector<2x128xf32>
    %438 = math.tanh %437 : vector<2x128xf32>
    %439 = vector.extract_strided_slice %430 {offsets = [0, 384], sizes = [2, 128], strides = [1, 1]} : vector<2x512xf32> to vector<2x128xf32>
    %440 = arith.negf %439 : vector<2x128xf32>
    %441 = math.exp %440 : vector<2x128xf32>
    %cst_182 = arith.constant 1.000000e+00 : f32
    %442 = vector.broadcast %cst_182 : f32 to vector<2x128xf32>
    %443 = arith.addf %442, %441 : vector<2x128xf32>
    %444 = arith.divf %442, %443 : vector<2x128xf32>
    %445 = arith.mulf %436, %438 : vector<2x128xf32>
    %446 = math.tanh %445 : vector<2x128xf32>
    %447 = arith.mulf %444, %446 : vector<2x128xf32>
    %c0_183 = arith.constant 0 : index
    %c0_184 = arith.constant 0 : index
    %448 = vector.load %arg17[%c0_183, %c0_184] : memref<256x64xf32, #tpu.memory_space<vmem>>, vector<128x64xf32>
    %cst_185 = arith.constant dense<0.000000e+00> : vector<2x64xf32>
    %449 = tpu.matmul %418, %448, %cst_185 {dimension_numbers = #tpu.dot_dimension_numbers<[1], [0], [0], [1], [0, 0, 1, 1], [], []>} : vector<2x128xf32>, vector<128x64xf32>, vector<2x64xf32> -> vector<2x64xf32>
    %c128_186 = arith.constant 128 : index
    %c0_187 = arith.constant 0 : index
    %450 = vector.load %arg17[%c128_186, %c0_187] : memref<256x64xf32, #tpu.memory_space<vmem>>, vector<128x64xf32>
    %cst_188 = arith.constant dense<0.000000e+00> : vector<2x64xf32>
    %451 = tpu.matmul %447, %450, %cst_188 {dimension_numbers = #tpu.dot_dimension_numbers<[1], [0], [0], [1], [0, 0, 1, 1], [], []>} : vector<2x128xf32>, vector<128x64xf32>, vector<2x64xf32> -> vector<2x64xf32>
    %452 = arith.addf %449, %451 : vector<2x64xf32>
    %c0_189 = arith.constant 0 : index
    %c0_190 = arith.constant 0 : index
    %453 = vector.load %arg18[%c0_189, %c0_190] : memref<1x64xf32, #tpu.memory_space<vmem>>, vector<1x64xf32>
    %454 = vector.broadcast %453 : vector<1x64xf32> to vector<2x64xf32>
    %455 = arith.addf %452, %454 : vector<2x64xf32>
    %cst_191 = arith.constant 0.000000e+00 : f32
    %456 = vector.broadcast %cst_191 : f32 to vector<2x64xf32>
    %457 = arith.maximumf %455, %456 : vector<2x64xf32>
    %c0_192 = arith.constant 0 : index
    %c0_193 = arith.constant 0 : index
    %458 = vector.load %arg19[%c0_192, %c0_193] : memref<64x8xf32, #tpu.memory_space<vmem>>, vector<64x8xf32>
    %cst_194 = arith.constant dense<0.000000e+00> : vector<2x8xf32>
    %459 = tpu.matmul %457, %458, %cst_194 {dimension_numbers = #tpu.dot_dimension_numbers<[1], [0], [0], [1], [0, 0, 1, 1], [], []>} : vector<2x64xf32>, vector<64x8xf32>, vector<2x8xf32> -> vector<2x8xf32>
    %c0_195 = arith.constant 0 : index
    %c0_196 = arith.constant 0 : index
    %460 = vector.load %arg20[%c0_195, %c0_196] : memref<1x8xf32, #tpu.memory_space<vmem>>, vector<1x8xf32>
    %461 = vector.broadcast %460 : vector<1x8xf32> to vector<2x8xf32>
    %462 = arith.addf %459, %461 : vector<2x8xf32>
    %c0_197 = arith.constant 0 : index
    %c0_198 = arith.constant 0 : index
    %463 = vector.load %arg21[%c0_197, %c0_198] : memref<2x8xf32, #tpu.memory_space<vmem>>, vector<2x8xf32>
    tpu.vector_store %arg21[%c0_197, %c0_198], %462 {strides = array<i32>} : memref<2x8xf32, #tpu.memory_space<vmem>>, vector<2x8xf32>,
    return
  }
  func.func @transform_0(%arg0: i32) -> (i32, i32) {
    %c0_i32 = arith.constant 0 : i32
    %c0_i32_0 = arith.constant 0 : i32
    %c0_i32_1 = arith.constant 0 : i32
    return %c0_i32, %c0_i32_0 : i32, i32
  }
  func.func @transform_1(%arg0: i32) -> (i32, i32, i32) {
    %c0_i32 = arith.constant 0 : i32
    %c0_i32_0 = arith.constant 0 : i32
    %c0_i32_1 = arith.constant 0 : i32
    %c0_i32_2 = arith.constant 0 : i32
    return %c0_i32, %c0_i32_0, %c0_i32_1 : i32, i32, i32
  }
  func.func @transform_2(%arg0: i32) -> (i32, i32) {
    %c0_i32 = arith.constant 0 : i32
    %c0_i32_0 = arith.constant 0 : i32
    %c0_i32_1 = arith.constant 0 : i32
    return %c0_i32, %c0_i32_0 : i32, i32
  }
  func.func @transform_3(%arg0: i32) -> (i32, i32) {
    %c0_i32 = arith.constant 0 : i32
    %c0_i32_0 = arith.constant 0 : i32
    %c0_i32_1 = arith.constant 0 : i32
    return %c0_i32, %c0_i32_0 : i32, i32
  }
  func.func @transform_4(%arg0: i32) -> (i32, i32) {
    %c0_i32 = arith.constant 0 : i32
    %c0_i32_0 = arith.constant 0 : i32
    %c0_i32_1 = arith.constant 0 : i32
    return %c0_i32, %c0_i32_0 : i32, i32
  }
  func.func @transform_5(%arg0: i32) -> (i32, i32) {
    %c0_i32 = arith.constant 0 : i32
    %c0_i32_0 = arith.constant 0 : i32
    %c0_i32_1 = arith.constant 0 : i32
    return %c0_i32, %c0_i32_0 : i32, i32
  }
  func.func @transform_6(%arg0: i32) -> (i32, i32) {
    %c0_i32 = arith.constant 0 : i32
    %c0_i32_0 = arith.constant 0 : i32
    %c0_i32_1 = arith.constant 0 : i32
    return %c0_i32, %c0_i32_0 : i32, i32
  }
  func.func @transform_7(%arg0: i32) -> (i32, i32) {
    %c0_i32 = arith.constant 0 : i32
    %c0_i32_0 = arith.constant 0 : i32
    %c0_i32_1 = arith.constant 0 : i32
    return %c0_i32, %c0_i32_0 : i32, i32
  }
  func.func @transform_8(%arg0: i32) -> (i32, i32) {
    %c0_i32 = arith.constant 0 : i32
    %c0_i32_0 = arith.constant 0 : i32
    %c0_i32_1 = arith.constant 0 : i32
    return %c0_i32, %c0_i32_0 : i32, i32
  }
  func.func @transform_9(%arg0: i32) -> (i32, i32) {
    %c0_i32 = arith.constant 0 : i32
    %c0_i32_0 = arith.constant 0 : i32
    %c0_i32_1 = arith.constant 0 : i32
    return %c0_i32, %c0_i32_0 : i32, i32
  }
  func.func @transform_10(%arg0: i32) -> (i32, i32) {
    %c0_i32 = arith.constant 0 : i32
    %c0_i32_0 = arith.constant 0 : i32
    %c0_i32_1 = arith.constant 0 : i32
    return %c0_i32, %c0_i32_0 : i32, i32
  }
  func.func @transform_11(%arg0: i32) -> (i32, i32) {
    %c0_i32 = arith.constant 0 : i32
    %c0_i32_0 = arith.constant 0 : i32
    %c0_i32_1 = arith.constant 0 : i32
    return %c0_i32, %c0_i32_0 : i32, i32
  }
  func.func @transform_12(%arg0: i32) -> (i32, i32) {
    %c0_i32 = arith.constant 0 : i32
    %c0_i32_0 = arith.constant 0 : i32
    %c0_i32_1 = arith.constant 0 : i32
    return %c0_i32, %c0_i32_0 : i32, i32
  }
  func.func @transform_13(%arg0: i32) -> (i32, i32) {
    %c0_i32 = arith.constant 0 : i32
    %c0_i32_0 = arith.constant 0 : i32
    %c0_i32_1 = arith.constant 0 : i32
    return %c0_i32, %c0_i32_0 : i32, i32
  }
  func.func @transform_14(%arg0: i32) -> (i32, i32) {
    %c0_i32 = arith.constant 0 : i32
    %c0_i32_0 = arith.constant 0 : i32
    %c0_i32_1 = arith.constant 0 : i32
    return %c0_i32, %c0_i32_0 : i32, i32
  }
  func.func @transform_15(%arg0: i32) -> (i32, i32) {
    %c0_i32 = arith.constant 0 : i32
    %c0_i32_0 = arith.constant 0 : i32
    %c0_i32_1 = arith.constant 0 : i32
    return %c0_i32, %c0_i32_0 : i32, i32
  }
  func.func @transform_16(%arg0: i32) -> (i32, i32) {
    %c0_i32 = arith.constant 0 : i32
    %c0_i32_0 = arith.constant 0 : i32
    %c0_i32_1 = arith.constant 0 : i32
    return %c0_i32, %c0_i32_0 : i32, i32
  }
  func.func @transform_17(%arg0: i32) -> (i32, i32) {
    %c0_i32 = arith.constant 0 : i32
    %c0_i32_0 = arith.constant 0 : i32
    %c0_i32_1 = arith.constant 0 : i32
    return %c0_i32, %c0_i32_0 : i32, i32
  }
  func.func @transform_18(%arg0: i32) -> (i32, i32) {
    %c0_i32 = arith.constant 0 : i32
    %c0_i32_0 = arith.constant 0 : i32
    %c0_i32_1 = arith.constant 0 : i32
    return %c0_i32, %c0_i32_0 : i32, i32
  }
  func.func @transform_19(%arg0: i32) -> (i32, i32) {
    %c0_i32 = arith.constant 0 : i32
    %c0_i32_0 = arith.constant 0 : i32
    %c0_i32_1 = arith.constant 0 : i32
    return %c0_i32, %c0_i32_0 : i32, i32
  }
  func.func @transform_20(%arg0: i32) -> (i32, i32) {
    %c0_i32 = arith.constant 0 : i32
    %c0_i32_0 = arith.constant 0 : i32
    %c0_i32_1 = arith.constant 0 : i32
    return %c0_i32, %c0_i32_0 : i32, i32
  }
}

</mosaic_0001>

<bundles_post_ra>
// kernel: forward.1
= control target key start
LH: loop header
LB: loop body
LE: loop exit
PB: predicated region body
PF: predicated region fallthrough
CT: control target
= control target key end

     0   :  { %s9679_s0 = inlined_call_operand.vmem [shape: f32[20,2], index: 0, kind: input, shape index: {}]   ;;  %s9680_s1 = inlined_call_operand.vmem [shape: f32[5,1,64], index: 1, kind: input, shape index: {}]   ;;  %s9681_s2 = inlined_call_operand.vmem [shape: f32[1,64], index: 2, kind: input, shape index: {}]   ;;  %s9682_s3 = inlined_call_operand.vmem [shape: f32[1,64], index: 3, kind: input, shape index: {}]   ;;  %s9683_s4 = inlined_call_operand.hbm [shape: f32[320,128], index: 4, kind: input, shape index: {}]   ;;  %s9684_s5 = inlined_call_operand.vmem [shape: f32[1,128], index: 5, kind: input, shape index: {}]   ;;  %s9685_s6 = inlined_call_operand.vmem [shape: f32[1,128], index: 6, kind: input, shape index: {}]   ;;  %s9686_s7 = inlined_call_operand.hbm [shape: f32[128,1024], index: 7, kind: input, shape index: {}]   ;;  %s9687_s8 = inlined_call_operand.vmem [shape: f32[1,1024], index: 8, kind: input, shape index: {}]   ;;  %s9688_s9 = inlined_call_operand.vmem [shape: f32[128,512], index: 9, kind: input, shape index: {}]   ;;  %s9689_s10 = inlined_call_operand.hbm [shape: f32[128,512], index: 10, kind: input, shape index: {}]   ;;  %s9690_s11 = inlined_call_operand.hbm [shape: f32[256,512], index: 11, kind: input, shape index: {}]   ;;  %s9691_s12 = inlined_call_operand.vmem [shape: f32[1,512], index: 12, kind: input, shape index: {}]   ;;  %s9692_s13 = inlined_call_operand.hbm [shape: f32[256,512], index: 13, kind: input, shape index: {}]   ;;  %s9693_s14 = inlined_call_operand.vmem [shape: f32[1,512], index: 14, kind: input, shape index: {}]   ;;  %s9694_s15 = inlined_call_operand.hbm [shape: f32[128,512], index: 15, kind: input, shape index: {}]   ;;  %s9695_s16 = inlined_call_operand.vmem [shape: f32[256,64], index: 16, kind: input, shape index: {}]   ;;  %s9696_s17 = inlined_call_operand.vmem [shape: f32[1,64], index: 17, kind: input, shape index: {}]   ;;  %s9697_s18 = inlined_call_operand.vmem [shape: f32[64,8], index: 18, kind: input, shape index: {}]   ;;  %s9698_s19 = inlined_call_operand.vmem [shape: f32[1,8], index: 19, kind: input, shape index: {}]   ;;  %s9699_s20 = inlined_call_operand.hbm [shape: f32[2,8], index: 20, kind: output, shape index: {}]  }
   0x1   :  { %9908 = sst [smem:[#allocation99_spill]] %s9679_s0 }
   0x2   :  { %9909 = sst [smem:[#allocation100_spill]] %s9680_s1 }
   0x3   :  { %9910 = sst [smem:[#allocation101_spill]] %s9681_s2 }
   0x4   :  { %9911 = sst [smem:[#allocation102_spill]] %s9682_s3 }
   0x5   :  { %9912 = sst [smem:[#allocation103_spill]] %s9683_s4 }
   0x6   :  { %25 = vsyncpa [#allocation6], 0 }
   0x7   :  { %26 = vsyncpa [#allocation9], 0 }
   0x8   :  { %27 = vsyncpa [#allocation12], 0 }
   0x9   :  { %28 = vsyncpa [#allocation15], 0 }
   0xa   :  { %29 = vsyncpa [#allocation7], 0  ;;  %s6810_s1 = smov [#allocation8]  }
   0xb   :  { %s59_s22 = sshll.u32 %s6810_s1, 4  ;;  %s60_s22 = int_to_ptr.vmem [resolvable:$true] %s59_s22 }
   0xc   :  { %s6668_s23 = scalar_lea.vmem %s60_s22, 16384  ;;  %p6673_p1 = scmp.lt.s32.totalorder %s60_s22, %s60_s22 }
   0xd   :  { %p6669_p0 = scmp.ne.s32.totalorder %s60_s22, %s6668_s23  ;;  %p6674_p2 = scmp.lt.s32.totalorder %s6668_s23, %s6668_s23 }
   0xf   :  { %p6675_p3 = por %p6674_p2, %p6673_p1 }
  0x11   :  { %p6676_p4 = pnand %p6675_p3, %p6669_p0 }
  0x13   :  { %6679 = shalt.err (!%p6676_p4)
}
  0x14   :  { %s6811_s24 = smov 1024   ;;  %s6812_s2 = smov 64  }
  0x15   :  { %65 = dma.hbm_to_vmem [thread:$0]  %s9686_s7, 16384, %s60_s22, [#allocation9], %s6811_s24, %s6811_s24, %s6812_s2  }
  0x16   :  { %s6813_s26 = smov [#allocation11]   ;;  %s6814_s28 = smov [#allocation5]  }
  0x17   :  { %s87_s27 = sshll.u32 %s6813_s26, 4  ;;  %s43_s4 = sshll.u32 %s6814_s28, 4  ;;  %s88_s27 = int_to_ptr.vmem [resolvable:$true] %s87_s27  ;;  %s44_s4 = int_to_ptr.vmem [resolvable:$true] %s43_s4 }
  0x18   :  { %s6688_s29 = scalar_lea.vmem %s88_s27, 16384  ;;  %p6693_p6 = scmp.lt.s32.totalorder %s88_s27, %s88_s27 }
  0x19   :  { %p6689_p5 = scmp.ne.s32.totalorder %s88_s27, %s6688_s29  ;;  %p6694_p7 = scmp.lt.s32.totalorder %s6688_s29, %s6688_s29 }
  0x1b   :  { %p6695_p8 = por %p6694_p7, %p6693_p6 }
  0x1d   :  { %p6696_p9 = pnand %p6695_p8, %p6689_p5 }
  0x1f   :  { %6699 = shalt.err (!%p6696_p9)
}
  0x20   :  { %s6815_s30 = smov 512   ;;  %s6816_s0 = smov 32  }
  0x21   :  { %93 = dma.hbm_to_vmem [thread:$0]  %s9690_s11, 16384, %s88_s27, [#allocation12], %s6815_s30, %s6815_s30, %s6816_s0  }
  0x22   :  { %s6708_s7 = scalar_lea.vmem %s44_s4, 5120  ;;  %p6713_p11 = scmp.lt.s32.totalorder %s44_s4, %s44_s4 }
  0x23   :  { %p6709_p10 = scmp.ne.s32.totalorder %s44_s4, %s6708_s7  ;;  %p6714_p12 = scmp.lt.s32.totalorder %s6708_s7, %s6708_s7 }
  0x25   :  { %p6715_p13 = por %p6714_p12, %p6713_p11 }
  0x27   :  { %p6716_p0 = pnand %p6715_p13, %p6709_p10 }
  0x29   :  { %6719 = shalt.err (!%p6716_p0)
}
  0x2a   :  { %s6817_s22 = smov 128   ;;  %s6818_s23 = smov 8  }
  0x2b   :  { %s9913_s3 = sld [smem:[#allocation103_spill]]  ;;  %s6819_s26 = smov [#allocation10]  }
  0x2c   :  { %s75_s28 = sshll.u32 %s6819_s26, 4  ;;  %s6820_s29 = smov [#allocation13]   ;;  %s76_s28 = int_to_ptr.vmem [resolvable:$true] %s75_s28 }
  0x2d   :  { %s101_s21 = sshll.u32 %s6820_s29, 4  ;;  %s6728_s11 = scalar_lea.vmem %s76_s28, 8192  ;;  %s102_s21 = int_to_ptr.vmem [resolvable:$true] %s101_s21 }
  0x2e   :  { %p6729_p1 = scmp.ne.s32.totalorder %s76_s28, %s6728_s11  ;;  %p6733_p2 = scmp.lt.s32.totalorder %s76_s28, %s76_s28 }
  0x2f   :  { %p6734_p3 = scmp.lt.s32.totalorder %s6728_s11, %s6728_s11 }
  0x31   :  { %49 = dma.hbm_to_vmem [thread:$0]  %s9913_s3, 5120, %s44_s4, [#allocation6], %s6817_s22, %s6817_s22, %s6818_s23  }
  0x32   :  { %p6735_p4 = por %p6734_p3, %p6733_p2 }
  0x34   :  { %p6736_p5 = pnand %p6735_p4, %p6729_p1 }
  0x36   :  { %6739 = shalt.err (!%p6736_p5)
}
  0x37   :  { %81 = dma.hbm_to_vmem [thread:$0]  %s9689_s10, 8192, %s76_s28, [#allocation9], %s6815_s30, %s6815_s30, %s6816_s0  }
  0x38   :  { %s6748_s4 = scalar_lea.vmem %s102_s21, 16384  ;;  %p6753_p7 = scmp.lt.s32.totalorder %s102_s21, %s102_s21 }
  0x39   :  { %p6749_p6 = scmp.ne.s32.totalorder %s102_s21, %s6748_s4  ;;  %p6754_p8 = scmp.lt.s32.totalorder %s6748_s4, %s6748_s4 }
  0x3b   :  { %p6755_p9 = por %p6754_p8, %p6753_p7 }
  0x3d   :  { %p6756_p10 = pnand %p6755_p9, %p6749_p6 }
  0x3f   :  { %6759 = shalt.err (!%p6756_p10)
}
  0x40   :  { %107 = dma.hbm_to_vmem [thread:$0]  %s9692_s13, 16384, %s102_s21, [#allocation12], %s6815_s30, %s6815_s30, %s6816_s0  }
  0x41   :  { %s6821_s23 = smov [#allocation14]  }
  0x42   :  { %s115_s24 = sshll.u32 %s6821_s23, 4  ;;  %s116_s24 = int_to_ptr.vmem [resolvable:$true] %s115_s24 }
  0x43   :  { %s6768_s25 = scalar_lea.vmem %s116_s24, 8192  ;;  %p6773_p12 = scmp.lt.s32.totalorder %s116_s24, %s116_s24 }
  0x44   :  { %p6769_p11 = scmp.ne.s32.totalorder %s116_s24, %s6768_s25  ;;  %p6774_p13 = scmp.lt.s32.totalorder %s6768_s25, %s6768_s25 }
  0x46   :  { %p6775_p0 = por %p6774_p13, %p6773_p12 }
  0x48   :  { %p6776_p1 = pnand %p6775_p0, %p6769_p11 }
  0x4a   :  { %6779 = shalt.err (!%p6776_p1)
}
  0x4b   :  { %121 = dma.hbm_to_vmem [thread:$0]  %s9694_s15, 8192, %s116_s24, [#allocation15], %s6815_s30, %s6815_s30, %s6816_s0  }
  0x4c   :  { %6800 = dma.done.wait [#allocation6], 5120  }
  0x4d   :  { %6801 = vsyncadd [#allocation6], 4294962176 }
  0x4e   :  { %6802 = dma.done.wait [#allocation9], 24576  }
  0x4f   :  { %6803 = vsyncadd [#allocation9], 4294942720 }
  0x50   :  { %6804 = dma.done.wait [#allocation12], 32768  }
  0x51   :  { %6805 = vsyncadd [#allocation12], 4294934528 }
  0x52   :  { %6806 = dma.done.wait [#allocation15], 8192  }
  0x53   :  { %6807 = vsyncadd [#allocation15], 4294959104  ;;  %v150_v0 = vlaneseq  ;;  %s9918_s30 = sld [smem:[#allocation99_spill]]  ;;  %vm1023_vm0 = vcmask 523264   ;;  %vm2578_vm1 = vcmask 1041408   ;;  %vm6824_vm2 = vmmov 0  }
  0x54   :  { %s9923_s28 = sld [smem:[#allocation100_spill]]  ;;  %s6825_s13 = smov [#allocation16]   ;;  %vm6233_vm3 = vcmask 58368  }
  0x55   :  { %v6962_v1 = vshrl.u32 %v150_v0, 7  ;;  %s9924_s24 = sld [smem:[#allocation101_spill]] }
  0x56   :  { %s9925_s3 = sld [smem:[#allocation102_spill]] }
  0x57   :  { %v6965_v2 = vsub.s32 2, %v6962_v1  ;;  %v6968_v3 = vsub.s32 0, %v6962_v1  ;;  %v6971_v4 = vsub.s32 3, %v6962_v1  ;;  %v6974_v5 = vsub.s32 1, %v6962_v1 }
  0x58   :  { %v6984_v11 = vsub.s32 5, %v6962_v1  ;;  %v6987_v12 = vsub.s32 4, %v6962_v1  ;;  %v6992_v15 = vsub.s32 7, %v6962_v1  ;;  %v6995_v16 = vsub.s32 6, %v6962_v1 }
  0x59   :  { %9914 = vst [vmem:[#allocation22_spill] sm:$0xff] %v6965_v2  ;;  %9915 = vst [vmem:[#allocation23_spill] sm:$0xff] %v6968_v3  ;;  %v148_v6 = vld [vmem:[%s9918_s30] sm:$0xff]  ;;  %v149_v19 = vld [vmem:[%s9918_s30 + $0x8] sm:$0xff] }
  0x5a   :  { %9916 = vst [vmem:[#allocation24_spill] sm:$0xff] %v6971_v4  ;;  %9917 = vst [vmem:[#allocation25_spill] sm:$0xff] %v6974_v5  ;;  %v167_v7 = vrot.slane %v148_v6, %v6965_v2  ;;  %v153_v8 = vrot.slane %v148_v6, %v6968_v3  ;;  %v174_v9 = vrot.slane %v148_v6, %v6971_v4  ;;  %v301_v22 = vld [vmem:[%s9918_s30 + $0x1] sm:$0xff]  ;;  %v302_v31 = vld [vmem:[%s9918_s30 + $0x9] sm:$0xff] }
  0x5b   :  { %v160_v10 = vrot.slane %v148_v6, %v6974_v5  ;;  %9919 = vst [vmem:[#allocation26_spill] sm:$0xff] %v6984_v11  ;;  %9920 = vst [vmem:[#allocation27_spill] sm:$0xff] %v6987_v12  ;;  %v188_v13 = vrot.slane %v148_v6, %v6984_v11  ;;  %v181_v14 = vrot.slane %v148_v6, %v6987_v12  ;;  %v455_v34 = vld [vmem:[%s9918_s30 + $0x2] sm:$0xff]  ;;  %v7034_v43 = vld [vmem:[%s9918_s30 + $0xa] sm:$0xff] }
  0x5c   :  { %169 = vbcast.lane.b32.xlu1 %v167_v7, 256  ;;  %155 = vbcast.lane.b32.xlu0 %v153_v8, 256  ;;  %9921 = vst [vmem:[#allocation28_spill] sm:$0xff] %v6992_v15  ;;  %9922 = vst [vmem:[#allocation29_spill] sm:$0xff] %v6995_v16  ;;  %v202_v17 = vrot.slane %v148_v6, %v6992_v15  ;;  %v195_v18 = vrot.slane %v148_v6, %v6995_v16  ;;  %v609_v58 = vld [vmem:[%s9918_s30 + $0x3] sm:$0xff]  ;;  %v7066_v8 = vld [vmem:[%s9918_s30 + $0xb] sm:$0xff] }
  0x5d   :  { %v216_v20 = vrot.slane %v149_v19, %v6974_v5  ;;  %v209_v21 = vrot.slane %v149_v19, %v6968_v3  ;;  %v313_v23 = vrot.slane %v301_v22, %v6974_v5  ;;  %v306_v24 = vrot.slane %v301_v22, %v6968_v3 }
  0x5e   :  { %v327_v25 = vrot.slane %v301_v22, %v6971_v4  ;;  %v320_v26 = vrot.slane %v301_v22, %v6965_v2  ;;  %v341_v27 = vrot.slane %v301_v22, %v6984_v11  ;;  %v334_v28 = vrot.slane %v301_v22, %v6987_v12 }
  0x5f   :  { %v355_v29 = vrot.slane %v301_v22, %v6992_v15  ;;  %v348_v30 = vrot.slane %v301_v22, %v6995_v16  ;;  %v369_v32 = vrot.slane %v302_v31, %v6974_v5  ;;  %v362_v33 = vrot.slane %v302_v31, %v6968_v3 }
  0x60   :  { %176 = vbcast.lane.b32.xlu1 %v174_v9, 256  ;;  %162 = vbcast.lane.b32.xlu0 %v160_v10, 256  ;;  %v467_v35 = vrot.slane %v455_v34, %v6974_v5  ;;  %v460_v36 = vrot.slane %v455_v34, %v6968_v3  ;;  %v481_v37 = vrot.slane %v455_v34, %v6971_v4 }
  0x61   :  { %v474_v38 = vrot.slane %v455_v34, %v6965_v2  ;;  %v495_v39 = vrot.slane %v455_v34, %v6984_v11  ;;  %v488_v40 = vrot.slane %v455_v34, %v6987_v12  ;;  %v509_v41 = vrot.slane %v455_v34, %v6992_v15 }
  0x62   :  { %v502_v42 = vrot.slane %v455_v34, %v6995_v16  ;;  %v523_v44 = vrot.slane %v7034_v43, %v6974_v5  ;;  %v516_v45 = vrot.slane %v7034_v43, %v6968_v3  ;;  %v230_v46 = vrot.slane %v149_v19, %v6971_v4 }
  0x63   :  { %v223_v47 = vrot.slane %v149_v19, %v6965_v2  ;;  %v244_v48 = vrot.slane %v149_v19, %v6984_v11  ;;  %v237_v49 = vrot.slane %v149_v19, %v6987_v12  ;;  %v258_v50 = vrot.slane %v149_v19, %v6992_v15 }
  0x64   :  { %190 = vbcast.lane.b32.xlu1 %v188_v13, 256  ;;  %183 = vbcast.lane.b32.xlu0 %v181_v14, 256  ;;  %v251_v51 = vrot.slane %v149_v19, %v6995_v16  ;;  %v383_v52 = vrot.slane %v302_v31, %v6971_v4  ;;  %v376_v53 = vrot.slane %v302_v31, %v6965_v2 }
  0x65   :  { %v397_v54 = vrot.slane %v302_v31, %v6984_v11  ;;  %v390_v55 = vrot.slane %v302_v31, %v6987_v12  ;;  %v411_v56 = vrot.slane %v302_v31, %v6992_v15  ;;  %v404_v57 = vrot.slane %v302_v31, %v6995_v16 }
  0x66   :  { %v621_v59 = vrot.slane %v609_v58, %v6974_v5  ;;  %v614_v60 = vrot.slane %v609_v58, %v6968_v3  ;;  %v635_v61 = vrot.slane %v609_v58, %v6971_v4  ;;  %v628_v62 = vrot.slane %v609_v58, %v6965_v2 }
  0x67   :  { %v649_v63 = vrot.slane %v609_v58, %v6984_v11  ;;  %v642_v0 = vrot.slane %v609_v58, %v6987_v12  ;;  %v663_v6 = vrot.slane %v609_v58, %v6992_v15  ;;  %v656_v7 = vrot.slane %v609_v58, %v6995_v16 }
  0x68   :  { %204 = vbcast.lane.b32.xlu1 %v202_v17, 256  ;;  %197 = vbcast.lane.b32.xlu0 %v195_v18, 256  ;;  %v677_v9 = vrot.slane %v7066_v8, %v6974_v5  ;;  %v670_v10 = vrot.slane %v7066_v8, %v6968_v3  ;;  %v537_v13 = vrot.slane %v7034_v43, %v6971_v4 }
  0x69   :  { %v530_v14 = vrot.slane %v7034_v43, %v6965_v2  ;;  %v551_v17 = vrot.slane %v7034_v43, %v6984_v11  ;;  %v544_v18 = vrot.slane %v7034_v43, %v6987_v12  ;;  %v565_v19 = vrot.slane %v7034_v43, %v6992_v15 }
  0x6c   :  { %218 = vbcast.lane.b32.xlu1 %v216_v20, 256  ;;  %211 = vbcast.lane.b32.xlu0 %v209_v21, 256  ;;  %v558_v20 = vrot.slane %v7034_v43, %v6995_v16  ;;  %v763_v21 = vld [vmem:[%s9918_s30 + $0x4] sm:$0xff]  ;;  %v7107_v43 = vld [vmem:[%s9923_s28] ss:$0 sm:$0xff] }
  0x6d   :  { %v775_v22 = vrot.slane %v763_v21, %v6974_v5  ;;  %v796_v31 = vrot.slane %v763_v21, %v6987_v12  ;;  %v817_v34 = vrot.slane %v763_v21, %v6992_v15 }
  0x70   :  { %315 = vbcast.lane.b32.xlu1 %v313_v23, 256  ;;  %308 = vbcast.lane.b32.xlu0 %v306_v24, 256  ;;  %v768_v23 = vrot.slane %v763_v21, %v6968_v3 }
  0x74   :  { %329 = vbcast.lane.b32.xlu1 %v327_v25, 256  ;;  %322 = vbcast.lane.b32.xlu0 %v320_v26, 256  ;;  %v789_v26 = vrot.slane %v763_v21, %v6971_v4 }
  0x78   :  { %343 = vbcast.lane.b32.xlu1 %v341_v27, 256  ;;  %336 = vbcast.lane.b32.xlu0 %v334_v28, 256  ;;  %v782_v27 = vrot.slane %v763_v21, %v6965_v2 }
  0x7c   :  { %357 = vbcast.lane.b32.xlu1 %v355_v29, 256  ;;  %350 = vbcast.lane.b32.xlu0 %v348_v30, 256  ;;  %v803_v30 = vrot.slane %v763_v21, %v6984_v11 }
  0x80   :  { %371 = vbcast.lane.b32.xlu1 %v369_v32, 256  ;;  %364 = vbcast.lane.b32.xlu0 %v362_v33, 256 }
  0x84   :  { %469 = vbcast.lane.b32.xlu1 %v467_v35, 256  ;;  %462 = vbcast.lane.b32.xlu0 %v460_v36, 256  ;;  %v810_v35 = vrot.slane %v763_v21, %v6995_v16  ;;  %v7098_v36 = vld [vmem:[%s9918_s30 + $0xc] sm:$0xff] }
  0x88   :  { %483 = vbcast.lane.b32.xlu1 %v481_v37, 256  ;;  %476 = vbcast.lane.b32.xlu0 %v474_v38, 256 }
  0x8c   :  { %497 = vbcast.lane.b32.xlu1 %v495_v39, 256  ;;  %490 = vbcast.lane.b32.xlu0 %v488_v40, 256  ;;  %v831_v39 = vrot.slane %v7098_v36, %v6974_v5  ;;  %v824_v40 = vrot.slane %v7098_v36, %v6968_v3  ;;  %v7834_v5 = vld [vmem:[%s9688_s9 + $0x18] sm:$0xff]  ;;  %v7848_v3 = vld [vmem:[%s9688_s9 + $0x10] sm:$0xff] }
  0x8d   :  { %9936 = vst [vmem:[#allocation40_spill] sm:$0xff] %v7834_v5  ;;  %9938 = vst [vmem:[#allocation42_spill] sm:$0xff] %v7848_v3 }
  0x90   :  { %511 = vbcast.lane.b32.xlu1 %v509_v41, 256  ;;  %504 = vbcast.lane.b32.xlu0 %v502_v42, 256 }
  0x94   :  { %525 = vbcast.lane.b32.xlu1 %v523_v44, 256  ;;  %518 = vbcast.lane.b32.xlu0 %v516_v45, 256  ;;  %v7112_v44 = vld [vmem:[%s9923_s28 + $0x1] ss:$0 sm:$0xff]  ;;  %v691_v45 = vrot.slane %v7066_v8, %v6971_v4 }
  0x98   :  { %232 = vbcast.lane.b32.xlu1 %v230_v46, 256  ;;  %225 = vbcast.lane.b32.xlu0 %v223_v47, 256  ;;  %v684_v46 = vrot.slane %v7066_v8, %v6965_v2 }
  0x9c   :  { %246 = vbcast.lane.b32.xlu1 %v244_v48, 256  ;;  %239 = vbcast.lane.b32.xlu0 %v237_v49, 256 }
  0xa0   :  { %260 = vbcast.lane.b32.xlu1 %v258_v50, 256  ;;  %253 = vbcast.lane.b32.xlu0 %v251_v51, 256 }
  0xa4   :  { %385 = vbcast.lane.b32.xlu1 %v383_v52, 256  ;;  %378 = vbcast.lane.b32.xlu0 %v376_v53, 256  ;;  %v705_v53 = vrot.slane %v7066_v8, %v6984_v11 }
  0xa8   :  { %399 = vbcast.lane.b32.xlu1 %v397_v54, 256  ;;  %392 = vbcast.lane.b32.xlu0 %v390_v55, 256  ;;  %v698_v54 = vrot.slane %v7066_v8, %v6987_v12 }
  0xac   :  { %413 = vbcast.lane.b32.xlu1 %v411_v56, 256  ;;  %406 = vbcast.lane.b32.xlu0 %v404_v57, 256 }
  0xb0   :  { %623 = vbcast.lane.b32.xlu1 %v621_v59, 256  ;;  %616 = vbcast.lane.b32.xlu0 %v614_v60, 256 }
  0xb4   :  { %637 = vbcast.lane.b32.xlu1 %v635_v61, 256  ;;  %630 = vbcast.lane.b32.xlu0 %v628_v62, 256 }
  0xb8   :  { %651 = vbcast.lane.b32.xlu1 %v649_v63, 256  ;;  %644 = vbcast.lane.b32.xlu0 %v642_v0, 256  ;;  %v719_v63 = vrot.slane %v7066_v8, %v6992_v15  ;;  %v712_v0 = vrot.slane %v7066_v8, %v6995_v16  ;;  %v838_v8 = vrot.slane %v7098_v36, %v6965_v2  ;;  %v7841_v2 = vld [vmem:[%s9688_s9] sm:$0xff] }
  0xb9   :  { %9937 = vst [vmem:[#allocation41_spill] sm:$0xff] %v7841_v2 }
  0xbc   :  { %665 = vbcast.lane.b32.xlu1 %v663_v6, 256  ;;  %658 = vbcast.lane.b32.xlu0 %v656_v7, 256 }
  0xc0   :  { %679 = vbcast.lane.b32.xlu1 %v677_v9, 256  ;;  %672 = vbcast.lane.b32.xlu0 %v670_v10, 256 }
  0xc4   :  { %539 = vbcast.lane.b32.xlu1 %v537_v13, 256  ;;  %532 = vbcast.lane.b32.xlu0 %v530_v14, 256 }
  0xc8   :  { %553 = vbcast.lane.b32.xlu1 %v551_v17, 256  ;;  %546 = vbcast.lane.b32.xlu0 %v544_v18, 256 }
  0xcc   :  { %567 = vbcast.lane.b32.xlu1 %v565_v19, 256  ;;  %560 = vbcast.lane.b32.xlu0 %v558_v20, 256  ;;  %v845_v19 = vrot.slane %v7098_v36, %v6971_v4  ;;  %v7829_v4 = vld [vmem:[%s9688_s9 + $0x8] sm:$0xff] }
  0xcd   :  { %9935 = vst [vmem:[#allocation39_spill] sm:$0xff] %v7829_v4 }
  0xce   :  { %v170_v24 = vpop.permute.xlu1 %169  ;;  %v156_v25 = vpop.permute.xlu0 %155 }
  0xcf   :  { %v269_v49 = vmul.f32 %v7107_v43, %v156_v25  ;;  %v271_v59 = vmul.f32 %v7107_v43, %v170_v24 }
  0xd0   :  { %777 = vbcast.lane.b32.xlu1 %v775_v22, 256  ;;  %770 = vbcast.lane.b32.xlu0 %v768_v23, 256 }
  0xd2   :  { %v177_v28 = vpop.permute.xlu1 %176  ;;  %v163_v29 = vpop.permute.xlu0 %162 }
  0xd3   :  { %v270_v50 = vmul.f32 %v7107_v43, %v163_v29  ;;  %v272_v60 = vmul.f32 %v7107_v43, %v177_v28  ;;  %v1204_v28 = vld [vmem:[#allocation5 + $0x138] sm:$0xff]  ;;  %v859_v29 = vrot.slane %v7098_v36, %v6984_v11 }
  0xd4   :  { %791 = vbcast.lane.b32.xlu1 %v789_v26, 256  ;;  %784 = vbcast.lane.b32.xlu0 %v782_v27, 256  ;;  %v7805_v11 = vld [vmem:[%s9688_s9 + $0x28] sm:$0xff] }
  0xd5   :  { %6396 = vmatprep.subr.mxu1 %v1204_v28  ;;  %9931 = vst [vmem:[#allocation35_spill] sm:$0xff] %v7805_v11 }
  0xd6   :  { %v191_v32 = vpop.permute.xlu1 %190  ;;  %v184_v33 = vpop.permute.xlu0 %183  ;;  %6397 = vmatpush3.msra.mxu1 %v1204_v28 }
  0xd7   :  { %v274_v13 = vmul.f32 %v7107_v43, %v191_v32  ;;  %v273_v14 = vmul.f32 %v7107_v43, %v184_v33  ;;  %v1203_v33 = vld [vmem:[#allocation5 + $0x130] sm:$0xff] }
  0xd8   :  { %805 = vbcast.lane.b32.xlu1 %v803_v30, 256  ;;  %798 = vbcast.lane.b32.xlu0 %v796_v31, 256  ;;  %v852_v30 = vrot.slane %v7098_v36, %v6987_v12  ;;  %v7817_v12 = vld [vmem:[%s9688_s9 + $0x20] sm:$0xff] }
  0xd9   :  { %6398 = vmatprep.subr.mxu1 %v1203_v33  ;;  %9933 = vst [vmem:[#allocation37_spill] sm:$0xff] %v7817_v12 }
  0xda   :  { %v205_v37 = vpop.permute.xlu1 %204  ;;  %v198_v38 = vpop.permute.xlu0 %197  ;;  %6399 = vmatpush3.msra.mxu1 %v1203_v33 }
  0xdb   :  { %v276_v24 = vmul.f32 %v7107_v43, %v205_v37  ;;  %v275_v25 = vmul.f32 %v7107_v43, %v198_v38 }
  0xdc   :  { %819 = vbcast.lane.b32.xlu1 %v817_v34, 256  ;;  %812 = vbcast.lane.b32.xlu0 %v810_v35, 256 }
  0xde   :  { %v219_v41 = vpop.permute.xlu1 %218  ;;  %v212_v42 = vpop.permute.xlu0 %211 }
  0xdf   :  { %v278_v37 = vmul.f32 %v7107_v43, %v219_v41  ;;  %v277_v38 = vmul.f32 %v7107_v43, %v212_v42  ;;  %v866_v41 = vrot.slane %v7098_v36, %v6995_v16  ;;  %v7810_v16 = vld [vmem:[%s9688_s9 + $0x38] sm:$0xff] }
  0xe0   :  { %833 = vbcast.lane.b32.xlu1 %v831_v39, 256  ;;  %826 = vbcast.lane.b32.xlu0 %v824_v40, 256  ;;  %9932 = vst [vmem:[#allocation36_spill] sm:$0xff] %v7810_v16 }
  0xe2   :  { %v316_v47 = vpop.permute.xlu1 %315  ;;  %v309_v48 = vpop.permute.xlu0 %308 }
  0xe3   :  { %v424_v51 = vmul.f32 %v7112_v44, %v316_v47  ;;  %v423_v52 = vmul.f32 %v7112_v44, %v309_v48  ;;  %v873_v47 = vrot.slane %v7098_v36, %v6992_v15  ;;  %v7798_v15 = vld [vmem:[%s9688_s9 + $0x50] sm:$0xff] }
  0xe4   :  { %693 = vbcast.lane.b32.xlu1 %v691_v45, 256  ;;  %686 = vbcast.lane.b32.xlu0 %v684_v46, 256  ;;  %v1202_v45 = vld [vmem:[#allocation5 + $0x128] sm:$0xff]  ;;  %v7173_v46 = vld [vmem:[%s9923_s28 + $0x2] ss:$0 sm:$0xff]  ;;  %9930 = vst [vmem:[#allocation34_spill] sm:$0xff] %v7798_v15 }
  0xe5   :  { %v7126_v55 = vadd.f32 %v424_v51, %v270_v50  ;;  %v7128_v56 = vadd.f32 %v423_v52, %v269_v49  ;;  %6400 = vmatprep.subr.mxu1 %v1202_v45  ;;  %v1201_v51 = vld [vmem:[#allocation5 + $0x120] sm:$0xff] }
  0xe6   :  { %v330_v57 = vpop.permute.xlu1 %329  ;;  %v323_v58 = vpop.permute.xlu0 %322  ;;  %6401 = vmatpush3.msra.mxu1 %v1202_v45 }
  0xe7   :  { %v426_v61 = vmul.f32 %v7112_v44, %v330_v57  ;;  %v425_v62 = vmul.f32 %v7112_v44, %v323_v58  ;;  %6402 = vmatprep.subr.mxu1 %v1201_v51 }
  0xe8   :  { %707 = vbcast.lane.b32.xlu1 %v705_v53, 256  ;;  %700 = vbcast.lane.b32.xlu0 %v698_v54, 256  ;;  %v1200_v54 = vld [vmem:[#allocation5 + $0x118] sm:$0xff] }
  0xe9   :  { %v7138_v6 = vadd.f32 %v426_v61, %v272_v60  ;;  %v7140_v7 = vadd.f32 %v425_v62, %v271_v59  ;;  %6403 = vmatpush3.msra.mxu1 %v1201_v51  ;;  %v1199_v60 = vld [vmem:[#allocation5 + $0x110] sm:$0xff] }
  0xea   :  { %v344_v9 = vpop.permute.xlu1 %343  ;;  %v337_v10 = vpop.permute.xlu0 %336  ;;  %6404 = vmatprep.subr.mxu1 %v1200_v54 }
  0xeb   :  { %v428_v17 = vmul.f32 %v7112_v44, %v344_v9  ;;  %v427_v18 = vmul.f32 %v7112_v44, %v337_v10  ;;  %6405 = vmatpush3.msra.mxu1 %v1200_v54 }
  0xec   :  { %721 = vbcast.lane.b32.xlu1 %v719_v63, 256  ;;  %714 = vbcast.lane.b32.xlu0 %v712_v0, 256  ;;  %v9702_v63 = vmov 0.0  }
  0xed   :  { %v7150_v20 = vadd.f32 %v428_v17, %v274_v13  ;;  %v7152_v21 = vadd.f32 %v427_v18, %v273_v14  ;;  %6406 = vmatprep.subr.mxu1 %v1199_v60  ;;  %v1197_v13 = vld [vmem:[#allocation5 + $0x100] sm:$0xff]  ;;  %v1196_v18 = vld [vmem:[#allocation5 + $0xf8] sm:$0xff] }
  0xee   :  { %v358_v22 = vpop.permute.xlu1 %357  ;;  %v351_v23 = vpop.permute.xlu0 %350  ;;  %6407 = vmatpush3.msra.mxu1 %v1199_v60  ;;  %6305 = vmatprep.subr.mxu0 %v1196_v18 }
  0xef   :  { %v430_v26 = vmul.f32 %v7112_v44, %v358_v22  ;;  %v429_v27 = vmul.f32 %v7112_v44, %v351_v23 }
  0xf0   :  { %847 = vbcast.lane.b32.xlu1 %v845_v19, 256  ;;  %840 = vbcast.lane.b32.xlu0 %v838_v8, 256  ;;  %v1180_v19 = vld [vmem:[#allocation5 + $0x78] sm:$0xff]  ;;  %v1195_v8 = vld [vmem:[#allocation5 + $0xf0] sm:$0xff] }
  0xf1   :  { %v7162_v31 = vadd.f32 %v430_v26, %v276_v24  ;;  %v7164_v32 = vadd.f32 %v429_v27, %v275_v25  ;;  %6306 = vmatpush3.msra.mxu0 %v1180_v19 }
  0xf2   :  { %v372_v34 = vpop.permute.xlu1 %371  ;;  %v365_v35 = vpop.permute.xlu0 %364  ;;  %6307 = vmatprep.subr.mxu0 %v1195_v8 }
  0xf3   :  { %v432_v39 = vmul.f32 %v7112_v44, %v372_v34  ;;  %v431_v40 = vmul.f32 %v7112_v44, %v365_v35 }
  0xf4   :  { %861 = vbcast.lane.b32.xlu1 %v859_v29, 256  ;;  %854 = vbcast.lane.b32.xlu0 %v852_v30, 256 }
  0xf5   :  { %v448_v42 = vadd.f32 %v432_v39, %v278_v37  ;;  %v447_v48 = vadd.f32 %v431_v40, %v277_v38 }
  0xf6   :  { %v470_v49 = vpop.permute.xlu1 %469  ;;  %v463_v50 = vpop.permute.xlu0 %462 }
  0xf7   :  { %v578_v52 = vmul.f32 %v7173_v46, %v470_v49  ;;  %v577_v53 = vmul.f32 %v7173_v46, %v463_v50 }
  0xf8   :  { %875 = vbcast.lane.b32.xlu1 %v873_v47, 256  ;;  %868 = vbcast.lane.b32.xlu0 %v866_v41, 256 }
  0xf9   :  { %v7182_v57 = vadd.f32 %v578_v52, %v7126_v55  ;;  %v7185_v36 = vadd.f32 %v577_v53, %v7128_v56  ;;  %v1198_v55 = vld [vmem:[#allocation5 + $0x108] sm:$0xff] }
  0xfa   :  { %v484_v58 = vpop.permute.xlu1 %483  ;;  %v477_v59 = vpop.permute.xlu0 %476  ;;  %6408 = vmatprep.subr.mxu1 %v1198_v55 }
  0xfb   :  { %v580_v61 = vmul.f32 %v7173_v46, %v484_v58  ;;  %v579_v62 = vmul.f32 %v7173_v46, %v477_v59  ;;  %6409 = vmatpush3.msra.mxu1 %v1198_v55 }
  0xfc   :  { %995 = vrot.lane.b32.xlu0 %v9702_v63, %s6812_s2  ;;  %6410 = vmatprep.subr.mxu1 %v1197_v13 }
  0xfd   :  { %v7192_v0 = vadd.f32 %v580_v61, %v7138_v6  ;;  %v7195_v56 = vadd.f32 %v579_v62, %v7140_v7  ;;  %v1179_v6 = vld [vmem:[#allocation5 + $0x70] sm:$0xff]  ;;  %6411 = vmatpush3.msra.mxu1 %v1197_v13 }
  0xfe   :  { %v498_v9 = vpop.permute.xlu1 %497  ;;  %v491_v10 = vpop.permute.xlu0 %490  ;;  %6308 = vmatpush3.msra.mxu0 %v1179_v6 }
  0xff   :  { %v582_v14 = vmul.f32 %v7173_v46, %v498_v9  ;;  %v581_v17 = vmul.f32 %v7173_v46, %v491_v10 }
 0x101   :  { %v7200_v22 = vadd.f32 %v582_v14, %v7150_v20  ;;  %v7203_v7 = vadd.f32 %v581_v17, %v7152_v21 }
 0x102   :  { %v512_v23 = vpop.permute.xlu1 %511  ;;  %v505_v24 = vpop.permute.xlu0 %504 }
 0x103   :  { %v584_v25 = vmul.f32 %v7173_v46, %v512_v23  ;;  %v583_v26 = vmul.f32 %v7173_v46, %v505_v24 }
 0x105   :  { %v7208_v27 = vadd.f32 %v584_v25, %v7162_v31  ;;  %v7211_v20 = vadd.f32 %v583_v26, %v7164_v32 }
 0x106   :  { %v526_v28 = vpop.permute.xlu1 %525  ;;  %v519_v21 = vpop.permute.xlu0 %518 }
 0x107   :  { %v586_v29 = vmul.f32 %v7173_v46, %v526_v28  ;;  %v585_v30 = vmul.f32 %v7173_v46, %v519_v21 }
 0x109   :  { %v7215_v33 = vadd.f32 %v586_v29, %v448_v42  ;;  %v7217_v34 = vadd.f32 %v585_v30, %v447_v48 }
 0x10a   :  { %v233_v35 = vpop.permute.xlu1 %232  ;;  %v226_v37 = vpop.permute.xlu0 %225 }
 0x10b   :  { %v280_v32 = vmul.f32 %v7107_v43, %v233_v35  ;;  %v279_v41 = vmul.f32 %v7107_v43, %v226_v37  ;;  %v7258_v37 = vld [vmem:[%s9923_s28 + $0x3] ss:$0 sm:$0xff] }
 0x10e   :  { %v247_v38 = vpop.permute.xlu1 %246  ;;  %v240_v39 = vpop.permute.xlu0 %239 }
 0x10f   :  { %v282_v53 = vmul.f32 %v7107_v43, %v247_v38  ;;  %v281_v54 = vmul.f32 %v7107_v43, %v240_v39 }
 0x112   :  { %v261_v40 = vpop.permute.xlu1 %260  ;;  %v254_v31 = vpop.permute.xlu0 %253 }
 0x113   :  { %v284_v9 = vmul.f32 %v7107_v43, %v261_v40  ;;  %v283_v10 = vmul.f32 %v7107_v43, %v254_v31 }
 0x116   :  { %v386_v45 = vpop.permute.xlu1 %385  ;;  %v379_v47 = vpop.permute.xlu0 %378 }
 0x117   :  { %v434_v49 = vmul.f32 %v7112_v44, %v386_v45  ;;  %v433_v50 = vmul.f32 %v7112_v44, %v379_v47  ;;  %v7269_v45 = vld [vmem:[%s9923_s28 + $0x4] ss:$0 sm:$0xff] }
 0x119   :  { %v7223_v42 = vadd.f32 %v434_v49, %v280_v32  ;;  %v7225_v48 = vadd.f32 %v433_v50, %v279_v41  ;;  %v1194_v50 = vld [vmem:[#allocation5 + $0xe8] sm:$0xff] }
 0x11a   :  { %v400_v51 = vpop.permute.xlu1 %399  ;;  %v393_v52 = vpop.permute.xlu0 %392  ;;  %6309 = vmatprep.subr.mxu0 %v1194_v50 }
 0x11b   :  { %v436_v58 = vmul.f32 %v7112_v44, %v400_v51  ;;  %v435_v59 = vmul.f32 %v7112_v44, %v393_v52 }
 0x11d   :  { %v7231_v60 = vadd.f32 %v436_v58, %v282_v53  ;;  %v7233_v61 = vadd.f32 %v435_v59, %v281_v54  ;;  %v1178_v58 = vld [vmem:[#allocation5 + $0x68] sm:$0xff]  ;;  %v1193_v59 = vld [vmem:[#allocation5 + $0xe0] sm:$0xff] }
 0x11e   :  { %v414_v62 = vpop.permute.xlu1 %413  ;;  %v407_v55 = vpop.permute.xlu0 %406  ;;  %6310 = vmatpush3.msra.mxu0 %v1178_v58 }
 0x11f   :  { %v438_v13 = vmul.f32 %v7112_v44, %v414_v62  ;;  %v437_v14 = vmul.f32 %v7112_v44, %v407_v55  ;;  %v1177_v62 = vld [vmem:[#allocation5 + $0x60] sm:$0xff]  ;;  %v7280_v55 = vld [vmem:[%s9924_s24] ss:$0 sm:$0xff]  ;;  %6311 = vmatprep.subr.mxu0 %v1193_v59 }
 0x120   :  { %6312 = vmatpush3.msra.mxu0 %v1177_v62 }
 0x121   :  { %v7239_v17 = vadd.f32 %v438_v13, %v284_v9  ;;  %v7241_v18 = vadd.f32 %v437_v14, %v283_v10 }
 0x122   :  { %v624_v19 = vpop.permute.xlu1 %623  ;;  %v617_v8 = vpop.permute.xlu0 %616 }
 0x123   :  { %v732_v40 = vmul.f32 %v7258_v37, %v624_v19  ;;  %v731_v31 = vmul.f32 %v7258_v37, %v617_v8 }
 0x125   :  { %v748_v51 = vadd.f32 %v732_v40, %v7182_v57  ;;  %v747_v52 = vadd.f32 %v731_v31, %v7185_v36 }
 0x126   :  { %v638_v6 = vpop.permute.xlu1 %637  ;;  %v631_v23 = vpop.permute.xlu0 %630 }
 0x127   :  { %v734_v47 = vmul.f32 %v7258_v37, %v638_v6  ;;  %v733_v32 = vmul.f32 %v7258_v37, %v631_v23  ;;  %v7289_v6 = vld [vmem:[%s9925_s3] ss:$0 sm:$0xff]  ;;  %v1192_v23 = vld [vmem:[#allocation5 + $0xd8] sm:$0xff] }
 0x128   :  { %6313 = vmatprep.subr.mxu0 %v1192_v23 }
 0x129   :  { %v750_v57 = vadd.f32 %v734_v47, %v7192_v0  ;;  %v749_v36 = vadd.f32 %v733_v32, %v7195_v56  ;;  %v1191_v47 = vld [vmem:[#allocation5 + $0xd0] sm:$0xff] }
 0x12a   :  { %v652_v24 = vpop.permute.xlu1 %651  ;;  %v645_v25 = vpop.permute.xlu0 %644 }
 0x12b   :  { %v736_v13 = vmul.f32 %v7258_v37, %v652_v24  ;;  %v735_v14 = vmul.f32 %v7258_v37, %v645_v25  ;;  %v1176_v24 = vld [vmem:[#allocation5 + $0x58] sm:$0xff] }
 0x12c   :  { %6314 = vmatpush3.msra.mxu0 %v1176_v24 }
 0x12d   :  { %6315 = vmatprep.subr.mxu0 %v1191_v47  ;;  %v1188_v47 = vld [vmem:[#allocation5 + $0xb8] sm:$0xff] }
 0x12e   :  { %v666_v26 = vpop.permute.xlu1 %665  ;;  %v659_v28 = vpop.permute.xlu0 %658 }
 0x12f   :  { %v738_v25 = vmul.f32 %v7258_v37, %v666_v26  ;;  %v1190_v26 = vld [vmem:[#allocation5 + $0xc8] sm:$0xff] }
 0x132   :  { %v7243_v21 = vpop.permute.xlu1 %679  ;;  %v7245_v29 = vpop.permute.xlu0 %672 }
 0x136   :  { %v7247_v43 = vpop.permute.xlu1 %539  ;;  %v7249_v30 = vpop.permute.xlu0 %532 }
 0x13a   :  { %v7251_v44 = vpop.permute.xlu1 %553  ;;  %v7253_v35 = vpop.permute.xlu0 %546 }
 0x13e   :  { %v7260_v38 = vpop.permute.xlu1 %567  ;;  %v7262_v39 = vpop.permute.xlu0 %560 }
 0x142   :  { %v778_v41 = vpop.permute.xlu1 %777  ;;  %v771_v49 = vpop.permute.xlu0 %770 }
 0x143   :  { %v886_v53 = vmul.f32 %v7269_v45, %v778_v41  ;;  %v885_v54 = vmul.f32 %v7269_v45, %v771_v49 }
 0x145   :  { %v902_v9 = vadd.f32 %v886_v53, %v748_v51  ;;  %v901_v10 = vadd.f32 %v885_v54, %v747_v52  ;;  %v1175_v51 = vld [vmem:[#allocation5 + $0x50] sm:$0xff]  ;;  %v752_v52 = vadd.f32 %v736_v13, %v7200_v22  ;;  %v751_v53 = vadd.f32 %v735_v14, %v7203_v7 }
 0x146   :  { %v792_v19 = vpop.permute.xlu1 %791  ;;  %v785_v8 = vpop.permute.xlu0 %784  ;;  %v737_v54 = vmul.f32 %v7258_v37, %v659_v28  ;;  %6316 = vmatpush3.msra.mxu0 %v1175_v51  ;;  %v754_v22 = vadd.f32 %v738_v25, %v7208_v27  ;;  %v1189_v28 = vld [vmem:[#allocation5 + $0xc0] sm:$0xff]  ;;  %v739_v27 = vmul.f32 %v7258_v37, %v7245_v29  ;;  %v1187_v51 = vld [vmem:[#allocation5 + $0xb0] sm:$0xff] }
 0x147   :  { %v925_v40 = vmul.f32 %v7280_v55, %v902_v9  ;;  %v924_v31 = vmul.f32 %v7280_v55, %v901_v10  ;;  %v888_v0 = vmul.f32 %v7269_v45, %v792_v19  ;;  %v887_v56 = vmul.f32 %v7269_v45, %v785_v8  ;;  %6317 = vmatprep.subr.mxu0 %v1190_v26 }
 0x149   :  { %v904_v32 = vadd.f32 %v888_v0, %v750_v57  ;;  %v903_v41 = vadd.f32 %v887_v56, %v749_v36  ;;  %v947_v49 = vadd.f32 %v7289_v6, %v924_v31  ;;  %v948_v50 = vadd.f32 %v7289_v6, %v925_v40  ;;  %v1174_v36 = vld [vmem:[#allocation5 + $0x48] sm:$0xff]  ;;  %v1173_v40 = vld [vmem:[#allocation5 + $0x40] sm:$0xff] }
 0x14a   :  { %v806_v58 = vpop.permute.xlu1 %805  ;;  %v799_v59 = vpop.permute.xlu0 %798  ;;  %6318 = vmatpush3.msra.mxu0 %v1174_v36  ;;  %v753_v31 = vadd.f32 %v737_v54, %v7211_v20  ;;  %v740_v0 = vmul.f32 %v7258_v37, %v7243_v21  ;;  %v1186_v36 = vld [vmem:[#allocation5 + $0xa8] sm:$0xff] }
 0x14b   :  { %v927_v62 = vmul.f32 %v7280_v55, %v904_v32  ;;  %v926_v9 = vmul.f32 %v7280_v55, %v903_v41  ;;  %v890_v10 = vmul.f32 %v7269_v45, %v806_v58  ;;  %v889_v57 = vmul.f32 %v7269_v45, %v799_v59  ;;  %6319 = vmatprep.subr.mxu0 %v1189_v28  ;;  %v1171_v59 = vld [vmem:[#allocation5 + $0x30] sm:$0xff] }
 0x14c   :  { %v963_v13 = vmax.f32 %v947_v49, 0.0  ;;  %v964_v7 = vmax.f32 %v948_v50, 0.0  ;;  %6320 = vmatpush3.msra.mxu0 %v1173_v40  ;;  %v1172_v50 = vld [vmem:[#allocation5 + $0x38] sm:$0xff]  ;;  %v756_v26 = vadd.f32 %v740_v0, %v7215_v33  ;;  %v1169_v0 = vld [vmem:[#allocation5 + $0x20] sm:$0xff] }
 0x14d   :  { %v906_v14 = vadd.f32 %v890_v10, %v752_v52  ;;  %v905_v19 = vadd.f32 %v889_v57, %v751_v53  ;;  %v949_v8 = vadd.f32 %v7289_v6, %v926_v9  ;;  %v950_v23 = vadd.f32 %v7289_v6, %v927_v62  ;;  %6321 = vmatprep.subr.mxu0 %v1188_v47 }
 0x14e   :  { %v820_v56 = vpop.permute.xlu1 %819  ;;  %v813_v24 = vpop.permute.xlu0 %812  ;;  %v7313_v25 = vmax.f32 %v963_v13, %v964_v7  ;;  %6322 = vmatpush3.msra.mxu0 %v1172_v50  ;;  %v755_v62 = vadd.f32 %v739_v27, %v7217_v34  ;;  %v1184_v27 = vld [vmem:[#allocation5 + $0x98] sm:$0xff]  ;;  %v1167_v50 = vld [vmem:[#allocation5 + $0x10] sm:$0xff] }
 0x14f   :  { %v929_v32 = vmul.f32 %v7280_v55, %v906_v14  ;;  %v928_v41 = vmul.f32 %v7280_v55, %v905_v19  ;;  %v892_v49 = vmul.f32 %v7269_v45, %v820_v56  ;;  %v891_v20 = vmul.f32 %v7269_v45, %v813_v24  ;;  %6323 = vmatprep.subr.mxu0 %v1187_v51  ;;  %v1170_v14 = vld [vmem:[#allocation5 + $0x28] sm:$0xff]  ;;  %v1185_v19 = vld [vmem:[#allocation5 + $0xa0] sm:$0xff]  ;;  %v1168_v56 = vld [vmem:[#allocation5 + $0x18] sm:$0xff] }
 0x150   :  { %997 = vrot.lane.b32.xlu1 %v7313_v25, %s6812_s2  ;;  %v965_v21 = vmax.f32 %v949_v8, 0.0  ;;  %v966_v29 = vmax.f32 %v950_v23, 0.0  ;;  %6324 = vmatpush3.msra.mxu0 %v1171_v59  ;;  %v1182_v51 = vld [vmem:[#allocation5 + $0x88] sm:$0xff] }
 0x151   :  { %v908_v52 = vadd.f32 %v892_v49, %v754_v22  ;;  %v907_v53 = vadd.f32 %v891_v20, %v753_v31  ;;  %v951_v54 = vadd.f32 %v7289_v6, %v928_v41  ;;  %v952_v58 = vadd.f32 %v7289_v6, %v929_v32  ;;  %6325 = vmatprep.subr.mxu0 %v1186_v36  ;;  %v1183_v41 = vld [vmem:[#allocation5 + $0x90] sm:$0xff]  ;;  %v1165_v36 = vld [vmem:[#allocation5] sm:$0xff] }
 0x152   :  { %v834_v9 = vpop.permute.xlu1 %833  ;;  %v827_v10 = vpop.permute.xlu0 %826  ;;  %v7325_v57 = vmax.f32 %v965_v21, %v966_v29  ;;  %6326 = vmatpush3.msra.mxu0 %v1170_v14 }
 0x153   :  { %v931_v13 = vmul.f32 %v7280_v55, %v908_v52  ;;  %v930_v22 = vmul.f32 %v7280_v55, %v907_v53  ;;  %v894_v7 = vmul.f32 %v7269_v45, %v834_v9  ;;  %v893_v28 = vmul.f32 %v7269_v45, %v827_v10  ;;  %6327 = vmatprep.subr.mxu0 %v1185_v19 }
 0x154   :  { %999 = vrot.lane.b32.xlu0 %v7325_v57, %s6812_s2  ;;  %v967_v33 = vmax.f32 %v951_v54, 0.0  ;;  %v968_v34 = vmax.f32 %v952_v58, 0.0  ;;  %6328 = vmatpush3.msra.mxu0 %v1169_v0  ;;  %v1166_v54 = vld [vmem:[#allocation5 + $0x8] sm:$0xff]  ;;  %v590_v19 = vmul.f32 %v7173_v46, %v7251_v44 }
 0x155   :  { %v910_v8 = vadd.f32 %v894_v7, %v756_v26  ;;  %v909_v23 = vadd.f32 %v893_v28, %v755_v62  ;;  %v953_v40 = vadd.f32 %v7289_v6, %v930_v22  ;;  %v954_v31 = vadd.f32 %v7289_v6, %v931_v13  ;;  %6329 = vmatprep.subr.mxu0 %v1184_v27  ;;  %v1181_v62 = vld [vmem:[#allocation5 + $0x80] sm:$0xff] }
 0x156   :  { %v694_v24 = vpop.permute.xlu1 %693  ;;  %v687_v47 = vpop.permute.xlu0 %686  ;;  %v7335_v32 = vmax.f32 %v967_v33, %v968_v34  ;;  %6330 = vmatpush3.msra.mxu0 %v1168_v56  ;;  %v588_v13 = vmul.f32 %v7173_v46, %v7247_v43  ;;  %v587_v22 = vmul.f32 %v7173_v46, %v7249_v30  ;;  %v589_v43 = vmul.f32 %v7173_v46, %v7253_v35 }
 0x157   :  { %v933_v49 = vmul.f32 %v7280_v55, %v910_v8  ;;  %v932_v20 = vmul.f32 %v7280_v55, %v909_v23  ;;  %v969_v21 = vmax.f32 %v953_v40, 0.0  ;;  %v970_v29 = vmax.f32 %v954_v31, 0.0  ;;  %6331 = vmatprep.subr.mxu0 %v1183_v41 }
 0x158   :  { %1001 = vrot.lane.b32.xlu1 %v7335_v32, %s6812_s2  ;;  %6332 = vmatpush3.msra.mxu0 %v1167_v50  ;;  %v742_v33 = vmul.f32 %v7258_v37, %v694_v24  ;;  %v741_v34 = vmul.f32 %v7258_v37, %v687_v47  ;;  %v6823_v30 = vmov 1983009808   ;;  %v604_v23 = vadd.f32 %v588_v13, %v7223_v42 }
 0x159   :  { %v955_v52 = vadd.f32 %v7289_v6, %v932_v20  ;;  %v956_v53 = vadd.f32 %v7289_v6, %v933_v49  ;;  %v7343_v26 = vmax.f32 %v969_v21, %v970_v29  ;;  %6333 = vmatprep.subr.mxu0 %v1182_v51  ;;  %v1046_v8 = vunpack.c.l.s4 %v6823_v30 }
 0x15a   :  { %v708_v58 = vpop.permute.xlu1 %707  ;;  %v701_v59 = vpop.permute.xlu0 %700  ;;  %6334 = vmatpush3.msra.mxu0 %v1166_v54  ;;  %v603_v40 = vadd.f32 %v587_v22, %v7225_v48  ;;  %v758_v24 = vadd.f32 %v742_v33, %v604_v23  ;;  %v606_v35 = vadd.f32 %v590_v19, %v7231_v60  ;;  %v605_v49 = vadd.f32 %v589_v43, %v7233_v61 }
 0x15b   :  { %v971_v9 = vmax.f32 %v955_v52, 0.0  ;;  %v972_v10 = vmax.f32 %v956_v53, 0.0  ;;  %1003 = vrot.lane.b32.xlu0 %v7343_v26, %s6812_s2  ;;  %6335 = vmatprep.subr.mxu0 %v1181_v62  ;;  %v744_v31 = vmul.f32 %v7258_v37, %v708_v58  ;;  %v743_v0 = vmul.f32 %v7258_v37, %v701_v59 }
 0x15c   :  { %6336 = vmatpush3.msra.mxu0 %v1165_v36  ;;  %v757_v47 = vadd.f32 %v741_v34, %v603_v40  ;;  %v592_v42 = vmul.f32 %v7173_v46, %v7260_v38  ;;  %v591_v48 = vmul.f32 %v7173_v46, %v7262_v39  ;;  %v1047_v20 = vunpack.c.0.s8 %v1046_v8 }
 0x15d   :  { %v7351_v7 = vmax.f32 %v971_v9, %v972_v10  ;;  %v760_v29 = vadd.f32 %v744_v31, %v606_v35  ;;  %v759_v51 = vadd.f32 %v743_v0, %v605_v49 }
 0x15e   :  { %v722_v28 = vpop.permute.xlu1 %721  ;;  %v715_v14 = vpop.permute.xlu0 %714  ;;  %v608_v46 = vadd.f32 %v592_v42, %v7239_v17  ;;  %v607_v39 = vadd.f32 %v591_v48, %v7241_v18  ;;  %v7384_v36 = vsub.s32 %v1047_v20, %v6962_v1 }
 0x15f   :  { %1005 = vrot.lane.b32.xlu1 %v7351_v7, %s6812_s2  ;;  %v746_v52 = vmul.f32 %v7258_v37, %v722_v28  ;;  %v745_v53 = vmul.f32 %v7258_v37, %v715_v14 }
 0x160   :  { %9926 = vst [vmem:[#allocation30_spill] sm:$0xff] %v7384_v36  ;;  %v1074_v30 = vrot.slane %v7343_v26, %v7384_v36  ;;  %v1058_v0 = vrot.slane %v7335_v32, %v7384_v36 }
 0x161   :  { %v762_v13 = vadd.f32 %v746_v52, %v608_v46  ;;  %v761_v22 = vadd.f32 %v745_v53, %v607_v39 }
 0x162   :  { %v848_v27 = vpop.permute.xlu1 %847  ;;  %v841_v56 = vpop.permute.xlu0 %840 }
 0x163   :  { %v896_v41 = vmul.f32 %v7269_v45, %v848_v27  ;;  %v895_v44 = vmul.f32 %v7269_v45, %v841_v56 }
 0x165   :  { %v912_v50 = vadd.f32 %v896_v41, %v758_v24  ;;  %v911_v21 = vadd.f32 %v895_v44, %v757_v47  ;;  %v1090_v47 = vrot.slane %v7351_v7, %v7384_v36  ;;  %v6265_v44 = vcombine.low %v1058_v0, %v1074_v30 }
 0x166   :  { %v862_v54 = vpop.permute.xlu1 %861  ;;  %v855_v58 = vpop.permute.xlu0 %854 }
 0x167   :  { %v935_v60 = vmul.f32 %v7280_v55, %v912_v50  ;;  %v934_v61 = vmul.f32 %v7280_v55, %v911_v21  ;;  %v898_v38 = vmul.f32 %v7269_v45, %v862_v54  ;;  %v897_v59 = vmul.f32 %v7269_v45, %v855_v58 }
 0x168   :  { %v1222_v21 = vrot.slane %v6265_v44, %v7384_v36 }
 0x169   :  { %v914_v62 = vadd.f32 %v898_v38, %v760_v29  ;;  %v913_v9 = vadd.f32 %v897_v59, %v759_v51  ;;  %v957_v10 = vadd.f32 %v7289_v6, %v934_v61  ;;  %v958_v37 = vadd.f32 %v7289_v6, %v935_v60 }
 0x16a   :  { %v876_v28 = vpop.permute.xlu1 %875  ;;  %v869_v14 = vpop.permute.xlu0 %868 }
 0x16b   :  { %v937_v33 = vmul.f32 %v7280_v55, %v914_v62  ;;  %v936_v34 = vmul.f32 %v7280_v55, %v913_v9  ;;  %v900_v17 = vmul.f32 %v7269_v45, %v876_v28  ;;  %v899_v18 = vmul.f32 %v7269_v45, %v869_v14 }
 0x16c   :  { %v973_v19 = vmax.f32 %v957_v10, 0.0  ;;  %v974_v43 = vmax.f32 %v958_v37, 0.0 }
 0x16d   :  { %v916_v8 = vadd.f32 %v900_v17, %v762_v13  ;;  %v915_v1 = vadd.f32 %v899_v18, %v761_v22  ;;  %v959_v23 = vadd.f32 %v7289_v6, %v936_v34  ;;  %v960_v40 = vadd.f32 %v7289_v6, %v937_v33 }
 0x16e   :  { %v7394_v31 = vmax.f32 %v973_v19, %v974_v43  ;;  %v996_v59 = vpop.permute.xlu0 %995 }
 0x16f   :  { %v939_v27 = vmul.f32 %v7280_v55, %v916_v8  ;;  %v938_v45 = vmul.f32 %v7280_v55, %v915_v1  ;;  %v975_v56 = vmax.f32 %v959_v23, 0.0  ;;  %v976_v24 = vmax.f32 %v960_v40, 0.0 }
 0x170   :  { %1007 = vrot.lane.b32.xlu0 %v7394_v31, %s6812_s2  ;;  %v1106_v41 = vrot.slane %v7394_v31, %v7384_v36  ;;  %v1154_v55 = vrot.slane %v9702_v63, %v7384_v36  ;;  %v1024_v10 = vsel %vm1023_vm0, 0.0, %v996_v59 }
 0x171   :  { %v962_v35 = vadd.f32 %v7289_v6, %v939_v27  ;;  %v961_v49 = vadd.f32 %v7289_v6, %v938_v45  ;;  %v985_v42 = vmax.f32 %v975_v56, %v976_v24 }
 0x172   :  { %v6267_v48 = vcombine.low %v1090_v47, %v1106_v41  ;;  %v6271_v52 = vcombine.low %v1154_v55, %v1154_v55 }
 0x173   :  { %v978_v20 = vmax.f32 %v962_v35, 0.0  ;;  %v977_v50 = vmax.f32 %v961_v49, 0.0  ;;  %1009 = vrot.lane.b32.xlu1 %v985_v42, %s6812_s2  ;;  %v1122_v54 = vrot.slane %v985_v42, %v7384_v36 }
 0x174   :  { %v1236_v29 = vrot.slane %v6267_v48, %v7384_v36  ;;  %v1271_v60 = vrot.slane %v6271_v52, %v7384_v36 }
 0x175   :  { %v986_v51 = vmax.f32 %v977_v50, %v978_v20 }
 0x176   :  { %v1239_v53 = vcombine.low %v1222_v21, %v1236_v29 }
 0x177   :  { %v1138_v6 = vrot.slane %v986_v51, %v7384_v36  ;;  %1020 = vrot.lane.b32.xlu0 %v986_v51, %s6812_s2  ;;  %v1033_v41 = vsel %vm1023_vm0, %v986_v51, %v996_v59  ;;  %v1615_v59 = vld [vmem:[#allocation8 + $0x390] sm:$0xff] }
 0x178   :  { %6412 = vmatprep.mubr.msk.f32.mxu1 %vm1023_vm0, %v1239_v53 }
 0x179   :  { %v6269_v58 = vcombine.low %v1122_v54, %v1138_v6  ;;  %v1624_v54 = vld [vmem:[#allocation8 + $0x3d8] sm:$0xff]  ;;  %v1621_v6 = vld [vmem:[#allocation8 + $0x3c0] sm:$0xff] }
 0x17a   :  { %1764 = vmatprep.subr.mxu0 %v1624_v54  ;;  %v1519_v54 = vld [vmem:[#allocation8 + $0x90] sm:$0xff] }
 0x17b   :  { %v1257_v61 = vrot.slane %v6269_v58, %v7384_v36  ;;  %v1623_v58 = vld [vmem:[#allocation8 + $0x3d0] sm:$0xff] }
 0x17d   :  { %v1274_v38 = vcombine.low %v1257_v61, %v1271_v60  ;;  %v1614_v60 = vld [vmem:[#allocation8 + $0x388] sm:$0xff]  ;;  %v1616_v61 = vld [vmem:[#allocation8 + $0x398] sm:$0xff] }
 0x17f   :  { %6413 = vmatmul.mubr.msk.f32.vlgmr.msra.gmra.mxu1 %vm1023_vm0, %v1274_v38  ;;  %v1613_v38 = vld [vmem:[#allocation8 + $0x380] sm:$0xff] }
 0x180   :  { %1757 = vmatprep.mubr.f32.mxu1 %v9702_v63 }
 0x1c2   :  { %v998_v46 = vpop.permute.xlu1 %997 }
 0x1c3   :  { %v1025_v37 = vsel %vm1023_vm0, 0.0, %v998_v46  ;;  %v1606_v46 = vld [vmem:[#allocation8 + $0x348] sm:$0xff] }
 0x1c6   :  { %v1000_v39 = vpop.permute.xlu0 %999 }
 0x1c7   :  { %v1026_v13 = vsel %vm1023_vm0, %v7313_v25, %v1000_v39  ;;  %v1608_v39 = vld [vmem:[#allocation8 + $0x358] sm:$0xff] }
 0x1c8   :  { %v1044_v14 = vcombine.low %v1024_v10, %v1026_v13  ;;  %v1598_v10 = vld [vmem:[#allocation8 + $0x308] sm:$0xff] }
 0x1ca   :  { %v1002_v62 = vpop.permute.xlu1 %1001  ;;  %v1051_v19 = vrot.slane %v1044_v14, %v7384_v36  ;;  %v1592_v14 = vld [vmem:[#allocation8 + $0x2d8] sm:$0xff] }
 0x1cb   :  { %v1027_v9 = vsel %vm1023_vm0, %v7325_v57, %v1002_v62  ;;  %v1605_v62 = vld [vmem:[#allocation8 + $0x340] sm:$0xff] }
 0x1cc   :  { %v1060_v22 = vcombine.low %v1025_v37, %v1027_v9  ;;  %v1600_v37 = vld [vmem:[#allocation8 + $0x318] sm:$0xff] }
 0x1cd   :  { %v1004_v28 = vpop.permute.xlu0 %1003 }
 0x1ce   :  { %v1028_v33 = vsel %vm1023_vm0, %v7335_v32, %v1004_v28  ;;  %v1067_v34 = vrot.slane %v1060_v22, %v7384_v36  ;;  %v1599_v22 = vld [vmem:[#allocation8 + $0x310] sm:$0xff]  ;;  %v1590_v28 = vld [vmem:[#allocation8 + $0x2c8] sm:$0xff] }
 0x1cf   :  { %v1076_v17 = vcombine.low %v1026_v13, %v1028_v33  ;;  %v1597_v13 = vld [vmem:[#allocation8 + $0x300] sm:$0xff] }
 0x1d0   :  { %v6264_v8 = vcombine.low %v1051_v19, %v1067_v34  ;;  %v1591_v34 = vld [vmem:[#allocation8 + $0x2d0] sm:$0xff] }
 0x1d1   :  { %v1006_v18 = vpop.permute.xlu1 %1005  ;;  %v1083_v30 = vrot.slane %v1076_v17, %v7384_v36  ;;  %v1582_v17 = vld [vmem:[#allocation8 + $0x288] sm:$0xff]  ;;  %v1583_v19 = vld [vmem:[#allocation8 + $0x290] sm:$0xff] }
 0x1d2   :  { %v1029_v57 = vsel %vm1023_vm0, %v7343_v26, %v1006_v18  ;;  %v1215_v23 = vrot.slane %v6264_v8, %v7384_v36  ;;  %v1584_v18 = vld [vmem:[#allocation8 + $0x298] sm:$0xff]  ;;  %v1575_v8 = vld [vmem:[#allocation8 + $0x250] sm:$0xff] }
 0x1d3   :  { %v1092_v43 = vcombine.low %v1027_v9, %v1029_v57  ;;  %v1607_v9 = vld [vmem:[#allocation8 + $0x350] sm:$0xff] }
 0x1d5   :  { %v1099_v25 = vrot.slane %v1092_v43, %v7384_v36  ;;  %v1574_v43 = vld [vmem:[#allocation8 + $0x248] sm:$0xff] }
 0x1d7   :  { %v6266_v1 = vcombine.low %v1083_v30, %v1099_v25  ;;  %v1576_v30 = vld [vmem:[#allocation8 + $0x258] sm:$0xff]  ;;  %v1573_v25 = vld [vmem:[#allocation8 + $0x240] sm:$0xff] }
 0x1d9   :  { %v1229_v32 = vrot.slane %v6266_v1, %v7384_v36  ;;  %v1566_v1 = vld [vmem:[#allocation8 + $0x208] sm:$0xff] }
 0x1db   :  { %v1238_v40 = vcombine.high %v1215_v23, %v1229_v32  ;;  %v1237_v0 = vcombine.low %v1215_v23, %v1229_v32  ;;  %v1568_v23 = vld [vmem:[#allocation8 + $0x218] sm:$0xff]  ;;  %v1565_v32 = vld [vmem:[#allocation8 + $0x200] sm:$0xff] }
 0x1dd   :  { %1347 = vmatprep.mubr.f32.mxu0 %v1238_v40  ;;  %v1567_v40 = vld [vmem:[#allocation8 + $0x210] sm:$0xff] }
 0x1de   :  { %1348 = vmatmul.mubr.f32.vlgmr.msra.gmra.mxu0 %v1237_v0  ;;  %v1558_v0 = vld [vmem:[#allocation8 + $0x1c8] sm:$0xff] }
 0x1df   :  { %1765 = vmatpush1.msra.mxu0 %v1623_v58  ;;  %v1512_v58 = vld [vmem:[#allocation8 + $0x58] sm:$0xff] }
 0x1e0   :  { %1766 = vmatprep.subr.mxu0 %v1616_v61  ;;  %v1511_v61 = vld [vmem:[#allocation8 + $0x50] sm:$0xff] }
 0x1e1   :  { %1767 = vmatpush1.msra.mxu0 %v1615_v59  ;;  %v1504_v59 = vld [vmem:[#allocation8 + $0x18] sm:$0xff] }
 0x1e2   :  { %v1008_v27 = vpop.permute.xlu0 %1007  ;;  %1768 = vmatprep.subr.mxu0 %v1608_v39  ;;  %v1503_v39 = vld [vmem:[#allocation8 + $0x10] sm:$0xff] }
 0x1e3   :  { %v1030_v26 = vsel %vm1023_vm0, %v7351_v7, %v1008_v27  ;;  %1769 = vmatpush1.msra.mxu0 %v1607_v9  ;;  %v1560_v27 = vld [vmem:[#allocation8 + $0x1d8] sm:$0xff] }
 0x1e4   :  { %v1108_v24 = vcombine.low %v1028_v33, %v1030_v26  ;;  %1770 = vmatprep.subr.mxu0 %v1600_v37  ;;  %v1589_v33 = vld [vmem:[#allocation8 + $0x2c0] sm:$0xff]  ;;  %v1628_v9 = vld [vmem:[#allocation8 + $0x3f8] sm:$0xff] }
 0x1e5   :  { %v1010_v45 = vpop.permute.xlu1 %1009  ;;  %1771 = vmatpush1.msra.mxu0 %v1599_v22 }
 0x1e6   :  { %v1031_v56 = vsel %vm1023_vm0, %v7394_v31, %v1010_v45  ;;  %v1115_v48 = vrot.slane %v1108_v24, %v7384_v36  ;;  %1772 = vmatprep.subr.mxu0 %v1592_v14  ;;  %v1559_v45 = vld [vmem:[#allocation8 + $0x1d0] sm:$0xff]  ;;  %v1552_v24 = vld [vmem:[#allocation8 + $0x198] sm:$0xff] }
 0x1e7   :  { %v1124_v47 = vcombine.low %v1029_v57, %v1031_v56  ;;  %v1156_v35 = vcombine.low %v1031_v56, %v1033_v41  ;;  %1773 = vmatpush1.msra.mxu0 %v1591_v34  ;;  %v1581_v57 = vld [vmem:[#allocation8 + $0x280] sm:$0xff]  ;;  %v1550_v56 = vld [vmem:[#allocation8 + $0x188] sm:$0xff]  ;;  %v1551_v41 = vld [vmem:[#allocation8 + $0x190] sm:$0xff] }
 0x1e8   :  { %1774 = vmatprep.subr.mxu0 %v1584_v18 }
 0x1e9   :  { %v1131_v44 = vrot.slane %v1124_v47, %v7384_v36  ;;  %v1021_v49 = vpop.permute.xlu0 %1020  ;;  %v1163_v50 = vrot.slane %v1156_v35, %v7384_v36  ;;  %1775 = vmatpush1.msra.mxu0 %v1583_v19  ;;  %v1549_v47 = vld [vmem:[#allocation8 + $0x180] sm:$0xff]  ;;  %v1544_v35 = vld [vmem:[#allocation8 + $0x158] sm:$0xff] }
 0x1ea   :  { %v1032_v55 = vsel %vm1023_vm0, %v985_v42, %v1021_v49  ;;  %v1622_v42 = vld [vmem:[#allocation8 + $0x3c8] sm:$0xff]  ;;  %1776 = vmatprep.subr.mxu0 %v1576_v30  ;;  %v1541_v49 = vld [vmem:[#allocation8 + $0x140] sm:$0xff] }
 0x1eb   :  { %v1140_v20 = vcombine.low %v1030_v26, %v1032_v55  ;;  %v6268_v7 = vcombine.low %v1115_v48, %v1131_v44  ;;  %1693 = vmatprep.subr.mxu1 %v1622_v42  ;;  %1777 = vmatpush1.msra.mxu0 %v1575_v8  ;;  %v1557_v26 = vld [vmem:[#allocation8 + $0x1c0] sm:$0xff]  ;;  %v1542_v44 = vld [vmem:[#allocation8 + $0x148] sm:$0xff]  ;;  %v1543_v55 = vld [vmem:[#allocation8 + $0x150] sm:$0xff] }
 0x1ec   :  { %1694 = vmatpush1.msra.mxu1 %v1621_v6  ;;  %1778 = vmatprep.subr.mxu0 %v1568_v23  ;;  %v1534_v48 = vld [vmem:[#allocation8 + $0x108] sm:$0xff]  ;;  %v1517_v42 = vld [vmem:[#allocation8 + $0x80] sm:$0xff] }
 0x1ed   :  { %v1147_v21 = vrot.slane %v1140_v20, %v7384_v36  ;;  %v1250_v31 = vrot.slane %v6268_v7, %v7384_v36  ;;  %1695 = vmatprep.subr.mxu1 %v1614_v60  ;;  %1779 = vmatpush1.msra.mxu0 %v1567_v40  ;;  %v1536_v20 = vld [vmem:[#allocation8 + $0x118] sm:$0xff]  ;;  %v1535_v7 = vld [vmem:[#allocation8 + $0x110] sm:$0xff]  ;;  %v1510_v6 = vld [vmem:[#allocation8 + $0x48] sm:$0xff] }
 0x1ee   :  { %1696 = vmatpush1.msra.mxu1 %v1613_v38  ;;  %1780 = vmatprep.subr.mxu0 %v1560_v27  ;;  %v1509_v60 = vld [vmem:[#allocation8 + $0x40] sm:$0xff]  ;;  %v1502_v38 = vld [vmem:[#allocation8 + $0x8] sm:$0xff] }
 0x1ef   :  { %v6270_v29 = vcombine.low %v1147_v21, %v1163_v50  ;;  %1697 = vmatprep.subr.mxu1 %v1606_v46  ;;  %1781 = vmatpush1.msra.mxu0 %v1559_v45  ;;  %v1533_v50 = vld [vmem:[#allocation8 + $0x100] sm:$0xff]  ;;  %v1526_v21 = vld [vmem:[#allocation8 + $0xc8] sm:$0xff] }
 0x1f0   :  { %1698 = vmatpush1.msra.mxu1 %v1605_v62  ;;  %1782 = vmatprep.subr.mxu0 %v1552_v24  ;;  %v1501_v46 = vld [vmem:[#allocation8] sm:$0xff]  ;;  %v1626_v62 = vld [vmem:[#allocation8 + $0x3e8] sm:$0xff] }
 0x1f1   :  { %v1264_v52 = vrot.slane %v6270_v29, %v7384_v36  ;;  %1699 = vmatprep.subr.mxu1 %v1598_v10  ;;  %1783 = vmatpush1.msra.mxu0 %v1551_v41  ;;  %v1528_v29 = vld [vmem:[#allocation8 + $0xd8] sm:$0xff] }
 0x1f2   :  { %1700 = vmatpush1.msra.mxu1 %v1597_v13  ;;  %1784 = vmatprep.subr.mxu0 %v1544_v35 }
 0x1f3   :  { %v1273_v51 = vcombine.high %v1250_v31, %v1264_v52  ;;  %v1272_v53 = vcombine.low %v1250_v31, %v1264_v52  ;;  %1701 = vmatprep.subr.mxu1 %v1590_v28  ;;  %1785 = vmatpush1.msra.mxu0 %v1543_v55  ;;  %v1525_v31 = vld [vmem:[#allocation8 + $0xc0] sm:$0xff]  ;;  %v1527_v52 = vld [vmem:[#allocation8 + $0xd0] sm:$0xff] }
 0x1f4   :  { %1702 = vmatpush1.msra.mxu1 %v1589_v33  ;;  %1786 = vmatprep.subr.mxu0 %v1536_v20  ;;  %v6274_v33 = vld [vmem:[%s9684_s5] ss:$0 sm:$0xff] }
 0x1f5   :  { %1352 = vmatprep.mubr.f32.mxu0 %v1273_v51  ;;  %1703 = vmatprep.subr.mxu1 %v1582_v17  ;;  %v1518_v51 = vld [vmem:[#allocation8 + $0x88] sm:$0xff]  ;;  %v6275_v17 = vld [vmem:[%s9685_s6] ss:$0 sm:$0xff] }
 0x1f6   :  { %1353 = vmatmul.mubr.f32.gmra.mxu0 %v1272_v53  ;;  %1704 = vmatpush1.msra.mxu1 %v1581_v57  ;;  %v1520_v53 = vld [vmem:[#allocation8 + $0x98] sm:$0xff] }
 0x1f7   :  { %1828 = vmatprep.mubr.f32.mxu0 %v9702_v63  ;;  %1705 = vmatprep.subr.mxu1 %v1574_v43 }
 0x1f8   :  { %1706 = vmatpush1.msra.mxu1 %v1573_v25  ;;  %1787 = vmatpush1.msra.mxu0 %v1535_v7 }
 0x1f9   :  { %1707 = vmatprep.subr.mxu1 %v1566_v1  ;;  %1788 = vmatprep.subr.mxu0 %v1528_v29  ;;  %v1625_v29 = vld [vmem:[#allocation8 + $0x3e0] sm:$0xff] }
 0x1fa   :  { %1708 = vmatpush1.msra.mxu1 %v1565_v32  ;;  %1789 = vmatpush1.msra.mxu0 %v1527_v52  ;;  %v1618_v52 = vld [vmem:[#allocation8 + $0x3a8] sm:$0xff] }
 0x1fb   :  { %1709 = vmatprep.subr.mxu1 %v1558_v0  ;;  %1790 = vmatprep.subr.mxu0 %v1520_v53  ;;  %v1617_v53 = vld [vmem:[#allocation8 + $0x3a0] sm:$0xff] }
 0x1fc   :  { %1710 = vmatpush1.msra.mxu1 %v1557_v26  ;;  %1791 = vmatpush1.msra.mxu0 %v1519_v54  ;;  %v1610_v54 = vld [vmem:[#allocation8 + $0x368] sm:$0xff] }
 0x1fd   :  { %1711 = vmatprep.subr.mxu1 %v1550_v56  ;;  %1792 = vmatprep.subr.mxu0 %v1512_v58  ;;  %v1609_v58 = vld [vmem:[#allocation8 + $0x360] sm:$0xff] }
 0x1fe   :  { %1712 = vmatpush1.msra.mxu1 %v1549_v47  ;;  %1793 = vmatpush1.msra.mxu0 %v1511_v61  ;;  %v1602_v61 = vld [vmem:[#allocation8 + $0x328] sm:$0xff] }
 0x1ff   :  { %1713 = vmatprep.subr.mxu1 %v1542_v44  ;;  %1794 = vmatprep.subr.mxu0 %v1504_v59  ;;  %v1601_v59 = vld [vmem:[#allocation8 + $0x320] sm:$0xff] }
 0x200   :  { %1714 = vmatpush1.msra.mxu1 %v1541_v49  ;;  %1795 = vmatpush1.msra.mxu0 %v1503_v39  ;;  %v1594_v39 = vld [vmem:[#allocation8 + $0x2e8] sm:$0xff] }
 0x201   :  { %1715 = vmatprep.subr.mxu1 %v1534_v48  ;;  %1906 = vmatprep.subr.mxu0 %v1628_v9  ;;  %v1593_v9 = vld [vmem:[#allocation8 + $0x2e0] sm:$0xff] }
 0x202   :  { %1716 = vmatpush1.msra.mxu1 %v1533_v50 }
 0x203   :  { %1717 = vmatprep.subr.mxu1 %v1526_v21 }
 0x204   :  { %1718 = vmatpush1.msra.mxu1 %v1525_v31  ;;  %v1627_v31 = vld [vmem:[#allocation8 + $0x3f0] sm:$0xff] }
 0x205   :  { %1719 = vmatprep.subr.mxu1 %v1518_v51  ;;  %v1620_v51 = vld [vmem:[#allocation8 + $0x3b8] sm:$0xff] }
 0x206   :  { %1720 = vmatpush1.msra.mxu1 %v1517_v42  ;;  %v1619_v42 = vld [vmem:[#allocation8 + $0x3b0] sm:$0xff] }
 0x207   :  { %1721 = vmatprep.subr.mxu1 %v1510_v6  ;;  %v1612_v6 = vld [vmem:[#allocation8 + $0x378] sm:$0xff] }
 0x208   :  { %1722 = vmatpush1.msra.mxu1 %v1509_v60  ;;  %v1611_v60 = vld [vmem:[#allocation8 + $0x370] sm:$0xff] }
 0x209   :  { %1723 = vmatprep.subr.mxu1 %v1502_v38  ;;  %v1604_v38 = vld [vmem:[#allocation8 + $0x338] sm:$0xff] }
 0x20a   :  { %1724 = vmatpush1.msra.mxu1 %v1501_v46  ;;  %v1603_v46 = vld [vmem:[#allocation8 + $0x330] sm:$0xff] }
 0x20b   :  { %1835 = vmatprep.subr.mxu1 %v1626_v62  ;;  %v1596_v62 = vld [vmem:[#allocation8 + $0x2f8] sm:$0xff] }
 0x23f   :  { %v6414_v13 = vpop.f32.mrf.mxu1 }
 0x241   :  { %v1424_v28 = vpop.f32.mrf.mxu1 }
 0x29e   :  { %v6337_v10 = vpop.f32.mrf.mxu0 }
 0x2a0   :  { %v6338_v37 = vpop.f32.mrf.mxu0 }
 0x2a1   :  { %v6339_v22 = vadd.f32 %v6338_v37, %v6337_v10  ;;  %v1595_v10 = vld [vmem:[#allocation8 + $0x2f0] sm:$0xff]  ;;  %v1586_v37 = vld [vmem:[#allocation8 + $0x2a8] sm:$0xff] }
 0x2a3   :  { %v1425_v14 = vadd.f32 %v6339_v22, %v1424_v28  ;;  %v1585_v22 = vld [vmem:[#allocation8 + $0x2a0] sm:$0xff]  ;;  %v1587_v28 = vld [vmem:[#allocation8 + $0x2b0] sm:$0xff] }
 0x2a5   :  { %v1440_v34 = vmul.f32 %v6274_v33, %v1425_v14  ;;  %v1578_v14 = vld [vmem:[#allocation8 + $0x268] sm:$0xff] }
 0x2a7   :  { %v1449_v18 = vadd.f32 %v6275_v17, %v1440_v34  ;;  %v1577_v34 = vld [vmem:[#allocation8 + $0x260] sm:$0xff] }
 0x2a9   :  { %v1451_v57 = vmax.f32 %v1449_v18, 0.0  ;;  %v1570_v18 = vld [vmem:[#allocation8 + $0x228] sm:$0xff] }
 0x2ab   :  { %v1455_v30 = vcombine.high %v1451_v57, %v1451_v57  ;;  %v1462_v32 = vrot.slane %v1451_v57, %v7384_v36  ;;  %v1572_v57 = vld [vmem:[#allocation8 + $0x238] sm:$0xff] }
 0x2ad   :  { %v1469_v1 = vrot.slane %v1455_v30, %v7384_v36  ;;  %v1470_v26 = vcombine.high %v1462_v32, %v1462_v32  ;;  %v1562_v30 = vld [vmem:[#allocation8 + $0x1e8] sm:$0xff] }
 0x2af   :  { %v1471_v0 = vcombine.high %v1469_v1, %v1469_v1  ;;  %v1497_v44 = vmax.f32 %v1462_v32, %v1470_v26  ;;  %v1556_v32 = vld [vmem:[#allocation8 + $0x1b8] sm:$0xff] }
 0x2b0   :  { %v1548_v26 = vld [vmem:[#allocation8 + $0x178] sm:$0xff] }
 0x2b1   :  { %v1498_v24 = vmax.f32 %v1469_v1, %v1471_v0  ;;  %v1563_v1 = vld [vmem:[#allocation8 + $0x1f0] sm:$0xff] }
 0x2b2   :  { %v1555_v0 = vld [vmem:[#allocation8 + $0x1b0] sm:$0xff] }
 0x2b3   :  { %v1675_v48 = vcombine.low %v1497_v44, %v1498_v24  ;;  %v1538_v24 = vld [vmem:[#allocation8 + $0x128] sm:$0xff]  ;;  %v1539_v44 = vld [vmem:[#allocation8 + $0x130] sm:$0xff] }
 0x2b5   :  { %v1683_v50 = vrot.slane %v1675_v48, %v7384_v36  ;;  %v1531_v48 = vld [vmem:[#allocation8 + $0xf0] sm:$0xff] }
 0x2b6   :  { %v6340_v19 = vpop.f32.mrf.mxu0 }
 0x2b8   :  { %v6341_v43 = vpop.f32.mrf.mxu0 }
 0x2b9   :  { %v6342_v25 = vadd.f32 %v6341_v43, %v6340_v19  ;;  %v1569_v19 = vld [vmem:[#allocation8 + $0x220] sm:$0xff]  ;;  %v1571_v43 = vld [vmem:[#allocation8 + $0x230] sm:$0xff] }
 0x2bb   :  { %v1430_v8 = vadd.f32 %v6414_v13, %v6342_v25  ;;  %v1588_v13 = vld [vmem:[#allocation8 + $0x2b8] sm:$0xff] }
 0x2bc   :  { %v1564_v25 = vld [vmem:[#allocation8 + $0x1f8] sm:$0xff] }
 0x2bd   :  { %v1441_v23 = vmul.f32 %v6274_v33, %v1430_v8  ;;  %v1580_v33 = vld [vmem:[#allocation8 + $0x278] sm:$0xff]  ;;  %v1561_v8 = vld [vmem:[#allocation8 + $0x1e0] sm:$0xff] }
 0x2bf   :  { %v1450_v40 = vadd.f32 %v6275_v17, %v1441_v23  ;;  %v1579_v17 = vld [vmem:[#allocation8 + $0x270] sm:$0xff]  ;;  %v1554_v23 = vld [vmem:[#allocation8 + $0x1a8] sm:$0xff] }
 0x2c1   :  { %v1452_v27 = vmax.f32 %v1450_v40, 0.0  ;;  %v1553_v40 = vld [vmem:[#allocation8 + $0x1a0] sm:$0xff] }
 0x2c3   :  { %v1472_v45 = vcombine.high %v1452_v27, %v1452_v27  ;;  %v1479_v56 = vrot.slane %v1452_v27, %v7384_v36  ;;  %v1546_v27 = vld [vmem:[#allocation8 + $0x168] sm:$0xff] }
 0x2c5   :  { %v1486_v47 = vrot.slane %v1472_v45, %v7384_v36  ;;  %v1487_v41 = vcombine.high %v1479_v56, %v1479_v56  ;;  %v1545_v45 = vld [vmem:[#allocation8 + $0x160] sm:$0xff] }
 0x2c7   :  { %v1488_v35 = vcombine.high %v1486_v47, %v1486_v47  ;;  %v1499_v49 = vmax.f32 %v1479_v56, %v1487_v41  ;;  %v1547_v56 = vld [vmem:[#allocation8 + $0x170] sm:$0xff]  ;;  %v1537_v41 = vld [vmem:[#allocation8 + $0x120] sm:$0xff] }
 0x2c9   :  { %v1500_v55 = vmax.f32 %v1486_v47, %v1488_v35  ;;  %v1540_v47 = vld [vmem:[#allocation8 + $0x138] sm:$0xff]  ;;  %v1530_v35 = vld [vmem:[#allocation8 + $0xe8] sm:$0xff] }
 0x2cb   :  { %v1676_v20 = vcombine.low %v1499_v49, %v1500_v55  ;;  %v1532_v49 = vld [vmem:[#allocation8 + $0xf8] sm:$0xff]  ;;  %v1529_v55 = vld [vmem:[#allocation8 + $0xe0] sm:$0xff] }
 0x2cd   :  { %v1690_v7 = vrot.slane %v1676_v20, %v7384_v36  ;;  %v1522_v20 = vld [vmem:[#allocation8 + $0xa8] sm:$0xff]  ;;  %v7822_v36 = vld [vmem:[%s9688_s9 + $0x30] sm:$0xff] }
 0x2ce   :  { %9934 = vst [vmem:[#allocation38_spill] sm:$0xff] %v7822_v36 }
 0x2cf   :  { %v7462_v21 = vcombine.low %v1683_v50, %v1690_v7  ;;  %v1524_v50 = vld [vmem:[#allocation8 + $0xb8] sm:$0xff]  ;;  %v1521_v7 = vld [vmem:[#allocation8 + $0xa0] sm:$0xff] }
 0x2d1   :  { %1758 = vmatmul.mubr.f32.vlgmr.msra.gmra.mxu1 %v7462_v21  ;;  %1829 = vmatmul.mubr.f32.vlgmr.msra.gmra.mxu0 %v7462_v21 }
 0x2d2   :  { %1836 = vmatpush1.msra.mxu1 %v1625_v29  ;;  %1907 = vmatpush1.msra.mxu0 %v1627_v31  ;;  %v1523_v29 = vld [vmem:[#allocation8 + $0xb0] sm:$0xff]  ;;  %v1514_v31 = vld [vmem:[#allocation8 + $0x68] sm:$0xff] }
 0x2d3   :  { %1837 = vmatprep.subr.mxu1 %v1618_v52  ;;  %1908 = vmatprep.subr.mxu0 %v1620_v51  ;;  %v1516_v52 = vld [vmem:[#allocation8 + $0x78] sm:$0xff]  ;;  %v1513_v51 = vld [vmem:[#allocation8 + $0x60] sm:$0xff] }
 0x2d4   :  { %1838 = vmatpush1.msra.mxu1 %v1617_v53  ;;  %1909 = vmatpush1.msra.mxu0 %v1619_v42  ;;  %v1515_v53 = vld [vmem:[#allocation8 + $0x70] sm:$0xff]  ;;  %v1506_v42 = vld [vmem:[#allocation8 + $0x28] sm:$0xff] }
 0x2d5   :  { %1839 = vmatprep.subr.mxu1 %v1610_v54  ;;  %1910 = vmatprep.subr.mxu0 %v1612_v6  ;;  %v1508_v54 = vld [vmem:[#allocation8 + $0x38] sm:$0xff]  ;;  %v1505_v6 = vld [vmem:[#allocation8 + $0x20] sm:$0xff] }
 0x2d6   :  { %1840 = vmatpush1.msra.mxu1 %v1609_v58  ;;  %1911 = vmatpush1.msra.mxu0 %v1611_v60  ;;  %v1507_v58 = vld [vmem:[#allocation8 + $0x30] sm:$0xff]  ;;  %v7470_v60 = vld [vmem:[%s9688_s9 + $0x1e8] sm:$0xff] }
 0x2d7   :  { %1841 = vmatprep.subr.mxu1 %v1602_v61  ;;  %1912 = vmatprep.subr.mxu0 %v1604_v38  ;;  %v7475_v61 = vld [vmem:[%s9688_s9 + $0x1f8] sm:$0xff]  ;;  %v7481_v38 = vld [vmem:[%s9688_s9 + $0x1e0] sm:$0xff] }
 0x2d8   :  { %1842 = vmatpush1.msra.mxu1 %v1601_v59  ;;  %1913 = vmatpush1.msra.mxu0 %v1603_v46  ;;  %v7486_v59 = vld [vmem:[%s9688_s9 + $0x1f0] sm:$0xff]  ;;  %v7493_v46 = vld [vmem:[%s9688_s9 + $0x1c8] sm:$0xff] }
 0x2d9   :  { %1843 = vmatprep.subr.mxu1 %v1594_v39  ;;  %1914 = vmatprep.subr.mxu0 %v1596_v62  ;;  %v7498_v39 = vld [vmem:[%s9688_s9 + $0x1d8] sm:$0xff]  ;;  %v7505_v62 = vld [vmem:[%s9688_s9 + $0x1c0] sm:$0xff] }
 0x2da   :  { %1844 = vmatpush1.msra.mxu1 %v1593_v9  ;;  %1915 = vmatpush1.msra.mxu0 %v1595_v10  ;;  %v7517_v9 = vld [vmem:[%s9688_s9 + $0x1a8] sm:$0xff]  ;;  %v7522_v10 = vld [vmem:[%s9688_s9 + $0x1b8] sm:$0xff] }
 0x2db   :  { %1845 = vmatprep.subr.mxu1 %v1586_v37  ;;  %1916 = vmatprep.subr.mxu0 %v1588_v13  ;;  %v7529_v37 = vld [vmem:[%s9688_s9 + $0x1a0] sm:$0xff]  ;;  %v7534_v13 = vld [vmem:[%s9688_s9 + $0x1b0] sm:$0xff] }
 0x2dc   :  { %1846 = vmatpush1.msra.mxu1 %v1585_v22  ;;  %1917 = vmatpush1.msra.mxu0 %v1587_v28  ;;  %v7541_v22 = vld [vmem:[%s9688_s9 + $0x188] sm:$0xff]  ;;  %v7546_v28 = vld [vmem:[%s9688_s9 + $0x198] sm:$0xff] }
 0x2dd   :  { %1847 = vmatprep.subr.mxu1 %v1578_v14  ;;  %1918 = vmatprep.subr.mxu0 %v1580_v33  ;;  %v7553_v14 = vld [vmem:[%s9688_s9 + $0x180] sm:$0xff]  ;;  %v7558_v33 = vld [vmem:[%s9688_s9 + $0x190] sm:$0xff] }
 0x2de   :  { %1848 = vmatpush1.msra.mxu1 %v1577_v34  ;;  %1919 = vmatpush1.msra.mxu0 %v1579_v17  ;;  %v7565_v34 = vld [vmem:[%s9688_s9 + $0x168] sm:$0xff]  ;;  %v7570_v17 = vld [vmem:[%s9688_s9 + $0x178] sm:$0xff] }
 0x2df   :  { %1849 = vmatprep.subr.mxu1 %v1570_v18  ;;  %1920 = vmatprep.subr.mxu0 %v1572_v57  ;;  %v7577_v18 = vld [vmem:[%s9688_s9 + $0x160] sm:$0xff]  ;;  %v7582_v57 = vld [vmem:[%s9688_s9 + $0x170] sm:$0xff] }
 0x2e0   :  { %1850 = vmatpush1.msra.mxu1 %v1569_v19  ;;  %1921 = vmatpush1.msra.mxu0 %v1571_v43  ;;  %v7589_v19 = vld [vmem:[%s9688_s9 + $0x148] sm:$0xff]  ;;  %v7594_v43 = vld [vmem:[%s9688_s9 + $0x158] sm:$0xff] }
 0x2e1   :  { %1851 = vmatprep.subr.mxu1 %v1562_v30  ;;  %1922 = vmatprep.subr.mxu0 %v1564_v25  ;;  %v7601_v30 = vld [vmem:[%s9688_s9 + $0x140] sm:$0xff]  ;;  %v7606_v25 = vld [vmem:[%s9688_s9 + $0x150] sm:$0xff] }
 0x2e2   :  { %1852 = vmatpush1.msra.mxu1 %v1561_v8  ;;  %1923 = vmatpush1.msra.mxu0 %v1563_v1  ;;  %v7613_v8 = vld [vmem:[%s9688_s9 + $0x128] sm:$0xff]  ;;  %v7618_v1 = vld [vmem:[%s9688_s9 + $0x138] sm:$0xff] }
 0x2e3   :  { %1853 = vmatprep.subr.mxu1 %v1554_v23  ;;  %1924 = vmatprep.subr.mxu0 %v1556_v32  ;;  %v7625_v23 = vld [vmem:[%s9688_s9 + $0x120] sm:$0xff]  ;;  %v7630_v32 = vld [vmem:[%s9688_s9 + $0x130] sm:$0xff] }
 0x2e4   :  { %1854 = vmatpush1.msra.mxu1 %v1553_v40  ;;  %1925 = vmatpush1.msra.mxu0 %v1555_v0  ;;  %v7637_v40 = vld [vmem:[%s9688_s9 + $0x108] sm:$0xff]  ;;  %v7642_v0 = vld [vmem:[%s9688_s9 + $0x118] sm:$0xff] }
 0x2e5   :  { %1855 = vmatprep.subr.mxu1 %v1546_v27  ;;  %1926 = vmatprep.subr.mxu0 %v1548_v26  ;;  %v7649_v27 = vld [vmem:[%s9688_s9 + $0x100] sm:$0xff]  ;;  %v7654_v26 = vld [vmem:[%s9688_s9 + $0x110] sm:$0xff] }
 0x2e6   :  { %1856 = vmatpush1.msra.mxu1 %v1545_v45  ;;  %1927 = vmatpush1.msra.mxu0 %v1547_v56  ;;  %v7661_v45 = vld [vmem:[%s9688_s9 + $0xe8] sm:$0xff]  ;;  %v7666_v56 = vld [vmem:[%s9688_s9 + $0xf8] sm:$0xff] }
 0x2e7   :  { %1857 = vmatprep.subr.mxu1 %v1538_v24  ;;  %1928 = vmatprep.subr.mxu0 %v1540_v47  ;;  %v7673_v24 = vld [vmem:[%s9688_s9 + $0xe0] sm:$0xff]  ;;  %v7678_v47 = vld [vmem:[%s9688_s9 + $0xf0] sm:$0xff] }
 0x2e8   :  { %1858 = vmatpush1.msra.mxu1 %v1537_v41  ;;  %1929 = vmatpush1.msra.mxu0 %v1539_v44  ;;  %v7685_v41 = vld [vmem:[%s9688_s9 + $0xc8] sm:$0xff]  ;;  %v7690_v44 = vld [vmem:[%s9688_s9 + $0xd8] sm:$0xff] }
 0x2e9   :  { %1859 = vmatprep.subr.mxu1 %v1530_v35  ;;  %1930 = vmatprep.subr.mxu0 %v1532_v49  ;;  %v7697_v35 = vld [vmem:[%s9688_s9 + $0xc0] sm:$0xff]  ;;  %v7702_v49 = vld [vmem:[%s9688_s9 + $0xd0] sm:$0xff] }
 0x2ea   :  { %1860 = vmatpush1.msra.mxu1 %v1529_v55  ;;  %1931 = vmatpush1.msra.mxu0 %v1531_v48  ;;  %v7709_v55 = vld [vmem:[%s9688_s9 + $0xa8] sm:$0xff]  ;;  %v7714_v48 = vld [vmem:[%s9688_s9 + $0xb8] sm:$0xff] }
 0x2eb   :  { %1861 = vmatprep.subr.mxu1 %v1522_v20  ;;  %1932 = vmatprep.subr.mxu0 %v1524_v50  ;;  %v7721_v20 = vld [vmem:[%s9688_s9 + $0xa0] sm:$0xff]  ;;  %v7726_v50 = vld [vmem:[%s9688_s9 + $0xb0] sm:$0xff] }
 0x2ec   :  { %1862 = vmatpush1.msra.mxu1 %v1521_v7  ;;  %1933 = vmatpush1.msra.mxu0 %v1523_v29  ;;  %v7733_v7 = vld [vmem:[%s9688_s9 + $0x88] sm:$0xff]  ;;  %v7738_v29 = vld [vmem:[%s9688_s9 + $0x98] sm:$0xff] }
 0x2ed   :  { %1863 = vmatprep.subr.mxu1 %v1514_v31  ;;  %1934 = vmatprep.subr.mxu0 %v1516_v52  ;;  %v7745_v31 = vld [vmem:[%s9688_s9 + $0x80] sm:$0xff]  ;;  %v7750_v52 = vld [vmem:[%s9688_s9 + $0x90] sm:$0xff] }
 0x2ee   :  { %1864 = vmatpush1.msra.mxu1 %v1513_v51  ;;  %1935 = vmatpush1.msra.mxu0 %v1515_v53  ;;  %v7757_v51 = vld [vmem:[%s9688_s9 + $0x68] sm:$0xff]  ;;  %v7762_v53 = vld [vmem:[%s9688_s9 + $0x78] sm:$0xff] }
 0x2ef   :  { %1865 = vmatprep.subr.mxu1 %v1506_v42  ;;  %1936 = vmatprep.subr.mxu0 %v1508_v54  ;;  %v7769_v42 = vld [vmem:[%s9688_s9 + $0x60] sm:$0xff]  ;;  %v7774_v54 = vld [vmem:[%s9688_s9 + $0x70] sm:$0xff] }
 0x2f0   :  { %1866 = vmatpush1.msra.mxu1 %v1505_v6  ;;  %1899 = vmatprep.mubr.f32.mxu1 %v9702_v63  ;;  %v7781_v6 = vld [vmem:[%s9688_s9 + $0x48] sm:$0xff] }
 0x2f1   :  { %1937 = vmatpush1.msra.mxu0 %v1507_v58  ;;  %1970 = vmatprep.mubr.f32.mxu0 %v9702_v63  ;;  %9927 = vst [vmem:[#allocation31_spill] sm:$0xff] %v7781_v6  ;;  %v7786_v58 = vld [vmem:[%s9688_s9 + $0x58] sm:$0xff]  ;;  %v7793_v63 = vld [vmem:[%s9688_s9 + $0x40] sm:$0xff] }
 0x2f2   :  { %1900 = vmatmul.mubr.f32.vlgmr.msra.gmra.mxu1 %v7462_v21  ;;  %1971 = vmatmul.mubr.f32.vlgmr.msra.gmra.mxu0 %v7462_v21  ;;  %v7510_v21 = vld [vmem:[%s9688_s9 + $0x1d0] sm:$0xff]  ;;  %9928 = vst [vmem:[#allocation32_spill] sm:$0xff] %v7786_v58  ;;  %9929 = vst [vmem:[#allocation33_spill] sm:$0xff] %v7793_v63 }
 0x2f3   :  { %2140 = vmatprep.subr.mxu1 %v7470_v60  ;;  %2211 = vmatprep.subr.mxu0 %v7475_v61 }
 0x2f4   :  { %2141 = vmatpush1.msra.mxu1 %v7481_v38  ;;  %2212 = vmatpush1.msra.mxu0 %v7486_v59 }
 0x2f5   :  { %2142 = vmatprep.subr.mxu1 %v7493_v46  ;;  %2213 = vmatprep.subr.mxu0 %v7498_v39 }
 0x2f6   :  { %2143 = vmatpush1.msra.mxu1 %v7505_v62  ;;  %2214 = vmatpush1.msra.mxu0 %v7510_v21 }
 0x2f7   :  { %2144 = vmatprep.subr.mxu1 %v7517_v9  ;;  %2215 = vmatprep.subr.mxu0 %v7522_v10 }
 0x2f8   :  { %2145 = vmatpush1.msra.mxu1 %v7529_v37  ;;  %2216 = vmatpush1.msra.mxu0 %v7534_v13 }
 0x2f9   :  { %2146 = vmatprep.subr.mxu1 %v7541_v22  ;;  %2217 = vmatprep.subr.mxu0 %v7546_v28 }
 0x2fa   :  { %2147 = vmatpush1.msra.mxu1 %v7553_v14  ;;  %2218 = vmatpush1.msra.mxu0 %v7558_v33 }
 0x2fb   :  { %2148 = vmatprep.subr.mxu1 %v7565_v34  ;;  %2219 = vmatprep.subr.mxu0 %v7570_v17 }
 0x2fc   :  { %2149 = vmatpush1.msra.mxu1 %v7577_v18  ;;  %2220 = vmatpush1.msra.mxu0 %v7582_v57 }
 0x2fd   :  { %2150 = vmatprep.subr.mxu1 %v7589_v19  ;;  %2221 = vmatprep.subr.mxu0 %v7594_v43 }
 0x2fe   :  { %2151 = vmatpush1.msra.mxu1 %v7601_v30  ;;  %2222 = vmatpush1.msra.mxu0 %v7606_v25 }
 0x2ff   :  { %2152 = vmatprep.subr.mxu1 %v7613_v8  ;;  %2223 = vmatprep.subr.mxu0 %v7618_v1 }
 0x300   :  { %2153 = vmatpush1.msra.mxu1 %v7625_v23  ;;  %2224 = vmatpush1.msra.mxu0 %v7630_v32 }
 0x301   :  { %2154 = vmatprep.subr.mxu1 %v7637_v40  ;;  %2225 = vmatprep.subr.mxu0 %v7642_v0 }
 0x302   :  { %2155 = vmatpush1.msra.mxu1 %v7649_v27  ;;  %2226 = vmatpush1.msra.mxu0 %v7654_v26 }
 0x303   :  { %2156 = vmatprep.subr.mxu1 %v7661_v45  ;;  %2227 = vmatprep.subr.mxu0 %v7666_v56 }
 0x304   :  { %2157 = vmatpush1.msra.mxu1 %v7673_v24  ;;  %2228 = vmatpush1.msra.mxu0 %v7678_v47 }
 0x305   :  { %2158 = vmatprep.subr.mxu1 %v7685_v41  ;;  %2229 = vmatprep.subr.mxu0 %v7690_v44 }
 0x306   :  { %2159 = vmatpush1.msra.mxu1 %v7697_v35  ;;  %2230 = vmatpush1.msra.mxu0 %v7702_v49 }
 0x307   :  { %2160 = vmatprep.subr.mxu1 %v7709_v55  ;;  %2231 = vmatprep.subr.mxu0 %v7714_v48 }
 0x308   :  { %2161 = vmatpush1.msra.mxu1 %v7721_v20  ;;  %2232 = vmatpush1.msra.mxu0 %v7726_v50 }
 0x309   :  { %2162 = vmatprep.subr.mxu1 %v7733_v7  ;;  %2233 = vmatprep.subr.mxu0 %v7738_v29 }
 0x30a   :  { %2163 = vmatpush1.msra.mxu1 %v7745_v31  ;;  %2234 = vmatpush1.msra.mxu0 %v7750_v52 }
 0x30b   :  { %2164 = vmatprep.subr.mxu1 %v7757_v51  ;;  %2235 = vmatprep.subr.mxu0 %v7762_v53 }
 0x30c   :  { %2165 = vmatpush1.msra.mxu1 %v7769_v42  ;;  %2236 = vmatpush1.msra.mxu0 %v7774_v54 }
 0x30d   :  { %2166 = vmatprep.subr.mxu1 %v7781_v6  ;;  %2237 = vmatprep.subr.mxu0 %v7786_v58  ;;  %v7880_v58 = vld [vmem:[#allocation10 + $0x1b8] sm:$0xff]  ;;  %v7884_v6 = vld [vmem:[#allocation10 + $0x1a0] sm:$0xff] }
 0x30e   :  { %2167 = vmatpush1.msra.mxu1 %v7793_v63  ;;  %2238 = vmatpush1.msra.mxu0 %v7798_v15  ;;  %v7856_v15 = vld [vmem:[#allocation10 + $0x1f8] sm:$0xff]  ;;  %v7878_v63 = vld [vmem:[#allocation10 + $0x1a8] sm:$0xff]  ;;  %9949 = vst [vmem:[#allocation52_spill] sm:$0xff] %v7880_v58  ;;  %9950 = vst [vmem:[#allocation53_spill] sm:$0xff] %v7884_v6 }
 0x30f   :  { %2168 = vmatprep.subr.mxu1 %v7805_v11  ;;  %2239 = vmatprep.subr.mxu0 %v7810_v16  ;;  %v9939_v16 = vmov 0.0   ;;  %v7854_v11 = vld [vmem:[#allocation10 + $0x1e8] sm:$0xff]  ;;  %9941 = vst [vmem:[#allocation44_spill] sm:$0xff] %v7856_v15  ;;  %9948 = vst [vmem:[#allocation51_spill] sm:$0xff] %v7878_v63 }
 0x310   :  { %2169 = vmatpush1.msra.mxu1 %v7817_v12  ;;  %2240 = vmatpush1.msra.mxu0 %v7822_v36  ;;  %9940 = vst [vmem:[#allocation43_spill] sm:$0xff] %v7854_v11  ;;  %v7860_v36 = vld [vmem:[#allocation10 + $0x1e0] sm:$0xff]  ;;  %v7862_v12 = vld [vmem:[#allocation10 + $0x1f0] sm:$0xff] }
 0x311   :  { %2170 = vmatprep.subr.mxu1 %v7829_v4  ;;  %2241 = vmatprep.subr.mxu0 %v7834_v5  ;;  %9942 = vst [vmem:[#allocation45_spill] sm:$0xff] %v7860_v36  ;;  %9943 = vst [vmem:[#allocation46_spill] sm:$0xff] %v7862_v12  ;;  %v7866_v5 = vld [vmem:[#allocation10 + $0x1c8] sm:$0xff]  ;;  %v7872_v4 = vld [vmem:[#allocation10 + $0x1c0] sm:$0xff] }
 0x312   :  { %2171 = vmatpush1.msra.mxu1 %v7841_v2  ;;  %2204 = vmatprep.mubr.f32.mxu1 %v9939_v16  ;;  %9944 = vst [vmem:[#allocation47_spill] sm:$0xff] %v7866_v5  ;;  %v7868_v2 = vld [vmem:[#allocation10 + $0x1d8] sm:$0xff]  ;;  %9946 = vst [vmem:[#allocation49_spill] sm:$0xff] %v7872_v4 }
 0x313   :  { %2242 = vmatpush1.msra.mxu0 %v7848_v3  ;;  %2275 = vmatprep.mubr.f32.mxu0 %v9939_v16  ;;  %9945 = vst [vmem:[#allocation48_spill] sm:$0xff] %v7868_v2  ;;  %v7874_v3 = vld [vmem:[#allocation10 + $0x1d0] sm:$0xff] }
 0x314   :  { %2205 = vmatmul.mubr.f32.vlgmr.msra.gmra.mxu1 %v9939_v16  ;;  %2276 = vmatmul.mubr.f32.vlgmr.msra.gmra.mxu0 %v9939_v16  ;;  %9947 = vst [vmem:[#allocation50_spill] sm:$0xff] %v7874_v3 }
 0x315   :  { %2369 = vmatprep.subr.mxu1 %v7854_v11  ;;  %2440 = vmatprep.subr.mxu0 %v7856_v15  ;;  %v7886_v11 = vld [vmem:[#allocation10 + $0x1b0] sm:$0xff]  ;;  %v7890_v15 = vld [vmem:[#allocation10 + $0x188] sm:$0xff] }
 0x316   :  { %2370 = vmatpush1.msra.mxu1 %v7860_v36  ;;  %2441 = vmatpush1.msra.mxu0 %v7862_v12  ;;  %9951 = vst [vmem:[#allocation54_spill] sm:$0xff] %v7886_v11  ;;  %9952 = vst [vmem:[#allocation55_spill] sm:$0xff] %v7890_v15  ;;  %v7892_v36 = vld [vmem:[#allocation10 + $0x198] sm:$0xff]  ;;  %v7896_v12 = vld [vmem:[#allocation10 + $0x180] sm:$0xff] }
 0x317   :  { %2371 = vmatprep.subr.mxu1 %v7866_v5  ;;  %2442 = vmatprep.subr.mxu0 %v7868_v2  ;;  %9953 = vst [vmem:[#allocation56_spill] sm:$0xff] %v7892_v36  ;;  %9954 = vst [vmem:[#allocation57_spill] sm:$0xff] %v7896_v12  ;;  %v7898_v5 = vld [vmem:[#allocation10 + $0x190] sm:$0xff]  ;;  %v7902_v2 = vld [vmem:[#allocation10 + $0x168] sm:$0xff] }
 0x318   :  { %2372 = vmatpush1.msra.mxu1 %v7872_v4  ;;  %2443 = vmatpush1.msra.mxu0 %v7874_v3  ;;  %9955 = vst [vmem:[#allocation58_spill] sm:$0xff] %v7898_v5  ;;  %9956 = vst [vmem:[#allocation59_spill] sm:$0xff] %v7902_v2  ;;  %v7904_v4 = vld [vmem:[#allocation10 + $0x178] sm:$0xff]  ;;  %v7908_v3 = vld [vmem:[#allocation10 + $0x160] sm:$0xff] }
 0x319   :  { %2373 = vmatprep.subr.mxu1 %v7878_v63  ;;  %2444 = vmatprep.subr.mxu0 %v7880_v58  ;;  %9957 = vst [vmem:[#allocation60_spill] sm:$0xff] %v7904_v4  ;;  %9958 = vst [vmem:[#allocation61_spill] sm:$0xff] %v7908_v3  ;;  %v7910_v63 = vld [vmem:[#allocation10 + $0x170] sm:$0xff]  ;;  %v7914_v58 = vld [vmem:[#allocation10 + $0x148] sm:$0xff] }
 0x31a   :  { %2374 = vmatpush1.msra.mxu1 %v7884_v6  ;;  %2445 = vmatpush1.msra.mxu0 %v7886_v11  ;;  %9959 = vst [vmem:[#allocation62_spill] sm:$0xff] %v7910_v63  ;;  %9960 = vst [vmem:[#allocation63_spill] sm:$0xff] %v7914_v58  ;;  %v7916_v6 = vld [vmem:[#allocation10 + $0x158] sm:$0xff]  ;;  %v7920_v11 = vld [vmem:[#allocation10 + $0x140] sm:$0xff] }
 0x31b   :  { %2375 = vmatprep.subr.mxu1 %v7890_v15  ;;  %2446 = vmatprep.subr.mxu0 %v7892_v36  ;;  %9961 = vst [vmem:[#allocation64_spill] sm:$0xff] %v7916_v6  ;;  %9962 = vst [vmem:[#allocation65_spill] sm:$0xff] %v7920_v11  ;;  %v7922_v15 = vld [vmem:[#allocation10 + $0x150] sm:$0xff]  ;;  %v7926_v36 = vld [vmem:[#allocation10 + $0x128] sm:$0xff] }
 0x31c   :  { %2376 = vmatpush1.msra.mxu1 %v7896_v12  ;;  %2447 = vmatpush1.msra.mxu0 %v7898_v5  ;;  %9963 = vst [vmem:[#allocation66_spill] sm:$0xff] %v7922_v15  ;;  %9964 = vst [vmem:[#allocation67_spill] sm:$0xff] %v7926_v36  ;;  %v7928_v12 = vld [vmem:[#allocation10 + $0x138] sm:$0xff]  ;;  %v7932_v5 = vld [vmem:[#allocation10 + $0x120] sm:$0xff] }
 0x31d   :  { %2377 = vmatprep.subr.mxu1 %v7902_v2  ;;  %2448 = vmatprep.subr.mxu0 %v7904_v4  ;;  %9965 = vst [vmem:[#allocation68_spill] sm:$0xff] %v7928_v12  ;;  %9966 = vst [vmem:[#allocation69_spill] sm:$0xff] %v7932_v5  ;;  %v7934_v2 = vld [vmem:[#allocation10 + $0x130] sm:$0xff]  ;;  %v7938_v4 = vld [vmem:[#allocation10 + $0x108] sm:$0xff] }
 0x31e   :  { %2378 = vmatpush1.msra.mxu1 %v7908_v3  ;;  %2449 = vmatpush1.msra.mxu0 %v7910_v63  ;;  %9967 = vst [vmem:[#allocation70_spill] sm:$0xff] %v7934_v2  ;;  %9968 = vst [vmem:[#allocation71_spill] sm:$0xff] %v7938_v4  ;;  %v7940_v3 = vld [vmem:[#allocation10 + $0x118] sm:$0xff]  ;;  %v7944_v63 = vld [vmem:[#allocation10 + $0x100] sm:$0xff] }
 0x31f   :  { %2379 = vmatprep.subr.mxu1 %v7914_v58  ;;  %2450 = vmatprep.subr.mxu0 %v7916_v6  ;;  %9969 = vst [vmem:[#allocation72_spill] sm:$0xff] %v7940_v3  ;;  %9970 = vst [vmem:[#allocation73_spill] sm:$0xff] %v7944_v63  ;;  %v7946_v58 = vld [vmem:[#allocation10 + $0x110] sm:$0xff]  ;;  %v7950_v6 = vld [vmem:[#allocation10 + $0xe8] sm:$0xff] }
 0x320   :  { %2380 = vmatpush1.msra.mxu1 %v7920_v11  ;;  %2451 = vmatpush1.msra.mxu0 %v7922_v15  ;;  %9971 = vst [vmem:[#allocation74_spill] sm:$0xff] %v7946_v58  ;;  %9972 = vst [vmem:[#allocation75_spill] sm:$0xff] %v7950_v6  ;;  %v7952_v11 = vld [vmem:[#allocation10 + $0xf8] sm:$0xff]  ;;  %v7956_v15 = vld [vmem:[#allocation10 + $0xe0] sm:$0xff] }
 0x321   :  { %2381 = vmatprep.subr.mxu1 %v7926_v36  ;;  %2452 = vmatprep.subr.mxu0 %v7928_v12  ;;  %9973 = vst [vmem:[#allocation76_spill] sm:$0xff] %v7952_v11  ;;  %9974 = vst [vmem:[#allocation77_spill] sm:$0xff] %v7956_v15  ;;  %v7958_v36 = vld [vmem:[#allocation10 + $0xf0] sm:$0xff]  ;;  %v7962_v12 = vld [vmem:[#allocation10 + $0xc8] sm:$0xff] }
 0x322   :  { %2382 = vmatpush1.msra.mxu1 %v7932_v5  ;;  %2453 = vmatpush1.msra.mxu0 %v7934_v2  ;;  %9975 = vst [vmem:[#allocation78_spill] sm:$0xff] %v7958_v36  ;;  %9976 = vst [vmem:[#allocation79_spill] sm:$0xff] %v7962_v12  ;;  %v7964_v5 = vld [vmem:[#allocation10 + $0xd8] sm:$0xff]  ;;  %v7968_v2 = vld [vmem:[#allocation10 + $0xc0] sm:$0xff] }
 0x323   :  { %2383 = vmatprep.subr.mxu1 %v7938_v4  ;;  %2454 = vmatprep.subr.mxu0 %v7940_v3  ;;  %9977 = vst [vmem:[#allocation80_spill] sm:$0xff] %v7964_v5  ;;  %9978 = vst [vmem:[#allocation81_spill] sm:$0xff] %v7968_v2  ;;  %v7970_v4 = vld [vmem:[#allocation10 + $0xd0] sm:$0xff]  ;;  %v7974_v3 = vld [vmem:[#allocation10 + $0xa8] sm:$0xff] }
 0x324   :  { %2384 = vmatpush1.msra.mxu1 %v7944_v63  ;;  %2455 = vmatpush1.msra.mxu0 %v7946_v58  ;;  %9979 = vst [vmem:[#allocation82_spill] sm:$0xff] %v7970_v4  ;;  %9980 = vst [vmem:[#allocation83_spill] sm:$0xff] %v7974_v3  ;;  %v7976_v63 = vld [vmem:[#allocation10 + $0xb8] sm:$0xff]  ;;  %v7980_v58 = vld [vmem:[#allocation10 + $0xa0] sm:$0xff] }
 0x325   :  { %2385 = vmatprep.subr.mxu1 %v7950_v6  ;;  %2456 = vmatprep.subr.mxu0 %v7952_v11  ;;  %9981 = vst [vmem:[#allocation84_spill] sm:$0xff] %v7976_v63  ;;  %9982 = vst [vmem:[#allocation85_spill] sm:$0xff] %v7980_v58  ;;  %v7982_v6 = vld [vmem:[#allocation10 + $0xb0] sm:$0xff]  ;;  %v7986_v11 = vld [vmem:[#allocation10 + $0x88] sm:$0xff] }
 0x326   :  { %2386 = vmatpush1.msra.mxu1 %v7956_v15  ;;  %2457 = vmatpush1.msra.mxu0 %v7958_v36  ;;  %9983 = vst [vmem:[#allocation86_spill] sm:$0xff] %v7982_v6  ;;  %9984 = vst [vmem:[#allocation87_spill] sm:$0xff] %v7986_v11  ;;  %v7988_v15 = vld [vmem:[#allocation10 + $0x98] sm:$0xff]  ;;  %v7992_v36 = vld [vmem:[#allocation10 + $0x80] sm:$0xff] }
 0x327   :  { %2387 = vmatprep.subr.mxu1 %v7962_v12  ;;  %2458 = vmatprep.subr.mxu0 %v7964_v5  ;;  %9985 = vst [vmem:[#allocation88_spill] sm:$0xff] %v7988_v15  ;;  %9986 = vst [vmem:[#allocation89_spill] sm:$0xff] %v7992_v36  ;;  %v7994_v12 = vld [vmem:[#allocation10 + $0x90] sm:$0xff]  ;;  %v7998_v5 = vld [vmem:[#allocation10 + $0x68] sm:$0xff] }
 0x328   :  { %2388 = vmatpush1.msra.mxu1 %v7968_v2  ;;  %2459 = vmatpush1.msra.mxu0 %v7970_v4  ;;  %9987 = vst [vmem:[#allocation90_spill] sm:$0xff] %v7994_v12  ;;  %9988 = vst [vmem:[#allocation91_spill] sm:$0xff] %v7998_v5  ;;  %v8000_v2 = vld [vmem:[#allocation10 + $0x78] sm:$0xff]  ;;  %v8004_v4 = vld [vmem:[#allocation10 + $0x60] sm:$0xff] }
 0x329   :  { %2389 = vmatprep.subr.mxu1 %v7974_v3  ;;  %2460 = vmatprep.subr.mxu0 %v7976_v63  ;;  %9989 = vst [vmem:[#allocation92_spill] sm:$0xff] %v8000_v2  ;;  %9990 = vst [vmem:[#allocation93_spill] sm:$0xff] %v8004_v4  ;;  %v8006_v3 = vld [vmem:[#allocation10 + $0x70] sm:$0xff]  ;;  %v8010_v63 = vld [vmem:[#allocation10 + $0x48] sm:$0xff] }
 0x32a   :  { %2390 = vmatpush1.msra.mxu1 %v7980_v58  ;;  %2461 = vmatpush1.msra.mxu0 %v7982_v6  ;;  %9991 = vst [vmem:[#allocation94_spill] sm:$0xff] %v8006_v3  ;;  %v8012_v58 = vld [vmem:[#allocation10 + $0x58] sm:$0xff]  ;;  %v8016_v6 = vld [vmem:[#allocation10 + $0x40] sm:$0xff] }
 0x32b   :  { %2391 = vmatprep.subr.mxu1 %v7986_v11  ;;  %2462 = vmatprep.subr.mxu0 %v7988_v15  ;;  %9992 = vst [vmem:[#allocation95_spill] sm:$0xff] %v8012_v58  ;;  %v8018_v11 = vld [vmem:[#allocation10 + $0x50] sm:$0xff]  ;;  %v8022_v15 = vld [vmem:[#allocation10 + $0x28] sm:$0xff] }
 0x32c   :  { %2392 = vmatpush1.msra.mxu1 %v7992_v36  ;;  %2463 = vmatpush1.msra.mxu0 %v7994_v12  ;;  %v8024_v36 = vld [vmem:[#allocation10 + $0x38] sm:$0xff]  ;;  %v8028_v12 = vld [vmem:[#allocation10 + $0x20] sm:$0xff] }
 0x32d   :  { %2393 = vmatprep.subr.mxu1 %v7998_v5  ;;  %2464 = vmatprep.subr.mxu0 %v8000_v2  ;;  %v8030_v5 = vld [vmem:[#allocation10 + $0x30] sm:$0xff]  ;;  %v8034_v2 = vld [vmem:[#allocation10 + $0x8] sm:$0xff] }
 0x32e   :  { %2394 = vmatpush1.msra.mxu1 %v8004_v4  ;;  %2465 = vmatpush1.msra.mxu0 %v8006_v3  ;;  %v8036_v4 = vld [vmem:[#allocation10 + $0x18] sm:$0xff]  ;;  %v8040_v3 = vld [vmem:[#allocation10] sm:$0xff] }
 0x32f   :  { %2395 = vmatprep.subr.mxu1 %v8010_v63  ;;  %2466 = vmatprep.subr.mxu0 %v8012_v58  ;;  %v8044_v58 = vld [vmem:[#allocation10 + $0x10] sm:$0xff] }
 0x330   :  { %2396 = vmatpush1.msra.mxu1 %v8016_v6  ;;  %2467 = vmatpush1.msra.mxu0 %v8018_v11 }
 0x331   :  { %2397 = vmatprep.subr.mxu1 %v8022_v15  ;;  %2468 = vmatprep.subr.mxu0 %v8024_v36 }
 0x332   :  { %2398 = vmatpush1.msra.mxu1 %v8028_v12  ;;  %2469 = vmatpush1.msra.mxu0 %v8030_v5 }
 0x333   :  { %2399 = vmatprep.subr.mxu1 %v8034_v2  ;;  %2470 = vmatprep.subr.mxu0 %v8036_v4 }
 0x334   :  { %2400 = vmatpush1.msra.mxu1 %v8040_v3  ;;  %2433 = vmatprep.mubr.f32.mxu1 %v9939_v16 }
 0x335   :  { %2471 = vmatpush1.msra.mxu0 %v8044_v58  ;;  %2504 = vmatprep.mubr.f32.mxu0 %v9939_v16 }
 0x336   :  { %2434 = vmatmul.mubr.f32.vlgmr.msra.gmra.mxu1 %v9939_v16  ;;  %2505 = vmatmul.mubr.f32.vlgmr.msra.gmra.mxu0 %v9939_v16 }
 0x337   :  { %2678 = vmatprep.subr.mxu1 %v7470_v60  ;;  %2749 = vmatprep.subr.mxu0 %v7475_v61  ;;  %v9993_v60 = vld [vmem:[#allocation31_spill] sm:$0xff]  ;;  %v9994_v61 = vld [vmem:[#allocation32_spill] sm:$0xff] }
 0x338   :  { %2679 = vmatpush1.msra.mxu1 %v7481_v38  ;;  %2750 = vmatpush1.msra.mxu0 %v7486_v59  ;;  %v9995_v38 = vld [vmem:[#allocation33_spill] sm:$0xff]  ;;  %v9996_v59 = vld [vmem:[#allocation34_spill] sm:$0xff] }
 0x339   :  { %2680 = vmatprep.subr.mxu1 %v7493_v46  ;;  %2751 = vmatprep.subr.mxu0 %v7498_v39  ;;  %v9997_v46 = vld [vmem:[#allocation35_spill] sm:$0xff]  ;;  %v9998_v39 = vld [vmem:[#allocation36_spill] sm:$0xff] }
 0x33a   :  { %2681 = vmatpush1.msra.mxu1 %v7505_v62  ;;  %2752 = vmatpush1.msra.mxu0 %v7510_v21  ;;  %v9999_v62 = vld [vmem:[#allocation37_spill] sm:$0xff]  ;;  %v10000_v21 = vld [vmem:[#allocation38_spill] sm:$0xff] }
 0x33b   :  { %2682 = vmatprep.subr.mxu1 %v7517_v9  ;;  %2753 = vmatprep.subr.mxu0 %v7522_v10  ;;  %v10001_v9 = vld [vmem:[#allocation39_spill] sm:$0xff]  ;;  %v10002_v10 = vld [vmem:[#allocation40_spill] sm:$0xff] }
 0x33c   :  { %2683 = vmatpush1.msra.mxu1 %v7529_v37  ;;  %2754 = vmatpush1.msra.mxu0 %v7534_v13  ;;  %v10003_v37 = vld [vmem:[#allocation41_spill] sm:$0xff]  ;;  %v10004_v13 = vld [vmem:[#allocation42_spill] sm:$0xff] }
 0x33d   :  { %2684 = vmatprep.subr.mxu1 %v7541_v22  ;;  %2755 = vmatprep.subr.mxu0 %v7546_v28  ;;  %v10005_v22 = vld [vmem:[#allocation43_spill] sm:$0xff]  ;;  %v10006_v28 = vld [vmem:[#allocation44_spill] sm:$0xff] }
 0x33e   :  { %2685 = vmatpush1.msra.mxu1 %v7553_v14  ;;  %2756 = vmatpush1.msra.mxu0 %v7558_v33  ;;  %v1629_v14 = vld [vmem:[%s9687_s8] sm:$0xff] }
 0x33f   :  { %2686 = vmatprep.subr.mxu1 %v7565_v34  ;;  %2757 = vmatprep.subr.mxu0 %v7570_v17  ;;  %v10007_v33 = vld [vmem:[#allocation23_spill] sm:$0xff]  ;;  %v10008_v17 = vld [vmem:[#allocation22_spill] sm:$0xff] }
 0x340   :  { %2687 = vmatpush1.msra.mxu1 %v7577_v18  ;;  %2758 = vmatpush1.msra.mxu0 %v7582_v57  ;;  %v1634_v34 = vrot.slane %v1629_v14, %v10007_v33  ;;  %v1642_v18 = vrot.slane %v1629_v14, %v10008_v17  ;;  %v10009_v57 = vld [vmem:[#allocation25_spill] sm:$0xff]  ;;  %v8553_v17 = vld [vmem:[%s9688_s9 + $0x78] sm:$0xff] }
 0x341   :  { %2688 = vmatprep.subr.mxu1 %v7589_v19  ;;  %2759 = vmatprep.subr.mxu0 %v7594_v43  ;;  %v1638_v19 = vrot.slane %v1629_v14, %v10009_v57  ;;  %v10010_v43 = vld [vmem:[#allocation24_spill] sm:$0xff]  ;;  %v8565_v57 = vld [vmem:[%s9688_s9 + $0x70] sm:$0xff] }
 0x342   :  { %2689 = vmatpush1.msra.mxu1 %v7601_v30  ;;  %2760 = vmatpush1.msra.mxu0 %v7606_v25  ;;  %v1646_v30 = vrot.slane %v1629_v14, %v10010_v43  ;;  %v8560_v43 = vld [vmem:[%s9688_s9 + $0x60] sm:$0xff]  ;;  %v8572_v33 = vld [vmem:[%s9688_s9 + $0x48] sm:$0xff] }
 0x343   :  { %2690 = vmatprep.subr.mxu1 %v7613_v8  ;;  %2761 = vmatprep.subr.mxu0 %v7618_v1 }
 0x344   :  { %2691 = vmatpush1.msra.mxu1 %v7625_v23  ;;  %2762 = vmatpush1.msra.mxu0 %v7630_v32 }
 0x345   :  { %2692 = vmatprep.subr.mxu1 %v7637_v40  ;;  %2763 = vmatprep.subr.mxu0 %v7642_v0 }
 0x346   :  { %2693 = vmatpush1.msra.mxu1 %v7649_v27  ;;  %2764 = vmatpush1.msra.mxu0 %v7654_v26 }
 0x347   :  { %2694 = vmatprep.subr.mxu1 %v7661_v45  ;;  %2765 = vmatprep.subr.mxu0 %v7666_v56 }
 0x348   :  { %2695 = vmatpush1.msra.mxu1 %v7673_v24  ;;  %2766 = vmatpush1.msra.mxu0 %v7678_v47  ;;  %v10011_v47 = vld [vmem:[#allocation30_spill] sm:$0xff] }
 0x349   :  { %2696 = vmatprep.subr.mxu1 %v7685_v41  ;;  %2767 = vmatprep.subr.mxu0 %v7690_v44 }
 0x34a   :  { %2697 = vmatpush1.msra.mxu1 %v7697_v35  ;;  %2768 = vmatpush1.msra.mxu0 %v7702_v49 }
 0x34b   :  { %2698 = vmatprep.subr.mxu1 %v7709_v55  ;;  %2769 = vmatprep.subr.mxu0 %v7714_v48  ;;  %v8536_v48 = vld [vmem:[%s9688_s9 + $0x80] sm:$0xff]  ;;  %v8548_v55 = vld [vmem:[%s9688_s9 + $0x68] sm:$0xff] }
 0x34c   :  { %2699 = vmatpush1.msra.mxu1 %v7721_v20  ;;  %2770 = vmatpush1.msra.mxu0 %v7726_v50  ;;  %v10014_v50 = vld [vmem:[#allocation27_spill] sm:$0xff]  ;;  %v8524_v20 = vld [vmem:[%s9688_s9 + $0x88] sm:$0xff]  ;;  %10079 = vst [vmem:[#allocation43_spill] sm:$0xff] %v8536_v48  ;;  %10081 = vst [vmem:[#allocation30_spill] sm:$0xff] %v8548_v55 }
 0x34d   :  { %2700 = vmatprep.subr.mxu1 %v7733_v7  ;;  %2771 = vmatprep.subr.mxu0 %v7738_v29  ;;  %v1650_v7 = vrot.slane %v1629_v14, %v10014_v50  ;;  %v10015_v29 = vld [vmem:[#allocation29_spill] sm:$0xff]  ;;  %10077 = vst [vmem:[#allocation41_spill] sm:$0xff] %v8524_v20  ;;  %10082 = vst [vmem:[#allocation27_spill] sm:$0xff] %v8553_v17 }
 0x34e   :  { %2701 = vmatpush1.msra.mxu1 %v7745_v31  ;;  %2772 = vmatpush1.msra.mxu0 %v7750_v52  ;;  %v1658_v31 = vrot.slane %v1629_v14, %v10015_v29  ;;  %v10016_v52 = vld [vmem:[#allocation26_spill] sm:$0xff]  ;;  %10083 = vst [vmem:[#allocation29_spill] sm:$0xff] %v8560_v43 }
 0x34f   :  { %2702 = vmatprep.subr.mxu1 %v7757_v51  ;;  %2773 = vmatprep.subr.mxu0 %v7762_v53  ;;  %v1654_v51 = vrot.slane %v1629_v14, %v10016_v52  ;;  %v10017_v53 = vld [vmem:[#allocation28_spill] sm:$0xff]  ;;  %10084 = vst [vmem:[#allocation26_spill] sm:$0xff] %v8565_v57 }
 0x350   :  { %2703 = vmatpush1.msra.mxu1 %v7769_v42  ;;  %2774 = vmatpush1.msra.mxu0 %v7774_v54  ;;  %v1662_v42 = vrot.slane %v1629_v14, %v10017_v53  ;;  %10085 = vst [vmem:[#allocation28_spill] sm:$0xff] %v8572_v33 }
 0x351   :  { %2704 = vmatprep.subr.mxu1 %v9993_v60  ;;  %2775 = vmatprep.subr.mxu0 %v9994_v61 }
 0x352   :  { %2705 = vmatpush1.msra.mxu1 %v9995_v38  ;;  %2776 = vmatpush1.msra.mxu0 %v9996_v59 }
 0x353   :  { %2706 = vmatprep.subr.mxu1 %v9997_v46  ;;  %2777 = vmatprep.subr.mxu0 %v9998_v39 }
 0x354   :  { %2707 = vmatpush1.msra.mxu1 %v9999_v62  ;;  %2778 = vmatpush1.msra.mxu0 %v10000_v21 }
 0x355   :  { %2708 = vmatprep.subr.mxu1 %v10001_v9  ;;  %2779 = vmatprep.subr.mxu0 %v10002_v10 }
 0x356   :  { %2709 = vmatpush1.msra.mxu1 %v10003_v37  ;;  %2780 = vmatpush1.msra.mxu0 %v10004_v13 }
 0x357   :  { %2742 = vmatprep.mubr.f32.mxu1 %v9939_v16  ;;  %2813 = vmatprep.mubr.f32.mxu0 %v9939_v16 }
 0x358   :  { %2910 = vmatprep.subr.mxu1 %v10005_v22  ;;  %2981 = vmatprep.subr.mxu0 %v10006_v28 }
 0x391   :  { %v1759_v25 = vpop.f32.mrf.mxu1  ;;  %v1830_v8 = vpop.f32.mrf.mxu0 }
 0x392   :  { %v1760_v32 = vadd.f32 %v1759_v25, %v1634_v34  ;;  %v1831_v40 = vadd.f32 %v1830_v8, %v1642_v18  ;;  %v8517_v34 = vld [vmem:[%s9688_s9 + $0xb0] sm:$0xff]  ;;  %v8529_v18 = vld [vmem:[%s9688_s9 + $0x98] sm:$0xff] }
 0x393   :  { %v1761_v1 = vpop.f32.mrf.mxu1  ;;  %v1832_v23 = vpop.f32.mrf.mxu0  ;;  %10076 = vst [vmem:[#allocation40_spill] sm:$0xff] %v8517_v34  ;;  %10078 = vst [vmem:[#allocation42_spill] sm:$0xff] %v8529_v18 }
 0x394   :  { %v1762_v0 = vadd.f32 %v1761_v1, %v1638_v19  ;;  %v1833_v27 = vadd.f32 %v1832_v23, %v1646_v30  ;;  %v8541_v19 = vld [vmem:[%s9688_s9 + $0x90] sm:$0xff] }
 0x395   :  { %10080 = vst [vmem:[#allocation44_spill] sm:$0xff] %v8541_v19 }
 0x396   :  { %v1985_v26 = vcombine.low %v1760_v32, %v1762_v0  ;;  %v1986_v45 = vcombine.high %v1760_v32, %v1762_v0  ;;  %v1987_v56 = vcombine.low %v1831_v40, %v1833_v27  ;;  %v1988_v24 = vcombine.high %v1831_v40, %v1833_v27 }
 0x398   :  { %v8130_v41 = vrot.slane %v1985_v26, %v10011_v47  ;;  %v8133_v44 = vrot.slane %v1986_v45, %v10011_v47  ;;  %v8136_v35 = vrot.slane %v1987_v56, %v10011_v47  ;;  %v8139_v49 = vrot.slane %v1988_v24, %v10011_v47 }
 0x39a   :  { %10012 = vst [vmem:[#allocation31_spill] sm:$0xff] %v8133_v44  ;;  %10013 = vst [vmem:[#allocation32_spill] sm:$0xff] %v8139_v49  ;;  %v2017_v29 = vcombine.low %v8130_v41, %v8136_v35  ;;  %v8589_v49 = vld [vmem:[%s9688_s9 + $0x50] sm:$0xff]  ;;  %v8596_v44 = vld [vmem:[%s9688_s9 + $0x28] sm:$0xff] }
 0x3b2   :  { %v1901_v54 = vpop.f32.mrf.mxu1  ;;  %v1972_v60 = vpop.f32.mrf.mxu0 }
 0x3b3   :  { %v1902_v59 = vadd.f32 %v1901_v54, %v1650_v7  ;;  %v1973_v46 = vadd.f32 %v1972_v60, %v1658_v31 }
 0x3b4   :  { %v1903_v61 = vpop.f32.mrf.mxu1  ;;  %v1974_v38 = vpop.f32.mrf.mxu0 }
 0x3b5   :  { %v1904_v39 = vadd.f32 %v1903_v61, %v1654_v51  ;;  %v1975_v62 = vadd.f32 %v1974_v38, %v1662_v42 }
 0x3b7   :  { %v2021_v21 = vcombine.low %v1902_v59, %v1904_v39  ;;  %v2022_v9 = vcombine.high %v1902_v59, %v1904_v39  ;;  %v2023_v10 = vcombine.low %v1973_v46, %v1975_v62  ;;  %v2024_v37 = vcombine.high %v1973_v46, %v1975_v62 }
 0x3b9   :  { %v8152_v13 = vrot.slane %v2021_v21, %v10011_v47  ;;  %v8155_v22 = vrot.slane %v2022_v9, %v10011_v47  ;;  %v8158_v28 = vrot.slane %v2023_v10, %v10011_v47  ;;  %v8161_v14 = vrot.slane %v2024_v37, %v10011_v47 }
 0x3bb   :  { %10018 = vst [vmem:[#allocation33_spill] sm:$0xff] %v8152_v13  ;;  %10019 = vst [vmem:[#allocation34_spill] sm:$0xff] %v8158_v28  ;;  %v2056_v51 = vcombine.high %v8155_v22, %v8161_v14  ;;  %v8577_v28 = vld [vmem:[%s9688_s9 + $0x58] sm:$0xff]  ;;  %v8584_v13 = vld [vmem:[%s9688_s9 + $0x40] sm:$0xff] }
 0x3d4   :  { %v2206_v30 = vpop.f32.mrf.mxu1  ;;  %v2277_v25 = vpop.f32.mrf.mxu0 }
 0x3d6   :  { %v2208_v8 = vpop.f32.mrf.mxu1  ;;  %v2279_v1 = vpop.f32.mrf.mxu0 }
 0x3d7   :  { %v2286_v23 = vcombine.low %v2206_v30, %v2208_v8  ;;  %v2287_v32 = vcombine.low %v2277_v25, %v2279_v1 }
 0x3d9   :  { %v2294_v40 = vrot.slane %v2286_v23, %v10011_v47  ;;  %v2301_v0 = vrot.slane %v2287_v32, %v10011_v47 }
 0x3db   :  { %v2302_v24 = vcombine.low %v2294_v40, %v2301_v0 }
 0x3dd   :  { %v2304_v53 = vadd.f32 %v2302_v24, %v2017_v29 }
 0x3df   :  { %v2542_v60 = vrot.slane %v2304_v53, %v10011_v47  ;;  %v2535_v62 = vcombine.high %v2304_v53, %v2304_v53 }
 0x3e1   :  { %v2550_v59 = vcombine.high %v2542_v60, %v2542_v60  ;;  %v2549_v30 = vrot.slane %v2535_v62, %v10011_v47  ;;  %v10027_v62 = vld [vmem:[#allocation52_spill] sm:$0xff] }
 0x3e3   :  { %v2551_v8 = vcombine.high %v2549_v30, %v2549_v30 }
 0x3f6   :  { %v2435_v27 = vpop.f32.mrf.mxu1  ;;  %v2506_v26 = vpop.f32.mrf.mxu0 }
 0x3f8   :  { %v2437_v45 = vpop.f32.mrf.mxu1  ;;  %v2508_v56 = vpop.f32.mrf.mxu0 }
 0x3f9   :  { %v2515_v50 = vcombine.low %v2435_v27, %v2437_v45  ;;  %v2516_v7 = vcombine.low %v2506_v26, %v2508_v56 }
 0x3fb   :  { %v2523_v31 = vrot.slane %v2515_v50, %v10011_v47  ;;  %v2530_v52 = vrot.slane %v2516_v7, %v10011_v47 }
 0x3fd   :  { %v2531_v42 = vcombine.low %v2523_v31, %v2530_v52 }
 0x3ff   :  { %v2533_v54 = vadd.f32 %v2531_v42, %v2056_v51 }
 0x401   :  { %v2557_v61 = vcombine.low %v2533_v54, %v2533_v54  ;;  %v2571_v10 = vrot.slane %v2533_v54, %v10011_v47  ;;  %v10020_v54 = vld [vmem:[#allocation45_spill] sm:$0xff] }
 0x402   :  { %10086 = vst [vmem:[#allocation45_spill] sm:$0xff] %v8577_v28 }
 0x403   :  { %v2564_v38 = vrot.slane %v2557_v61, %v10011_v47  ;;  %v2573_v25 = vcombine.high %v2571_v10, %v2571_v10  ;;  %v2581_v40 = vsel %vm2578_vm1, %v2549_v30, %v2571_v10  ;;  %v10022_v61 = vld [vmem:[#allocation47_spill] sm:$0xff]  ;;  %v10032_v30 = vld [vmem:[#allocation57_spill] sm:$0xff] }
 0x404   :  { %v10030_v10 = vld [vmem:[#allocation55_spill] sm:$0xff]  ;;  %10088 = vst [vmem:[#allocation47_spill] sm:$0xff] %v8589_v49 }
 0x405   :  { %v2572_v46 = vcombine.high %v2564_v38, %v2564_v38  ;;  %v2579_v39 = vsel %vm2578_vm1, %v2542_v60, %v2564_v38  ;;  %v2582_v1 = vsel %vm2578_vm1, %v2551_v8, %v2573_v25  ;;  %v10021_v60 = vld [vmem:[#allocation46_spill] sm:$0xff]  ;;  %v10023_v38 = vld [vmem:[#allocation48_spill] sm:$0xff]  ;;  %v10034_v8 = vld [vmem:[#allocation59_spill] sm:$0xff] }
 0x406   :  { %v6276_v21 = vmul.f32 -1.442695, %v2579_v39  ;;  %v6278_v23 = vmul.f32 -1.442695, %v2582_v1  ;;  %v10026_v39 = vld [vmem:[#allocation51_spill] sm:$0xff]  ;;  %v10033_v25 = vld [vmem:[#allocation58_spill] sm:$0xff] }
 0x407   :  { %v2580_v9 = vsel %vm2578_vm1, %v2550_v59, %v2572_v46  ;;  %v10024_v59 = vld [vmem:[#allocation49_spill] sm:$0xff]  ;;  %v10025_v46 = vld [vmem:[#allocation50_spill] sm:$0xff]  ;;  %v10035_v1 = vld [vmem:[#allocation60_spill] sm:$0xff]  ;;  %10087 = vst [vmem:[#allocation46_spill] sm:$0xff] %v8584_v13 }
 0x408   :  { %6520 = vpow2.f32 %v6276_v21  ;;  %v6277_v37 = vmul.f32 -1.442695, %v2580_v9  ;;  %v10028_v21 = vld [vmem:[#allocation53_spill] sm:$0xff]  ;;  %v10029_v9 = vld [vmem:[#allocation54_spill] sm:$0xff]  ;;  %10089 = vst [vmem:[#allocation48_spill] sm:$0xff] %v8596_v44 }
 0x40a   :  { %6522 = vpow2.f32 %v6277_v37  ;;  %v10031_v37 = vld [vmem:[#allocation56_spill] sm:$0xff] }
 0x40b   :  { %6524 = vpow2.f32 %v6278_v23  ;;  %v10036_v23 = vld [vmem:[#allocation61_spill] sm:$0xff] }
 0x415   :  { %v6521_v32 = vpop.eup %6520 }
 0x416   :  { %v2586_v0 = vadd.f32 1.0, %v6521_v32  ;;  %v10037_v32 = vld [vmem:[#allocation62_spill] sm:$0xff] }
 0x417   :  { %v6523_v27 = vpop.eup %6522 }
 0x418   :  { %6526 = vrcp.f32 %v2586_v0  ;;  %v2592_v26 = vadd.f32 1.0, %v6523_v27  ;;  %v6525_v45 = vpop.eup %6524  ;;  %v10039_v0 = vld [vmem:[#allocation64_spill] sm:$0xff]  ;;  %v10040_v27 = vld [vmem:[#allocation65_spill] sm:$0xff] }
 0x419   :  { %6528 = vtanh.f32 %v2581_v40  ;;  %v2599_v7 = vadd.f32 1.0, %v6525_v45  ;;  %v10038_v40 = vld [vmem:[#allocation63_spill] sm:$0xff] }
 0x41a   :  { %6530 = vrcp.f32 %v2592_v26  ;;  %v10041_v26 = vld [vmem:[#allocation66_spill] sm:$0xff]  ;;  %v10042_v45 = vld [vmem:[#allocation67_spill] sm:$0xff] }
 0x41b   :  { %6532 = vrcp.f32 %v2599_v7  ;;  %v10046_v7 = vld [vmem:[#allocation71_spill] sm:$0xff] }
 0x425   :  { %v6527_v56 = vpop.eup %6526 }
 0x426   :  { %v6529_v24 = vpop.eup %6528 }
 0x427   :  { %v6531_v50 = vpop.eup %6530  ;;  %v2603_v31 = vmul.f32 %v6529_v24, %v6527_v56  ;;  %v10043_v56 = vld [vmem:[#allocation68_spill] sm:$0xff]  ;;  %v10044_v24 = vld [vmem:[#allocation69_spill] sm:$0xff] }
 0x428   :  { %v2602_v29 = vmul.f32 0.0, %v6531_v50  ;;  %v6533_v51 = vpop.eup %6532  ;;  %v10045_v50 = vld [vmem:[#allocation70_spill] sm:$0xff] }
 0x42a   :  { %v8185_v52 = vadd.f32 %v2603_v31, %v2602_v29  ;;  %v10047_v29 = vld [vmem:[#allocation72_spill] sm:$0xff]  ;;  %v10048_v31 = vld [vmem:[#allocation73_spill] sm:$0xff] }
 0x42c   :  { %6534 = vtanh.f32 %v8185_v52 }
 0x439   :  { %v6535_v53 = vpop.eup %6534 }
 0x43a   :  { %v8188_v42 = vmul.f32 %v6535_v53, %v6533_v51  ;;  %v10049_v51 = vld [vmem:[#allocation74_spill] sm:$0xff]  ;;  %v10050_v53 = vld [vmem:[#allocation75_spill] sm:$0xff] }
 0x43c   :  { %2607 = vst [vmem:[#allocation3] sm:$0x3] %v8188_v42  ;;  %2609 = vst [vmem:[#allocation4 + $0x4] sm:$0xc] %v8188_v42  ;;  %2743 = vmatmul.mubr.f32.vlgmr.msra.gmra.mxu1 %v8188_v42  ;;  %2814 = vmatmul.mubr.f32.vlgmr.msra.gmra.mxu0 %v8188_v42 }
 0x43d   :  { %2911 = vmatpush1.msra.mxu1 %v10020_v54  ;;  %2982 = vmatpush1.msra.mxu0 %v10021_v60  ;;  %v10051_v54 = vld [vmem:[#allocation76_spill] sm:$0xff]  ;;  %v10052_v60 = vld [vmem:[#allocation77_spill] sm:$0xff] }
 0x43e   :  { %2912 = vmatprep.subr.mxu1 %v10022_v61  ;;  %2983 = vmatprep.subr.mxu0 %v10023_v38  ;;  %v10053_v61 = vld [vmem:[#allocation78_spill] sm:$0xff]  ;;  %v10054_v38 = vld [vmem:[#allocation79_spill] sm:$0xff] }
 0x43f   :  { %2913 = vmatpush1.msra.mxu1 %v10024_v59  ;;  %2984 = vmatpush1.msra.mxu0 %v10025_v46  ;;  %v10055_v59 = vld [vmem:[#allocation80_spill] sm:$0xff]  ;;  %v10056_v46 = vld [vmem:[#allocation81_spill] sm:$0xff] }
 0x440   :  { %2914 = vmatprep.subr.mxu1 %v10026_v39  ;;  %2985 = vmatprep.subr.mxu0 %v10027_v62  ;;  %v10057_v39 = vld [vmem:[#allocation82_spill] sm:$0xff]  ;;  %v10058_v62 = vld [vmem:[#allocation83_spill] sm:$0xff] }
 0x441   :  { %2915 = vmatpush1.msra.mxu1 %v10028_v21  ;;  %2986 = vmatpush1.msra.mxu0 %v10029_v9  ;;  %v10059_v21 = vld [vmem:[#allocation84_spill] sm:$0xff]  ;;  %v10060_v9 = vld [vmem:[#allocation85_spill] sm:$0xff] }
 0x442   :  { %2916 = vmatprep.subr.mxu1 %v10030_v10  ;;  %2987 = vmatprep.subr.mxu0 %v10031_v37  ;;  %v10061_v10 = vld [vmem:[#allocation86_spill] sm:$0xff]  ;;  %v10062_v37 = vld [vmem:[#allocation87_spill] sm:$0xff] }
 0x443   :  { %2917 = vmatpush1.msra.mxu1 %v10032_v30  ;;  %2988 = vmatpush1.msra.mxu0 %v10033_v25  ;;  %v10063_v30 = vld [vmem:[#allocation88_spill] sm:$0xff]  ;;  %v10064_v25 = vld [vmem:[#allocation89_spill] sm:$0xff] }
 0x444   :  { %2918 = vmatprep.subr.mxu1 %v10034_v8  ;;  %2989 = vmatprep.subr.mxu0 %v10035_v1  ;;  %v10065_v8 = vld [vmem:[#allocation90_spill] sm:$0xff]  ;;  %v10066_v1 = vld [vmem:[#allocation91_spill] sm:$0xff] }
 0x445   :  { %2919 = vmatpush1.msra.mxu1 %v10036_v23  ;;  %2990 = vmatpush1.msra.mxu0 %v10037_v32  ;;  %v10067_v23 = vld [vmem:[#allocation92_spill] sm:$0xff]  ;;  %v10068_v32 = vld [vmem:[#allocation93_spill] sm:$0xff] }
 0x446   :  { %2920 = vmatprep.subr.mxu1 %v10038_v40  ;;  %2991 = vmatprep.subr.mxu0 %v10039_v0  ;;  %v10069_v40 = vld [vmem:[#allocation94_spill] sm:$0xff]  ;;  %v10070_v0 = vld [vmem:[#allocation95_spill] sm:$0xff] }
 0x447   :  { %2921 = vmatpush1.msra.mxu1 %v10040_v27  ;;  %2992 = vmatpush1.msra.mxu0 %v10041_v26  ;;  %v8329_v27 = vld [vmem:[%s9688_s9 + $0x1b0] sm:$0xff]  ;;  %v8336_v26 = vld [vmem:[%s9688_s9 + $0x188] sm:$0xff] }
 0x448   :  { %2922 = vmatprep.subr.mxu1 %v10042_v45  ;;  %2993 = vmatprep.subr.mxu0 %v10043_v56  ;;  %v8341_v45 = vld [vmem:[%s9688_s9 + $0x198] sm:$0xff]  ;;  %v8348_v56 = vld [vmem:[%s9688_s9 + $0x180] sm:$0xff] }
 0x449   :  { %2923 = vmatpush1.msra.mxu1 %v10044_v24  ;;  %2994 = vmatpush1.msra.mxu0 %v10045_v50  ;;  %v8353_v24 = vld [vmem:[%s9688_s9 + $0x190] sm:$0xff]  ;;  %v8360_v50 = vld [vmem:[%s9688_s9 + $0x168] sm:$0xff] }
 0x44a   :  { %2924 = vmatprep.subr.mxu1 %v10046_v7  ;;  %2995 = vmatprep.subr.mxu0 %v10047_v29  ;;  %v8365_v7 = vld [vmem:[%s9688_s9 + $0x178] sm:$0xff]  ;;  %v8372_v29 = vld [vmem:[%s9688_s9 + $0x160] sm:$0xff] }
 0x44b   :  { %2925 = vmatpush1.msra.mxu1 %v10048_v31  ;;  %2996 = vmatpush1.msra.mxu0 %v10049_v51  ;;  %v8377_v31 = vld [vmem:[%s9688_s9 + $0x170] sm:$0xff]  ;;  %v8384_v51 = vld [vmem:[%s9688_s9 + $0x148] sm:$0xff] }
 0x44c   :  { %2926 = vmatprep.subr.mxu1 %v10050_v53  ;;  %2997 = vmatprep.subr.mxu0 %v10051_v54  ;;  %v8389_v53 = vld [vmem:[%s9688_s9 + $0x158] sm:$0xff]  ;;  %v8396_v54 = vld [vmem:[%s9688_s9 + $0x140] sm:$0xff] }
 0x44d   :  { %2927 = vmatpush1.msra.mxu1 %v10052_v60  ;;  %2998 = vmatpush1.msra.mxu0 %v10053_v61  ;;  %v8401_v60 = vld [vmem:[%s9688_s9 + $0x150] sm:$0xff]  ;;  %v8406_v61 = vld [vmem:[%s9688_s9 + $0x128] sm:$0xff] }
 0x44e   :  { %2928 = vmatprep.subr.mxu1 %v10054_v38  ;;  %2999 = vmatprep.subr.mxu0 %v10055_v59  ;;  %v8413_v38 = vld [vmem:[%s9688_s9 + $0x138] sm:$0xff]  ;;  %v8418_v59 = vld [vmem:[%s9688_s9 + $0x120] sm:$0xff] }
 0x44f   :  { %2929 = vmatpush1.msra.mxu1 %v10056_v46  ;;  %3000 = vmatpush1.msra.mxu0 %v10057_v39  ;;  %v8423_v46 = vld [vmem:[%s9688_s9 + $0x130] sm:$0xff]  ;;  %v8430_v39 = vld [vmem:[%s9688_s9 + $0x108] sm:$0xff] }
 0x450   :  { %2930 = vmatprep.subr.mxu1 %v10058_v62  ;;  %3001 = vmatprep.subr.mxu0 %v10059_v21  ;;  %v8435_v62 = vld [vmem:[%s9688_s9 + $0x118] sm:$0xff]  ;;  %v8440_v21 = vld [vmem:[%s9688_s9 + $0x100] sm:$0xff] }
 0x451   :  { %2931 = vmatpush1.msra.mxu1 %v10060_v9  ;;  %3002 = vmatpush1.msra.mxu0 %v10061_v10  ;;  %v8447_v9 = vld [vmem:[%s9688_s9 + $0x110] sm:$0xff]  ;;  %v8452_v10 = vld [vmem:[%s9688_s9 + $0xe8] sm:$0xff] }
 0x452   :  { %2932 = vmatprep.subr.mxu1 %v10062_v37  ;;  %3003 = vmatprep.subr.mxu0 %v10063_v30  ;;  %v8457_v37 = vld [vmem:[%s9688_s9 + $0xf8] sm:$0xff]  ;;  %v8464_v30 = vld [vmem:[%s9688_s9 + $0xe0] sm:$0xff] }
 0x453   :  { %2933 = vmatpush1.msra.mxu1 %v10064_v25  ;;  %3004 = vmatpush1.msra.mxu0 %v10065_v8  ;;  %v8469_v25 = vld [vmem:[%s9688_s9 + $0xf0] sm:$0xff]  ;;  %v8476_v8 = vld [vmem:[%s9688_s9 + $0xc8] sm:$0xff] }
 0x454   :  { %2934 = vmatprep.subr.mxu1 %v10066_v1  ;;  %3005 = vmatprep.subr.mxu0 %v10067_v23  ;;  %v8481_v1 = vld [vmem:[%s9688_s9 + $0xd8] sm:$0xff]  ;;  %v8488_v23 = vld [vmem:[%s9688_s9 + $0xc0] sm:$0xff] }
 0x455   :  { %2935 = vmatpush1.msra.mxu1 %v10068_v32  ;;  %3006 = vmatpush1.msra.mxu0 %v10069_v40  ;;  %10071 = vst [vmem:[#allocation35_spill] sm:$0xff] %v8488_v23  ;;  %v8493_v32 = vld [vmem:[%s9688_s9 + $0xd0] sm:$0xff]  ;;  %v8500_v40 = vld [vmem:[%s9688_s9 + $0xa8] sm:$0xff] }
 0x456   :  { %2936 = vmatprep.subr.mxu1 %v8010_v63  ;;  %3007 = vmatprep.subr.mxu0 %v10070_v0  ;;  %v2908_v63 = vrot.slane %v8188_v42, 2  ;;  %v8324_v42 = vld [vmem:[%s9688_s9 + $0x1a0] sm:$0xff]  ;;  %10072 = vst [vmem:[#allocation36_spill] sm:$0xff] %v8493_v32  ;;  %10073 = vst [vmem:[#allocation37_spill] sm:$0xff] %v8500_v40  ;;  %v8505_v0 = vld [vmem:[%s9688_s9 + $0xb8] sm:$0xff] }
 0x457   :  { %2937 = vmatpush1.msra.mxu1 %v8016_v6  ;;  %3008 = vmatpush1.msra.mxu0 %v8018_v11  ;;  %v8288_v11 = vld [vmem:[%s9688_s9 + $0x1c8] sm:$0xff]  ;;  %10074 = vst [vmem:[#allocation38_spill] sm:$0xff] %v8505_v0 }
 0x458   :  { %2938 = vmatprep.subr.mxu1 %v8022_v15  ;;  %3009 = vmatprep.subr.mxu0 %v8024_v36  ;;  %v8300_v15 = vld [vmem:[%s9688_s9 + $0x1c0] sm:$0xff]  ;;  %v8305_v36 = vld [vmem:[%s9688_s9 + $0x1d0] sm:$0xff]  ;;  %v8312_v6 = vld [vmem:[%s9688_s9 + $0x1a8] sm:$0xff] }
 0x459   :  { %2939 = vmatpush1.msra.mxu1 %v8028_v12  ;;  %3010 = vmatpush1.msra.mxu0 %v8030_v5  ;;  %v8281_v5 = vld [vmem:[%s9688_s9 + $0x1f0] sm:$0xff]  ;;  %v8293_v12 = vld [vmem:[%s9688_s9 + $0x1d8] sm:$0xff] }
 0x45a   :  { %2940 = vmatprep.subr.mxu1 %v8034_v2  ;;  %3011 = vmatprep.subr.mxu0 %v8036_v4  ;;  %v8264_v2 = vld [vmem:[%s9688_s9 + $0x1e8] sm:$0xff]  ;;  %v8276_v4 = vld [vmem:[%s9688_s9 + $0x1e0] sm:$0xff] }
 0x45b   :  { %2941 = vmatpush1.msra.mxu1 %v8040_v3  ;;  %2974 = vmatprep.mubr.f32.mxu1 %v9939_v16  ;;  %v8269_v3 = vld [vmem:[%s9688_s9 + $0x1f8] sm:$0xff] }
 0x45c   :  { %3012 = vmatpush1.msra.mxu0 %v8044_v58  ;;  %3045 = vmatprep.mubr.f32.mxu0 %v9939_v16  ;;  %v8317_v58 = vld [vmem:[%s9688_s9 + $0x1b8] sm:$0xff] }
 0x45d   :  { %2975 = vmatmul.mubr.f32.vlgmr.msra.gmra.mxu1 %v2908_v63  ;;  %3046 = vmatmul.mubr.f32.vlgmr.msra.gmra.mxu0 %v2908_v63  ;;  %v8512_v63 = vld [vmem:[%s9688_s9 + $0xa0] sm:$0xff] }
 0x45e   :  { %3281 = vmatprep.mubr.f32.mxu1 %v9939_v16  ;;  %3352 = vmatprep.mubr.f32.mxu0 %v9939_v16  ;;  %10075 = vst [vmem:[#allocation39_spill] sm:$0xff] %v8512_v63 }
 0x45f   :  { %3217 = vmatprep.subr.mxu1 %v8264_v2  ;;  %3288 = vmatprep.subr.mxu0 %v8269_v3 }
 0x460   :  { %3218 = vmatpush1.msra.mxu1 %v8276_v4  ;;  %3289 = vmatpush1.msra.mxu0 %v8281_v5 }
 0x461   :  { %3219 = vmatprep.subr.mxu1 %v8288_v11  ;;  %3290 = vmatprep.subr.mxu0 %v8293_v12 }
 0x462   :  { %3220 = vmatpush1.msra.mxu1 %v8300_v15  ;;  %3291 = vmatpush1.msra.mxu0 %v8305_v36 }
 0x463   :  { %3221 = vmatprep.subr.mxu1 %v8312_v6  ;;  %3292 = vmatprep.subr.mxu0 %v8317_v58 }
 0x464   :  { %3222 = vmatpush1.msra.mxu1 %v8324_v42  ;;  %3293 = vmatpush1.msra.mxu0 %v8329_v27 }
 0x465   :  { %3223 = vmatprep.subr.mxu1 %v8336_v26  ;;  %3294 = vmatprep.subr.mxu0 %v8341_v45 }
 0x466   :  { %3224 = vmatpush1.msra.mxu1 %v8348_v56  ;;  %3295 = vmatpush1.msra.mxu0 %v8353_v24 }
 0x467   :  { %3225 = vmatprep.subr.mxu1 %v8360_v50  ;;  %3296 = vmatprep.subr.mxu0 %v8365_v7 }
 0x468   :  { %3226 = vmatpush1.msra.mxu1 %v8372_v29  ;;  %3297 = vmatpush1.msra.mxu0 %v8377_v31 }
 0x469   :  { %3227 = vmatprep.subr.mxu1 %v8384_v51  ;;  %3298 = vmatprep.subr.mxu0 %v8389_v53 }
 0x46a   :  { %3228 = vmatpush1.msra.mxu1 %v8396_v54  ;;  %3299 = vmatpush1.msra.mxu0 %v8401_v60 }
 0x46b   :  { %3229 = vmatprep.subr.mxu1 %v8406_v61  ;;  %3300 = vmatprep.subr.mxu0 %v8413_v38 }
 0x46c   :  { %3230 = vmatpush1.msra.mxu1 %v8418_v59  ;;  %3301 = vmatpush1.msra.mxu0 %v8423_v46 }
 0x46d   :  { %3231 = vmatprep.subr.mxu1 %v8430_v39  ;;  %3302 = vmatprep.subr.mxu0 %v8435_v62 }
 0x46e   :  { %3232 = vmatpush1.msra.mxu1 %v8440_v21  ;;  %3303 = vmatpush1.msra.mxu0 %v8447_v9 }
 0x46f   :  { %3233 = vmatprep.subr.mxu1 %v8452_v10  ;;  %3304 = vmatprep.subr.mxu0 %v8457_v37 }
 0x470   :  { %3234 = vmatpush1.msra.mxu1 %v8464_v30  ;;  %3305 = vmatpush1.msra.mxu0 %v8469_v25 }
 0x471   :  { %3235 = vmatprep.subr.mxu1 %v8476_v8  ;;  %3306 = vmatprep.subr.mxu0 %v8481_v1 }
 0x472   :  { %3236 = vmatpush1.msra.mxu1 %v8488_v23  ;;  %3307 = vmatpush1.msra.mxu0 %v8493_v32 }
 0x473   :  { %3237 = vmatprep.subr.mxu1 %v8500_v40  ;;  %3308 = vmatprep.subr.mxu0 %v8505_v0 }
 0x474   :  { %3238 = vmatpush1.msra.mxu1 %v8512_v63  ;;  %3309 = vmatpush1.msra.mxu0 %v8517_v34 }
 0x475   :  { %3239 = vmatprep.subr.mxu1 %v8524_v20  ;;  %3310 = vmatprep.subr.mxu0 %v8529_v18 }
 0x476   :  { %3240 = vmatpush1.msra.mxu1 %v8536_v48  ;;  %3311 = vmatpush1.msra.mxu0 %v8541_v19  ;;  %v8643_v19 = vld [vmem:[#allocation10 + $0x1f8] sm:$0xff] }
 0x477   :  { %3241 = vmatprep.subr.mxu1 %v8548_v55  ;;  %3312 = vmatprep.subr.mxu0 %v8553_v17  ;;  %v8601_v17 = vld [vmem:[%s9688_s9 + $0x38] sm:$0xff]  ;;  %10098 = vst [vmem:[#allocation57_spill] sm:$0xff] %v8643_v19 }
 0x478   :  { %3242 = vmatpush1.msra.mxu1 %v8560_v43  ;;  %3313 = vmatpush1.msra.mxu0 %v8565_v57  ;;  %10090 = vst [vmem:[#allocation49_spill] sm:$0xff] %v8601_v17  ;;  %v8608_v43 = vld [vmem:[%s9688_s9 + $0x20] sm:$0xff]  ;;  %v8613_v57 = vld [vmem:[%s9688_s9 + $0x30] sm:$0xff]  ;;  %v8641_v55 = vld [vmem:[#allocation10 + $0x1e8] sm:$0xff] }
 0x479   :  { %3243 = vmatprep.subr.mxu1 %v8572_v33  ;;  %3314 = vmatprep.subr.mxu0 %v8577_v28  ;;  %10091 = vst [vmem:[#allocation50_spill] sm:$0xff] %v8608_v43  ;;  %10092 = vst [vmem:[#allocation51_spill] sm:$0xff] %v8613_v57  ;;  %v8620_v33 = vld [vmem:[%s9688_s9 + $0x8] sm:$0xff]  ;;  %v8625_v28 = vld [vmem:[%s9688_s9 + $0x18] sm:$0xff] }
 0x47a   :  { %3244 = vmatpush1.msra.mxu1 %v8584_v13  ;;  %3315 = vmatpush1.msra.mxu0 %v8589_v49  ;;  %10093 = vst [vmem:[#allocation52_spill] sm:$0xff] %v8620_v33  ;;  %10094 = vst [vmem:[#allocation53_spill] sm:$0xff] %v8625_v28  ;;  %v8632_v13 = vld [vmem:[%s9688_s9] sm:$0xff]  ;;  %v8637_v49 = vld [vmem:[%s9688_s9 + $0x10] sm:$0xff] }
 0x47b   :  { %3245 = vmatprep.subr.mxu1 %v8596_v44  ;;  %3316 = vmatprep.subr.mxu0 %v8601_v17  ;;  %10095 = vst [vmem:[#allocation54_spill] sm:$0xff] %v8632_v13  ;;  %10096 = vst [vmem:[#allocation55_spill] sm:$0xff] %v8637_v49 }
 0x47c   :  { %3246 = vmatpush1.msra.mxu1 %v8608_v43  ;;  %3317 = vmatpush1.msra.mxu0 %v8613_v57  ;;  %10097 = vst [vmem:[#allocation56_spill] sm:$0xff] %v8641_v55 }
 0x47d   :  { %3247 = vmatprep.subr.mxu1 %v8620_v33  ;;  %3318 = vmatprep.subr.mxu0 %v8625_v28 }
 0x47e   :  { %3248 = vmatpush1.msra.mxu1 %v8632_v13  ;;  %3319 = vmatpush1.msra.mxu0 %v8637_v49  ;;  %v10099_v49 = vcombine.high %v8130_v41, %v8136_v35 }
 0x47f   :  { %3449 = vmatprep.subr.mxu1 %v8641_v55  ;;  %3520 = vmatprep.subr.mxu0 %v8643_v19 }
 0x4fc   :  { %v2744_v17 = vpop.f32.mrf.mxu1  ;;  %v2815_v43 = vpop.f32.mrf.mxu0 }
 0x4fe   :  { %v2746_v44 = vpop.f32.mrf.mxu1  ;;  %v2817_v57 = vpop.f32.mrf.mxu0 }
 0x4ff   :  { %v2824_v48 = vcombine.low %v2744_v17, %v2746_v44  ;;  %v2825_v18 = vcombine.low %v2815_v43, %v2817_v57 }
 0x501   :  { %v2832_v20 = vrot.slane %v2824_v48, %v10011_v47  ;;  %v2839_v33 = vrot.slane %v2825_v18, %v10011_v47 }
 0x503   :  { %v2840_v34 = vcombine.low %v2832_v20, %v2839_v33  ;;  %v10100_v33 = vcombine.low %v8155_v22, %v8161_v14 }
 0x505   :  { %v2842_v13 = vadd.f32 %v2840_v34, %v10099_v49 }
 0x507   :  { %v3076_v32 = vcombine.high %v2842_v13, %v2842_v13  ;;  %v3083_v48 = vrot.slane %v2842_v13, %v10011_v47 }
 0x509   :  { %v3090_v43 = vrot.slane %v3076_v32, %v10011_v47  ;;  %v3091_v34 = vcombine.high %v3083_v48, %v3083_v48 }
 0x50b   :  { %v3092_v49 = vcombine.high %v3090_v43, %v3090_v43 }
 0x51d   :  { %v2976_v28 = vpop.f32.mrf.mxu1  ;;  %v3047_v63 = vpop.f32.mrf.mxu0 }
 0x51f   :  { %v2978_v55 = vpop.f32.mrf.mxu1  ;;  %v3049_v0 = vpop.f32.mrf.mxu0 }
 0x520   :  { %v3056_v19 = vcombine.low %v2976_v28, %v2978_v55  ;;  %v3057_v40 = vcombine.low %v3047_v63, %v3049_v0 }
 0x522   :  { %v3064_v23 = vrot.slane %v3056_v19, %v10011_v47  ;;  %v3071_v17 = vrot.slane %v3057_v40, %v10011_v47 }
 0x524   :  { %v3072_v57 = vcombine.low %v3064_v23, %v3071_v17 }
 0x526   :  { %v3074_v44 = vadd.f32 %v3072_v57, %v10100_v33 }
 0x528   :  { %v3098_v41 = vcombine.low %v3074_v44, %v3074_v44  ;;  %v3112_v35 = vrot.slane %v3074_v44, %v10011_v47 }
 0x52a   :  { %v3105_v55 = vrot.slane %v3098_v41, %v10011_v47  ;;  %v3114_v20 = vcombine.high %v3112_v35, %v3112_v35  ;;  %v3121_v28 = vsel %vm2578_vm1, %v3090_v43, %v3112_v35 }
 0x52c   :  { %v3113_v18 = vcombine.high %v3105_v55, %v3105_v55  ;;  %v3119_v19 = vsel %vm2578_vm1, %v3083_v48, %v3105_v55  ;;  %v3122_v23 = vsel %vm2578_vm1, %v3092_v49, %v3114_v20 }
 0x52d   :  { %v6279_v32 = vmul.f32 -1.442695, %v3119_v19  ;;  %v6281_v14 = vmul.f32 -1.442695, %v3122_v23  ;;  %v8679_v19 = vld [vmem:[#allocation10 + $0x1c8] sm:$0xff]  ;;  %v8681_v23 = vld [vmem:[#allocation10 + $0x1d8] sm:$0xff] }
 0x52e   :  { %v3120_v22 = vsel %vm2578_vm1, %v3091_v34, %v3113_v18  ;;  %v8675_v34 = vld [vmem:[#allocation10 + $0x1e0] sm:$0xff]  ;;  %v8677_v18 = vld [vmem:[#allocation10 + $0x1f0] sm:$0xff] }
 0x52f   :  { %6536 = vpow2.f32 %v6279_v32  ;;  %v6280_v13 = vmul.f32 -1.442695, %v3120_v22  ;;  %v8689_v32 = vld [vmem:[#allocation10 + $0x1d0] sm:$0xff]  ;;  %v8693_v22 = vld [vmem:[#allocation10 + $0x1a8] sm:$0xff] }
 0x531   :  { %6538 = vpow2.f32 %v6280_v13  ;;  %v8695_v13 = vld [vmem:[#allocation10 + $0x1b8] sm:$0xff] }
 0x532   :  { %6540 = vtanh.f32 %v3121_v28 }
 0x533   :  { %6542 = vpow2.f32 %v6281_v14  ;;  %v8699_v14 = vld [vmem:[#allocation10 + $0x1a0] sm:$0xff] }
 0x53c   :  { %v6537_v40 = vpop.eup %6536 }
 0x53d   :  { %v3126_v0 = vadd.f32 1.0, %v6537_v40  ;;  %v8701_v40 = vld [vmem:[#allocation10 + $0x1b0] sm:$0xff] }
 0x53e   :  { %v6539_v63 = vpop.eup %6538 }
 0x53f   :  { %6544 = vrcp.f32 %v3126_v0  ;;  %v3132_v17 = vadd.f32 1.0, %v6539_v63  ;;  %v6541_v57 = vpop.eup %6540  ;;  %v8705_v0 = vld [vmem:[#allocation10 + $0x188] sm:$0xff]  ;;  %v8707_v63 = vld [vmem:[#allocation10 + $0x198] sm:$0xff] }
 0x540   :  { %v6543_v43 = vpop.eup %6542  ;;  %10101 = vst [vmem:[#allocation58_spill] sm:$0xff] %v8707_v63 }
 0x541   :  { %6546 = vrcp.f32 %v3132_v17  ;;  %v3139_v41 = vadd.f32 1.0, %v6543_v43  ;;  %v8711_v17 = vld [vmem:[#allocation10 + $0x180] sm:$0xff]  ;;  %v8717_v43 = vld [vmem:[#allocation10 + $0x168] sm:$0xff] }
 0x542   :  { %10102 = vst [vmem:[#allocation59_spill] sm:$0xff] %v8711_v17  ;;  %10104 = vst [vmem:[#allocation61_spill] sm:$0xff] %v8717_v43 }
 0x543   :  { %6548 = vrcp.f32 %v3139_v41  ;;  %v8729_v41 = vld [vmem:[#allocation10 + $0x148] sm:$0xff] }
 0x544   :  { %10108 = vst [vmem:[#allocation65_spill] sm:$0xff] %v8729_v41 }
 0x54c   :  { %v6545_v33 = vpop.eup %6544 }
 0x54d   :  { %v3143_v44 = vmul.f32 %v6545_v33, %v6541_v57  ;;  %v8713_v57 = vld [vmem:[#allocation10 + $0x190] sm:$0xff]  ;;  %v8719_v33 = vld [vmem:[#allocation10 + $0x178] sm:$0xff] }
 0x54e   :  { %v6547_v48 = vpop.eup %6546  ;;  %10103 = vst [vmem:[#allocation60_spill] sm:$0xff] %v8713_v57  ;;  %10105 = vst [vmem:[#allocation62_spill] sm:$0xff] %v8719_v33 }
 0x54f   :  { %v3142_v35 = vmul.f32 %v6547_v48, %v8185_v52  ;;  %v8687_v52 = vld [vmem:[#allocation10 + $0x1c0] sm:$0xff]  ;;  %v8725_v48 = vld [vmem:[#allocation10 + $0x170] sm:$0xff] }
 0x550   :  { %v6549_v55 = vpop.eup %6548  ;;  %10107 = vst [vmem:[#allocation64_spill] sm:$0xff] %v8725_v48 }
 0x551   :  { %v8670_v49 = vadd.f32 %v3143_v44, %v3142_v35  ;;  %v8723_v44 = vld [vmem:[#allocation10 + $0x160] sm:$0xff]  ;;  %v8731_v35 = vld [vmem:[#allocation10 + $0x158] sm:$0xff] }
 0x552   :  { %10106 = vst [vmem:[#allocation63_spill] sm:$0xff] %v8723_v44  ;;  %10109 = vst [vmem:[#allocation66_spill] sm:$0xff] %v8731_v35 }
 0x553   :  { %6550 = vtanh.f32 %v8670_v49 }
 0x560   :  { %v6551_v20 = vpop.eup %6550 }
 0x561   :  { %v8673_v28 = vmul.f32 %v6551_v20, %v6549_v55  ;;  %v8735_v55 = vld [vmem:[#allocation10 + $0x140] sm:$0xff]  ;;  %v8737_v20 = vld [vmem:[#allocation10 + $0x150] sm:$0xff] }
 0x562   :  { %10110 = vst [vmem:[#allocation67_spill] sm:$0xff] %v8735_v55  ;;  %10111 = vst [vmem:[#allocation68_spill] sm:$0xff] %v8737_v20 }
 0x563   :  { %3148 = vst [vmem:[#allocation3 + $0x2] sm:$0x3] %v8673_v28  ;;  %3150 = vst [vmem:[#allocation4 + $0x2] sm:$0xc] %v8673_v28  ;;  %3282 = vmatmul.mubr.f32.vlgmr.msra.gmra.mxu1 %v8673_v28  ;;  %3353 = vmatmul.mubr.f32.vlgmr.msra.gmra.mxu0 %v8673_v28 }
 0x564   :  { %3450 = vmatpush1.msra.mxu1 %v8675_v34  ;;  %3521 = vmatpush1.msra.mxu0 %v8677_v18 }
 0x565   :  { %3451 = vmatprep.subr.mxu1 %v8679_v19  ;;  %3522 = vmatprep.subr.mxu0 %v8681_v23 }
 0x566   :  { %3452 = vmatpush1.msra.mxu1 %v8687_v52  ;;  %3523 = vmatpush1.msra.mxu0 %v8689_v32 }
 0x567   :  { %3453 = vmatprep.subr.mxu1 %v8693_v22  ;;  %3524 = vmatprep.subr.mxu0 %v8695_v13 }
 0x568   :  { %3454 = vmatpush1.msra.mxu1 %v8699_v14  ;;  %3525 = vmatpush1.msra.mxu0 %v8701_v40 }
 0x569   :  { %3455 = vmatprep.subr.mxu1 %v8705_v0  ;;  %3526 = vmatprep.subr.mxu0 %v8707_v63  ;;  %v8741_v63 = vld [vmem:[#allocation10 + $0x128] sm:$0xff] }
 0x56a   :  { %3456 = vmatpush1.msra.mxu1 %v8711_v17  ;;  %3527 = vmatpush1.msra.mxu0 %v8713_v57  ;;  %10112 = vst [vmem:[#allocation69_spill] sm:$0xff] %v8741_v63  ;;  %v8743_v17 = vld [vmem:[#allocation10 + $0x138] sm:$0xff]  ;;  %v8747_v57 = vld [vmem:[#allocation10 + $0x120] sm:$0xff] }
 0x56b   :  { %3457 = vmatprep.subr.mxu1 %v8717_v43  ;;  %3528 = vmatprep.subr.mxu0 %v8719_v33  ;;  %10113 = vst [vmem:[#allocation70_spill] sm:$0xff] %v8743_v17  ;;  %10114 = vst [vmem:[#allocation71_spill] sm:$0xff] %v8747_v57  ;;  %v8749_v43 = vld [vmem:[#allocation10 + $0x130] sm:$0xff]  ;;  %v8753_v33 = vld [vmem:[#allocation10 + $0x108] sm:$0xff] }
 0x56c   :  { %3458 = vmatpush1.msra.mxu1 %v8723_v44  ;;  %3529 = vmatpush1.msra.mxu0 %v8725_v48  ;;  %10115 = vst [vmem:[#allocation72_spill] sm:$0xff] %v8749_v43  ;;  %10116 = vst [vmem:[#allocation73_spill] sm:$0xff] %v8753_v33  ;;  %v8755_v44 = vld [vmem:[#allocation10 + $0x118] sm:$0xff]  ;;  %v8759_v48 = vld [vmem:[#allocation10 + $0x100] sm:$0xff] }
 0x56d   :  { %3459 = vmatprep.subr.mxu1 %v8729_v41  ;;  %3530 = vmatprep.subr.mxu0 %v8731_v35  ;;  %10117 = vst [vmem:[#allocation74_spill] sm:$0xff] %v8755_v44  ;;  %10118 = vst [vmem:[#allocation75_spill] sm:$0xff] %v8759_v48  ;;  %v8761_v41 = vld [vmem:[#allocation10 + $0x110] sm:$0xff]  ;;  %v8765_v35 = vld [vmem:[#allocation10 + $0xe8] sm:$0xff] }
 0x56e   :  { %3460 = vmatpush1.msra.mxu1 %v8735_v55  ;;  %3531 = vmatpush1.msra.mxu0 %v8737_v20  ;;  %10119 = vst [vmem:[#allocation76_spill] sm:$0xff] %v8761_v41  ;;  %10120 = vst [vmem:[#allocation77_spill] sm:$0xff] %v8765_v35  ;;  %v8767_v55 = vld [vmem:[#allocation10 + $0xf8] sm:$0xff]  ;;  %v8771_v20 = vld [vmem:[#allocation10 + $0xe0] sm:$0xff] }
 0x56f   :  { %3461 = vmatprep.subr.mxu1 %v8741_v63  ;;  %3532 = vmatprep.subr.mxu0 %v8743_v17  ;;  %10121 = vst [vmem:[#allocation78_spill] sm:$0xff] %v8767_v55  ;;  %10122 = vst [vmem:[#allocation79_spill] sm:$0xff] %v8771_v20  ;;  %v8773_v63 = vld [vmem:[#allocation10 + $0xf0] sm:$0xff]  ;;  %v8777_v17 = vld [vmem:[#allocation10 + $0xc8] sm:$0xff] }
 0x570   :  { %3462 = vmatpush1.msra.mxu1 %v8747_v57  ;;  %3533 = vmatpush1.msra.mxu0 %v8749_v43  ;;  %10123 = vst [vmem:[#allocation80_spill] sm:$0xff] %v8773_v63  ;;  %10124 = vst [vmem:[#allocation81_spill] sm:$0xff] %v8777_v17  ;;  %v8779_v57 = vld [vmem:[#allocation10 + $0xd8] sm:$0xff]  ;;  %v8783_v43 = vld [vmem:[#allocation10 + $0xc0] sm:$0xff] }
 0x571   :  { %3463 = vmatprep.subr.mxu1 %v8753_v33  ;;  %3534 = vmatprep.subr.mxu0 %v8755_v44  ;;  %10125 = vst [vmem:[#allocation82_spill] sm:$0xff] %v8779_v57  ;;  %10126 = vst [vmem:[#allocation83_spill] sm:$0xff] %v8783_v43  ;;  %v8785_v33 = vld [vmem:[#allocation10 + $0xd0] sm:$0xff]  ;;  %v8789_v44 = vld [vmem:[#allocation10 + $0xa8] sm:$0xff] }
 0x572   :  { %3464 = vmatpush1.msra.mxu1 %v8759_v48  ;;  %3535 = vmatpush1.msra.mxu0 %v8761_v41  ;;  %10127 = vst [vmem:[#allocation84_spill] sm:$0xff] %v8785_v33  ;;  %10128 = vst [vmem:[#allocation85_spill] sm:$0xff] %v8789_v44  ;;  %v8791_v48 = vld [vmem:[#allocation10 + $0xb8] sm:$0xff]  ;;  %v8795_v41 = vld [vmem:[#allocation10 + $0xa0] sm:$0xff] }
 0x573   :  { %3465 = vmatprep.subr.mxu1 %v8765_v35  ;;  %3536 = vmatprep.subr.mxu0 %v8767_v55  ;;  %10129 = vst [vmem:[#allocation86_spill] sm:$0xff] %v8791_v48  ;;  %10130 = vst [vmem:[#allocation87_spill] sm:$0xff] %v8795_v41  ;;  %v8797_v35 = vld [vmem:[#allocation10 + $0xb0] sm:$0xff]  ;;  %v8801_v55 = vld [vmem:[#allocation10 + $0x88] sm:$0xff] }
 0x574   :  { %3466 = vmatpush1.msra.mxu1 %v8771_v20  ;;  %3537 = vmatpush1.msra.mxu0 %v8773_v63  ;;  %10131 = vst [vmem:[#allocation88_spill] sm:$0xff] %v8797_v35  ;;  %10132 = vst [vmem:[#allocation89_spill] sm:$0xff] %v8801_v55  ;;  %v8803_v20 = vld [vmem:[#allocation10 + $0x98] sm:$0xff]  ;;  %v8807_v63 = vld [vmem:[#allocation10 + $0x80] sm:$0xff] }
 0x575   :  { %3467 = vmatprep.subr.mxu1 %v8777_v17  ;;  %3538 = vmatprep.subr.mxu0 %v8779_v57  ;;  %10133 = vst [vmem:[#allocation90_spill] sm:$0xff] %v8803_v20  ;;  %10134 = vst [vmem:[#allocation91_spill] sm:$0xff] %v8807_v63  ;;  %v8809_v17 = vld [vmem:[#allocation10 + $0x90] sm:$0xff]  ;;  %v8813_v57 = vld [vmem:[#allocation10 + $0x68] sm:$0xff] }
 0x576   :  { %3468 = vmatpush1.msra.mxu1 %v8783_v43  ;;  %3539 = vmatpush1.msra.mxu0 %v8785_v33  ;;  %10135 = vst [vmem:[#allocation92_spill] sm:$0xff] %v8809_v17  ;;  %10136 = vst [vmem:[#allocation93_spill] sm:$0xff] %v8813_v57  ;;  %v8815_v43 = vld [vmem:[#allocation10 + $0x78] sm:$0xff]  ;;  %v8819_v33 = vld [vmem:[#allocation10 + $0x60] sm:$0xff] }
 0x577   :  { %3469 = vmatprep.subr.mxu1 %v8789_v44  ;;  %3540 = vmatprep.subr.mxu0 %v8791_v48  ;;  %10137 = vst [vmem:[#allocation94_spill] sm:$0xff] %v8815_v43  ;;  %10138 = vst [vmem:[#allocation95_spill] sm:$0xff] %v8819_v33  ;;  %v8821_v44 = vld [vmem:[#allocation10 + $0x70] sm:$0xff]  ;;  %v8825_v48 = vld [vmem:[#allocation10 + $0x48] sm:$0xff] }
 0x578   :  { %3470 = vmatpush1.msra.mxu1 %v8795_v41  ;;  %3541 = vmatpush1.msra.mxu0 %v8797_v35  ;;  %10139 = vst [vmem:[#allocation96_spill] sm:$0xff] %v8821_v44  ;;  %v8827_v41 = vld [vmem:[#allocation10 + $0x58] sm:$0xff]  ;;  %v8831_v35 = vld [vmem:[#allocation10 + $0x40] sm:$0xff] }
 0x579   :  { %3471 = vmatprep.subr.mxu1 %v8801_v55  ;;  %3542 = vmatprep.subr.mxu0 %v8803_v20  ;;  %10140 = vst [vmem:[#allocation97_spill] sm:$0xff] %v8827_v41  ;;  %v8833_v55 = vld [vmem:[#allocation10 + $0x50] sm:$0xff]  ;;  %v8837_v20 = vld [vmem:[#allocation10 + $0x28] sm:$0xff] }
 0x57a   :  { %3472 = vmatpush1.msra.mxu1 %v8807_v63  ;;  %3543 = vmatpush1.msra.mxu0 %v8809_v17  ;;  %10141 = vst [vmem:[#allocation98_spill] sm:$0xff] %v8837_v20  ;;  %v8839_v63 = vld [vmem:[#allocation10 + $0x38] sm:$0xff]  ;;  %v8843_v17 = vld [vmem:[#allocation10 + $0x20] sm:$0xff] }
 0x57b   :  { %3473 = vmatprep.subr.mxu1 %v8813_v57  ;;  %3544 = vmatprep.subr.mxu0 %v8815_v43  ;;  %v8845_v57 = vld [vmem:[#allocation10 + $0x30] sm:$0xff]  ;;  %v8849_v43 = vld [vmem:[#allocation10 + $0x8] sm:$0xff] }
 0x57c   :  { %3474 = vmatpush1.msra.mxu1 %v8819_v33  ;;  %3545 = vmatpush1.msra.mxu0 %v8821_v44  ;;  %v8851_v33 = vld [vmem:[#allocation10 + $0x18] sm:$0xff]  ;;  %v8855_v44 = vld [vmem:[#allocation10] sm:$0xff] }
 0x57d   :  { %3475 = vmatprep.subr.mxu1 %v8825_v48  ;;  %3546 = vmatprep.subr.mxu0 %v8827_v41  ;;  %v8859_v41 = vld [vmem:[#allocation10 + $0x10] sm:$0xff] }
 0x57e   :  { %3476 = vmatpush1.msra.mxu1 %v8831_v35  ;;  %3547 = vmatpush1.msra.mxu0 %v8833_v55 }
 0x57f   :  { %3477 = vmatprep.subr.mxu1 %v8837_v20  ;;  %3548 = vmatprep.subr.mxu0 %v8839_v63  ;;  %v3447_v20 = vrot.slane %v8673_v28, 2 }
 0x580   :  { %3478 = vmatpush1.msra.mxu1 %v8843_v17  ;;  %3549 = vmatpush1.msra.mxu0 %v8845_v57 }
 0x581   :  { %3479 = vmatprep.subr.mxu1 %v8849_v43  ;;  %3550 = vmatprep.subr.mxu0 %v8851_v33 }
 0x582   :  { %3480 = vmatpush1.msra.mxu1 %v8855_v44  ;;  %3513 = vmatprep.mubr.f32.mxu1 %v9939_v16 }
 0x583   :  { %3551 = vmatpush1.msra.mxu0 %v8859_v41  ;;  %3584 = vmatprep.mubr.f32.mxu0 %v9939_v16 }
 0x584   :  { %3514 = vmatmul.mubr.f32.vlgmr.msra.gmra.mxu1 %v3447_v20  ;;  %3585 = vmatmul.mubr.f32.vlgmr.msra.gmra.mxu0 %v3447_v20  ;;  %v10170_v20 = vld [vmem:[#allocation31_spill] sm:$0xff] }
 0x585   :  { %3756 = vmatprep.subr.mxu1 %v8264_v2  ;;  %3827 = vmatprep.subr.mxu0 %v8269_v3  ;;  %v10142_v2 = vld [vmem:[#allocation35_spill] sm:$0xff]  ;;  %v10143_v3 = vld [vmem:[#allocation36_spill] sm:$0xff] }
 0x586   :  { %3757 = vmatpush1.msra.mxu1 %v8276_v4  ;;  %3828 = vmatpush1.msra.mxu0 %v8281_v5  ;;  %v10144_v4 = vld [vmem:[#allocation37_spill] sm:$0xff]  ;;  %v10145_v5 = vld [vmem:[#allocation38_spill] sm:$0xff] }
 0x587   :  { %3758 = vmatprep.subr.mxu1 %v8288_v11  ;;  %3829 = vmatprep.subr.mxu0 %v8293_v12  ;;  %v10146_v11 = vld [vmem:[#allocation39_spill] sm:$0xff]  ;;  %v10147_v12 = vld [vmem:[#allocation40_spill] sm:$0xff] }
 0x588   :  { %3759 = vmatpush1.msra.mxu1 %v8300_v15  ;;  %3830 = vmatpush1.msra.mxu0 %v8305_v36  ;;  %v10148_v15 = vld [vmem:[#allocation41_spill] sm:$0xff]  ;;  %v10149_v36 = vld [vmem:[#allocation42_spill] sm:$0xff] }
 0x589   :  { %3760 = vmatprep.subr.mxu1 %v8312_v6  ;;  %3831 = vmatprep.subr.mxu0 %v8317_v58  ;;  %v10150_v6 = vld [vmem:[#allocation43_spill] sm:$0xff]  ;;  %v10151_v58 = vld [vmem:[#allocation44_spill] sm:$0xff] }
 0x58a   :  { %3761 = vmatpush1.msra.mxu1 %v8324_v42  ;;  %3832 = vmatpush1.msra.mxu0 %v8329_v27  ;;  %v10152_v42 = vld [vmem:[#allocation30_spill] sm:$0xff]  ;;  %v10153_v27 = vld [vmem:[#allocation27_spill] sm:$0xff] }
 0x58b   :  { %3762 = vmatprep.subr.mxu1 %v8336_v26  ;;  %3833 = vmatprep.subr.mxu0 %v8341_v45  ;;  %v10154_v26 = vld [vmem:[#allocation29_spill] sm:$0xff]  ;;  %v10155_v45 = vld [vmem:[#allocation26_spill] sm:$0xff] }
 0x58c   :  { %3763 = vmatpush1.msra.mxu1 %v8348_v56  ;;  %3834 = vmatpush1.msra.mxu0 %v8353_v24  ;;  %v10156_v56 = vld [vmem:[#allocation28_spill] sm:$0xff]  ;;  %v10157_v24 = vld [vmem:[#allocation45_spill] sm:$0xff] }
 0x58d   :  { %3764 = vmatprep.subr.mxu1 %v8360_v50  ;;  %3835 = vmatprep.subr.mxu0 %v8365_v7  ;;  %v10158_v50 = vld [vmem:[#allocation46_spill] sm:$0xff]  ;;  %v10159_v7 = vld [vmem:[#allocation47_spill] sm:$0xff] }
 0x58e   :  { %3765 = vmatpush1.msra.mxu1 %v8372_v29  ;;  %3836 = vmatpush1.msra.mxu0 %v8377_v31  ;;  %v10160_v29 = vld [vmem:[#allocation48_spill] sm:$0xff]  ;;  %v10161_v31 = vld [vmem:[#allocation49_spill] sm:$0xff] }
 0x58f   :  { %3766 = vmatprep.subr.mxu1 %v8384_v51  ;;  %3837 = vmatprep.subr.mxu0 %v8389_v53  ;;  %v10162_v51 = vld [vmem:[#allocation50_spill] sm:$0xff]  ;;  %v10163_v53 = vld [vmem:[#allocation51_spill] sm:$0xff] }
 0x590   :  { %3767 = vmatpush1.msra.mxu1 %v8396_v54  ;;  %3838 = vmatpush1.msra.mxu0 %v8401_v60  ;;  %v10164_v54 = vld [vmem:[#allocation52_spill] sm:$0xff]  ;;  %v10165_v60 = vld [vmem:[#allocation53_spill] sm:$0xff] }
 0x591   :  { %3768 = vmatprep.subr.mxu1 %v8406_v61  ;;  %3839 = vmatprep.subr.mxu0 %v8413_v38  ;;  %v10166_v61 = vld [vmem:[#allocation54_spill] sm:$0xff]  ;;  %v10167_v38 = vld [vmem:[#allocation55_spill] sm:$0xff] }
 0x592   :  { %3769 = vmatpush1.msra.mxu1 %v8418_v59  ;;  %3840 = vmatpush1.msra.mxu0 %v8423_v46  ;;  %v10168_v59 = vld [vmem:[#allocation56_spill] sm:$0xff]  ;;  %v10169_v46 = vld [vmem:[#allocation57_spill] sm:$0xff] }
 0x593   :  { %3770 = vmatprep.subr.mxu1 %v8430_v39  ;;  %3841 = vmatprep.subr.mxu0 %v8435_v62 }
 0x594   :  { %3771 = vmatpush1.msra.mxu1 %v8440_v21  ;;  %3842 = vmatpush1.msra.mxu0 %v8447_v9 }
 0x595   :  { %3772 = vmatprep.subr.mxu1 %v8452_v10  ;;  %3843 = vmatprep.subr.mxu0 %v8457_v37 }
 0x596   :  { %3773 = vmatpush1.msra.mxu1 %v8464_v30  ;;  %3844 = vmatpush1.msra.mxu0 %v8469_v25 }
 0x597   :  { %3774 = vmatprep.subr.mxu1 %v8476_v8  ;;  %3845 = vmatprep.subr.mxu0 %v8481_v1 }
 0x598   :  { %3775 = vmatpush1.msra.mxu1 %v10142_v2  ;;  %3846 = vmatpush1.msra.mxu0 %v10143_v3  ;;  %v10171_v2 = vld [vmem:[#allocation32_spill] sm:$0xff] }
 0x599   :  { %3776 = vmatprep.subr.mxu1 %v10144_v4  ;;  %3847 = vmatprep.subr.mxu0 %v10145_v5  ;;  %v10172_v3 = vcombine.low %v10170_v20, %v10171_v2 }
 0x59a   :  { %3777 = vmatpush1.msra.mxu1 %v10146_v11  ;;  %3848 = vmatpush1.msra.mxu0 %v10147_v12 }
 0x59b   :  { %3778 = vmatprep.subr.mxu1 %v10148_v15  ;;  %3849 = vmatprep.subr.mxu0 %v10149_v36 }
 0x59c   :  { %3779 = vmatpush1.msra.mxu1 %v10150_v6  ;;  %3850 = vmatpush1.msra.mxu0 %v10151_v58 }
 0x59d   :  { %3780 = vmatprep.subr.mxu1 %v10152_v42  ;;  %3851 = vmatprep.subr.mxu0 %v10153_v27 }
 0x59e   :  { %3781 = vmatpush1.msra.mxu1 %v10154_v26  ;;  %3852 = vmatpush1.msra.mxu0 %v10155_v45  ;;  %v10173_v26 = vld [vmem:[#allocation33_spill] sm:$0xff]  ;;  %v10174_v45 = vld [vmem:[#allocation34_spill] sm:$0xff] }
 0x59f   :  { %3782 = vmatprep.subr.mxu1 %v10156_v56  ;;  %3853 = vmatprep.subr.mxu0 %v10157_v24  ;;  %v10175_v56 = vcombine.high %v10173_v26, %v10174_v45 }
 0x5a0   :  { %3783 = vmatpush1.msra.mxu1 %v10158_v50  ;;  %3854 = vmatpush1.msra.mxu0 %v10159_v7 }
 0x5a1   :  { %3784 = vmatprep.subr.mxu1 %v10160_v29  ;;  %3855 = vmatprep.subr.mxu0 %v10161_v31 }
 0x5a2   :  { %3785 = vmatpush1.msra.mxu1 %v10162_v51  ;;  %3856 = vmatpush1.msra.mxu0 %v10163_v53 }
 0x5a3   :  { %3786 = vmatprep.subr.mxu1 %v10164_v54  ;;  %3857 = vmatprep.subr.mxu0 %v10165_v60 }
 0x5a4   :  { %3787 = vmatpush1.msra.mxu1 %v10166_v61  ;;  %3858 = vmatpush1.msra.mxu0 %v10167_v38 }
 0x5a5   :  { %3820 = vmatprep.mubr.f32.mxu1 %v9939_v16  ;;  %3891 = vmatprep.mubr.f32.mxu0 %v9939_v16 }
 0x5a6   :  { %3988 = vmatprep.subr.mxu1 %v10168_v59  ;;  %4059 = vmatprep.subr.mxu0 %v10169_v46 }
 0x623   :  { %v3283_v39 = vpop.f32.mrf.mxu1  ;;  %v3354_v62 = vpop.f32.mrf.mxu0 }
 0x625   :  { %v3285_v21 = vpop.f32.mrf.mxu1  ;;  %v3356_v9 = vpop.f32.mrf.mxu0 }
 0x626   :  { %v3363_v10 = vcombine.low %v3283_v39, %v3285_v21  ;;  %v3364_v37 = vcombine.low %v3354_v62, %v3356_v9 }
 0x628   :  { %v3371_v30 = vrot.slane %v3363_v10, %v10011_v47  ;;  %v3378_v25 = vrot.slane %v3364_v37, %v10011_v47 }
 0x62a   :  { %v3379_v8 = vcombine.low %v3371_v30, %v3378_v25 }
 0x62c   :  { %v3381_v4 = vadd.f32 %v3379_v8, %v10172_v3 }
 0x62e   :  { %v3615_v36 = vcombine.high %v3381_v4, %v3381_v4  ;;  %v3622_v50 = vrot.slane %v3381_v4, %v10011_v47 }
 0x630   :  { %v3629_v27 = vrot.slane %v3615_v36, %v10011_v47  ;;  %v3630_v60 = vcombine.high %v3622_v50, %v3622_v50 }
 0x632   :  { %v3631_v31 = vcombine.high %v3629_v27, %v3629_v27 }
 0x644   :  { %v3515_v1 = vpop.f32.mrf.mxu1  ;;  %v3586_v28 = vpop.f32.mrf.mxu0 }
 0x646   :  { %v3517_v5 = vpop.f32.mrf.mxu1  ;;  %v3588_v11 = vpop.f32.mrf.mxu0 }
 0x647   :  { %v3595_v12 = vcombine.low %v3515_v1, %v3517_v5  ;;  %v3596_v15 = vcombine.low %v3586_v28, %v3588_v11 }
 0x649   :  { %v3603_v6 = vrot.slane %v3595_v12, %v10011_v47  ;;  %v3610_v58 = vrot.slane %v3596_v15, %v10011_v47 }
 0x64b   :  { %v3611_v42 = vcombine.low %v3603_v6, %v3610_v58  ;;  %v10188_v6 = vld [vmem:[#allocation70_spill] sm:$0xff]  ;;  %v10189_v58 = vld [vmem:[#allocation71_spill] sm:$0xff] }
 0x64d   :  { %v3613_v24 = vadd.f32 %v3611_v42, %v10175_v56  ;;  %v10190_v42 = vld [vmem:[#allocation72_spill] sm:$0xff]  ;;  %v10192_v56 = vld [vmem:[#allocation74_spill] sm:$0xff] }
 0x64f   :  { %v3637_v7 = vcombine.low %v3613_v24, %v3613_v24  ;;  %v3651_v29 = vrot.slane %v3613_v24, %v10011_v47  ;;  %v10193_v24 = vld [vmem:[#allocation75_spill] sm:$0xff] }
 0x651   :  { %v3644_v51 = vrot.slane %v3637_v7, %v10011_v47  ;;  %v3653_v53 = vcombine.high %v3651_v29, %v3651_v29  ;;  %v3660_v54 = vsel %vm2578_vm1, %v3629_v27, %v3651_v29  ;;  %v10191_v27 = vld [vmem:[#allocation73_spill] sm:$0xff]  ;;  %v10196_v29 = vld [vmem:[#allocation78_spill] sm:$0xff] }
 0x652   :  { %v10195_v7 = vld [vmem:[#allocation77_spill] sm:$0xff] }
 0x653   :  { %v3652_v61 = vcombine.high %v3644_v51, %v3644_v51  ;;  %v3658_v38 = vsel %vm2578_vm1, %v3622_v50, %v3644_v51  ;;  %v3661_v59 = vsel %vm2578_vm1, %v3631_v31, %v3653_v53  ;;  %v10194_v50 = vld [vmem:[#allocation76_spill] sm:$0xff]  ;;  %v10197_v31 = vld [vmem:[#allocation79_spill] sm:$0xff]  ;;  %v10199_v53 = vld [vmem:[#allocation81_spill] sm:$0xff] }
 0x654   :  { %v6282_v46 = vmul.f32 -1.442695, %v3658_v38  ;;  %v6284_v21 = vmul.f32 -1.442695, %v3661_v59  ;;  %v10198_v51 = vld [vmem:[#allocation80_spill] sm:$0xff]  ;;  %v10203_v38 = vld [vmem:[#allocation85_spill] sm:$0xff] }
 0x655   :  { %v3659_v39 = vsel %vm2578_vm1, %v3630_v60, %v3652_v61  ;;  %v10201_v60 = vld [vmem:[#allocation83_spill] sm:$0xff]  ;;  %v10202_v61 = vld [vmem:[#allocation84_spill] sm:$0xff]  ;;  %v10204_v59 = vld [vmem:[#allocation86_spill] sm:$0xff] }
 0x656   :  { %6552 = vpow2.f32 %v6282_v46  ;;  %v6283_v62 = vmul.f32 -1.442695, %v3659_v39  ;;  %v10205_v46 = vld [vmem:[#allocation87_spill] sm:$0xff]  ;;  %v10206_v39 = vld [vmem:[#allocation88_spill] sm:$0xff] }
 0x658   :  { %6554 = vpow2.f32 %v6283_v62  ;;  %v10207_v62 = vld [vmem:[#allocation89_spill] sm:$0xff] }
 0x659   :  { %6556 = vtanh.f32 %v3660_v54  ;;  %v10200_v54 = vld [vmem:[#allocation82_spill] sm:$0xff] }
 0x65a   :  { %6558 = vpow2.f32 %v6284_v21  ;;  %v10208_v21 = vld [vmem:[#allocation90_spill] sm:$0xff] }
 0x663   :  { %v6553_v9 = vpop.eup %6552 }
 0x664   :  { %v3665_v10 = vadd.f32 1.0, %v6553_v9  ;;  %v10209_v9 = vld [vmem:[#allocation91_spill] sm:$0xff] }
 0x665   :  { %v6555_v37 = vpop.eup %6554 }
 0x666   :  { %6560 = vrcp.f32 %v3665_v10  ;;  %v3671_v30 = vadd.f32 1.0, %v6555_v37  ;;  %v6557_v25 = vpop.eup %6556  ;;  %v10210_v10 = vld [vmem:[#allocation92_spill] sm:$0xff]  ;;  %v10211_v37 = vld [vmem:[#allocation93_spill] sm:$0xff] }
 0x667   :  { %v6559_v8 = vpop.eup %6558 }
 0x668   :  { %6562 = vrcp.f32 %v3671_v30  ;;  %v3678_v4 = vadd.f32 1.0, %v6559_v8  ;;  %v10212_v30 = vld [vmem:[#allocation94_spill] sm:$0xff]  ;;  %v10214_v8 = vld [vmem:[#allocation96_spill] sm:$0xff] }
 0x66a   :  { %6564 = vrcp.f32 %v3678_v4  ;;  %v4352_v4 = vld [vmem:[#allocation11 + $0x3a0] sm:$0xff] }
 0x673   :  { %v6561_v1 = vpop.eup %6560 }
 0x674   :  { %v3682_v28 = vmul.f32 %v6561_v1, %v6557_v25  ;;  %v10213_v25 = vld [vmem:[#allocation95_spill] sm:$0xff]  ;;  %v10215_v1 = vld [vmem:[#allocation97_spill] sm:$0xff] }
 0x675   :  { %v6563_v3 = vpop.eup %6562 }
 0x676   :  { %v3681_v5 = vmul.f32 %v6563_v3, %v8670_v49  ;;  %v10176_v49 = vld [vmem:[#allocation58_spill] sm:$0xff]  ;;  %v4355_v3 = vld [vmem:[#allocation11 + $0x3b8] sm:$0xff] }
 0x677   :  { %v6565_v12 = vpop.eup %6564 }
 0x678   :  { %v8955_v11 = vadd.f32 %v3682_v28, %v3681_v5  ;;  %v10216_v28 = vld [vmem:[#allocation98_spill] sm:$0xff]  ;;  %v4354_v5 = vld [vmem:[#allocation11 + $0x3b0] sm:$0xff] }
 0x67a   :  { %6566 = vtanh.f32 %v8955_v11 }
 0x687   :  { %v6567_v15 = vpop.eup %6566 }
 0x688   :  { %v8958_v36 = vmul.f32 %v6567_v15, %v6565_v12  ;;  %v4349_v12 = vld [vmem:[#allocation11 + $0x388] sm:$0xff]  ;;  %v4351_v15 = vld [vmem:[#allocation11 + $0x398] sm:$0xff] }
 0x68a   :  { %3687 = vst [vmem:[#allocation3 + $0x4] sm:$0x3] %v8958_v36  ;;  %3689 = vst [vmem:[#allocation4] sm:$0xc] %v8958_v36  ;;  %3821 = vmatmul.mubr.f32.vlgmr.msra.gmra.mxu1 %v8958_v36  ;;  %3892 = vmatmul.mubr.f32.vlgmr.msra.gmra.mxu0 %v8958_v36 }
 0x68b   :  { %3989 = vmatpush1.msra.mxu1 %v8675_v34  ;;  %4060 = vmatpush1.msra.mxu0 %v8677_v18  ;;  %v10177_v34 = vld [vmem:[#allocation59_spill] sm:$0xff]  ;;  %v10178_v18 = vld [vmem:[#allocation60_spill] sm:$0xff] }
 0x68c   :  { %3990 = vmatprep.subr.mxu1 %v8679_v19  ;;  %4061 = vmatprep.subr.mxu0 %v8681_v23  ;;  %v10179_v19 = vld [vmem:[#allocation61_spill] sm:$0xff]  ;;  %v10180_v23 = vld [vmem:[#allocation62_spill] sm:$0xff] }
 0x68d   :  { %3991 = vmatpush1.msra.mxu1 %v8687_v52  ;;  %4062 = vmatpush1.msra.mxu0 %v8689_v32  ;;  %v10181_v52 = vld [vmem:[#allocation63_spill] sm:$0xff]  ;;  %v10182_v32 = vld [vmem:[#allocation64_spill] sm:$0xff] }
 0x68e   :  { %3992 = vmatprep.subr.mxu1 %v8693_v22  ;;  %4063 = vmatprep.subr.mxu0 %v8695_v13  ;;  %v10183_v22 = vld [vmem:[#allocation65_spill] sm:$0xff]  ;;  %v10184_v13 = vld [vmem:[#allocation66_spill] sm:$0xff] }
 0x68f   :  { %3993 = vmatpush1.msra.mxu1 %v8699_v14  ;;  %4064 = vmatpush1.msra.mxu0 %v8701_v40  ;;  %v10185_v14 = vld [vmem:[#allocation67_spill] sm:$0xff]  ;;  %v10186_v40 = vld [vmem:[#allocation68_spill] sm:$0xff] }
 0x690   :  { %3994 = vmatprep.subr.mxu1 %v8705_v0  ;;  %4065 = vmatprep.subr.mxu0 %v10176_v49  ;;  %v10187_v0 = vld [vmem:[#allocation69_spill] sm:$0xff]  ;;  %v4350_v49 = vld [vmem:[#allocation11 + $0x390] sm:$0xff] }
 0x691   :  { %3995 = vmatpush1.msra.mxu1 %v10177_v34  ;;  %4066 = vmatpush1.msra.mxu0 %v10178_v18  ;;  %v4345_v34 = vld [vmem:[#allocation11 + $0x368] sm:$0xff]  ;;  %v4347_v18 = vld [vmem:[#allocation11 + $0x378] sm:$0xff] }
 0x692   :  { %3996 = vmatprep.subr.mxu1 %v10179_v19  ;;  %4067 = vmatprep.subr.mxu0 %v10180_v23  ;;  %v4344_v19 = vld [vmem:[#allocation11 + $0x360] sm:$0xff]  ;;  %v4346_v23 = vld [vmem:[#allocation11 + $0x370] sm:$0xff] }
 0x693   :  { %3997 = vmatpush1.msra.mxu1 %v10181_v52  ;;  %4068 = vmatpush1.msra.mxu0 %v10182_v32  ;;  %v4341_v52 = vld [vmem:[#allocation11 + $0x348] sm:$0xff]  ;;  %v4343_v32 = vld [vmem:[#allocation11 + $0x358] sm:$0xff] }
 0x694   :  { %3998 = vmatprep.subr.mxu1 %v10183_v22  ;;  %4069 = vmatprep.subr.mxu0 %v10184_v13  ;;  %v4340_v22 = vld [vmem:[#allocation11 + $0x340] sm:$0xff]  ;;  %v4342_v13 = vld [vmem:[#allocation11 + $0x350] sm:$0xff] }
 0x695   :  { %3999 = vmatpush1.msra.mxu1 %v10185_v14  ;;  %4070 = vmatpush1.msra.mxu0 %v10186_v40  ;;  %v4337_v14 = vld [vmem:[#allocation11 + $0x328] sm:$0xff]  ;;  %v4339_v40 = vld [vmem:[#allocation11 + $0x338] sm:$0xff] }
 0x696   :  { %4000 = vmatprep.subr.mxu1 %v10187_v0  ;;  %4071 = vmatprep.subr.mxu0 %v10188_v6  ;;  %v4336_v0 = vld [vmem:[#allocation11 + $0x320] sm:$0xff]  ;;  %v4338_v6 = vld [vmem:[#allocation11 + $0x330] sm:$0xff] }
 0x697   :  { %4001 = vmatpush1.msra.mxu1 %v10189_v58  ;;  %4072 = vmatpush1.msra.mxu0 %v10190_v42  ;;  %v4333_v58 = vld [vmem:[#allocation11 + $0x308] sm:$0xff]  ;;  %v4335_v42 = vld [vmem:[#allocation11 + $0x318] sm:$0xff] }
 0x698   :  { %4002 = vmatprep.subr.mxu1 %v10191_v27  ;;  %4073 = vmatprep.subr.mxu0 %v10192_v56  ;;  %v4332_v27 = vld [vmem:[#allocation11 + $0x300] sm:$0xff]  ;;  %v4334_v56 = vld [vmem:[#allocation11 + $0x310] sm:$0xff] }
 0x699   :  { %4003 = vmatpush1.msra.mxu1 %v10193_v24  ;;  %4074 = vmatpush1.msra.mxu0 %v10194_v50  ;;  %v4329_v24 = vld [vmem:[#allocation11 + $0x2e8] sm:$0xff]  ;;  %v4331_v50 = vld [vmem:[#allocation11 + $0x2f8] sm:$0xff] }
 0x69a   :  { %4004 = vmatprep.subr.mxu1 %v10195_v7  ;;  %4075 = vmatprep.subr.mxu0 %v10196_v29  ;;  %v4328_v7 = vld [vmem:[#allocation11 + $0x2e0] sm:$0xff]  ;;  %v4330_v29 = vld [vmem:[#allocation11 + $0x2f0] sm:$0xff] }
 0x69b   :  { %4005 = vmatpush1.msra.mxu1 %v10197_v31  ;;  %4076 = vmatpush1.msra.mxu0 %v10198_v51  ;;  %v4325_v31 = vld [vmem:[#allocation11 + $0x2c8] sm:$0xff]  ;;  %v4327_v51 = vld [vmem:[#allocation11 + $0x2d8] sm:$0xff] }
 0x69c   :  { %4006 = vmatprep.subr.mxu1 %v10199_v53  ;;  %4077 = vmatprep.subr.mxu0 %v10200_v54  ;;  %v4324_v53 = vld [vmem:[#allocation11 + $0x2c0] sm:$0xff]  ;;  %v4326_v54 = vld [vmem:[#allocation11 + $0x2d0] sm:$0xff] }
 0x69d   :  { %4007 = vmatpush1.msra.mxu1 %v10201_v60  ;;  %4078 = vmatpush1.msra.mxu0 %v10202_v61  ;;  %v4321_v60 = vld [vmem:[#allocation11 + $0x2a8] sm:$0xff]  ;;  %v4323_v61 = vld [vmem:[#allocation11 + $0x2b8] sm:$0xff] }
 0x69e   :  { %4008 = vmatprep.subr.mxu1 %v10203_v38  ;;  %4079 = vmatprep.subr.mxu0 %v10204_v59  ;;  %v4320_v38 = vld [vmem:[#allocation11 + $0x2a0] sm:$0xff]  ;;  %v4322_v59 = vld [vmem:[#allocation11 + $0x2b0] sm:$0xff] }
 0x69f   :  { %4009 = vmatpush1.msra.mxu1 %v10205_v46  ;;  %4080 = vmatpush1.msra.mxu0 %v10206_v39  ;;  %v4317_v46 = vld [vmem:[#allocation11 + $0x288] sm:$0xff]  ;;  %v4319_v39 = vld [vmem:[#allocation11 + $0x298] sm:$0xff] }
 0x6a0   :  { %4010 = vmatprep.subr.mxu1 %v10207_v62  ;;  %4081 = vmatprep.subr.mxu0 %v10208_v21  ;;  %v4316_v62 = vld [vmem:[#allocation11 + $0x280] sm:$0xff]  ;;  %v4318_v21 = vld [vmem:[#allocation11 + $0x290] sm:$0xff] }
 0x6a1   :  { %4011 = vmatpush1.msra.mxu1 %v10209_v9  ;;  %4082 = vmatpush1.msra.mxu0 %v10210_v10  ;;  %v4313_v9 = vld [vmem:[#allocation11 + $0x268] sm:$0xff]  ;;  %v4315_v10 = vld [vmem:[#allocation11 + $0x278] sm:$0xff] }
 0x6a2   :  { %4012 = vmatprep.subr.mxu1 %v10211_v37  ;;  %4083 = vmatprep.subr.mxu0 %v10212_v30  ;;  %v4312_v37 = vld [vmem:[#allocation11 + $0x260] sm:$0xff]  ;;  %v4314_v30 = vld [vmem:[#allocation11 + $0x270] sm:$0xff] }
 0x6a3   :  { %4013 = vmatpush1.msra.mxu1 %v10213_v25  ;;  %4084 = vmatpush1.msra.mxu0 %v10214_v8  ;;  %v4309_v25 = vld [vmem:[#allocation11 + $0x248] sm:$0xff]  ;;  %v4311_v8 = vld [vmem:[#allocation11 + $0x258] sm:$0xff] }
 0x6a4   :  { %4014 = vmatprep.subr.mxu1 %v8825_v48  ;;  %4085 = vmatprep.subr.mxu0 %v10215_v1  ;;  %v3986_v48 = vrot.slane %v8958_v36, 2  ;;  %v4348_v36 = vld [vmem:[#allocation11 + $0x380] sm:$0xff] }
 0x6a5   :  { %4015 = vmatpush1.msra.mxu1 %v8831_v35  ;;  %4086 = vmatpush1.msra.mxu0 %v8833_v55  ;;  %v4358_v35 = vld [vmem:[#allocation11 + $0x3d0] sm:$0xff]  ;;  %v4353_v55 = vld [vmem:[#allocation11 + $0x3a8] sm:$0xff]  ;;  %v4308_v1 = vld [vmem:[#allocation11 + $0x240] sm:$0xff] }
 0x6a6   :  { %4016 = vmatprep.subr.mxu1 %v10216_v28  ;;  %4087 = vmatprep.subr.mxu0 %v8839_v63  ;;  %v4361_v63 = vld [vmem:[#allocation11 + $0x3e8] sm:$0xff]  ;;  %v4310_v28 = vld [vmem:[#allocation11 + $0x250] sm:$0xff] }
 0x6a7   :  { %4017 = vmatpush1.msra.mxu1 %v8843_v17  ;;  %4088 = vmatpush1.msra.mxu0 %v8845_v57  ;;  %v4363_v17 = vld [vmem:[#allocation11 + $0x3f8] sm:$0xff]  ;;  %v4360_v57 = vld [vmem:[#allocation11 + $0x3e0] sm:$0xff] }
 0x6a8   :  { %4018 = vmatprep.subr.mxu1 %v8849_v43  ;;  %4089 = vmatprep.subr.mxu0 %v8851_v33  ;;  %v4362_v43 = vld [vmem:[#allocation11 + $0x3f0] sm:$0xff]  ;;  %v4357_v33 = vld [vmem:[#allocation11 + $0x3c8] sm:$0xff] }
 0x6a9   :  { %4019 = vmatpush1.msra.mxu1 %v8855_v44  ;;  %4052 = vmatprep.mubr.f32.mxu1 %v9939_v16  ;;  %v4359_v44 = vld [vmem:[#allocation11 + $0x3d8] sm:$0xff] }
 0x6aa   :  { %4090 = vmatpush1.msra.mxu0 %v8859_v41  ;;  %4123 = vmatprep.mubr.f32.mxu0 %v9939_v16  ;;  %v4356_v41 = vld [vmem:[#allocation11 + $0x3c0] sm:$0xff] }
 0x6ab   :  { %4053 = vmatmul.mubr.f32.vlgmr.msra.gmra.mxu1 %v3986_v48  ;;  %4124 = vmatmul.mubr.f32.vlgmr.msra.gmra.mxu0 %v3986_v48  ;;  %v4305_v48 = vld [vmem:[#allocation11 + $0x228] sm:$0xff] }
 0x6ac   :  { %4450 = vmatprep.mubr.f32.mxu1 %v9939_v16  ;;  %4521 = vmatprep.mubr.f32.mxu0 %v9939_v16 }
 0x6ad   :  { %4386 = vmatprep.subr.mxu1 %v4361_v63  ;;  %4457 = vmatprep.subr.mxu0 %v4363_v17  ;;  %v4307_v63 = vld [vmem:[#allocation11 + $0x238] sm:$0xff]  ;;  %v4304_v17 = vld [vmem:[#allocation11 + $0x220] sm:$0xff] }
 0x6ae   :  { %4387 = vmatpush1.msra.mxu1 %v4360_v57  ;;  %4458 = vmatpush1.msra.mxu0 %v4362_v43  ;;  %v4306_v57 = vld [vmem:[#allocation11 + $0x230] sm:$0xff]  ;;  %v4301_v43 = vld [vmem:[#allocation11 + $0x208] sm:$0xff] }
 0x6af   :  { %4388 = vmatprep.subr.mxu1 %v4357_v33  ;;  %4459 = vmatprep.subr.mxu0 %v4359_v44  ;;  %v4303_v33 = vld [vmem:[#allocation11 + $0x218] sm:$0xff]  ;;  %v4300_v44 = vld [vmem:[#allocation11 + $0x200] sm:$0xff] }
 0x6b0   :  { %4389 = vmatpush1.msra.mxu1 %v4356_v41  ;;  %4460 = vmatpush1.msra.mxu0 %v4358_v35  ;;  %v4302_v41 = vld [vmem:[#allocation11 + $0x210] sm:$0xff]  ;;  %v4297_v35 = vld [vmem:[#allocation11 + $0x1e8] sm:$0xff] }
 0x6b1   :  { %4390 = vmatprep.subr.mxu1 %v4353_v55  ;;  %4461 = vmatprep.subr.mxu0 %v4355_v3  ;;  %v4299_v55 = vld [vmem:[#allocation11 + $0x1f8] sm:$0xff] }
 0x6b2   :  { %4391 = vmatpush1.msra.mxu1 %v4352_v4  ;;  %4462 = vmatpush1.msra.mxu0 %v4354_v5 }
 0x6b3   :  { %4392 = vmatprep.subr.mxu1 %v4349_v12  ;;  %4463 = vmatprep.subr.mxu0 %v4351_v15 }
 0x6b4   :  { %4393 = vmatpush1.msra.mxu1 %v4348_v36  ;;  %4464 = vmatpush1.msra.mxu0 %v4350_v49 }
 0x6b5   :  { %4394 = vmatprep.subr.mxu1 %v4345_v34  ;;  %4465 = vmatprep.subr.mxu0 %v4347_v18 }
 0x6b6   :  { %4395 = vmatpush1.msra.mxu1 %v4344_v19  ;;  %4466 = vmatpush1.msra.mxu0 %v4346_v23 }
 0x6b7   :  { %4396 = vmatprep.subr.mxu1 %v4341_v52  ;;  %4467 = vmatprep.subr.mxu0 %v4343_v32  ;;  %v10217_v52 = vcombine.high %v10170_v20, %v10171_v2 }
 0x6b8   :  { %4397 = vmatpush1.msra.mxu1 %v4340_v22  ;;  %4468 = vmatpush1.msra.mxu0 %v4342_v13 }
 0x6b9   :  { %4398 = vmatprep.subr.mxu1 %v4337_v14  ;;  %4469 = vmatprep.subr.mxu0 %v4339_v40 }
 0x6ba   :  { %4399 = vmatpush1.msra.mxu1 %v4336_v0  ;;  %4470 = vmatpush1.msra.mxu0 %v4338_v6 }
 0x6bb   :  { %4400 = vmatprep.subr.mxu1 %v4333_v58  ;;  %4471 = vmatprep.subr.mxu0 %v4335_v42 }
 0x6bc   :  { %4401 = vmatpush1.msra.mxu1 %v4332_v27  ;;  %4472 = vmatpush1.msra.mxu0 %v4334_v56  ;;  %v10218_v56 = vcombine.low %v10173_v26, %v10174_v45 }
 0x6bd   :  { %4402 = vmatprep.subr.mxu1 %v4329_v24  ;;  %4473 = vmatprep.subr.mxu0 %v4331_v50 }
 0x6be   :  { %4403 = vmatpush1.msra.mxu1 %v4328_v7  ;;  %4474 = vmatpush1.msra.mxu0 %v4330_v29 }
 0x6bf   :  { %4404 = vmatprep.subr.mxu1 %v4325_v31  ;;  %4475 = vmatprep.subr.mxu0 %v4327_v51 }
 0x6c0   :  { %4405 = vmatpush1.msra.mxu1 %v4324_v53  ;;  %4476 = vmatpush1.msra.mxu0 %v4326_v54 }
 0x6c1   :  { %4406 = vmatprep.subr.mxu1 %v4321_v60  ;;  %4477 = vmatprep.subr.mxu0 %v4323_v61 }
 0x6c2   :  { %4407 = vmatpush1.msra.mxu1 %v4320_v38  ;;  %4478 = vmatpush1.msra.mxu0 %v4322_v59 }
 0x6c3   :  { %4408 = vmatprep.subr.mxu1 %v4317_v46  ;;  %4479 = vmatprep.subr.mxu0 %v4319_v39 }
 0x6c4   :  { %4409 = vmatpush1.msra.mxu1 %v4316_v62  ;;  %4480 = vmatpush1.msra.mxu0 %v4318_v21 }
 0x6c5   :  { %4410 = vmatprep.subr.mxu1 %v4313_v9  ;;  %4481 = vmatprep.subr.mxu0 %v4315_v10 }
 0x6c6   :  { %4411 = vmatpush1.msra.mxu1 %v4312_v37  ;;  %4482 = vmatpush1.msra.mxu0 %v4314_v30 }
 0x6c7   :  { %4412 = vmatprep.subr.mxu1 %v4309_v25  ;;  %4483 = vmatprep.subr.mxu0 %v4311_v8 }
 0x6c8   :  { %4413 = vmatpush1.msra.mxu1 %v4308_v1  ;;  %4484 = vmatpush1.msra.mxu0 %v4310_v28 }
 0x6c9   :  { %4414 = vmatprep.subr.mxu1 %v4305_v48  ;;  %4485 = vmatprep.subr.mxu0 %v4307_v63 }
 0x6ca   :  { %4415 = vmatpush1.msra.mxu1 %v4304_v17  ;;  %4486 = vmatpush1.msra.mxu0 %v4306_v57  ;;  %v4234_v57 = vld [vmem:[#allocation4 + $0x4] sm:$0x3] }
 0x6cb   :  { %4416 = vmatprep.subr.mxu1 %v4301_v43  ;;  %4487 = vmatprep.subr.mxu0 %v4303_v33  ;;  %v4235_v43 = vld [vmem:[#allocation4 + $0x6] sm:$0x3] }
 0x6cc   :  { %4417 = vmatpush1.msra.mxu1 %v4300_v44  ;;  %4488 = vmatpush1.msra.mxu0 %v4302_v41  ;;  %v4369_v33 = vcombine.low %v4234_v57, %v4235_v43  ;;  %v4233_v41 = vld [vmem:[#allocation4 + $0x2] sm:$0x3]  ;;  %v4245_v57 = vld [vmem:[#allocation11 + $0x48] sm:$0xff] }
 0x6cd   :  { %4550 = vmatprep.subr.mxu1 %v4297_v35  ;;  %4621 = vmatprep.subr.mxu0 %v4299_v55  ;;  %v4247_v43 = vld [vmem:[#allocation11 + $0x58] sm:$0xff] }
 0x74a   :  { %v3822_v3 = vpop.f32.mrf.mxu1  ;;  %v3893_v4 = vpop.f32.mrf.mxu0 }
 0x74c   :  { %v3824_v5 = vpop.f32.mrf.mxu1  ;;  %v3895_v12 = vpop.f32.mrf.mxu0 }
 0x74d   :  { %v3902_v15 = vcombine.low %v3822_v3, %v3824_v5  ;;  %v3903_v36 = vcombine.low %v3893_v4, %v3895_v12  ;;  %v4383_v3 = vrot.slane %v4369_v33, %v10011_v47  ;;  %v4298_v5 = vld [vmem:[#allocation11 + $0x1f0] sm:$0xff]  ;;  %v4293_v12 = vld [vmem:[#allocation11 + $0x1c8] sm:$0xff] }
 0x74f   :  { %v3910_v49 = vrot.slane %v3902_v15, %v10011_v47  ;;  %v3917_v34 = vrot.slane %v3903_v36, %v10011_v47  ;;  %v4295_v15 = vld [vmem:[#allocation11 + $0x1d8] sm:$0xff]  ;;  %v4292_v36 = vld [vmem:[#allocation11 + $0x1c0] sm:$0xff] }
 0x751   :  { %v3918_v18 = vcombine.low %v3910_v49, %v3917_v34  ;;  %v4294_v49 = vld [vmem:[#allocation11 + $0x1d0] sm:$0xff]  ;;  %v4289_v34 = vld [vmem:[#allocation11 + $0x1a8] sm:$0xff] }
 0x753   :  { %v3920_v32 = vadd.f32 %v3918_v18, %v10217_v52  ;;  %v4291_v18 = vld [vmem:[#allocation11 + $0x1b8] sm:$0xff]  ;;  %v4285_v52 = vld [vmem:[#allocation11 + $0x188] sm:$0xff] }
 0x755   :  { %v4154_v0 = vcombine.high %v3920_v32, %v3920_v32  ;;  %v4161_v50 = vrot.slane %v3920_v32, %v10011_v47  ;;  %v4287_v32 = vld [vmem:[#allocation11 + $0x198] sm:$0xff] }
 0x757   :  { %v4168_v27 = vrot.slane %v4154_v0, %v10011_v47  ;;  %v4169_v53 = vcombine.high %v4161_v50, %v4161_v50  ;;  %v4280_v0 = vld [vmem:[#allocation11 + $0x160] sm:$0xff] }
 0x759   :  { %v4170_v7 = vcombine.high %v4168_v27, %v4168_v27 }
 0x76b   :  { %v4054_v19 = vpop.f32.mrf.mxu1  ;;  %v4125_v23 = vpop.f32.mrf.mxu0 }
 0x76d   :  { %v4056_v22 = vpop.f32.mrf.mxu1  ;;  %v4127_v13 = vpop.f32.mrf.mxu0 }
 0x76e   :  { %v4134_v14 = vcombine.low %v4054_v19, %v4056_v22  ;;  %v4135_v40 = vcombine.low %v4125_v23, %v4127_v13  ;;  %v4288_v19 = vld [vmem:[#allocation11 + $0x1a0] sm:$0xff]  ;;  %v4290_v23 = vld [vmem:[#allocation11 + $0x1b0] sm:$0xff] }
 0x76f   :  { %v4284_v22 = vld [vmem:[#allocation11 + $0x180] sm:$0xff]  ;;  %v4286_v13 = vld [vmem:[#allocation11 + $0x190] sm:$0xff] }
 0x770   :  { %v4142_v6 = vrot.slane %v4134_v14, %v10011_v47  ;;  %v4149_v58 = vrot.slane %v4135_v40, %v10011_v47  ;;  %v4281_v14 = vld [vmem:[#allocation11 + $0x168] sm:$0xff]  ;;  %v4283_v40 = vld [vmem:[#allocation11 + $0x178] sm:$0xff] }
 0x772   :  { %v4150_v42 = vcombine.low %v4142_v6, %v4149_v58  ;;  %v4282_v6 = vld [vmem:[#allocation11 + $0x170] sm:$0xff]  ;;  %v4277_v58 = vld [vmem:[#allocation11 + $0x148] sm:$0xff] }
 0x774   :  { %v4152_v24 = vadd.f32 %v4150_v42, %v10218_v56  ;;  %v4279_v42 = vld [vmem:[#allocation11 + $0x158] sm:$0xff]  ;;  %v4278_v56 = vld [vmem:[#allocation11 + $0x150] sm:$0xff] }
 0x776   :  { %v4176_v20 = vcombine.low %v4152_v24, %v4152_v24  ;;  %v4190_v2 = vrot.slane %v4152_v24, %v10011_v47  ;;  %v4273_v24 = vld [vmem:[#allocation11 + $0x128] sm:$0xff] }
 0x778   :  { %v4183_v29 = vrot.slane %v4176_v20, %v10011_v47  ;;  %v4192_v31 = vcombine.high %v4190_v2, %v4190_v2  ;;  %v4199_v51 = vsel %vm2578_vm1, %v4168_v27, %v4190_v2  ;;  %v4276_v27 = vld [vmem:[#allocation11 + $0x140] sm:$0xff]  ;;  %v4274_v2 = vld [vmem:[#allocation11 + $0x130] sm:$0xff] }
 0x779   :  { %v4272_v20 = vld [vmem:[#allocation11 + $0x120] sm:$0xff] }
 0x77a   :  { %v4191_v54 = vcombine.high %v4183_v29, %v4183_v29  ;;  %v4197_v60 = vsel %vm2578_vm1, %v4161_v50, %v4183_v29  ;;  %v4200_v61 = vsel %vm2578_vm1, %v4170_v7, %v4192_v31  ;;  %v4275_v50 = vld [vmem:[#allocation11 + $0x138] sm:$0xff]  ;;  %v4269_v7 = vld [vmem:[#allocation11 + $0x108] sm:$0xff]  ;;  %v4268_v31 = vld [vmem:[#allocation11 + $0x100] sm:$0xff] }
 0x77b   :  { %v6285_v38 = vmul.f32 -1.442695, %v4197_v60  ;;  %v6287_v59 = vmul.f32 -1.442695, %v4200_v61  ;;  %v4271_v29 = vld [vmem:[#allocation11 + $0x118] sm:$0xff]  ;;  %v4264_v60 = vld [vmem:[#allocation11 + $0xe0] sm:$0xff] }
 0x77c   :  { %v4198_v26 = vsel %vm2578_vm1, %v4169_v53, %v4191_v54  ;;  %v4265_v53 = vld [vmem:[#allocation11 + $0xe8] sm:$0xff]  ;;  %v4267_v54 = vld [vmem:[#allocation11 + $0xf8] sm:$0xff]  ;;  %v4266_v61 = vld [vmem:[#allocation11 + $0xf0] sm:$0xff] }
 0x77d   :  { %6568 = vpow2.f32 %v6285_v38  ;;  %v6286_v45 = vmul.f32 -1.442695, %v4198_v26  ;;  %v4261_v38 = vld [vmem:[#allocation11 + $0xc8] sm:$0xff]  ;;  %v4263_v26 = vld [vmem:[#allocation11 + $0xd8] sm:$0xff] }
 0x77f   :  { %6570 = vpow2.f32 %v6286_v45  ;;  %v4260_v45 = vld [vmem:[#allocation11 + $0xc0] sm:$0xff] }
 0x780   :  { %6572 = vtanh.f32 %v4199_v51  ;;  %v4270_v51 = vld [vmem:[#allocation11 + $0x110] sm:$0xff] }
 0x781   :  { %6574 = vpow2.f32 %v6287_v59  ;;  %v4262_v59 = vld [vmem:[#allocation11 + $0xd0] sm:$0xff] }
 0x78a   :  { %v6569_v46 = vpop.eup %6568 }
 0x78b   :  { %v4204_v39 = vadd.f32 1.0, %v6569_v46  ;;  %v4257_v46 = vld [vmem:[#allocation11 + $0xa8] sm:$0xff] }
 0x78c   :  { %v6571_v62 = vpop.eup %6570 }
 0x78d   :  { %6576 = vrcp.f32 %v4204_v39  ;;  %v4210_v21 = vadd.f32 1.0, %v6571_v62  ;;  %v6573_v9 = vpop.eup %6572  ;;  %v4259_v39 = vld [vmem:[#allocation11 + $0xb8] sm:$0xff]  ;;  %v4256_v62 = vld [vmem:[#allocation11 + $0xa0] sm:$0xff] }
 0x78e   :  { %v6575_v10 = vpop.eup %6574 }
 0x78f   :  { %6578 = vrcp.f32 %v4210_v21  ;;  %v4217_v8 = vadd.f32 1.0, %v6575_v10  ;;  %v4258_v21 = vld [vmem:[#allocation11 + $0xb0] sm:$0xff]  ;;  %v4255_v10 = vld [vmem:[#allocation11 + $0x98] sm:$0xff] }
 0x791   :  { %6580 = vrcp.f32 %v4217_v8  ;;  %v4249_v8 = vld [vmem:[#allocation11 + $0x68] sm:$0xff] }
 0x79a   :  { %v6577_v37 = vpop.eup %6576 }
 0x79b   :  { %v4221_v30 = vmul.f32 %v6577_v37, %v6573_v9  ;;  %v4253_v9 = vld [vmem:[#allocation11 + $0x88] sm:$0xff]  ;;  %v4252_v37 = vld [vmem:[#allocation11 + $0x80] sm:$0xff] }
 0x79c   :  { %v6579_v25 = vpop.eup %6578 }
 0x79d   :  { %v4220_v1 = vmul.f32 %v6579_v25, %v8955_v11  ;;  %v4296_v11 = vld [vmem:[#allocation11 + $0x1e0] sm:$0xff] }
 0x79e   :  { %v6581_v48 = vpop.eup %6580 }
 0x79f   :  { %v4222_v28 = vadd.f32 %v4221_v30, %v4220_v1  ;;  %v4254_v30 = vld [vmem:[#allocation11 + $0x90] sm:$0xff]  ;;  %v4251_v1 = vld [vmem:[#allocation11 + $0x78] sm:$0xff] }
 0x7a1   :  { %6582 = vtanh.f32 %v4222_v28  ;;  %v4229_v28 = vld [vmem:[#allocation3 + $0x2] sm:$0x3] }
 0x7ae   :  { %v6583_v63 = vpop.eup %6582 }
 0x7af   :  { %v4224_v17 = vmul.f32 %v6583_v63, %v6581_v48  ;;  %v4248_v48 = vld [vmem:[#allocation11 + $0x60] sm:$0xff]  ;;  %v4250_v63 = vld [vmem:[#allocation11 + $0x70] sm:$0xff] }
 0x7b1   :  { %4226 = vst [vmem:[#allocation3 + $0x6] sm:$0x3] %v4224_v17  ;;  %4227 = vst [vmem:[#allocation4 - $0x2] sm:$0xc] %v4224_v17  ;;  %v4230_v17 = vld [vmem:[#allocation3 + $0x4] sm:$0x3] }
 0x7b8   :  { %v4232_v44 = vld [vmem:[#allocation4] sm:$0x3]  ;;  %v4231_v25 = vld [vmem:[#allocation3 + $0x6] sm:$0x3] }
 0x7b9   :  { %v4368_v35 = vcombine.low %v4232_v44, %v4233_v41  ;;  %v4533_v33 = vcombine.low %v4230_v17, %v4231_v25  ;;  %v4244_v44 = vld [vmem:[#allocation11 + $0x40] sm:$0xff]  ;;  %v4246_v41 = vld [vmem:[#allocation11 + $0x50] sm:$0xff]  ;;  %v9184_v17 = vld [vmem:[#allocation14 + $0x88] sm:$0xff] }
 0x7ba   :  { %v9166_v25 = vld [vmem:[#allocation14 + $0xc0] sm:$0xff]  ;;  %10222 = vst [vmem:[#allocation38_spill] sm:$0xff] %v9184_v17 }
 0x7bb   :  { %v4376_v55 = vrot.slane %v4368_v35, %v10011_v47  ;;  %v4228_v35 = vld [vmem:[#allocation3] sm:$0x3] }
 0x7bd   :  { %v4384_v4 = vcombine.low %v4376_v55, %v4383_v3  ;;  %v4241_v55 = vld [vmem:[#allocation11 + $0x28] sm:$0xff]  ;;  %v4243_v3 = vld [vmem:[#allocation11 + $0x38] sm:$0xff] }
 0x7bf   :  { %4451 = vmatmul.mubr.f32.vlgmr.msra.gmra.mxu1 %v4384_v4  ;;  %4522 = vmatmul.mubr.f32.vlgmr.msra.gmra.mxu0 %v4384_v4  ;;  %v4532_v4 = vcombine.low %v4228_v35, %v4229_v28  ;;  %v9174_v28 = vld [vmem:[#allocation14 + $0xb8] sm:$0xff]  ;;  %v9202_v35 = vld [vmem:[#allocation14 + $0x60] sm:$0xff] }
 0x7c0   :  { %4551 = vmatpush1.msra.mxu1 %v4296_v11  ;;  %4622 = vmatpush1.msra.mxu0 %v4298_v5  ;;  %v4240_v11 = vld [vmem:[#allocation11 + $0x20] sm:$0xff]  ;;  %v4242_v5 = vld [vmem:[#allocation11 + $0x30] sm:$0xff]  ;;  %10228 = vst [vmem:[#allocation44_spill] sm:$0xff] %v9202_v35 }
 0x7c1   :  { %4552 = vmatprep.subr.mxu1 %v4293_v12  ;;  %4623 = vmatprep.subr.mxu0 %v4295_v15  ;;  %v4237_v12 = vld [vmem:[#allocation11 + $0x8] sm:$0xff]  ;;  %v4239_v15 = vld [vmem:[#allocation11 + $0x18] sm:$0xff] }
 0x7c2   :  { %4553 = vmatpush1.msra.mxu1 %v4292_v36  ;;  %4624 = vmatpush1.msra.mxu0 %v4294_v49  ;;  %v4547_v36 = vrot.slane %v4533_v33, %v10011_v47  ;;  %v4236_v49 = vld [vmem:[#allocation11] sm:$0xff]  ;;  %v9192_v33 = vld [vmem:[#allocation14 + $0x90] sm:$0xff] }
 0x7c3   :  { %4554 = vmatprep.subr.mxu1 %v4289_v34  ;;  %4625 = vmatprep.subr.mxu0 %v4291_v18  ;;  %v4238_v34 = vld [vmem:[#allocation11 + $0x10] sm:$0xff]  ;;  %v4540_v18 = vrot.slane %v4532_v4, %v10011_v47  ;;  %v9064_v47 = vld [vmem:[#allocation14 + $0x1c8] sm:$0xff]  ;;  %10225 = vst [vmem:[#allocation41_spill] sm:$0xff] %v9192_v33  ;;  %v9210_v4 = vld [vmem:[#allocation14 + $0x58] sm:$0xff] }
 0x7c4   :  { %4555 = vmatpush1.msra.mxu1 %v4288_v19  ;;  %4626 = vmatpush1.msra.mxu0 %v4290_v23  ;;  %v9055_v23 = vld [vmem:[#allocation14 + $0x1e8] sm:$0xff]  ;;  %10231 = vst [vmem:[#allocation29_spill] sm:$0xff] %v9210_v4 }
 0x7c5   :  { %4556 = vmatprep.subr.mxu1 %v4285_v52  ;;  %4627 = vmatprep.subr.mxu0 %v4287_v32  ;;  %v4548_v19 = vcombine.low %v4540_v18, %v4547_v36  ;;  %10219 = vst [vmem:[#allocation35_spill] sm:$0xff] %v9055_v23  ;;  %v9057_v52 = vld [vmem:[#allocation14 + $0x1f8] sm:$0xff]  ;;  %v9060_v32 = vld [vmem:[#allocation14 + $0x1e0] sm:$0xff] }
 0x7c6   :  { %4557 = vmatpush1.msra.mxu1 %v4284_v22  ;;  %4628 = vmatpush1.msra.mxu0 %v4286_v13  ;;  %10220 = vst [vmem:[#allocation36_spill] sm:$0xff] %v9057_v52  ;;  %v9062_v22 = vld [vmem:[#allocation14 + $0x1f0] sm:$0xff]  ;;  %v9066_v13 = vld [vmem:[#allocation14 + $0x1d8] sm:$0xff]  ;;  %v9226_v36 = vld [vmem:[#allocation14 + $0x20] sm:$0xff] }
 0x7c7   :  { %4558 = vmatprep.subr.mxu1 %v4281_v14  ;;  %4629 = vmatprep.subr.mxu0 %v4283_v40  ;;  %v9070_v14 = vld [vmem:[#allocation14 + $0x1c0] sm:$0xff]  ;;  %v9072_v40 = vld [vmem:[#allocation14 + $0x1d0] sm:$0xff]  ;;  %10236 = vst [vmem:[#allocation47_spill] sm:$0xff] %v9226_v36  ;;  %v9234_v18 = vld [vmem:[#allocation14 + $0x18] sm:$0xff] }
 0x7c8   :  { %4559 = vmatpush1.msra.mxu1 %v4280_v0  ;;  %4630 = vmatpush1.msra.mxu0 %v4282_v6  ;;  %v9076_v0 = vld [vmem:[#allocation14 + $0x1a8] sm:$0xff]  ;;  %v9078_v6 = vld [vmem:[#allocation14 + $0x1b8] sm:$0xff]  ;;  %10239 = vst [vmem:[#allocation50_spill] sm:$0xff] %v9234_v18 }
 0x7c9   :  { %4560 = vmatprep.subr.mxu1 %v4277_v58  ;;  %4631 = vmatprep.subr.mxu0 %v4279_v42  ;;  %v9082_v58 = vld [vmem:[#allocation14 + $0x1a0] sm:$0xff]  ;;  %v9084_v42 = vld [vmem:[#allocation14 + $0x1b0] sm:$0xff] }
 0x7ca   :  { %4561 = vmatpush1.msra.mxu1 %v4276_v27  ;;  %4632 = vmatpush1.msra.mxu0 %v4278_v56  ;;  %v9088_v27 = vld [vmem:[#allocation14 + $0x188] sm:$0xff]  ;;  %v9090_v56 = vld [vmem:[#allocation14 + $0x198] sm:$0xff] }
 0x7cb   :  { %4562 = vmatprep.subr.mxu1 %v4273_v24  ;;  %4633 = vmatprep.subr.mxu0 %v4275_v50  ;;  %v9094_v24 = vld [vmem:[#allocation14 + $0x180] sm:$0xff]  ;;  %v9096_v50 = vld [vmem:[#allocation14 + $0x190] sm:$0xff] }
 0x7cc   :  { %4563 = vmatpush1.msra.mxu1 %v4272_v20  ;;  %4634 = vmatpush1.msra.mxu0 %v4274_v2  ;;  %v9100_v20 = vld [vmem:[#allocation14 + $0x168] sm:$0xff]  ;;  %v9102_v2 = vld [vmem:[#allocation14 + $0x178] sm:$0xff] }
 0x7cd   :  { %4564 = vmatprep.subr.mxu1 %v4269_v7  ;;  %4635 = vmatprep.subr.mxu0 %v4271_v29  ;;  %v9106_v7 = vld [vmem:[#allocation14 + $0x160] sm:$0xff]  ;;  %v9108_v29 = vld [vmem:[#allocation14 + $0x170] sm:$0xff] }
 0x7ce   :  { %4565 = vmatpush1.msra.mxu1 %v4268_v31  ;;  %4636 = vmatpush1.msra.mxu0 %v4270_v51  ;;  %v9112_v31 = vld [vmem:[#allocation14 + $0x148] sm:$0xff]  ;;  %v9114_v51 = vld [vmem:[#allocation14 + $0x158] sm:$0xff] }
 0x7cf   :  { %4566 = vmatprep.subr.mxu1 %v4265_v53  ;;  %4637 = vmatprep.subr.mxu0 %v4267_v54  ;;  %v9118_v53 = vld [vmem:[#allocation14 + $0x140] sm:$0xff]  ;;  %v9120_v54 = vld [vmem:[#allocation14 + $0x150] sm:$0xff] }
 0x7d0   :  { %4567 = vmatpush1.msra.mxu1 %v4264_v60  ;;  %4638 = vmatpush1.msra.mxu0 %v4266_v61  ;;  %v9124_v60 = vld [vmem:[#allocation14 + $0x128] sm:$0xff]  ;;  %v9126_v61 = vld [vmem:[#allocation14 + $0x138] sm:$0xff] }
 0x7d1   :  { %4568 = vmatprep.subr.mxu1 %v4261_v38  ;;  %4639 = vmatprep.subr.mxu0 %v4263_v26  ;;  %v9130_v38 = vld [vmem:[#allocation14 + $0x120] sm:$0xff]  ;;  %v9132_v26 = vld [vmem:[#allocation14 + $0x130] sm:$0xff] }
 0x7d2   :  { %4569 = vmatpush1.msra.mxu1 %v4260_v45  ;;  %4640 = vmatpush1.msra.mxu0 %v4262_v59  ;;  %v9136_v45 = vld [vmem:[#allocation14 + $0x108] sm:$0xff]  ;;  %v9138_v59 = vld [vmem:[#allocation14 + $0x118] sm:$0xff] }
 0x7d3   :  { %4570 = vmatprep.subr.mxu1 %v4257_v46  ;;  %4641 = vmatprep.subr.mxu0 %v4259_v39  ;;  %v9142_v46 = vld [vmem:[#allocation14 + $0x100] sm:$0xff]  ;;  %v9144_v39 = vld [vmem:[#allocation14 + $0x110] sm:$0xff] }
 0x7d4   :  { %4571 = vmatpush1.msra.mxu1 %v4256_v62  ;;  %4642 = vmatpush1.msra.mxu0 %v4258_v21  ;;  %v9148_v62 = vld [vmem:[#allocation14 + $0xe8] sm:$0xff]  ;;  %v9150_v21 = vld [vmem:[#allocation14 + $0xf8] sm:$0xff] }
 0x7d5   :  { %4572 = vmatprep.subr.mxu1 %v4253_v9  ;;  %4643 = vmatprep.subr.mxu0 %v4255_v10  ;;  %v9154_v9 = vld [vmem:[#allocation14 + $0xe0] sm:$0xff]  ;;  %v9156_v10 = vld [vmem:[#allocation14 + $0xf0] sm:$0xff] }
 0x7d6   :  { %4573 = vmatpush1.msra.mxu1 %v4252_v37  ;;  %4644 = vmatpush1.msra.mxu0 %v4254_v30  ;;  %v9160_v37 = vld [vmem:[#allocation14 + $0xc8] sm:$0xff]  ;;  %v9162_v30 = vld [vmem:[#allocation14 + $0xd8] sm:$0xff] }
 0x7d7   :  { %4574 = vmatprep.subr.mxu1 %v4249_v8  ;;  %4645 = vmatprep.subr.mxu0 %v4251_v1  ;;  %v9168_v8 = vld [vmem:[#allocation14 + $0xd0] sm:$0xff]  ;;  %v9172_v1 = vld [vmem:[#allocation14 + $0xa8] sm:$0xff] }
 0x7d8   :  { %4575 = vmatpush1.msra.mxu1 %v4248_v48  ;;  %4646 = vmatpush1.msra.mxu0 %v4250_v63  ;;  %v9178_v48 = vld [vmem:[#allocation14 + $0xa0] sm:$0xff]  ;;  %v9180_v63 = vld [vmem:[#allocation14 + $0xb0] sm:$0xff] }
 0x7d9   :  { %4576 = vmatprep.subr.mxu1 %v4245_v57  ;;  %4647 = vmatprep.subr.mxu0 %v4247_v43  ;;  %10221 = vst [vmem:[#allocation37_spill] sm:$0xff] %v9178_v48  ;;  %v9186_v57 = vld [vmem:[#allocation14 + $0x98] sm:$0xff]  ;;  %v9190_v43 = vld [vmem:[#allocation14 + $0x80] sm:$0xff] }
 0x7da   :  { %4577 = vmatpush1.msra.mxu1 %v4244_v44  ;;  %4648 = vmatpush1.msra.mxu0 %v4246_v41  ;;  %10223 = vst [vmem:[#allocation39_spill] sm:$0xff] %v9186_v57  ;;  %10224 = vst [vmem:[#allocation40_spill] sm:$0xff] %v9190_v43  ;;  %v9196_v44 = vld [vmem:[#allocation14 + $0x68] sm:$0xff]  ;;  %v9198_v41 = vld [vmem:[#allocation14 + $0x78] sm:$0xff] }
 0x7db   :  { %4578 = vmatprep.subr.mxu1 %v4241_v55  ;;  %4649 = vmatprep.subr.mxu0 %v4243_v3  ;;  %10226 = vst [vmem:[#allocation42_spill] sm:$0xff] %v9196_v44  ;;  %10227 = vst [vmem:[#allocation43_spill] sm:$0xff] %v9198_v41  ;;  %v9204_v55 = vld [vmem:[#allocation14 + $0x70] sm:$0xff]  ;;  %v9208_v3 = vld [vmem:[#allocation14 + $0x48] sm:$0xff] }
 0x7dc   :  { %4579 = vmatpush1.msra.mxu1 %v4240_v11  ;;  %4650 = vmatpush1.msra.mxu0 %v4242_v5  ;;  %10229 = vst [vmem:[#allocation30_spill] sm:$0xff] %v9204_v55  ;;  %10230 = vst [vmem:[#allocation27_spill] sm:$0xff] %v9208_v3  ;;  %v9214_v11 = vld [vmem:[#allocation14 + $0x40] sm:$0xff]  ;;  %v9216_v5 = vld [vmem:[#allocation14 + $0x50] sm:$0xff] }
 0x7dd   :  { %4580 = vmatprep.subr.mxu1 %v4237_v12  ;;  %4651 = vmatprep.subr.mxu0 %v4239_v15  ;;  %10232 = vst [vmem:[#allocation26_spill] sm:$0xff] %v9214_v11  ;;  %10233 = vst [vmem:[#allocation28_spill] sm:$0xff] %v9216_v5  ;;  %v9220_v12 = vld [vmem:[#allocation14 + $0x28] sm:$0xff]  ;;  %v9222_v15 = vld [vmem:[#allocation14 + $0x38] sm:$0xff] }
 0x7de   :  { %4581 = vmatpush1.msra.mxu1 %v4236_v49  ;;  %4614 = vmatprep.mubr.f32.mxu1 %v9939_v16  ;;  %10234 = vst [vmem:[#allocation45_spill] sm:$0xff] %v9220_v12  ;;  %10235 = vst [vmem:[#allocation46_spill] sm:$0xff] %v9222_v15  ;;  %v9228_v49 = vld [vmem:[#allocation14 + $0x30] sm:$0xff] }
 0x7df   :  { %4652 = vmatpush1.msra.mxu0 %v4238_v34  ;;  %4685 = vmatprep.mubr.f32.mxu0 %v9939_v16  ;;  %10237 = vst [vmem:[#allocation48_spill] sm:$0xff] %v9228_v49  ;;  %v9232_v34 = vld [vmem:[#allocation14 + $0x8] sm:$0xff] }
 0x7e0   :  { %4615 = vmatmul.mubr.f32.vlgmr.msra.gmra.mxu1 %v4548_v19  ;;  %4686 = vmatmul.mubr.f32.vlgmr.msra.gmra.mxu0 %v4548_v19  ;;  %10238 = vst [vmem:[#allocation49_spill] sm:$0xff] %v9232_v34  ;;  %v9238_v19 = vld [vmem:[#allocation14] sm:$0xff] }
 0x7e1   :  { %4782 = vmatprep.subr.mxu1 %v9055_v23  ;;  %4853 = vmatprep.subr.mxu0 %v9057_v52  ;;  %10240 = vst [vmem:[#allocation51_spill] sm:$0xff] %v9238_v19 }
 0x7e2   :  { %4783 = vmatpush1.msra.mxu1 %v9060_v32  ;;  %4854 = vmatpush1.msra.mxu0 %v9062_v22 }
 0x7e3   :  { %4784 = vmatprep.subr.mxu1 %v9064_v47  ;;  %4855 = vmatprep.subr.mxu0 %v9066_v13 }
 0x7e4   :  { %4785 = vmatpush1.msra.mxu1 %v9070_v14  ;;  %4856 = vmatpush1.msra.mxu0 %v9072_v40 }
 0x7e5   :  { %4786 = vmatprep.subr.mxu1 %v9076_v0  ;;  %4857 = vmatprep.subr.mxu0 %v9078_v6 }
 0x7e6   :  { %4787 = vmatpush1.msra.mxu1 %v9082_v58  ;;  %4858 = vmatpush1.msra.mxu0 %v9084_v42 }
 0x7e7   :  { %4788 = vmatprep.subr.mxu1 %v9088_v27  ;;  %4859 = vmatprep.subr.mxu0 %v9090_v56 }
 0x7e8   :  { %4789 = vmatpush1.msra.mxu1 %v9094_v24  ;;  %4860 = vmatpush1.msra.mxu0 %v9096_v50 }
 0x7e9   :  { %4790 = vmatprep.subr.mxu1 %v9100_v20  ;;  %4861 = vmatprep.subr.mxu0 %v9102_v2 }
 0x7ea   :  { %4791 = vmatpush1.msra.mxu1 %v9106_v7  ;;  %4862 = vmatpush1.msra.mxu0 %v9108_v29 }
 0x7eb   :  { %4792 = vmatprep.subr.mxu1 %v9112_v31  ;;  %4863 = vmatprep.subr.mxu0 %v9114_v51 }
 0x7ec   :  { %4793 = vmatpush1.msra.mxu1 %v9118_v53  ;;  %4864 = vmatpush1.msra.mxu0 %v9120_v54 }
 0x7ed   :  { %4794 = vmatprep.subr.mxu1 %v9124_v60  ;;  %4865 = vmatprep.subr.mxu0 %v9126_v61 }
 0x7ee   :  { %4795 = vmatpush1.msra.mxu1 %v9130_v38  ;;  %4866 = vmatpush1.msra.mxu0 %v9132_v26 }
 0x7ef   :  { %4796 = vmatprep.subr.mxu1 %v9136_v45  ;;  %4867 = vmatprep.subr.mxu0 %v9138_v59 }
 0x7f0   :  { %4797 = vmatpush1.msra.mxu1 %v9142_v46  ;;  %4868 = vmatpush1.msra.mxu0 %v9144_v39 }
 0x7f1   :  { %4798 = vmatprep.subr.mxu1 %v9148_v62  ;;  %4869 = vmatprep.subr.mxu0 %v9150_v21 }
 0x7f2   :  { %4799 = vmatpush1.msra.mxu1 %v9154_v9  ;;  %4870 = vmatpush1.msra.mxu0 %v9156_v10 }
 0x7f3   :  { %4800 = vmatprep.subr.mxu1 %v9160_v37  ;;  %4871 = vmatprep.subr.mxu0 %v9162_v30 }
 0x7f4   :  { %4801 = vmatpush1.msra.mxu1 %v9166_v25  ;;  %4872 = vmatpush1.msra.mxu0 %v9168_v8 }
 0x7f5   :  { %4802 = vmatprep.subr.mxu1 %v9172_v1  ;;  %4873 = vmatprep.subr.mxu0 %v9174_v28 }
 0x7f6   :  { %4803 = vmatpush1.msra.mxu1 %v9178_v48  ;;  %4874 = vmatpush1.msra.mxu0 %v9180_v63 }
 0x7f7   :  { %4804 = vmatprep.subr.mxu1 %v9184_v17  ;;  %4875 = vmatprep.subr.mxu0 %v9186_v57 }
 0x7f8   :  { %4805 = vmatpush1.msra.mxu1 %v9190_v43  ;;  %4876 = vmatpush1.msra.mxu0 %v9192_v33 }
 0x7f9   :  { %4806 = vmatprep.subr.mxu1 %v9196_v44  ;;  %4877 = vmatprep.subr.mxu0 %v9198_v41 }
 0x7fa   :  { %4807 = vmatpush1.msra.mxu1 %v9202_v35  ;;  %4878 = vmatpush1.msra.mxu0 %v9204_v55 }
 0x7fb   :  { %4808 = vmatprep.subr.mxu1 %v9208_v3  ;;  %4879 = vmatprep.subr.mxu0 %v9210_v4  ;;  %v9242_v4 = vld [vmem:[#allocation14 + $0x10] sm:$0xff] }
 0x7fc   :  { %4809 = vmatpush1.msra.mxu1 %v9214_v11  ;;  %4880 = vmatpush1.msra.mxu0 %v9216_v5  ;;  %10241 = vst [vmem:[#allocation52_spill] sm:$0xff] %v9242_v4 }
 0x7fd   :  { %4810 = vmatprep.subr.mxu1 %v9220_v12  ;;  %4881 = vmatprep.subr.mxu0 %v9222_v15 }
 0x7fe   :  { %4811 = vmatpush1.msra.mxu1 %v9226_v36  ;;  %4882 = vmatpush1.msra.mxu0 %v9228_v49 }
 0x7ff   :  { %4812 = vmatprep.subr.mxu1 %v9232_v34  ;;  %4883 = vmatprep.subr.mxu0 %v9234_v18 }
 0x800   :  { %4813 = vmatpush1.msra.mxu1 %v9238_v19  ;;  %4846 = vmatprep.mubr.f32.mxu1 %v9939_v16 }
 0x801   :  { %4884 = vmatpush1.msra.mxu0 %v9242_v4  ;;  %4917 = vmatprep.mubr.f32.mxu0 %v9939_v16 }
 0x802   :  { %4847 = vmatmul.mubr.f32.vlgmr.msra.gmra.mxu1 %v9939_v16  ;;  %4918 = vmatmul.mubr.f32.vlgmr.msra.gmra.mxu0 %v9939_v16 }
 0x803   :  { %4952 = vmatprep.subr.mxu1 %v9055_v23  ;;  %5023 = vmatprep.subr.mxu0 %v9057_v52 }
 0x804   :  { %4953 = vmatpush1.msra.mxu1 %v9060_v32  ;;  %5024 = vmatpush1.msra.mxu0 %v9062_v22 }
 0x805   :  { %4954 = vmatprep.subr.mxu1 %v9064_v47  ;;  %5025 = vmatprep.subr.mxu0 %v9066_v13 }
 0x806   :  { %4955 = vmatpush1.msra.mxu1 %v9070_v14  ;;  %5026 = vmatpush1.msra.mxu0 %v9072_v40 }
 0x807   :  { %4956 = vmatprep.subr.mxu1 %v9076_v0  ;;  %5027 = vmatprep.subr.mxu0 %v9078_v6 }
 0x808   :  { %4957 = vmatpush1.msra.mxu1 %v9082_v58  ;;  %5028 = vmatpush1.msra.mxu0 %v9084_v42 }
 0x809   :  { %4958 = vmatprep.subr.mxu1 %v9088_v27  ;;  %5029 = vmatprep.subr.mxu0 %v9090_v56 }
 0x80a   :  { %4959 = vmatpush1.msra.mxu1 %v9094_v24  ;;  %5030 = vmatpush1.msra.mxu0 %v9096_v50 }
 0x80b   :  { %4960 = vmatprep.subr.mxu1 %v9100_v20  ;;  %5031 = vmatprep.subr.mxu0 %v9102_v2 }
 0x80c   :  { %4961 = vmatpush1.msra.mxu1 %v9106_v7  ;;  %5032 = vmatpush1.msra.mxu0 %v9108_v29 }
 0x80d   :  { %4962 = vmatprep.subr.mxu1 %v9112_v31  ;;  %5033 = vmatprep.subr.mxu0 %v9114_v51 }
 0x80e   :  { %4963 = vmatpush1.msra.mxu1 %v9118_v53  ;;  %5034 = vmatpush1.msra.mxu0 %v9120_v54 }
 0x80f   :  { %4964 = vmatprep.subr.mxu1 %v9124_v60  ;;  %5035 = vmatprep.subr.mxu0 %v9126_v61 }
 0x810   :  { %4965 = vmatpush1.msra.mxu1 %v9130_v38  ;;  %5036 = vmatpush1.msra.mxu0 %v9132_v26 }
 0x811   :  { %4966 = vmatprep.subr.mxu1 %v9136_v45  ;;  %5037 = vmatprep.subr.mxu0 %v9138_v59 }
 0x812   :  { %4967 = vmatpush1.msra.mxu1 %v9142_v46  ;;  %5038 = vmatpush1.msra.mxu0 %v9144_v39 }
 0x813   :  { %4968 = vmatprep.subr.mxu1 %v9148_v62  ;;  %5039 = vmatprep.subr.mxu0 %v9150_v21 }
 0x814   :  { %4969 = vmatpush1.msra.mxu1 %v9154_v9  ;;  %5040 = vmatpush1.msra.mxu0 %v9156_v10 }
 0x815   :  { %4970 = vmatprep.subr.mxu1 %v9160_v37  ;;  %5041 = vmatprep.subr.mxu0 %v9162_v30 }
 0x816   :  { %4971 = vmatpush1.msra.mxu1 %v9166_v25  ;;  %5042 = vmatpush1.msra.mxu0 %v9168_v8 }
 0x817   :  { %4972 = vmatprep.subr.mxu1 %v9172_v1  ;;  %5043 = vmatprep.subr.mxu0 %v9174_v28 }
 0x818   :  { %4973 = vmatpush1.msra.mxu1 %v9178_v48  ;;  %5044 = vmatpush1.msra.mxu0 %v9180_v63  ;;  %v10242_v48 = vld [vmem:[#allocation29_spill] sm:$0xff] }
 0x819   :  { %4974 = vmatprep.subr.mxu1 %v9184_v17  ;;  %5045 = vmatprep.subr.mxu0 %v9186_v57 }
 0x81a   :  { %4975 = vmatpush1.msra.mxu1 %v9190_v43  ;;  %5046 = vmatpush1.msra.mxu0 %v9192_v33 }
 0x81b   :  { %4976 = vmatprep.subr.mxu1 %v9196_v44  ;;  %5047 = vmatprep.subr.mxu0 %v9198_v41 }
 0x81c   :  { %4977 = vmatpush1.msra.mxu1 %v9202_v35  ;;  %5048 = vmatpush1.msra.mxu0 %v9204_v55 }
 0x81d   :  { %4978 = vmatprep.subr.mxu1 %v9208_v3  ;;  %5049 = vmatprep.subr.mxu0 %v10242_v48  ;;  %v10244_v3 = vld [vmem:[#allocation25_spill] sm:$0xff] }
 0x81e   :  { %4979 = vmatpush1.msra.mxu1 %v9214_v11  ;;  %5050 = vmatpush1.msra.mxu0 %v9216_v5  ;;  %v10243_v5 = vld [vmem:[#allocation23_spill] sm:$0xff] }
 0x81f   :  { %4980 = vmatprep.subr.mxu1 %v9220_v12  ;;  %5051 = vmatprep.subr.mxu0 %v9222_v15 }
 0x820   :  { %4981 = vmatpush1.msra.mxu1 %v9226_v36  ;;  %5052 = vmatpush1.msra.mxu0 %v9228_v49 }
 0x821   :  { %4982 = vmatprep.subr.mxu1 %v9232_v34  ;;  %5053 = vmatprep.subr.mxu0 %v9234_v18  ;;  %v4692_v34 = vld [vmem:[%s9691_s12] sm:$0xf] }
 0x822   :  { %4983 = vmatpush1.msra.mxu1 %v9238_v19  ;;  %5016 = vmatprep.mubr.f32.mxu1 %v9939_v16  ;;  %v4697_v11 = vrot.slane %v4692_v34, %v10243_v5 }
 0x823   :  { %5054 = vmatpush1.msra.mxu0 %v9242_v4  ;;  %5087 = vmatprep.mubr.f32.mxu0 %v9939_v16  ;;  %v4701_v16 = vrot.slane %v4692_v34, %v10244_v3 }
 0x824   :  { %5140 = vmatprep.subr.mxu1 %v9055_v23  ;;  %5211 = vmatprep.subr.mxu0 %v9057_v52 }
 0x87f   :  { %v4452_v15 = vpop.f32.mrf.mxu1  ;;  %v4523_v18 = vpop.f32.mrf.mxu0 }
 0x881   :  { %v4454_v36 = vpop.f32.mrf.mxu1  ;;  %v4525_v48 = vpop.f32.mrf.mxu0 }
 0x8a0   :  { %v4616_v12 = vpop.f32.mrf.mxu1  ;;  %v4687_v23 = vpop.f32.mrf.mxu0 }
 0x8a1   :  { %v4617_v19 = vadd.f32 %v4616_v12, %v4452_v15 }
 0x8a2   :  { %v4618_v49 = vpop.f32.mrf.mxu1  ;;  %v4689_v33 = vpop.f32.mrf.mxu0 }
 0x8a3   :  { %v4619_v4 = vadd.f32 %v4618_v49, %v4454_v36  ;;  %v9325_v55 = vadd.f32 %v4697_v11, %v4617_v19  ;;  %v4690_v5 = vadd.f32 %v4689_v33, %v4525_v48  ;;  %v10246_v36 = vld [vmem:[#allocation24_spill] sm:$0xff]  ;;  %v4688_v19 = vadd.f32 %v4687_v23, %v4523_v18 }
 0x8a4   :  { %v4709_v49 = vrot.slane %v4692_v34, %v10246_v36  ;;  %v10266_v36 = vld [vmem:[#allocation50_spill] sm:$0xff] }
 0x8a5   :  { %10245 = vst [vmem:[#allocation53_spill] sm:$0xff] %v9325_v55  ;;  %v9327_v35 = vadd.f32 %v4701_v16, %v4619_v4  ;;  %v10247_v16 = vld [vmem:[#allocation22_spill] sm:$0xff] }
 0x8a6   :  { %v9332_v11 = vadd.f32 %v4709_v49, %v4690_v5  ;;  %v4705_v4 = vrot.slane %v4692_v34, %v10247_v16  ;;  %v10265_v16 = vld [vmem:[#allocation49_spill] sm:$0xff] }
 0x8c2   :  { %v4848_v52 = vpop.f32.mrf.mxu1  ;;  %v4919_v12 = vpop.f32.mrf.mxu0 }
 0x8c3   :  { %v4924_v41 = vadd.f32 %v4848_v52, %v9325_v55  ;;  %v9336_v55 = vadd.f32 %v4705_v4, %v4688_v19  ;;  %v10248_v4 = vld [vmem:[#allocation37_spill] sm:$0xff] }
 0x8c4   :  { %v4850_v44 = vpop.f32.mrf.mxu1  ;;  %v4921_v3 = vpop.f32.mrf.mxu0 }
 0x8c5   :  { %v6288_v43 = vmul.f32 -1.442695, %v4924_v41  ;;  %v4925_v57 = vadd.f32 %v4850_v44, %v9327_v35  ;;  %v4927_v52 = vadd.f32 %v4921_v3, %v9332_v11 }
 0x8c7   :  { %6584 = vpow2.f32 %v6288_v43  ;;  %v6289_v15 = vmul.f32 -1.442695, %v4925_v57  ;;  %v6290_v41 = vmul.f32 -1.442695, %v4927_v52  ;;  %v4926_v43 = vadd.f32 %v4919_v12, %v9336_v55  ;;  %v10249_v52 = vld [vmem:[#allocation38_spill] sm:$0xff] }
 0x8c9   :  { %6586 = vpow2.f32 %v6289_v15 }
 0x8ca   :  { %6588 = vpow2.f32 %v6290_v41  ;;  %v10250_v41 = vld [vmem:[#allocation39_spill] sm:$0xff] }
 0x8d4   :  { %v6585_v17 = vpop.eup %6584 }
 0x8d5   :  { %v4931_v44 = vadd.f32 1.0, %v6585_v17 }
 0x8d6   :  { %v6587_v57 = vpop.eup %6586 }
 0x8d7   :  { %6590 = vrcp.f32 %v4931_v44  ;;  %v4937_v48 = vadd.f32 1.0, %v6587_v57  ;;  %v6589_v33 = vpop.eup %6588  ;;  %v10252_v44 = vld [vmem:[#allocation41_spill] sm:$0xff]  ;;  %v10253_v57 = vld [vmem:[#allocation42_spill] sm:$0xff] }
 0x8d8   :  { %6592 = vtanh.f32 %v4926_v43  ;;  %v4944_v34 = vadd.f32 1.0, %v6589_v33  ;;  %v10251_v43 = vld [vmem:[#allocation40_spill] sm:$0xff] }
 0x8d9   :  { %6594 = vrcp.f32 %v4937_v48  ;;  %v10254_v48 = vld [vmem:[#allocation43_spill] sm:$0xff]  ;;  %v10255_v33 = vld [vmem:[#allocation44_spill] sm:$0xff] }
 0x8da   :  { %6596 = vrcp.f32 %v4944_v34  ;;  %v10259_v34 = vld [vmem:[#allocation26_spill] sm:$0xff] }
 0x8e4   :  { %v6591_v5 = vpop.eup %6590 }
 0x8e5   :  { %v6593_v23 = vpop.eup %6592 }
 0x8e6   :  { %v6595_v18 = vpop.eup %6594  ;;  %v4948_v49 = vmul.f32 %v6593_v23, %v6591_v5  ;;  %v10256_v5 = vld [vmem:[#allocation30_spill] sm:$0xff]  ;;  %v10257_v23 = vld [vmem:[#allocation27_spill] sm:$0xff] }
 0x8e7   :  { %v4947_v15 = vmul.f32 0.0, %v6595_v18  ;;  %v6597_v12 = vpop.eup %6596  ;;  %v10258_v18 = vld [vmem:[#allocation29_spill] sm:$0xff] }
 0x8e9   :  { %v9339_v3 = vadd.f32 %v4948_v49, %v4947_v15  ;;  %v10260_v15 = vld [vmem:[#allocation28_spill] sm:$0xff]  ;;  %v10261_v49 = vld [vmem:[#allocation45_spill] sm:$0xff] }
 0x8eb   :  { %6598 = vtanh.f32 %v9339_v3 }
 0x8f8   :  { %v6599_v17 = vpop.eup %6598 }
 0x8f9   :  { %v4951_v19 = vmul.f32 %v6599_v17, %v6597_v12  ;;  %v10262_v12 = vld [vmem:[#allocation46_spill] sm:$0xff]  ;;  %v10263_v17 = vld [vmem:[#allocation47_spill] sm:$0xff] }
 0x8fb   :  { %5017 = vmatmul.mubr.f32.vlgmr.msra.gmra.mxu1 %v4951_v19  ;;  %5088 = vmatmul.mubr.f32.vlgmr.msra.gmra.mxu0 %v4951_v19  ;;  %v10264_v19 = vld [vmem:[#allocation48_spill] sm:$0xff] }
 0x8fc   :  { %5141 = vmatpush1.msra.mxu1 %v9060_v32  ;;  %5212 = vmatpush1.msra.mxu0 %v9062_v22 }
 0x8fd   :  { %5142 = vmatprep.subr.mxu1 %v9064_v47  ;;  %5213 = vmatprep.subr.mxu0 %v9066_v13 }
 0x8fe   :  { %5143 = vmatpush1.msra.mxu1 %v9070_v14  ;;  %5214 = vmatpush1.msra.mxu0 %v9072_v40 }
 0x8ff   :  { %5144 = vmatprep.subr.mxu1 %v9076_v0  ;;  %5215 = vmatprep.subr.mxu0 %v9078_v6 }
 0x900   :  { %5145 = vmatpush1.msra.mxu1 %v9082_v58  ;;  %5216 = vmatpush1.msra.mxu0 %v9084_v42 }
 0x901   :  { %5146 = vmatprep.subr.mxu1 %v9088_v27  ;;  %5217 = vmatprep.subr.mxu0 %v9090_v56 }
 0x902   :  { %5147 = vmatpush1.msra.mxu1 %v9094_v24  ;;  %5218 = vmatpush1.msra.mxu0 %v9096_v50 }
 0x903   :  { %5148 = vmatprep.subr.mxu1 %v9100_v20  ;;  %5219 = vmatprep.subr.mxu0 %v9102_v2 }
 0x904   :  { %5149 = vmatpush1.msra.mxu1 %v9106_v7  ;;  %5220 = vmatpush1.msra.mxu0 %v9108_v29 }
 0x905   :  { %5150 = vmatprep.subr.mxu1 %v9112_v31  ;;  %5221 = vmatprep.subr.mxu0 %v9114_v51 }
 0x906   :  { %5151 = vmatpush1.msra.mxu1 %v9118_v53  ;;  %5222 = vmatpush1.msra.mxu0 %v9120_v54 }
 0x907   :  { %5152 = vmatprep.subr.mxu1 %v9124_v60  ;;  %5223 = vmatprep.subr.mxu0 %v9126_v61 }
 0x908   :  { %5153 = vmatpush1.msra.mxu1 %v9130_v38  ;;  %5224 = vmatpush1.msra.mxu0 %v9132_v26 }
 0x909   :  { %5154 = vmatprep.subr.mxu1 %v9136_v45  ;;  %5225 = vmatprep.subr.mxu0 %v9138_v59 }
 0x90a   :  { %5155 = vmatpush1.msra.mxu1 %v9142_v46  ;;  %5226 = vmatpush1.msra.mxu0 %v9144_v39 }
 0x90b   :  { %5156 = vmatprep.subr.mxu1 %v9148_v62  ;;  %5227 = vmatprep.subr.mxu0 %v9150_v21 }
 0x90c   :  { %5157 = vmatpush1.msra.mxu1 %v9154_v9  ;;  %5228 = vmatpush1.msra.mxu0 %v9156_v10 }
 0x90d   :  { %5158 = vmatprep.subr.mxu1 %v9160_v37  ;;  %5229 = vmatprep.subr.mxu0 %v9162_v30 }
 0x90e   :  { %5159 = vmatpush1.msra.mxu1 %v9166_v25  ;;  %5230 = vmatpush1.msra.mxu0 %v9168_v8 }
 0x90f   :  { %5160 = vmatprep.subr.mxu1 %v9172_v1  ;;  %5231 = vmatprep.subr.mxu0 %v9174_v28 }
 0x910   :  { %5161 = vmatpush1.msra.mxu1 %v10248_v4  ;;  %5232 = vmatpush1.msra.mxu0 %v9180_v63 }
 0x911   :  { %5162 = vmatprep.subr.mxu1 %v10249_v52  ;;  %5233 = vmatprep.subr.mxu0 %v10250_v41 }
 0x912   :  { %5163 = vmatpush1.msra.mxu1 %v10251_v43  ;;  %5234 = vmatpush1.msra.mxu0 %v10252_v44 }
 0x913   :  { %5164 = vmatprep.subr.mxu1 %v10253_v57  ;;  %5235 = vmatprep.subr.mxu0 %v10254_v48 }
 0x914   :  { %5165 = vmatpush1.msra.mxu1 %v10255_v33  ;;  %5236 = vmatpush1.msra.mxu0 %v10256_v5  ;;  %v10267_v5 = vld [vmem:[#allocation51_spill] sm:$0xff] }
 0x915   :  { %5166 = vmatprep.subr.mxu1 %v10257_v23  ;;  %5237 = vmatprep.subr.mxu0 %v10258_v18  ;;  %v10268_v23 = vmov 0.0   ;;  %v10269_v18 = vld [vmem:[#allocation52_spill] sm:$0xff] }
 0x916   :  { %5167 = vmatpush1.msra.mxu1 %v10259_v34  ;;  %5238 = vmatpush1.msra.mxu0 %v10260_v15  ;;  %v10270_v15 = vld [vmem:[#allocation35_spill] sm:$0xff] }
 0x917   :  { %5168 = vmatprep.subr.mxu1 %v10261_v49  ;;  %5239 = vmatprep.subr.mxu0 %v10262_v12  ;;  %v10271_v49 = vld [vmem:[#allocation36_spill] sm:$0xff] }
 0x918   :  { %5169 = vmatpush1.msra.mxu1 %v10263_v17  ;;  %5240 = vmatpush1.msra.mxu0 %v10264_v19  ;;  %v10272_v19 = vld [vmem:[#allocation53_spill] sm:$0xff] }
 0x919   :  { %5170 = vmatprep.subr.mxu1 %v10265_v16  ;;  %5241 = vmatprep.subr.mxu0 %v10266_v36 }
 0x91a   :  { %5171 = vmatpush1.msra.mxu1 %v10267_v5  ;;  %5204 = vmatprep.mubr.f32.mxu1 %v10268_v23 }
 0x91b   :  { %5242 = vmatpush1.msra.mxu0 %v10269_v18  ;;  %5275 = vmatprep.mubr.f32.mxu0 %v10268_v23 }
 0x91c   :  { %5328 = vmatprep.subr.mxu1 %v10270_v15  ;;  %5399 = vmatprep.subr.mxu0 %v10271_v49 }
 0x9bb   :  { %v5018_v12 = vpop.f32.mrf.mxu1  ;;  %v5089_v16 = vpop.f32.mrf.mxu0 }
 0x9bc   :  { %v5098_v17 = vrot.slane %v5018_v12, 6  ;;  %v5100_v15 = vrot.slane %v5089_v16, 6 }
 0x9bd   :  { %v5020_v34 = vpop.f32.mrf.mxu1  ;;  %v5091_v44 = vpop.f32.mrf.mxu0 }
 0x9be   :  { %v5106_v33 = vadd.f32 %v5098_v17, %v10272_v19  ;;  %v5099_v48 = vrot.slane %v5020_v34, 6  ;;  %v5101_v18 = vrot.slane %v5091_v44, 6  ;;  %v5108_v12 = vadd.f32 %v5100_v15, %v9336_v55 }
 0x9c0   :  { %v6291_v36 = vmul.f32 -1.442695, %v5106_v33  ;;  %v5107_v5 = vadd.f32 %v5099_v48, %v9327_v35  ;;  %v5109_v23 = vadd.f32 %v5101_v18, %v9332_v11 }
 0x9c2   :  { %6600 = vpow2.f32 %v6291_v36  ;;  %v6292_v57 = vmul.f32 -1.442695, %v5107_v5  ;;  %v6293_v43 = vmul.f32 -1.442695, %v5109_v23 }
 0x9c4   :  { %6602 = vpow2.f32 %v6292_v57  ;;  %v5130_v57 = vrot.slane %v9339_v3, 6 }
 0x9c5   :  { %6604 = vpow2.f32 %v6293_v43 }
 0x9cf   :  { %v6601_v49 = vpop.eup %6600 }
 0x9d0   :  { %v5113_v41 = vadd.f32 1.0, %v6601_v49 }
 0x9d1   :  { %v6603_v52 = vpop.eup %6602 }
 0x9d2   :  { %6606 = vrcp.f32 %v5113_v41  ;;  %v5119_v34 = vadd.f32 1.0, %v6603_v52  ;;  %v6605_v48 = vpop.eup %6604 }
 0x9d3   :  { %6608 = vtanh.f32 %v5108_v12  ;;  %v5126_v5 = vadd.f32 1.0, %v6605_v48 }
 0x9d4   :  { %6610 = vrcp.f32 %v5119_v34 }
 0x9d5   :  { %6612 = vrcp.f32 %v5126_v5 }
 0x9df   :  { %v6607_v36 = vpop.eup %6606 }
 0x9e0   :  { %v6609_v33 = vpop.eup %6608 }
 0x9e1   :  { %v6611_v44 = vpop.eup %6610  ;;  %v5133_v18 = vmul.f32 %v6609_v33, %v6607_v36 }
 0x9e2   :  { %v5132_v16 = vmul.f32 %v6611_v44, %v5130_v57  ;;  %v6613_v17 = vpop.eup %6612 }
 0x9e4   :  { %v9413_v23 = vadd.f32 %v5133_v18, %v5132_v16 }
 0x9e6   :  { %6614 = vtanh.f32 %v9413_v23  ;;  %v5318_v12 = vrot.slane %v9413_v23, 6  ;;  %v5635_v23 = vld [vmem:[#allocation13 + $0x3c0] sm:$0xff] }
 0x9f3   :  { %v6615_v43 = vpop.eup %6614 }
 0x9f4   :  { %v5136_v41 = vmul.f32 %v6615_v43, %v6613_v17  ;;  %v5639_v17 = vld [vmem:[#allocation13 + $0x3e0] sm:$0xff]  ;;  %v5641_v43 = vld [vmem:[#allocation13 + $0x3f0] sm:$0xff] }
 0x9f6   :  { %v5138_v52 = vrot.slane %v5136_v41, 2  ;;  %v5636_v41 = vld [vmem:[#allocation13 + $0x3c8] sm:$0xff] }
 0x9f8   :  { %5205 = vmatmul.mubr.f32.vlgmr.msra.gmra.mxu1 %v5138_v52  ;;  %5276 = vmatmul.mubr.f32.vlgmr.msra.gmra.mxu0 %v5138_v52  ;;  %v5638_v52 = vld [vmem:[#allocation13 + $0x3d8] sm:$0xff] }
 0x9f9   :  { %5329 = vmatpush1.msra.mxu1 %v9060_v32  ;;  %5400 = vmatpush1.msra.mxu0 %v9062_v22  ;;  %v10273_v32 = vld [vmem:[#allocation38_spill] sm:$0xff]  ;;  %v10274_v22 = vld [vmem:[#allocation39_spill] sm:$0xff] }
 0x9fa   :  { %5330 = vmatprep.subr.mxu1 %v9064_v47  ;;  %5401 = vmatprep.subr.mxu0 %v9066_v13  ;;  %v10275_v47 = vld [vmem:[#allocation40_spill] sm:$0xff]  ;;  %v10276_v13 = vld [vmem:[#allocation41_spill] sm:$0xff] }
 0x9fb   :  { %5331 = vmatpush1.msra.mxu1 %v9070_v14  ;;  %5402 = vmatpush1.msra.mxu0 %v9072_v40  ;;  %v10277_v14 = vld [vmem:[#allocation42_spill] sm:$0xff]  ;;  %v10278_v40 = vld [vmem:[#allocation43_spill] sm:$0xff] }
 0x9fc   :  { %5332 = vmatprep.subr.mxu1 %v9076_v0  ;;  %5403 = vmatprep.subr.mxu0 %v9078_v6  ;;  %v10279_v0 = vld [vmem:[#allocation44_spill] sm:$0xff]  ;;  %v10280_v6 = vld [vmem:[#allocation30_spill] sm:$0xff] }
 0x9fd   :  { %5333 = vmatpush1.msra.mxu1 %v9082_v58  ;;  %5404 = vmatpush1.msra.mxu0 %v9084_v42  ;;  %v10281_v58 = vld [vmem:[#allocation27_spill] sm:$0xff]  ;;  %v10282_v42 = vld [vmem:[#allocation29_spill] sm:$0xff] }
 0x9fe   :  { %5334 = vmatprep.subr.mxu1 %v9088_v27  ;;  %5405 = vmatprep.subr.mxu0 %v9090_v56  ;;  %v10283_v27 = vld [vmem:[#allocation26_spill] sm:$0xff]  ;;  %v10284_v56 = vld [vmem:[#allocation28_spill] sm:$0xff] }
 0x9ff   :  { %5335 = vmatpush1.msra.mxu1 %v9094_v24  ;;  %5406 = vmatpush1.msra.mxu0 %v9096_v50  ;;  %v10285_v24 = vld [vmem:[#allocation45_spill] sm:$0xff]  ;;  %v10286_v50 = vld [vmem:[#allocation46_spill] sm:$0xff] }
 0xa00   :  { %5336 = vmatprep.subr.mxu1 %v9100_v20  ;;  %5407 = vmatprep.subr.mxu0 %v9102_v2  ;;  %v10287_v20 = vld [vmem:[#allocation47_spill] sm:$0xff]  ;;  %v10288_v2 = vld [vmem:[#allocation48_spill] sm:$0xff] }
 0xa01   :  { %5337 = vmatpush1.msra.mxu1 %v9106_v7  ;;  %5408 = vmatpush1.msra.mxu0 %v9108_v29  ;;  %v10289_v7 = vld [vmem:[#allocation49_spill] sm:$0xff]  ;;  %v10290_v29 = vld [vmem:[#allocation50_spill] sm:$0xff] }
 0xa02   :  { %5338 = vmatprep.subr.mxu1 %v9112_v31  ;;  %5409 = vmatprep.subr.mxu0 %v9114_v51  ;;  %v10291_v31 = vld [vmem:[#allocation51_spill] sm:$0xff]  ;;  %v10292_v51 = vld [vmem:[#allocation52_spill] sm:$0xff] }
 0xa03   :  { %5339 = vmatpush1.msra.mxu1 %v9118_v53  ;;  %5410 = vmatpush1.msra.mxu0 %v9120_v54  ;;  %v10293_v53 = vmov 0.0   ;;  %v5640_v54 = vld [vmem:[#allocation13 + $0x3e8] sm:$0xff] }
 0xa04   :  { %5340 = vmatprep.subr.mxu1 %v9124_v60  ;;  %5411 = vmatprep.subr.mxu0 %v9126_v61  ;;  %v5642_v60 = vld [vmem:[#allocation13 + $0x3f8] sm:$0xff] }
 0xa05   :  { %5341 = vmatpush1.msra.mxu1 %v9130_v38  ;;  %5412 = vmatpush1.msra.mxu0 %v9132_v26 }
 0xa06   :  { %5342 = vmatprep.subr.mxu1 %v9136_v45  ;;  %5413 = vmatprep.subr.mxu0 %v9138_v59 }
 0xa07   :  { %5343 = vmatpush1.msra.mxu1 %v9142_v46  ;;  %5414 = vmatpush1.msra.mxu0 %v9144_v39 }
 0xa08   :  { %5344 = vmatprep.subr.mxu1 %v9148_v62  ;;  %5415 = vmatprep.subr.mxu0 %v9150_v21 }
 0xa09   :  { %5345 = vmatpush1.msra.mxu1 %v9154_v9  ;;  %5416 = vmatpush1.msra.mxu0 %v9156_v10 }
 0xa0a   :  { %5346 = vmatprep.subr.mxu1 %v9160_v37  ;;  %5417 = vmatprep.subr.mxu0 %v9162_v30 }
 0xa0b   :  { %5347 = vmatpush1.msra.mxu1 %v9166_v25  ;;  %5418 = vmatpush1.msra.mxu0 %v9168_v8 }
 0xa0c   :  { %5348 = vmatprep.subr.mxu1 %v9172_v1  ;;  %5419 = vmatprep.subr.mxu0 %v9174_v28 }
 0xa0d   :  { %5349 = vmatpush1.msra.mxu1 %v10248_v4  ;;  %5420 = vmatpush1.msra.mxu0 %v9180_v63 }
 0xa0e   :  { %5350 = vmatprep.subr.mxu1 %v10273_v32  ;;  %5421 = vmatprep.subr.mxu0 %v10274_v22  ;;  %v5637_v32 = vld [vmem:[#allocation13 + $0x3d0] sm:$0xff]  ;;  %v5632_v22 = vld [vmem:[#allocation13 + $0x3a8] sm:$0xff] }
 0xa0f   :  { %5351 = vmatpush1.msra.mxu1 %v10275_v47  ;;  %5422 = vmatpush1.msra.mxu0 %v10276_v13  ;;  %v5634_v47 = vld [vmem:[#allocation13 + $0x3b8] sm:$0xff]  ;;  %v5631_v13 = vld [vmem:[#allocation13 + $0x3a0] sm:$0xff] }
 0xa10   :  { %5352 = vmatprep.subr.mxu1 %v10277_v14  ;;  %5423 = vmatprep.subr.mxu0 %v10278_v40  ;;  %v5633_v14 = vld [vmem:[#allocation13 + $0x3b0] sm:$0xff]  ;;  %v5628_v40 = vld [vmem:[#allocation13 + $0x388] sm:$0xff] }
 0xa11   :  { %5353 = vmatpush1.msra.mxu1 %v10279_v0  ;;  %5424 = vmatpush1.msra.mxu0 %v10280_v6  ;;  %v5630_v0 = vld [vmem:[#allocation13 + $0x398] sm:$0xff]  ;;  %v5627_v6 = vld [vmem:[#allocation13 + $0x380] sm:$0xff] }
 0xa12   :  { %5354 = vmatprep.subr.mxu1 %v10281_v58  ;;  %5425 = vmatprep.subr.mxu0 %v10282_v42  ;;  %v5629_v58 = vld [vmem:[#allocation13 + $0x390] sm:$0xff]  ;;  %v5624_v42 = vld [vmem:[#allocation13 + $0x368] sm:$0xff] }
 0xa13   :  { %5355 = vmatpush1.msra.mxu1 %v10283_v27  ;;  %5426 = vmatpush1.msra.mxu0 %v10284_v56  ;;  %v5626_v27 = vld [vmem:[#allocation13 + $0x378] sm:$0xff]  ;;  %v5623_v56 = vld [vmem:[#allocation13 + $0x360] sm:$0xff] }
 0xa14   :  { %5356 = vmatprep.subr.mxu1 %v10285_v24  ;;  %5427 = vmatprep.subr.mxu0 %v10286_v50  ;;  %v5625_v24 = vld [vmem:[#allocation13 + $0x370] sm:$0xff]  ;;  %v5620_v50 = vld [vmem:[#allocation13 + $0x348] sm:$0xff] }
 0xa15   :  { %5357 = vmatpush1.msra.mxu1 %v10287_v20  ;;  %5428 = vmatpush1.msra.mxu0 %v10288_v2  ;;  %v5622_v20 = vld [vmem:[#allocation13 + $0x358] sm:$0xff]  ;;  %v5619_v2 = vld [vmem:[#allocation13 + $0x340] sm:$0xff] }
 0xa16   :  { %5358 = vmatprep.subr.mxu1 %v10289_v7  ;;  %5429 = vmatprep.subr.mxu0 %v10290_v29  ;;  %v5621_v7 = vld [vmem:[#allocation13 + $0x350] sm:$0xff]  ;;  %v5616_v29 = vld [vmem:[#allocation13 + $0x328] sm:$0xff] }
 0xa17   :  { %5359 = vmatpush1.msra.mxu1 %v10291_v31  ;;  %5430 = vmatpush1.msra.mxu0 %v10292_v51  ;;  %v5618_v31 = vld [vmem:[#allocation13 + $0x338] sm:$0xff]  ;;  %v5615_v51 = vld [vmem:[#allocation13 + $0x320] sm:$0xff] }
 0xa18   :  { %5392 = vmatprep.mubr.f32.mxu1 %v10293_v53  ;;  %5463 = vmatprep.mubr.f32.mxu0 %v10293_v53 }
 0xa19   :  { %5643 = vmatprep.subr.mxu1 %v5640_v54  ;;  %5713 = vmatprep.subr.mxu0 %v5642_v60  ;;  %v5617_v54 = vld [vmem:[#allocation13 + $0x330] sm:$0xff]  ;;  %v5612_v60 = vld [vmem:[#allocation13 + $0x308] sm:$0xff] }
 0xab8   :  { %v5206_v61 = vpop.f32.mrf.mxu1  ;;  %v5277_v59 = vpop.f32.mrf.mxu0 }
 0xab9   :  { %v5286_v38 = vrot.slane %v5206_v61, 4  ;;  %v5288_v30 = vrot.slane %v5277_v59, 4  ;;  %v5614_v61 = vld [vmem:[#allocation13 + $0x318] sm:$0xff] }
 0xaba   :  { %v5208_v26 = vpop.f32.mrf.mxu1  ;;  %v5279_v9 = vpop.f32.mrf.mxu0  ;;  %v5610_v59 = vld [vmem:[#allocation13 + $0x2f8] sm:$0xff] }
 0xabb   :  { %v5294_v45 = vadd.f32 %v5286_v38, %v10272_v19  ;;  %v5287_v46 = vrot.slane %v5208_v26, 4  ;;  %v5289_v10 = vrot.slane %v5279_v9, 4  ;;  %v5296_v1 = vadd.f32 %v5288_v30, %v9336_v55  ;;  %v5611_v38 = vld [vmem:[#allocation13 + $0x300] sm:$0xff]  ;;  %v5613_v26 = vld [vmem:[#allocation13 + $0x310] sm:$0xff]  ;;  %v5602_v30 = vld [vmem:[#allocation13 + $0x2b8] sm:$0xff] }
 0xabc   :  { %v5603_v9 = vld [vmem:[#allocation13 + $0x2c0] sm:$0xff] }
 0xabd   :  { %v6294_v39 = vmul.f32 -1.442695, %v5294_v45  ;;  %v5295_v62 = vadd.f32 %v5287_v46, %v9327_v35  ;;  %v5297_v37 = vadd.f32 %v5289_v10, %v9332_v11  ;;  %v5608_v45 = vld [vmem:[#allocation13 + $0x2e8] sm:$0xff]  ;;  %v5607_v46 = vld [vmem:[#allocation13 + $0x2e0] sm:$0xff]  ;;  %v5605_v10 = vld [vmem:[#allocation13 + $0x2d0] sm:$0xff] }
 0xabf   :  { %6616 = vpow2.f32 %v6294_v39  ;;  %v6295_v21 = vmul.f32 -1.442695, %v5295_v62  ;;  %v6296_v25 = vmul.f32 -1.442695, %v5297_v37  ;;  %v5609_v39 = vld [vmem:[#allocation13 + $0x2f0] sm:$0xff]  ;;  %v5604_v62 = vld [vmem:[#allocation13 + $0x2c8] sm:$0xff] }
 0xac0   :  { %v5600_v37 = vld [vmem:[#allocation13 + $0x2a8] sm:$0xff] }
 0xac1   :  { %6618 = vpow2.f32 %v6295_v21  ;;  %v5606_v21 = vld [vmem:[#allocation13 + $0x2d8] sm:$0xff] }
 0xac2   :  { %6620 = vpow2.f32 %v6296_v25  ;;  %v5599_v25 = vld [vmem:[#allocation13 + $0x2a0] sm:$0xff] }
 0xacc   :  { %v6617_v8 = vpop.eup %6616 }
 0xacd   :  { %v5301_v28 = vadd.f32 1.0, %v6617_v8  ;;  %v5601_v8 = vld [vmem:[#allocation13 + $0x2b0] sm:$0xff] }
 0xace   :  { %v6619_v63 = vpop.eup %6618 }
 0xacf   :  { %6622 = vrcp.f32 %v5301_v28  ;;  %v5307_v3 = vadd.f32 1.0, %v6619_v63  ;;  %v6621_v4 = vpop.eup %6620  ;;  %v5598_v28 = vld [vmem:[#allocation13 + $0x298] sm:$0xff]  ;;  %v5595_v63 = vld [vmem:[#allocation13 + $0x280] sm:$0xff] }
 0xad0   :  { %6624 = vtanh.f32 %v5296_v1  ;;  %v5314_v48 = vadd.f32 1.0, %v6621_v4  ;;  %v5596_v1 = vld [vmem:[#allocation13 + $0x288] sm:$0xff] }
 0xad1   :  { %6626 = vrcp.f32 %v5307_v3  ;;  %v5597_v3 = vld [vmem:[#allocation13 + $0x290] sm:$0xff]  ;;  %v5592_v4 = vld [vmem:[#allocation13 + $0x268] sm:$0xff] }
 0xad2   :  { %6628 = vrcp.f32 %v5314_v48  ;;  %v5590_v48 = vld [vmem:[#allocation13 + $0x258] sm:$0xff] }
 0xadc   :  { %v6623_v15 = vpop.eup %6622 }
 0xadd   :  { %v6625_v49 = vpop.eup %6624 }
 0xade   :  { %v6627_v34 = vpop.eup %6626  ;;  %v5321_v36 = vmul.f32 %v6625_v49, %v6623_v15  ;;  %v5594_v15 = vld [vmem:[#allocation13 + $0x278] sm:$0xff]  ;;  %v5591_v49 = vld [vmem:[#allocation13 + $0x260] sm:$0xff] }
 0xadf   :  { %v5320_v33 = vmul.f32 %v6627_v34, %v5318_v12  ;;  %v6629_v44 = vpop.eup %6628  ;;  %v5593_v12 = vld [vmem:[#allocation13 + $0x270] sm:$0xff]  ;;  %v5588_v34 = vld [vmem:[#allocation13 + $0x248] sm:$0xff] }
 0xae1   :  { %v9485_v57 = vadd.f32 %v5321_v36, %v5320_v33  ;;  %v5587_v36 = vld [vmem:[#allocation13 + $0x240] sm:$0xff]  ;;  %v5589_v33 = vld [vmem:[#allocation13 + $0x250] sm:$0xff] }
 0xae3   :  { %6630 = vtanh.f32 %v9485_v57 }
 0xaf0   :  { %v6631_v5 = vpop.eup %6630 }
 0xaf1   :  { %v5324_v18 = vmul.f32 %v6631_v5, %v6629_v44  ;;  %v5584_v44 = vld [vmem:[#allocation13 + $0x228] sm:$0xff]  ;;  %v5586_v5 = vld [vmem:[#allocation13 + $0x238] sm:$0xff] }
 0xaf3   :  { %v5326_v16 = vrot.slane %v5324_v18, 4  ;;  %v5583_v18 = vld [vmem:[#allocation13 + $0x220] sm:$0xff] }
 0xaf5   :  { %5393 = vmatmul.mubr.f32.vlgmr.msra.gmra.mxu1 %v5326_v16  ;;  %5464 = vmatmul.mubr.f32.vlgmr.msra.gmra.mxu0 %v5326_v16  ;;  %v5585_v16 = vld [vmem:[#allocation13 + $0x230] sm:$0xff] }
 0xaf6   :  { %5644 = vmatpush1.msra.mxu1 %v5639_v17  ;;  %5714 = vmatpush1.msra.mxu0 %v5641_v43  ;;  %v5580_v17 = vld [vmem:[#allocation13 + $0x208] sm:$0xff]  ;;  %v5582_v43 = vld [vmem:[#allocation13 + $0x218] sm:$0xff] }
 0xaf7   :  { %5645 = vmatprep.subr.mxu1 %v5636_v41  ;;  %5715 = vmatprep.subr.mxu0 %v5638_v52  ;;  %v5579_v41 = vld [vmem:[#allocation13 + $0x200] sm:$0xff]  ;;  %v5581_v52 = vld [vmem:[#allocation13 + $0x210] sm:$0xff] }
 0xaf8   :  { %5646 = vmatpush1.msra.mxu1 %v5635_v23  ;;  %5716 = vmatpush1.msra.mxu0 %v5637_v32  ;;  %v5575_v23 = vld [vmem:[#allocation13 + $0x1e8] sm:$0xff]  ;;  %v5577_v32 = vld [vmem:[#allocation13 + $0x1f8] sm:$0xff] }
 0xaf9   :  { %5647 = vmatprep.subr.mxu1 %v5632_v22  ;;  %5717 = vmatprep.subr.mxu0 %v5634_v47  ;;  %v5578_v22 = vld [vmem:[#allocation4 + $0x6] sm:$0x3]  ;;  %v5574_v47 = vld [vmem:[#allocation13 + $0x1e0] sm:$0xff] }
 0xafa   :  { %5648 = vmatpush1.msra.mxu1 %v5631_v13  ;;  %5718 = vmatpush1.msra.mxu0 %v5633_v14  ;;  %v5576_v13 = vld [vmem:[#allocation13 + $0x1f0] sm:$0xff]  ;;  %v5571_v14 = vld [vmem:[#allocation13 + $0x1c8] sm:$0xff] }
 0xafb   :  { %5649 = vmatprep.subr.mxu1 %v5628_v40  ;;  %5719 = vmatprep.subr.mxu0 %v5630_v0  ;;  %v5573_v40 = vld [vmem:[#allocation13 + $0x1d8] sm:$0xff]  ;;  %v5570_v0 = vld [vmem:[#allocation13 + $0x1c0] sm:$0xff] }
 0xafc   :  { %5650 = vmatpush1.msra.mxu1 %v5627_v6  ;;  %5720 = vmatpush1.msra.mxu0 %v5629_v58  ;;  %v5572_v6 = vld [vmem:[#allocation13 + $0x1d0] sm:$0xff]  ;;  %v5567_v58 = vld [vmem:[#allocation13 + $0x1a8] sm:$0xff] }
 0xafd   :  { %5651 = vmatprep.subr.mxu1 %v5624_v42  ;;  %5721 = vmatprep.subr.mxu0 %v5626_v27  ;;  %v5569_v42 = vld [vmem:[#allocation13 + $0x1b8] sm:$0xff]  ;;  %v5566_v27 = vld [vmem:[#allocation13 + $0x1a0] sm:$0xff] }
 0xafe   :  { %5652 = vmatpush1.msra.mxu1 %v5623_v56  ;;  %5722 = vmatpush1.msra.mxu0 %v5625_v24  ;;  %v5568_v56 = vld [vmem:[#allocation13 + $0x1b0] sm:$0xff]  ;;  %v5563_v24 = vld [vmem:[#allocation13 + $0x188] sm:$0xff] }
 0xaff   :  { %5653 = vmatprep.subr.mxu1 %v5620_v50  ;;  %5723 = vmatprep.subr.mxu0 %v5622_v20  ;;  %v5565_v50 = vld [vmem:[#allocation13 + $0x198] sm:$0xff]  ;;  %v5562_v20 = vld [vmem:[#allocation13 + $0x180] sm:$0xff] }
 0xb00   :  { %5654 = vmatpush1.msra.mxu1 %v5619_v2  ;;  %5724 = vmatpush1.msra.mxu0 %v5621_v7  ;;  %v5564_v2 = vld [vmem:[#allocation13 + $0x190] sm:$0xff]  ;;  %v5559_v7 = vld [vmem:[#allocation13 + $0x168] sm:$0xff] }
 0xb01   :  { %5655 = vmatprep.subr.mxu1 %v5616_v29  ;;  %5725 = vmatprep.subr.mxu0 %v5618_v31  ;;  %v5561_v29 = vld [vmem:[#allocation13 + $0x178] sm:$0xff]  ;;  %v5558_v31 = vld [vmem:[#allocation13 + $0x160] sm:$0xff] }
 0xb02   :  { %5656 = vmatpush1.msra.mxu1 %v5615_v51  ;;  %5726 = vmatpush1.msra.mxu0 %v5617_v54  ;;  %v5560_v51 = vld [vmem:[#allocation13 + $0x170] sm:$0xff]  ;;  %v5555_v54 = vld [vmem:[#allocation13 + $0x148] sm:$0xff] }
 0xb03   :  { %5657 = vmatprep.subr.mxu1 %v5612_v60  ;;  %5727 = vmatprep.subr.mxu0 %v5614_v61  ;;  %v5557_v60 = vld [vmem:[#allocation13 + $0x158] sm:$0xff]  ;;  %v5554_v61 = vld [vmem:[#allocation13 + $0x140] sm:$0xff] }
 0xb04   :  { %5658 = vmatpush1.msra.mxu1 %v5611_v38  ;;  %5728 = vmatpush1.msra.mxu0 %v5613_v26  ;;  %v5556_v38 = vld [vmem:[#allocation13 + $0x150] sm:$0xff]  ;;  %v5551_v26 = vld [vmem:[#allocation13 + $0x128] sm:$0xff] }
 0xb05   :  { %5659 = vmatprep.subr.mxu1 %v5608_v45  ;;  %5729 = vmatprep.subr.mxu0 %v5610_v59  ;;  %v5553_v45 = vld [vmem:[#allocation13 + $0x138] sm:$0xff]  ;;  %v5550_v59 = vld [vmem:[#allocation13 + $0x120] sm:$0xff] }
 0xb06   :  { %5660 = vmatpush1.msra.mxu1 %v5607_v46  ;;  %5730 = vmatpush1.msra.mxu0 %v5609_v39  ;;  %v5552_v46 = vld [vmem:[#allocation13 + $0x130] sm:$0xff]  ;;  %v5547_v39 = vld [vmem:[#allocation13 + $0x108] sm:$0xff] }
 0xb07   :  { %5661 = vmatprep.subr.mxu1 %v5604_v62  ;;  %5731 = vmatprep.subr.mxu0 %v5606_v21  ;;  %v5549_v62 = vld [vmem:[#allocation13 + $0x118] sm:$0xff]  ;;  %v5546_v21 = vld [vmem:[#allocation13 + $0x100] sm:$0xff] }
 0xb08   :  { %5662 = vmatpush1.msra.mxu1 %v5603_v9  ;;  %5732 = vmatpush1.msra.mxu0 %v5605_v10  ;;  %v5548_v9 = vld [vmem:[#allocation13 + $0x110] sm:$0xff]  ;;  %v5543_v10 = vld [vmem:[#allocation13 + $0xe8] sm:$0xff] }
 0xb09   :  { %5663 = vmatprep.subr.mxu1 %v5600_v37  ;;  %5733 = vmatprep.subr.mxu0 %v5602_v30  ;;  %v5545_v37 = vld [vmem:[#allocation13 + $0xf8] sm:$0xff]  ;;  %v5542_v30 = vld [vmem:[#allocation13 + $0xe0] sm:$0xff] }
 0xb0a   :  { %5664 = vmatpush1.msra.mxu1 %v5599_v25  ;;  %5734 = vmatpush1.msra.mxu0 %v5601_v8  ;;  %v5544_v25 = vld [vmem:[#allocation13 + $0xf0] sm:$0xff]  ;;  %v5539_v8 = vld [vmem:[#allocation13 + $0xc8] sm:$0xff] }
 0xb0b   :  { %5665 = vmatprep.subr.mxu1 %v5596_v1  ;;  %5735 = vmatprep.subr.mxu0 %v5598_v28  ;;  %v5541_v1 = vld [vmem:[#allocation13 + $0xd8] sm:$0xff]  ;;  %v5538_v28 = vld [vmem:[#allocation13 + $0xc0] sm:$0xff] }
 0xb0c   :  { %5666 = vmatpush1.msra.mxu1 %v5595_v63  ;;  %5736 = vmatpush1.msra.mxu0 %v5597_v3  ;;  %v5540_v63 = vld [vmem:[#allocation13 + $0xd0] sm:$0xff]  ;;  %v5535_v3 = vld [vmem:[#allocation13 + $0xa8] sm:$0xff] }
 0xb0d   :  { %5667 = vmatprep.subr.mxu1 %v5592_v4  ;;  %5737 = vmatprep.subr.mxu0 %v5594_v15  ;;  %v5537_v4 = vld [vmem:[#allocation13 + $0xb8] sm:$0xff]  ;;  %v5534_v15 = vld [vmem:[#allocation13 + $0xa0] sm:$0xff] }
 0xb0e   :  { %5668 = vmatpush1.msra.mxu1 %v5591_v49  ;;  %5738 = vmatpush1.msra.mxu0 %v5593_v12  ;;  %v5536_v49 = vld [vmem:[#allocation13 + $0xb0] sm:$0xff]  ;;  %v5531_v12 = vld [vmem:[#allocation13 + $0x88] sm:$0xff] }
 0xb0f   :  { %5669 = vmatprep.subr.mxu1 %v5588_v34  ;;  %5739 = vmatprep.subr.mxu0 %v5590_v48  ;;  %v5533_v34 = vld [vmem:[#allocation13 + $0x98] sm:$0xff]  ;;  %v5530_v48 = vld [vmem:[#allocation13 + $0x80] sm:$0xff] }
 0xb10   :  { %5670 = vmatpush1.msra.mxu1 %v5587_v36  ;;  %5740 = vmatpush1.msra.mxu0 %v5589_v33  ;;  %v5532_v36 = vld [vmem:[#allocation13 + $0x90] sm:$0xff]  ;;  %v5527_v33 = vld [vmem:[#allocation13 + $0x68] sm:$0xff] }
 0xb11   :  { %5671 = vmatprep.subr.mxu1 %v5584_v44  ;;  %5741 = vmatprep.subr.mxu0 %v5586_v5  ;;  %v5529_v44 = vld [vmem:[#allocation13 + $0x78] sm:$0xff]  ;;  %v5526_v5 = vld [vmem:[#allocation13 + $0x60] sm:$0xff] }
 0xb12   :  { %5672 = vmatpush1.msra.mxu1 %v5583_v18  ;;  %5742 = vmatpush1.msra.mxu0 %v5585_v16  ;;  %v5528_v18 = vld [vmem:[#allocation13 + $0x70] sm:$0xff]  ;;  %v5523_v16 = vld [vmem:[#allocation13 + $0x48] sm:$0xff] }
 0xb13   :  { %5673 = vmatprep.subr.mxu1 %v5580_v17  ;;  %5743 = vmatprep.subr.mxu0 %v5582_v43  ;;  %v5525_v17 = vld [vmem:[#allocation13 + $0x58] sm:$0xff]  ;;  %v5522_v43 = vld [vmem:[#allocation13 + $0x40] sm:$0xff] }
 0xb14   :  { %5674 = vmatpush1.msra.mxu1 %v5579_v41  ;;  %5707 = vmatprep.mubr.f32.mxu1 %v10293_v53  ;;  %v5524_v41 = vld [vmem:[#allocation13 + $0x50] sm:$0xff] }
 0xb15   :  { %5744 = vmatpush1.msra.mxu0 %v5581_v52  ;;  %5777 = vmatprep.mubr.f32.mxu0 %v10293_v53  ;;  %v5519_v52 = vld [vmem:[#allocation13 + $0x28] sm:$0xff] }
 0xb16   :  { %5708 = vmatmul.mubr.f32.vlgmr.msra.gmra.mxu1 %v5578_v22  ;;  %5778 = vmatmul.mubr.f32.vlgmr.msra.gmra.mxu0 %v5578_v22  ;;  %v5520_v22 = vld [vmem:[#allocation13 + $0x30] sm:$0xff] }
 0xb17   :  { %5784 = vmatprep.subr.mxu1 %v5575_v23  ;;  %5854 = vmatprep.subr.mxu0 %v5577_v32  ;;  %v5521_v23 = vld [vmem:[#allocation13 + $0x38] sm:$0xff]  ;;  %v5518_v32 = vld [vmem:[#allocation13 + $0x20] sm:$0xff] }
 0xb18   :  { %5785 = vmatpush1.msra.mxu1 %v5574_v47  ;;  %5855 = vmatpush1.msra.mxu0 %v5576_v13  ;;  %v5515_v47 = vld [vmem:[#allocation13 + $0x8] sm:$0xff]  ;;  %v5517_v13 = vld [vmem:[#allocation13 + $0x18] sm:$0xff] }
 0xb19   :  { %5786 = vmatprep.subr.mxu1 %v5571_v14  ;;  %5856 = vmatprep.subr.mxu0 %v5573_v40  ;;  %v5514_v14 = vld [vmem:[#allocation13] sm:$0xff]  ;;  %v5516_v40 = vld [vmem:[#allocation13 + $0x10] sm:$0xff] }
 0xb1a   :  { %5787 = vmatpush1.msra.mxu1 %v5570_v0  ;;  %5857 = vmatpush1.msra.mxu0 %v5572_v6  ;;  %v5513_v0 = vld [vmem:[#allocation3 + $0x6] sm:$0x3]  ;;  %v5976_v6 = vld [vmem:[%s9695_s16 + $0x78] sm:$0xff] }
 0xb1b   :  { %5788 = vmatprep.subr.mxu1 %v5567_v58  ;;  %5858 = vmatprep.subr.mxu0 %v5569_v42  ;;  %v5975_v58 = vld [vmem:[%s9695_s16 + $0x70] sm:$0xff]  ;;  %v5974_v42 = vld [vmem:[%s9695_s16 + $0x68] sm:$0xff] }
 0xb1c   :  { %5789 = vmatpush1.msra.mxu1 %v5566_v27  ;;  %5859 = vmatpush1.msra.mxu0 %v5568_v56  ;;  %v5973_v27 = vld [vmem:[%s9695_s16 + $0x60] sm:$0xff]  ;;  %v5972_v56 = vld [vmem:[%s9695_s16 + $0x58] sm:$0xff] }
 0xb1d   :  { %5790 = vmatprep.subr.mxu1 %v5563_v24  ;;  %5860 = vmatprep.subr.mxu0 %v5565_v50  ;;  %v5971_v24 = vld [vmem:[%s9695_s16 + $0x50] sm:$0xff]  ;;  %v5970_v50 = vld [vmem:[%s9695_s16 + $0x48] sm:$0xff] }
 0xb1e   :  { %5791 = vmatpush1.msra.mxu1 %v5562_v20  ;;  %5861 = vmatpush1.msra.mxu0 %v5564_v2  ;;  %v5969_v20 = vld [vmem:[%s9695_s16 + $0x40] sm:$0xff]  ;;  %v5968_v2 = vld [vmem:[%s9695_s16 + $0x38] sm:$0xff] }
 0xb1f   :  { %5792 = vmatprep.subr.mxu1 %v5559_v7  ;;  %5862 = vmatprep.subr.mxu0 %v5561_v29  ;;  %v5967_v7 = vld [vmem:[%s9695_s16 + $0x30] sm:$0xff]  ;;  %v5966_v29 = vld [vmem:[%s9695_s16 + $0x28] sm:$0xff] }
 0xb20   :  { %5793 = vmatpush1.msra.mxu1 %v5558_v31  ;;  %5863 = vmatpush1.msra.mxu0 %v5560_v51  ;;  %v5965_v31 = vld [vmem:[%s9695_s16 + $0x20] sm:$0xff]  ;;  %v5964_v51 = vld [vmem:[%s9695_s16 + $0x18] sm:$0xff] }
 0xb21   :  { %5794 = vmatprep.subr.mxu1 %v5555_v54  ;;  %5864 = vmatprep.subr.mxu0 %v5557_v60  ;;  %v5963_v54 = vld [vmem:[%s9695_s16 + $0x10] sm:$0xff]  ;;  %v5962_v60 = vld [vmem:[%s9695_s16 + $0x8] sm:$0xff] }
 0xb22   :  { %5795 = vmatpush1.msra.mxu1 %v5554_v61  ;;  %5865 = vmatpush1.msra.mxu0 %v5556_v38  ;;  %v5961_v61 = vld [vmem:[%s9695_s16] sm:$0xff]  ;;  %v5992_v38 = vld [vmem:[%s9695_s16 + $0xf8] sm:$0xff] }
 0xb23   :  { %5796 = vmatprep.subr.mxu1 %v5551_v26  ;;  %5866 = vmatprep.subr.mxu0 %v5553_v45  ;;  %v5991_v26 = vld [vmem:[%s9695_s16 + $0xf0] sm:$0xff]  ;;  %v5990_v45 = vld [vmem:[%s9695_s16 + $0xe8] sm:$0xff] }
 0xb24   :  { %5797 = vmatpush1.msra.mxu1 %v5550_v59  ;;  %5867 = vmatpush1.msra.mxu0 %v5552_v46  ;;  %v5989_v59 = vld [vmem:[%s9695_s16 + $0xe0] sm:$0xff]  ;;  %v5988_v46 = vld [vmem:[%s9695_s16 + $0xd8] sm:$0xff] }
 0xb25   :  { %5798 = vmatprep.subr.mxu1 %v5547_v39  ;;  %5868 = vmatprep.subr.mxu0 %v5549_v62  ;;  %v5987_v39 = vld [vmem:[%s9695_s16 + $0xd0] sm:$0xff]  ;;  %v5986_v62 = vld [vmem:[%s9695_s16 + $0xc8] sm:$0xff] }
 0xb26   :  { %5799 = vmatpush1.msra.mxu1 %v5546_v21  ;;  %5869 = vmatpush1.msra.mxu0 %v5548_v9  ;;  %v5985_v21 = vld [vmem:[%s9695_s16 + $0xc0] sm:$0xff]  ;;  %v5984_v9 = vld [vmem:[%s9695_s16 + $0xb8] sm:$0xff] }
 0xb27   :  { %5800 = vmatprep.subr.mxu1 %v5543_v10  ;;  %5870 = vmatprep.subr.mxu0 %v5545_v37  ;;  %v5983_v10 = vld [vmem:[%s9695_s16 + $0xb0] sm:$0xff]  ;;  %v5982_v37 = vld [vmem:[%s9695_s16 + $0xa8] sm:$0xff] }
 0xb28   :  { %5801 = vmatpush1.msra.mxu1 %v5542_v30  ;;  %5871 = vmatpush1.msra.mxu0 %v5544_v25  ;;  %v5981_v30 = vld [vmem:[%s9695_s16 + $0xa0] sm:$0xff]  ;;  %v5980_v25 = vld [vmem:[%s9695_s16 + $0x98] sm:$0xff] }
 0xb29   :  { %5802 = vmatprep.subr.mxu1 %v5539_v8  ;;  %5872 = vmatprep.subr.mxu0 %v5541_v1  ;;  %v5979_v8 = vld [vmem:[%s9695_s16 + $0x90] sm:$0xff]  ;;  %v5978_v1 = vld [vmem:[%s9695_s16 + $0x88] sm:$0xff] }
 0xb2a   :  { %5803 = vmatpush1.msra.mxu1 %v5538_v28  ;;  %5873 = vmatpush1.msra.mxu0 %v5540_v63  ;;  %v5977_v28 = vld [vmem:[%s9695_s16 + $0x80] sm:$0xff] }
 0xb2b   :  { %5804 = vmatprep.subr.mxu1 %v5535_v3  ;;  %5874 = vmatprep.subr.mxu0 %v5537_v4 }
 0xb2c   :  { %5805 = vmatpush1.msra.mxu1 %v5534_v15  ;;  %5875 = vmatpush1.msra.mxu0 %v5536_v49 }
 0xb2d   :  { %5806 = vmatprep.subr.mxu1 %v5531_v12  ;;  %5876 = vmatprep.subr.mxu0 %v5533_v34 }
 0xb2e   :  { %5807 = vmatpush1.msra.mxu1 %v5530_v48  ;;  %5877 = vmatpush1.msra.mxu0 %v5532_v36 }
 0xb2f   :  { %5808 = vmatprep.subr.mxu1 %v5527_v33  ;;  %5878 = vmatprep.subr.mxu0 %v5529_v44 }
 0xb30   :  { %5809 = vmatpush1.msra.mxu1 %v5526_v5  ;;  %5879 = vmatpush1.msra.mxu0 %v5528_v18 }
 0xb31   :  { %5810 = vmatprep.subr.mxu1 %v5523_v16  ;;  %5880 = vmatprep.subr.mxu0 %v5525_v17 }
 0xb32   :  { %5811 = vmatpush1.msra.mxu1 %v5522_v43  ;;  %5881 = vmatpush1.msra.mxu0 %v5524_v41 }
 0xb33   :  { %5812 = vmatprep.subr.mxu1 %v5519_v52  ;;  %5882 = vmatprep.subr.mxu0 %v5521_v23 }
 0xb34   :  { %5813 = vmatpush1.msra.mxu1 %v5518_v32  ;;  %5883 = vmatpush1.msra.mxu0 %v5520_v22 }
 0xb35   :  { %5814 = vmatprep.subr.mxu1 %v5515_v47  ;;  %5884 = vmatprep.subr.mxu0 %v5517_v13  ;;  %v5506_v13 = vrot.slane %v9485_v57, 6 }
 0xb36   :  { %5815 = vmatpush1.msra.mxu1 %v5514_v14  ;;  %5848 = vmatprep.mubr.f32.mxu1 %v10293_v53 }
 0xb37   :  { %5885 = vmatpush1.msra.mxu0 %v5516_v40  ;;  %5918 = vmatprep.mubr.f32.mxu0 %v10293_v53 }
 0xb38   :  { %5849 = vmatmul.mubr.f32.vlgmr.msra.gmra.mxu1 %v5513_v0  ;;  %5919 = vmatmul.mubr.f32.vlgmr.msra.gmra.mxu0 %v5513_v0 }
 0xb39   :  { %6450 = vmatprep.subr.mxu0 %v10293_v53  ;;  %6415 = vmatprep.subr.mxu1 %v10293_v53 }
 0xb3a   :  { %6451 = vmatpush3.msra.mxu0 %v5976_v6  ;;  %6482 = vmatprep.mubr.msk.f32.mxu0 %vm6824_vm2, %v10293_v53 }
 0xb3b   :  { %6452 = vmatprep.subr.mxu0 %v10293_v53  ;;  %6447 = vmatprep.mubr.msk.f32.mxu1 %vm6824_vm2, %v10293_v53 }
 0xb3c   :  { %6453 = vmatpush3.msra.mxu0 %v5975_v58  ;;  %6416 = vmatpush3.msra.mxu1 %v5992_v38  ;;  %v10295_v38 = vld [vmem:[#allocation24_spill] sm:$0xff] }
 0xb3d   :  { %6454 = vmatprep.subr.mxu0 %v10293_v53  ;;  %6417 = vmatprep.subr.mxu1 %v10293_v53 }
 0xb3e   :  { %6455 = vmatpush3.msra.mxu0 %v5974_v42  ;;  %6418 = vmatpush3.msra.mxu1 %v5991_v26 }
 0xb3f   :  { %6456 = vmatprep.subr.mxu0 %v10293_v53  ;;  %6419 = vmatprep.subr.mxu1 %v10293_v53 }
 0xb40   :  { %6457 = vmatpush3.msra.mxu0 %v5973_v27  ;;  %6420 = vmatpush3.msra.mxu1 %v5990_v45 }
 0xb41   :  { %6458 = vmatprep.subr.mxu0 %v10293_v53  ;;  %6421 = vmatprep.subr.mxu1 %v10293_v53 }
 0xb42   :  { %6459 = vmatpush3.msra.mxu0 %v5972_v56  ;;  %6422 = vmatpush3.msra.mxu1 %v5989_v59 }
 0xb43   :  { %6460 = vmatprep.subr.mxu0 %v10293_v53  ;;  %6423 = vmatprep.subr.mxu1 %v10293_v53 }
 0xb44   :  { %6461 = vmatpush3.msra.mxu0 %v5971_v24  ;;  %6424 = vmatpush3.msra.mxu1 %v5988_v46  ;;  %v5925_v24 = vld [vmem:[%s9693_s14] sm:$0xf]  ;;  %v10296_v46 = vld [vmem:[#allocation22_spill] sm:$0xff] }
 0xb45   :  { %6462 = vmatprep.subr.mxu0 %v10293_v53  ;;  %6425 = vmatprep.subr.mxu1 %v10293_v53  ;;  %v5938_v26 = vrot.slane %v5925_v24, %v10295_v38 }
 0xb46   :  { %6463 = vmatpush3.msra.mxu0 %v5970_v50  ;;  %6426 = vmatpush3.msra.mxu1 %v5987_v39  ;;  %v5934_v39 = vrot.slane %v5925_v24, %v10296_v46 }
 0xb47   :  { %6464 = vmatprep.subr.mxu0 %v10293_v53  ;;  %6427 = vmatprep.subr.mxu1 %v10293_v53 }
 0xb48   :  { %6465 = vmatpush3.msra.mxu0 %v5969_v20  ;;  %6428 = vmatpush3.msra.mxu1 %v5986_v62  ;;  %v10294_v20 = vld [vmem:[#allocation23_spill] sm:$0xff] }
 0xb49   :  { %6466 = vmatprep.subr.mxu0 %v10293_v53  ;;  %6429 = vmatprep.subr.mxu1 %v10293_v53  ;;  %v5930_v57 = vrot.slane %v5925_v24, %v10294_v20 }
 0xb4a   :  { %6467 = vmatpush3.msra.mxu0 %v5968_v2  ;;  %6430 = vmatpush3.msra.mxu1 %v5985_v21 }
 0xb4b   :  { %6468 = vmatprep.subr.mxu0 %v10293_v53  ;;  %6431 = vmatprep.subr.mxu1 %v10293_v53 }
 0xb4c   :  { %6469 = vmatpush3.msra.mxu0 %v5967_v7  ;;  %6432 = vmatpush3.msra.mxu1 %v5984_v9 }
 0xb4d   :  { %6470 = vmatprep.subr.mxu0 %v10293_v53  ;;  %6433 = vmatprep.subr.mxu1 %v10293_v53 }
 0xb4e   :  { %6471 = vmatpush3.msra.mxu0 %v5966_v29  ;;  %6434 = vmatpush3.msra.mxu1 %v5983_v10 }
 0xb4f   :  { %6472 = vmatprep.subr.mxu0 %v10293_v53  ;;  %6435 = vmatprep.subr.mxu1 %v10293_v53 }
 0xb50   :  { %6473 = vmatpush3.msra.mxu0 %v5965_v31  ;;  %6436 = vmatpush3.msra.mxu1 %v5982_v37 }
 0xb51   :  { %6474 = vmatprep.subr.mxu0 %v10293_v53  ;;  %6437 = vmatprep.subr.mxu1 %v10293_v53 }
 0xb52   :  { %6475 = vmatpush3.msra.mxu0 %v5964_v51  ;;  %6438 = vmatpush3.msra.mxu1 %v5981_v30 }
 0xb53   :  { %6476 = vmatprep.subr.mxu0 %v10293_v53  ;;  %6439 = vmatprep.subr.mxu1 %v10293_v53 }
 0xb54   :  { %6477 = vmatpush3.msra.mxu0 %v5963_v54  ;;  %6440 = vmatpush3.msra.mxu1 %v5980_v25 }
 0xb55   :  { %6478 = vmatprep.subr.mxu0 %v10293_v53  ;;  %6441 = vmatprep.subr.mxu1 %v10293_v53 }
 0xb56   :  { %6479 = vmatpush3.msra.mxu0 %v5962_v60  ;;  %6442 = vmatpush3.msra.mxu1 %v5979_v8 }
 0xb57   :  { %6480 = vmatprep.subr.mxu0 %v10293_v53  ;;  %6443 = vmatprep.subr.mxu1 %v10293_v53 }
 0xb58   :  { %6481 = vmatpush3.msra.mxu0 %v5961_v61  ;;  %6444 = vmatpush3.msra.mxu1 %v5978_v1 }
 0xb59   :  { %6445 = vmatprep.subr.mxu1 %v10293_v53 }
 0xb5a   :  { %6446 = vmatpush3.msra.mxu1 %v5977_v28 }
 0xb5b   :  { %6485 = vmatprep.subr.mxu1 %v10293_v53 }
 0xbb5   :  { %v5394_v63 = vpop.f32.mrf.mxu1  ;;  %v5465_v49 = vpop.f32.mrf.mxu0 }
 0xbb6   :  { %v5474_v3 = vrot.slane %v5394_v63, 2  ;;  %v5476_v18 = vrot.slane %v5465_v49, 2  ;;  %v6150_v49 = vld [vmem:[%s9697_s18 + $0x28] sm:$0xff] }
 0xbb7   :  { %v5396_v4 = vpop.f32.mrf.mxu1  ;;  %v5467_v33 = vpop.f32.mrf.mxu0 }
 0xbb8   :  { %v5482_v15 = vadd.f32 %v5474_v3, %v10272_v19  ;;  %v5475_v12 = vrot.slane %v5396_v4, 2  ;;  %v5477_v44 = vrot.slane %v5467_v33, 2  ;;  %v5484_v43 = vadd.f32 %v5476_v18, %v9336_v55  ;;  %v6152_v4 = vld [vmem:[%s9697_s18 + $0x38] sm:$0xff]  ;;  %v6145_v33 = vld [vmem:[%s9697_s18] sm:$0xff] }
 0xbba   :  { %v6297_v34 = vmul.f32 -1.442695, %v5482_v15  ;;  %v5483_v48 = vadd.f32 %v5475_v12, %v9327_v35  ;;  %v5485_v5 = vadd.f32 %v5477_v44, %v9332_v11  ;;  %v6151_v15 = vld [vmem:[%s9697_s18 + $0x30] sm:$0xff]  ;;  %v6149_v12 = vld [vmem:[%s9697_s18 + $0x20] sm:$0xff] }
 0xbbc   :  { %6632 = vpow2.f32 %v6297_v34  ;;  %v6298_v36 = vmul.f32 -1.442695, %v5483_v48  ;;  %v6299_v16 = vmul.f32 -1.442695, %v5485_v5  ;;  %v6148_v34 = vld [vmem:[%s9697_s18 + $0x18] sm:$0xff]  ;;  %v6147_v48 = vld [vmem:[%s9697_s18 + $0x10] sm:$0xff] }
 0xbbe   :  { %6634 = vpow2.f32 %v6298_v36  ;;  %v6146_v36 = vld [vmem:[%s9697_s18 + $0x8] sm:$0xff]  ;;  %s6241_s18 = sshll.u32 %s6825_s13, 4  ;;  %s6242_s18 = int_to_ptr.vmem [resolvable:$true] %s6241_s18 }
 0xbbf   :  { %6636 = vpow2.f32 %v6299_v16  ;;  %v6302_v16 = vld [vmem:[%s9696_s17] ss:$0 sm:$0xff]  ;;  %s6780_s8 = scalar_lea.vmem %s6242_s18, 32  ;;  %p6785_p3 = scmp.lt.s32.totalorder %s6242_s18, %s6242_s18 }
 0xbc0   :  { %p6781_p2 = scmp.ne.s32.totalorder %s6242_s18, %s6780_s8  ;;  %p6786_p4 = scmp.lt.s32.totalorder %s6780_s8, %s6780_s8 }
 0xbc2   :  { %p6787_p5 = por %p6786_p4, %p6785_p3 }
 0xbc4   :  { %p6788_p6 = pnand %p6787_p5, %p6781_p2 }
 0xbc9   :  { %v6633_v17 = vpop.eup %6632 }
 0xbca   :  { %v5489_v41 = vadd.f32 1.0, %v6633_v17 }
 0xbcb   :  { %v6635_v52 = vpop.eup %6634 }
 0xbcc   :  { %6638 = vrcp.f32 %v5489_v41  ;;  %v5495_v19 = vadd.f32 1.0, %v6635_v52  ;;  %v6637_v23 = vpop.eup %6636 }
 0xbcd   :  { %6640 = vtanh.f32 %v5484_v43  ;;  %v5502_v14 = vadd.f32 1.0, %v6637_v23 }
 0xbce   :  { %6642 = vrcp.f32 %v5495_v19 }
 0xbcf   :  { %6644 = vrcp.f32 %v5502_v14 }
 0xbd6   :  { %v5709_v35 = vpop.f32.mrf.mxu1  ;;  %v5779_v56 = vpop.f32.mrf.mxu0 }
 0xbd8   :  { %v5711_v32 = vpop.f32.mrf.mxu1  ;;  %v5781_v50 = vpop.f32.mrf.mxu0 }
 0xbd9   :  { %v6639_v22 = vpop.eup %6638 }
 0xbda   :  { %v6641_v47 = vpop.eup %6640 }
 0xbdb   :  { %v6643_v11 = vpop.eup %6642  ;;  %v5509_v40 = vmul.f32 %v6641_v47, %v6639_v22 }
 0xbdc   :  { %v5508_v0 = vmul.f32 %v6643_v11, %v5506_v13  ;;  %v6645_v55 = vpop.eup %6644 }
 0xbde   :  { %v5510_v6 = vadd.f32 %v5509_v40, %v5508_v0 }
 0xbe0   :  { %6646 = vtanh.f32 %v5510_v6 }
 0xbed   :  { %v6647_v58 = vpop.eup %6646 }
 0xbee   :  { %v5512_v42 = vmul.f32 %v6647_v58, %v6645_v55 }
 0xbf0   :  { %v6064_v27 = vrot.slane %v5512_v42, 6 }
 0xbf2   :  { %6483 = vmatmul.mubr.f32.vlgmr.msra.gmra.mxu0 %v6064_v27 }
 0xbf8   :  { %v5850_v2 = vpop.f32.mrf.mxu1  ;;  %v5920_v7 = vpop.f32.mrf.mxu0 }
 0xbf9   :  { %v5851_v29 = vadd.f32 %v5850_v2, %v5709_v35  ;;  %v5921_v59 = vadd.f32 %v5920_v7, %v5779_v56 }
 0xbfa   :  { %v5852_v31 = vpop.f32.mrf.mxu1  ;;  %v5922_v54 = vpop.f32.mrf.mxu0 }
 0xbfb   :  { %v5942_v51 = vadd.f32 %v5930_v57, %v5851_v29  ;;  %v5923_v61 = vadd.f32 %v5922_v54, %v5781_v50  ;;  %v5943_v21 = vadd.f32 %v5934_v39, %v5921_v59 }
 0xbfd   :  { %v6300_v60 = vmul.f32 -1.442695, %v5942_v51  ;;  %v5944_v45 = vadd.f32 %v5938_v26, %v5923_v61 }
 0xbff   :  { %6648 = vpow2.f32 %v6300_v60  ;;  %v6301_v62 = vmul.f32 -1.442695, %v5944_v45 }
 0xc01   :  { %6650 = vpow2.f32 %v6301_v62 }
 0xc02   :  { %6652 = vtanh.f32 %v5943_v21 }
 0xc0c   :  { %v6649_v9 = vpop.eup %6648 }
 0xc0d   :  { %v5948_v10 = vadd.f32 1.0, %v6649_v9 }
 0xc0e   :  { %v6651_v37 = vpop.eup %6650 }
 0xc0f   :  { %6654 = vrcp.f32 %v5948_v10  ;;  %v5955_v30 = vadd.f32 1.0, %v6651_v37  ;;  %v6653_v25 = vpop.eup %6652 }
 0xc11   :  { %6656 = vrcp.f32 %v5955_v30 }
 0xc1c   :  { %v6655_v8 = vpop.eup %6654 }
 0xc1d   :  { %v5958_v1 = vmul.f32 %v6655_v8, %v6653_v25 }
 0xc1e   :  { %v6657_v28 = vpop.eup %6656 }
 0xc1f   :  { %6658 = vtanh.f32 %v5958_v1 }
 0xc2c   :  { %v6659_v63 = vpop.eup %6658 }
 0xc2d   :  { %v5960_v3 = vmul.f32 %v6659_v63, %v6657_v28 }
 0xc2f   :  { %6448 = vmatmul.mubr.f32.vlgmr.msra.gmra.mxu1 %v5960_v3 }
 0xc30   :  { %6501 = vmatprep.mubr.msk.f32.mxu1 %vm6824_vm2, %v10293_v53  ;;  %6486 = vmatpush3.msra.mxu1 %v6152_v4 }
 0xc31   :  { %6487 = vmatprep.subr.mxu1 %v10293_v53 }
 0xc32   :  { %6488 = vmatpush3.msra.mxu1 %v6151_v15 }
 0xc33   :  { %6489 = vmatprep.subr.mxu1 %v10293_v53 }
 0xc34   :  { %6490 = vmatpush3.msra.mxu1 %v6150_v49 }
 0xc35   :  { %6491 = vmatprep.subr.mxu1 %v10293_v53 }
 0xc36   :  { %6492 = vmatpush3.msra.mxu1 %v6149_v12 }
 0xc37   :  { %6493 = vmatprep.subr.mxu1 %v10293_v53 }
 0xc38   :  { %6494 = vmatpush3.msra.mxu1 %v6148_v34 }
 0xc39   :  { %6495 = vmatprep.subr.mxu1 %v10293_v53 }
 0xc3a   :  { %6496 = vmatpush3.msra.mxu1 %v6147_v48 }
 0xc3b   :  { %6497 = vmatprep.subr.mxu1 %v10293_v53 }
 0xc3c   :  { %6498 = vmatpush3.msra.mxu1 %v6146_v36 }
 0xc3d   :  { %6499 = vmatprep.subr.mxu1 %v10293_v53  ;;  %v6303_v53 = vld [vmem:[%s9698_s19] ss:$0 sm:$0xff] }
 0xc3e   :  { %6500 = vmatpush3.msra.mxu1 %v6145_v33 }
 0xcb2   :  { %v6132_v44 = vpop.f32.mrf.mxu0 }
 0xcb4   :  { %v6484_v5 = vpop.f32.mrf.mxu0 }
 0xcef   :  { %v6059_v18 = vpop.f32.mrf.mxu1 }
 0xcf0   :  { %v6133_v17 = vadd.f32 %v6132_v44, %v6059_v18 }
 0xcf1   :  { %v6449_v43 = vpop.f32.mrf.mxu1 }
 0xcf2   :  { %v6143_v41 = vadd.f32 %v6302_v16, %v6133_v17 }
 0xcf4   :  { %v6144_v52 = vmax.f32 %v6143_v41, 0.0 }
 0xcf6   :  { %6502 = vmatmul.mubr.msk.f32.vlgmr.msra.gmra.mxu1 %vm1023_vm0, %v6144_v52 }
 0xdb6   :  { %v6229_v19 = vpop.f32.mrf.mxu1 }
 0xdb7   :  { %v6230_v35 = vadd.f32 %v6303_v53, %v6229_v19 }
 0xdb8   :  { %v6503_v23 = vpop.f32.mrf.mxu1 }
 0xdb9   :  { %6234 = vst.msk [vmem:[#allocation16] sm:$0x3] %vm6233_vm3, %v6230_v35 }
 0xdba   :  { %6791 = shalt.err (!%p6788_p6)
}
 0xdbb   :  { %6244 = dma.vmem_to_hbm [thread:$0]  %s6242_s18, 32, %s9699_s20, [#allocation7]  }
 0xdbc   :  { %6808 = dma.done.wait [#allocation7], 32  }
 0xdbd   :  { %6809 = vsyncadd [#allocation7], 4294967264 }
 0xdbe   :  { %6248 = vsyncpa [#allocation6], 1 }
 0xdbf   :  { %6249 = vsyncpa [#allocation9], 1 }
 0xdc0   :  { %6250 = vsyncpa [#allocation12], 1 }
 0xdc1   :  { %6251 = vsyncpa [#allocation15], 1 }
 0xdc2   :  { %6252 = vsyncpa [#allocation7], 1 }

</bundles_post_ra>
